<compile_context>
chip_gen: v7x
topology: tpu7x:2x2x1
jax: 0.10.0
libtpu: 0.0.40
codegen_flags: <defaults>
</compile_context>

<pallas_src>
import functools

import jax
import jax.numpy as jnp
from jax.experimental import pallas as pl
from jax.experimental.pallas import tpu as pltpu


# ---------------------------------------------------------------------------
# In-kernel helpers
# ---------------------------------------------------------------------------
def _im2col(xp, kh_size, kw_size, hout, wout):
    """Build the (hout*wout, kw*kh*cin) patch matrix from padded `xp`.

    xp is a (Hp, Wp, Cin) value (already zero padded). Column ordering is
    k = kw*(KH*Cin) + kh*Cin + c, matching `_flatten_weight` below.
    """
    cin = xp.shape[-1]
    # Fold KH*Cin onto the channel (lane) axis: KH cheap slices along H + concat.
    s = jnp.concatenate([xp[kh:kh + hout, :, :] for kh in range(kh_size)],
                        axis=-1)                                   # (hout, Wp, KH*Cin)
    # Fold KW on top: KW slices along W + concat -> full patch tensor.
    p = jnp.concatenate([s[:, kw:kw + wout, :] for kw in range(kw_size)],
                        axis=-1)                                   # (hout, wout, KW*KH*Cin)
    return p.reshape(hout * wout, kw_size * kh_size * cin)


def _deblur_fused_kernel(x_ref, w1_ref, b1_ref, w2_ref, b2_ref, w3_ref, b3_ref,
                         o_ref, xp_scr, a2p_scr, *, H, W):
    # Static shapes (module spec: kernels 9/1/5, padding=2 everywhere).
    H1, W1 = H - 4, W - 4          # conv1 output spatial (9x9, pad 2)
    C2 = w2_ref.shape[-1]          # 32
    C3 = w3_ref.shape[-1]          # 3

    # ---- conv1: zero-pad input in VMEM, im2col, one (144,243)@(243,64) ------
    xp_scr[...] = jnp.zeros_like(xp_scr)
    xp_scr[2:2 + H, 2:2 + W, :] = x_ref[0]
    patches1 = _im2col(xp_scr[...], 9, 9, H1, W1)                  # (144, 243)
    a1 = jnp.dot(patches1.astype(jnp.bfloat16), w1_ref[...],
                 preferred_element_type=jnp.float32)                # (144, 64)
    a1 = jnp.maximum(a1 + b1_ref[...], 0.0)

    # ---- conv2 (1x1, pad 2): matmul only on the 12x12 interior ---------------
    a2 = jnp.dot(a1.astype(jnp.bfloat16), w2_ref[...],
                 preferred_element_type=jnp.float32)                # (144, 32)
    a2 = jnp.maximum(a2 + b2_ref[...], 0.0)
    border2 = jnp.maximum(b2_ref[...], 0.0)                         # relu(b2)

    # ---- assemble conv3's padded input directly in VMEM ----------------------
    #   outer ring (width 2): zeros          (conv3's own padding)
    #   next ring  (width 2): relu(b2)       (conv2 applied to its zero pad)
    #   12x12 interior:       relu(a1 @ W2 + b2)
    a2p_scr[...] = jnp.zeros_like(a2p_scr)
    a2p_scr[2:2 + H, 2:2 + W, :] = jnp.broadcast_to(
        border2.reshape(1, 1, C2), (H, W, C2))
    a2p_scr[4:4 + H1, 4:4 + W1, :] = a2.reshape(H1, W1, C2)

    # ---- conv3: im2col, one (256,800)@(800,3) matmul, bias, store ------------
    patches3 = _im2col(a2p_scr[...], 5, 5, H, W)                    # (256, 800)
    y = jnp.dot(patches3.astype(jnp.bfloat16), w3_ref[...],
                preferred_element_type=jnp.float32) + b3_ref[...]   # (256, 3)
    o_ref[...] = y.reshape(1, H, W, C3).astype(o_ref.dtype)


# ---------------------------------------------------------------------------
# Host wrapper: weight flattening + one pallas_call for the whole forward
# ---------------------------------------------------------------------------
def _flatten_weight(w_hwio):
    """(KH, KW, Cin, Cout) -> (KW*KH*Cin, Cout), matching _im2col ordering."""
    kh, kw, cin, cout = w_hwio.shape
    return jnp.transpose(w_hwio, (1, 0, 2, 3)).reshape(kw * kh * cin, cout)


def deblur_cnn_forward(params, x_nchw):
    """Forward pass matching DeblurCNN.forward; input/output are NCHW."""
    w1, b1 = params["conv1"]   # (9,9,3,64), (64,)
    w2, b2 = params["conv2"]   # (1,1,64,32), (32,)
    w3, b3 = params["conv3"]   # (5,5,32,3), (3,)

    x = jnp.transpose(x_nchw, (0, 2, 3, 1)).astype(jnp.float32)     # NHWC
    N, H, W, Cin = x.shape
    assert Cin == w1.shape[2] and H > 4 and W > 4

    C1, C2, C3 = w1.shape[3], w2.shape[3], w3.shape[3]
    w1f = _flatten_weight(w1).astype(jnp.bfloat16)                  # (243, 64)
    w2f = w2.reshape(w2.shape[2], C2).astype(jnp.bfloat16)          # (64, 32)
    w3f = _flatten_weight(w3).astype(jnp.bfloat16)                  # (800, 3)

    kernel = functools.partial(_deblur_fused_kernel, H=H, W=W)

    out_nhwc = pl.pallas_call(
        kernel,
        out_shape=jax.ShapeDtypeStruct((N, H, W, C3), jnp.float32),
        grid=(N,),
        in_specs=[
            pl.BlockSpec((1, H, W, Cin), lambda n: (n, 0, 0, 0)),
            pl.BlockSpec(w1f.shape, lambda n: (0, 0)),
            pl.BlockSpec((1, C1), lambda n: (0, 0)),
            pl.BlockSpec(w2f.shape, lambda n: (0, 0)),
            pl.BlockSpec((1, C2), lambda n: (0, 0)),
            pl.BlockSpec(w3f.shape, lambda n: (0, 0)),
            pl.BlockSpec((1, C3), lambda n: (0, 0)),
        ],
        out_specs=pl.BlockSpec((1, H, W, C3), lambda n: (n, 0, 0, 0)),
        scratch_shapes=[
            pltpu.VMEM((H + 4, W + 4, Cin), jnp.float32),   # padded input
            pltpu.VMEM((H + 4, W + 4, C2), jnp.float32),    # padded conv2 out
        ],
        compiler_params=pltpu.CompilerParams(
            dimension_semantics=("parallel",)),
    )(x, w1f, b1.reshape(1, C1), w2f, b2.reshape(1, C2),
      w3f, b3.reshape(1, C3))

    return jnp.transpose(out_nhwc, (0, 3, 1, 2))                    # NHWC -> NCHW


# ---------------------------------------------------------------------------
# DeblurCNN parameters (deterministic, PyTorch-default-style init)
# ---------------------------------------------------------------------------
def _init_conv(key, kh, kw, cin, cout):
    # PyTorch Conv2d default: kaiming-uniform(a=sqrt(5)) ~ U(-1/sqrt(fan_in), +)
    kw_key, kb_key = jax.random.split(key)
    fan_in = cin * kh * kw
    bound = 1.0 / jnp.sqrt(fan_in)
    w = jax.random.uniform(kw_key, (kh, kw, cin, cout), jnp.float32, -bound, bound)
    b = jax.random.uniform(kb_key, (cout,), jnp.float32, -bound, bound)
    return w, b


def init_deblur_params(key):
    k1, k2, k3 = jax.random.split(key, 3)
    return {
        "conv1": _init_conv(k1, 9, 9, 3, 64),   # Conv2d(3, 64, k=9, p=2)
        "conv2": _init_conv(k2, 1, 1, 64, 32),  # Conv2d(64, 32, k=1, p=2)
        "conv3": _init_conv(k3, 5, 5, 32, 3),   # Conv2d(32, 3, k=5, p=2)
    }


# ---------------------------------------------------------------------------
# Pure-JAX reference (lax.conv, f32 HIGHEST) for a correctness sanity check
# ---------------------------------------------------------------------------
def _ref_conv(x_nchw, w_hwio, b, padding, relu):
    w_oihw = jnp.transpose(w_hwio, (3, 2, 0, 1))
    y = jax.lax.conv_general_dilated(
        x_nchw, w_oihw, window_strides=(1, 1),
        padding=((padding, padding), (padding, padding)),
        dimension_numbers=("NCHW", "OIHW", "NCHW"),
        precision=jax.lax.Precision.HIGHEST)
    y = y + b.reshape(1, -1, 1, 1)
    return jnp.maximum(y, 0.0) if relu else y


def deblur_cnn_reference(params, x_nchw):
    w1, b1 = params["conv1"]
    w2, b2 = params["conv2"]
    w3, b3 = params["conv3"]
    x = _ref_conv(x_nchw, w1, b1, 2, True)
    x = _ref_conv(x, w2, b2, 2, True)
    x = _ref_conv(x, w3, b3, 2, False)
    return x


if __name__ == "__main__":
    key = jax.random.PRNGKey(0)
    pkey, xkey = jax.random.split(key)

    params = init_deblur_params(pkey)
    # Small deterministic input: batch=2, channels=3 (RGB), 16x16 spatial.
    x = jax.random.normal(xkey, (2, 3, 16, 16), dtype=jnp.float32)

    fwd = jax.jit(deblur_cnn_forward)
    out = jax.block_until_ready(fwd(params, x))
    assert out.shape == (2, 3, 16, 16), out.shape

    ref = jax.block_until_ready(deblur_cnn_reference(params, x))
    max_err = float(jnp.max(jnp.abs(out - ref)))
    # bf16 operands + f32 accumulation vs. f32 HIGHEST reference.
    assert jnp.allclose(out, ref, rtol=1e-2, atol=1e-2), max_err

    print("KERNEL_OK")
</pallas_src>

<mosaic_0001>
module attributes {stable_mosaic.version = 11 : i64} {
  func.func @_deblur_fused_kernel(%arg0: i32, %arg1: memref<1x16x16x3xf32, #tpu.memory_space<vmem>>, %arg2: memref<243x64xbf16, #tpu.memory_space<vmem>>, %arg3: memref<1x64xf32, #tpu.memory_space<vmem>>, %arg4: memref<64x32xbf16, #tpu.memory_space<vmem>>, %arg5: memref<1x32xf32, #tpu.memory_space<vmem>>, %arg6: memref<800x3xbf16, #tpu.memory_space<vmem>>, %arg7: memref<1x3xf32, #tpu.memory_space<vmem>>, %arg8: memref<1x16x16x3xf32, #tpu.memory_space<vmem>>, %arg9: memref<20x20x3xf32, #tpu.memory_space<vmem>>, %arg10: memref<20x20x32xf32, #tpu.memory_space<vmem>>) attributes {dimension_semantics = [#tpu.dimension_semantics<parallel>], iteration_bounds = array<i64: 2>, scalar_prefetch = 0 : i64, scratch_operands = 2 : i64, tpu.core_type = #tpu.core_type<tc>, window_params = [{transform_indices = @transform_0, window_bounds = array<i64: 1, 16, 16, 3>}, {pipeline_mode = #tpu.pipeline_mode<synchronous>, transform_indices = @transform_1, window_bounds = array<i64: 243, 64>}, {pipeline_mode = #tpu.pipeline_mode<synchronous>, transform_indices = @transform_2, window_bounds = array<i64: 1, 64>}, {pipeline_mode = #tpu.pipeline_mode<synchronous>, transform_indices = @transform_3, window_bounds = array<i64: 64, 32>}, {pipeline_mode = #tpu.pipeline_mode<synchronous>, transform_indices = @transform_4, window_bounds = array<i64: 1, 32>}, {pipeline_mode = #tpu.pipeline_mode<synchronous>, transform_indices = @transform_5, window_bounds = array<i64: 800, 3>}, {pipeline_mode = #tpu.pipeline_mode<synchronous>, transform_indices = @transform_6, window_bounds = array<i64: 1, 3>}, {transform_indices = @transform_7, window_bounds = array<i64: 1, 16, 16, 3>}]} {
    %cst = arith.constant 0.000000e+00 : f32
    %0 = vector.broadcast %cst : f32 to vector<20x20x3xf32>
    %c0 = arith.constant 0 : index
    %c0_0 = arith.constant 0 : index
    %c0_1 = arith.constant 0 : index
    %1 = vector.load %arg9[%c0, %c0_0, %c0_1] : memref<20x20x3xf32, #tpu.memory_space<vmem>>, vector<20x20x3xf32>
    tpu.vector_store %arg9[%c0, %c0_0, %c0_1], %0 {strides = array<i32>} : memref<20x20x3xf32, #tpu.memory_space<vmem>>, vector<20x20x3xf32>,
    %c0_2 = arith.constant 0 : index
    %c0_3 = arith.constant 0 : index
    %c0_4 = arith.constant 0 : index
    %c0_5 = arith.constant 0 : index
    %2 = vector.load %arg1[%c0_2, %c0_3, %c0_4, %c0_5] : memref<1x16x16x3xf32, #tpu.memory_space<vmem>>, vector<1x16x16x3xf32>
    %3 = vector.shape_cast %2 : vector<1x16x16x3xf32> to vector<16x16x3xf32>
    %c2 = arith.constant 2 : index
    %c2_6 = arith.constant 2 : index
    %c0_7 = arith.constant 0 : index
    %4 = vector.load %arg9[%c2, %c2_6, %c0_7] : memref<20x20x3xf32, #tpu.memory_space<vmem>>, vector<16x16x3xf32>
    tpu.vector_store %arg9[%c2, %c2_6, %c0_7], %3 {strides = array<i32>} : memref<20x20x3xf32, #tpu.memory_space<vmem>>, vector<16x16x3xf32>,
    %c0_8 = arith.constant 0 : index
    %c0_9 = arith.constant 0 : index
    %c0_10 = arith.constant 0 : index
    %5 = vector.load %arg9[%c0_8, %c0_9, %c0_10] : memref<20x20x3xf32, #tpu.memory_space<vmem>>, vector<20x20x3xf32>
    %6 = vector.extract_strided_slice %5 {offsets = [0, 0, 0], sizes = [12, 20, 3], strides = [1, 1, 1]} : vector<20x20x3xf32> to vector<12x20x3xf32>
    %7 = vector.extract_strided_slice %5 {offsets = [1, 0, 0], sizes = [12, 20, 3], strides = [1, 1, 1]} : vector<20x20x3xf32> to vector<12x20x3xf32>
    %8 = vector.extract_strided_slice %5 {offsets = [2, 0, 0], sizes = [12, 20, 3], strides = [1, 1, 1]} : vector<20x20x3xf32> to vector<12x20x3xf32>
    %9 = vector.extract_strided_slice %5 {offsets = [3, 0, 0], sizes = [12, 20, 3], strides = [1, 1, 1]} : vector<20x20x3xf32> to vector<12x20x3xf32>
    %10 = vector.extract_strided_slice %5 {offsets = [4, 0, 0], sizes = [12, 20, 3], strides = [1, 1, 1]} : vector<20x20x3xf32> to vector<12x20x3xf32>
    %11 = vector.extract_strided_slice %5 {offsets = [5, 0, 0], sizes = [12, 20, 3], strides = [1, 1, 1]} : vector<20x20x3xf32> to vector<12x20x3xf32>
    %12 = vector.extract_strided_slice %5 {offsets = [6, 0, 0], sizes = [12, 20, 3], strides = [1, 1, 1]} : vector<20x20x3xf32> to vector<12x20x3xf32>
    %13 = vector.extract_strided_slice %5 {offsets = [7, 0, 0], sizes = [12, 20, 3], strides = [1, 1, 1]} : vector<20x20x3xf32> to vector<12x20x3xf32>
    %14 = vector.extract_strided_slice %5 {offsets = [8, 0, 0], sizes = [12, 20, 3], strides = [1, 1, 1]} : vector<20x20x3xf32> to vector<12x20x3xf32>
    %15 = tpu.concatenate %6, %7, %8, %9, %10, %11, %12, %13, %14 in 2 : vector<12x20x3xf32>, vector<12x20x3xf32>, vector<12x20x3xf32>, vector<12x20x3xf32>, vector<12x20x3xf32>, vector<12x20x3xf32>, vector<12x20x3xf32>, vector<12x20x3xf32>, vector<12x20x3xf32> -> vector<12x20x27xf32>
    %16 = vector.extract_strided_slice %15 {offsets = [0, 0, 0], sizes = [12, 12, 27], strides = [1, 1, 1]} : vector<12x20x27xf32> to vector<12x12x27xf32>
    %17 = vector.extract_strided_slice %15 {offsets = [0, 1, 0], sizes = [12, 12, 27], strides = [1, 1, 1]} : vector<12x20x27xf32> to vector<12x12x27xf32>
    %18 = vector.extract_strided_slice %15 {offsets = [0, 2, 0], sizes = [12, 12, 27], strides = [1, 1, 1]} : vector<12x20x27xf32> to vector<12x12x27xf32>
    %19 = vector.extract_strided_slice %15 {offsets = [0, 3, 0], sizes = [12, 12, 27], strides = [1, 1, 1]} : vector<12x20x27xf32> to vector<12x12x27xf32>
    %20 = vector.extract_strided_slice %15 {offsets = [0, 4, 0], sizes = [12, 12, 27], strides = [1, 1, 1]} : vector<12x20x27xf32> to vector<12x12x27xf32>
    %21 = vector.extract_strided_slice %15 {offsets = [0, 5, 0], sizes = [12, 12, 27], strides = [1, 1, 1]} : vector<12x20x27xf32> to vector<12x12x27xf32>
    %22 = vector.extract_strided_slice %15 {offsets = [0, 6, 0], sizes = [12, 12, 27], strides = [1, 1, 1]} : vector<12x20x27xf32> to vector<12x12x27xf32>
    %23 = vector.extract_strided_slice %15 {offsets = [0, 7, 0], sizes = [12, 12, 27], strides = [1, 1, 1]} : vector<12x20x27xf32> to vector<12x12x27xf32>
    %24 = vector.extract_strided_slice %15 {offsets = [0, 8, 0], sizes = [12, 12, 27], strides = [1, 1, 1]} : vector<12x20x27xf32> to vector<12x12x27xf32>
    %25 = tpu.concatenate %16, %17, %18, %19, %20, %21, %22, %23, %24 in 2 : vector<12x12x27xf32>, vector<12x12x27xf32>, vector<12x12x27xf32>, vector<12x12x27xf32>, vector<12x12x27xf32>, vector<12x12x27xf32>, vector<12x12x27xf32>, vector<12x12x27xf32>, vector<12x12x27xf32> -> vector<12x12x243xf32>
    %26 = vector.shape_cast %25 : vector<12x12x243xf32> to vector<144x243xf32>
    %27 = arith.truncf %26 : vector<144x243xf32> to vector<144x243xbf16>
    %c0_11 = arith.constant 0 : index
    %c0_12 = arith.constant 0 : index
    %28 = vector.load %arg2[%c0_11, %c0_12] : memref<243x64xbf16, #tpu.memory_space<vmem>>, vector<243x64xbf16>
    %cst_13 = arith.constant dense<0.000000e+00> : vector<144x64xf32>
    %29 = tpu.matmul %27, %28, %cst_13 {dimension_numbers = #tpu.dot_dimension_numbers<[1], [0], [0], [1], [0, 0, 1, 1], [], []>} : vector<144x243xbf16>, vector<243x64xbf16>, vector<144x64xf32> -> vector<144x64xf32>
    %c0_14 = arith.constant 0 : index
    %c0_15 = arith.constant 0 : index
    %30 = vector.load %arg3[%c0_14, %c0_15] : memref<1x64xf32, #tpu.memory_space<vmem>>, vector<1x64xf32>
    %31 = vector.broadcast %30 : vector<1x64xf32> to vector<144x64xf32>
    %32 = arith.addf %29, %31 : vector<144x64xf32>
    %cst_16 = arith.constant 0.000000e+00 : f32
    %33 = vector.broadcast %cst_16 : f32 to vector<144x64xf32>
    %34 = arith.maximumf %32, %33 : vector<144x64xf32>
    %35 = arith.truncf %34 : vector<144x64xf32> to vector<144x64xbf16>
    %c0_17 = arith.constant 0 : index
    %c0_18 = arith.constant 0 : index
    %36 = vector.load %arg4[%c0_17, %c0_18] : memref<64x32xbf16, #tpu.memory_space<vmem>>, vector<64x32xbf16>
    %cst_19 = arith.constant dense<0.000000e+00> : vector<144x32xf32>
    %37 = tpu.matmul %35, %36, %cst_19 {dimension_numbers = #tpu.dot_dimension_numbers<[1], [0], [0], [1], [0, 0, 1, 1], [], []>} : vector<144x64xbf16>, vector<64x32xbf16>, vector<144x32xf32> -> vector<144x32xf32>
    %c0_20 = arith.constant 0 : index
    %c0_21 = arith.constant 0 : index
    %38 = vector.load %arg5[%c0_20, %c0_21] : memref<1x32xf32, #tpu.memory_space<vmem>>, vector<1x32xf32>
    %39 = vector.broadcast %38 : vector<1x32xf32> to vector<144x32xf32>
    %40 = arith.addf %37, %39 : vector<144x32xf32>
    %cst_22 = arith.constant 0.000000e+00 : f32
    %41 = vector.broadcast %cst_22 : f32 to vector<144x32xf32>
    %42 = arith.maximumf %40, %41 : vector<144x32xf32>
    %c0_23 = arith.constant 0 : index
    %c0_24 = arith.constant 0 : index
    %43 = vector.load %arg5[%c0_23, %c0_24] : memref<1x32xf32, #tpu.memory_space<vmem>>, vector<1x32xf32>
    %cst_25 = arith.constant 0.000000e+00 : f32
    %44 = vector.broadcast %cst_25 : f32 to vector<1x32xf32>
    %45 = arith.maximumf %43, %44 : vector<1x32xf32>
    %cst_26 = arith.constant 0.000000e+00 : f32
    %46 = vector.broadcast %cst_26 : f32 to vector<20x20x32xf32>
    %c0_27 = arith.constant 0 : index
    %c0_28 = arith.constant 0 : index
    %c0_29 = arith.constant 0 : index
    %47 = vector.load %arg10[%c0_27, %c0_28, %c0_29] : memref<20x20x32xf32, #tpu.memory_space<vmem>>, vector<20x20x32xf32>
    tpu.vector_store %arg10[%c0_27, %c0_28, %c0_29], %46 {strides = array<i32>} : memref<20x20x32xf32, #tpu.memory_space<vmem>>, vector<20x20x32xf32>,
    %48 = vector.shape_cast %45 : vector<1x32xf32> to vector<1x1x32xf32>
    %49 = vector.shape_cast %48 : vector<1x1x32xf32> to vector<1x1x32xf32>
    %50 = vector.broadcast %49 : vector<1x1x32xf32> to vector<16x16x32xf32>
    %c2_30 = arith.constant 2 : index
    %c2_31 = arith.constant 2 : index
    %c0_32 = arith.constant 0 : index
    %51 = vector.load %arg10[%c2_30, %c2_31, %c0_32] : memref<20x20x32xf32, #tpu.memory_space<vmem>>, vector<16x16x32xf32>
    tpu.vector_store %arg10[%c2_30, %c2_31, %c0_32], %50 {strides = array<i32>} : memref<20x20x32xf32, #tpu.memory_space<vmem>>, vector<16x16x32xf32>,
    %52 = vector.shape_cast %42 : vector<144x32xf32> to vector<12x12x32xf32>
    %c4 = arith.constant 4 : index
    %c4_33 = arith.constant 4 : index
    %c0_34 = arith.constant 0 : index
    %53 = vector.load %arg10[%c4, %c4_33, %c0_34] : memref<20x20x32xf32, #tpu.memory_space<vmem>>, vector<12x12x32xf32>
    tpu.vector_store %arg10[%c4, %c4_33, %c0_34], %52 {strides = array<i32>} : memref<20x20x32xf32, #tpu.memory_space<vmem>>, vector<12x12x32xf32>,
    %c0_35 = arith.constant 0 : index
    %c0_36 = arith.constant 0 : index
    %c0_37 = arith.constant 0 : index
    %54 = vector.load %arg10[%c0_35, %c0_36, %c0_37] : memref<20x20x32xf32, #tpu.memory_space<vmem>>, vector<20x20x32xf32>
    %55 = vector.extract_strided_slice %54 {offsets = [0, 0, 0], sizes = [16, 20, 32], strides = [1, 1, 1]} : vector<20x20x32xf32> to vector<16x20x32xf32>
    %56 = vector.extract_strided_slice %54 {offsets = [1, 0, 0], sizes = [16, 20, 32], strides = [1, 1, 1]} : vector<20x20x32xf32> to vector<16x20x32xf32>
    %57 = vector.extract_strided_slice %54 {offsets = [2, 0, 0], sizes = [16, 20, 32], strides = [1, 1, 1]} : vector<20x20x32xf32> to vector<16x20x32xf32>
    %58 = vector.extract_strided_slice %54 {offsets = [3, 0, 0], sizes = [16, 20, 32], strides = [1, 1, 1]} : vector<20x20x32xf32> to vector<16x20x32xf32>
    %59 = vector.extract_strided_slice %54 {offsets = [4, 0, 0], sizes = [16, 20, 32], strides = [1, 1, 1]} : vector<20x20x32xf32> to vector<16x20x32xf32>
    %60 = tpu.concatenate %55, %56, %57, %58, %59 in 2 : vector<16x20x32xf32>, vector<16x20x32xf32>, vector<16x20x32xf32>, vector<16x20x32xf32>, vector<16x20x32xf32> -> vector<16x20x160xf32>
    %61 = vector.extract_strided_slice %60 {offsets = [0, 0, 0], sizes = [16, 16, 160], strides = [1, 1, 1]} : vector<16x20x160xf32> to vector<16x16x160xf32>
    %62 = vector.extract_strided_slice %60 {offsets = [0, 1, 0], sizes = [16, 16, 160], strides = [1, 1, 1]} : vector<16x20x160xf32> to vector<16x16x160xf32>
    %63 = vector.extract_strided_slice %60 {offsets = [0, 2, 0], sizes = [16, 16, 160], strides = [1, 1, 1]} : vector<16x20x160xf32> to vector<16x16x160xf32>
    %64 = vector.extract_strided_slice %60 {offsets = [0, 3, 0], sizes = [16, 16, 160], strides = [1, 1, 1]} : vector<16x20x160xf32> to vector<16x16x160xf32>
    %65 = vector.extract_strided_slice %60 {offsets = [0, 4, 0], sizes = [16, 16, 160], strides = [1, 1, 1]} : vector<16x20x160xf32> to vector<16x16x160xf32>
    %66 = tpu.concatenate %61, %62, %63, %64, %65 in 2 : vector<16x16x160xf32>, vector<16x16x160xf32>, vector<16x16x160xf32>, vector<16x16x160xf32>, vector<16x16x160xf32> -> vector<16x16x800xf32>
    %67 = vector.shape_cast %66 : vector<16x16x800xf32> to vector<256x800xf32>
    %68 = arith.truncf %67 : vector<256x800xf32> to vector<256x800xbf16>
    %c0_38 = arith.constant 0 : index
    %c0_39 = arith.constant 0 : index
    %69 = vector.load %arg6[%c0_38, %c0_39] : memref<800x3xbf16, #tpu.memory_space<vmem>>, vector<800x3xbf16>
    %cst_40 = arith.constant dense<0.000000e+00> : vector<256x3xf32>
    %70 = tpu.matmul %68, %69, %cst_40 {dimension_numbers = #tpu.dot_dimension_numbers<[1], [0], [0], [1], [0, 0, 1, 1], [], []>} : vector<256x800xbf16>, vector<800x3xbf16>, vector<256x3xf32> -> vector<256x3xf32>
    %c0_41 = arith.constant 0 : index
    %c0_42 = arith.constant 0 : index
    %71 = vector.load %arg7[%c0_41, %c0_42] : memref<1x3xf32, #tpu.memory_space<vmem>>, vector<1x3xf32>
    %72 = vector.broadcast %71 : vector<1x3xf32> to vector<256x3xf32>
    %73 = arith.addf %70, %72 : vector<256x3xf32>
    %74 = vector.shape_cast %73 : vector<256x3xf32> to vector<1x16x16x3xf32>
    %c0_43 = arith.constant 0 : index
    %c0_44 = arith.constant 0 : index
    %c0_45 = arith.constant 0 : index
    %c0_46 = arith.constant 0 : index
    %75 = vector.load %arg8[%c0_43, %c0_44, %c0_45, %c0_46] : memref<1x16x16x3xf32, #tpu.memory_space<vmem>>, vector<1x16x16x3xf32>
    tpu.vector_store %arg8[%c0_43, %c0_44, %c0_45, %c0_46], %74 {strides = array<i32>} : memref<1x16x16x3xf32, #tpu.memory_space<vmem>>, vector<1x16x16x3xf32>,
    return
  }
  func.func @transform_0(%arg0: i32) -> (i32, i32, i32, i32) {
    %c0_i32 = arith.constant 0 : i32
    %c0_i32_0 = arith.constant 0 : i32
    %c0_i32_1 = arith.constant 0 : i32
    %c0_i32_2 = arith.constant 0 : i32
    return %arg0, %c0_i32, %c0_i32_0, %c0_i32_1 : i32, i32, i32, i32
  }
  func.func @transform_1(%arg0: i32) -> (i32, i32) {
    %c0_i32 = arith.constant 0 : i32
    %c0_i32_0 = arith.constant 0 : i32
    %c0_i32_1 = arith.constant 0 : i32
    return %c0_i32, %c0_i32_0 : i32, i32
  }
  func.func @transform_2(%arg0: i32) -> (i32, i32) {
    %c0_i32 = arith.constant 0 : i32
    %c0_i32_0 = arith.constant 0 : i32
    %c0_i32_1 = arith.constant 0 : i32
    return %c0_i32, %c0_i32_0 : i32, i32
  }
  func.func @transform_3(%arg0: i32) -> (i32, i32) {
    %c0_i32 = arith.constant 0 : i32
    %c0_i32_0 = arith.constant 0 : i32
    %c0_i32_1 = arith.constant 0 : i32
    return %c0_i32, %c0_i32_0 : i32, i32
  }
  func.func @transform_4(%arg0: i32) -> (i32, i32) {
    %c0_i32 = arith.constant 0 : i32
    %c0_i32_0 = arith.constant 0 : i32
    %c0_i32_1 = arith.constant 0 : i32
    return %c0_i32, %c0_i32_0 : i32, i32
  }
  func.func @transform_5(%arg0: i32) -> (i32, i32) {
    %c0_i32 = arith.constant 0 : i32
    %c0_i32_0 = arith.constant 0 : i32
    %c0_i32_1 = arith.constant 0 : i32
    return %c0_i32, %c0_i32_0 : i32, i32
  }
  func.func @transform_6(%arg0: i32) -> (i32, i32) {
    %c0_i32 = arith.constant 0 : i32
    %c0_i32_0 = arith.constant 0 : i32
    %c0_i32_1 = arith.constant 0 : i32
    return %c0_i32, %c0_i32_0 : i32, i32
  }
  func.func @transform_7(%arg0: i32) -> (i32, i32, i32, i32) {
    %c0_i32 = arith.constant 0 : i32
    %c0_i32_0 = arith.constant 0 : i32
    %c0_i32_1 = arith.constant 0 : i32
    %c0_i32_2 = arith.constant 0 : i32
    return %arg0, %c0_i32, %c0_i32_0, %c0_i32_1 : i32, i32, i32, i32
  }
}

</mosaic_0001>

<bundles_post_ra>
// kernel: deblur_cnn_forward.1
= control target key start
LH: loop header
LB: loop body
LE: loop exit
PB: predicated region body
PF: predicated region fallthrough
CT: control target
= control target key end

     0   :  { %s9268_s24 = smov 0   ;;  %s16403_s0 = inlined_call_operand.vmem [shape: f32[2,16,16,3], index: 0, kind: input, shape index: {}]   ;;  %s16404_s1 = inlined_call_operand.vmem [shape: bf16[243,64], index: 1, kind: input, shape index: {}]   ;;  %s16405_s2 = inlined_call_operand.vmem [shape: f32[1,64], index: 2, kind: input, shape index: {}]   ;;  %s16406_s3 = inlined_call_operand.vmem [shape: bf16[64,32], index: 3, kind: input, shape index: {}]   ;;  %s16407_s4 = inlined_call_operand.vmem [shape: f32[1,32], index: 4, kind: input, shape index: {}]   ;;  %s16408_s5 = inlined_call_operand.vmem [shape: bf16[800,3], index: 5, kind: input, shape index: {}]   ;;  %s16409_s6 = inlined_call_operand.vmem [shape: f32[1,3], index: 6, kind: input, shape index: {}]   ;;  %s16410_s7 = inlined_call_operand.vmem [shape: f32[2,16,16,3], index: 7, kind: output, shape index: {}]  }
   0x1 LB: > { %s7191_s25 = sadd.s32 4294967295, %s9204_s24   ;;  %p7195_p0 = scmp.ge.s32.totalorder %s9204_s24, 1  ;;  %s9204_s24 = sphi %s9268_s24, %s17_s24  }
   0x2   : > { %p237_p1 = scmp.lt.s32.totalorder %s9204_s24, 3 }
   0x4   : > { %p238_p2 = pnand %p7195_p0, %p237_p1 }
   0x6   : > { %241 = sbr.rel (%p238_p2) target bundleno = 2375 (0x947), region = 48 }
   0xd   : > { %vm283_vm0 = vcmask 19456   ;;  %vm16464_vm1 = vcmask 23552   ;;  %p9278_p3 = scmp.lt.s32.totalorder %s7191_s25, 1  ;;  %v16411_v0 = vmov 0.0   ;;  %s9207_s8 = smov 3   ;;  %vm1424_vm2 = vcmask 48128  }
   0xe   : > { %287 = vst.msk [vmem:[#allocation2 + $0x28] sm:$0xf] %vm283_vm0, %v16411_v0  ;;  %284 = vst.msk [vmem:[#allocation2 + $0x10] sm:$0xf] %vm283_vm0, %v16411_v0  ;;  %7771 = vmatprep.subr.bf16.mxu1 %v16411_v0  ;;  %s9208_s9 = smov 6   ;;  %s9209_s10 = smov 9  }
   0xf   : > { %290 = vst.msk [vmem:[#allocation2 + $0x40] sm:$0xf] %vm283_vm0, %v16411_v0  ;;  %293 = vst.msk [vmem:[#allocation2 + $0x58] sm:$0xf] %vm283_vm0, %v16411_v0  ;;  %s17626_s25 = smov (!%p9278_p3, %s7191_s25), 1  ;;  %s9210_s11 = smov 12  }
  0x10   : > { %296 = vst.msk [vmem:[#allocation2 + $0x70] sm:$0xf] %vm283_vm0, %v16411_v0  ;;  %299 = vst.msk [vmem:[#allocation2 + $0x88] sm:$0xf] %vm283_vm0, %v16411_v0  ;;  %s7332_s27 = sshll.u32 %s17626_s25, 8  ;;  %s9211_s12 = smov 15  }
  0x11   : > { %302 = vst.msk [vmem:[#allocation2 + $0xa0] sm:$0xf] %vm283_vm0, %v16411_v0  ;;  %305 = vst.msk [vmem:[#allocation2 + $0xb8] sm:$0xf] %vm283_vm0, %v16411_v0  ;;  %s9415_s30 = scalar_lea.vmem %s16403_s0, %s7332_s27  ;;  %vm1461_vm3 = vcmask 72704   ;;  %vm1498_vm4 = vcmask 97280   ;;  %s16296_s26 = scalar_lea.vmem %s16410_s7, %s7332_s27 }
  0x12   : > { %308 = vst.msk [vmem:[#allocation2 + $0xd0] sm:$0xf] %vm283_vm0, %v16411_v0  ;;  %311 = vst.msk [vmem:[#allocation2 + $0xe8] sm:$0xf] %vm283_vm0, %v16411_v0  ;;  %v342_v1 = vld [vmem:[%s9415_s30] sm:$0xff]  ;;  %v344_v2 = vld [vmem:[%s9415_s30 + $0x10] sm:$0xff] }
  0x13   : > { %314 = vst.msk [vmem:[#allocation2 + $0x100] sm:$0xf] %vm283_vm0, %v16411_v0  ;;  %317 = vst.msk [vmem:[#allocation2 + $0x118] sm:$0xf] %vm283_vm0, %v16411_v0  ;;  %v343_v3 = vld [vmem:[%s9415_s30 + $0x8] sm:$0xff]  ;;  %v345_v4 = vld [vmem:[%s9415_s30 + $0x18] sm:$0xff] }
  0x14   : > { %320 = vst.msk [vmem:[#allocation2 + $0x130] sm:$0xf] %vm283_vm0, %v16411_v0  ;;  %323 = vst.msk [vmem:[#allocation2 + $0x148] sm:$0xf] %vm283_vm0, %v16411_v0  ;;  %v346_v5 = vld [vmem:[%s9415_s30 + $0x20] sm:$0xff]  ;;  %v347_v6 = vld [vmem:[%s9415_s30 + $0x28] sm:$0xff] }
  0x15   : > { %326 = vst.msk [vmem:[#allocation2 + $0x160] sm:$0xf] %vm283_vm0, %v16411_v0  ;;  %329 = vst.msk [vmem:[#allocation2 + $0x178] sm:$0xf] %vm283_vm0, %v16411_v0  ;;  %v412_v7 = vld [vmem:[#allocation2 + $0x28] sm:$0xf] }
  0x16   : > { %332 = vst.msk [vmem:[#allocation2 + $0x190] sm:$0xf] %vm283_vm0, %v16411_v0  ;;  %335 = vst.msk [vmem:[#allocation2 + $0x1a8] sm:$0xf] %vm283_vm0, %v16411_v0  ;;  %507 = vrot.lane.b32.xlu1 %v412_v7, %s9207_s8  ;;  %v348_v9 = vld [vmem:[%s9415_s30 + $0x30] sm:$0xff]  ;;  %v349_v12 = vld [vmem:[%s9415_s30 + $0x38] sm:$0xff] }
  0x17   : > { %338 = vst.msk [vmem:[#allocation2 + $0x1c0] sm:$0xf] %vm283_vm0, %v16411_v0  ;;  %341 = vst.msk [vmem:[#allocation2 + $0x1d8] sm:$0xf] %vm283_vm0, %v16411_v0  ;;  %v352_v10 = vld [vmem:[%s9415_s30 + $0x50] sm:$0xff]  ;;  %v350_v13 = vld [vmem:[%s9415_s30 + $0x40] sm:$0xff] }
  0x18   : > { %286 = vst.msk [vmem:[#allocation2 + $0x20] sm:$0xff] %vm16464_vm1, %v16411_v0  ;;  %281 = vst.msk [vmem:[#allocation2] sm:$0xff] %vm16464_vm1, %v16411_v0  ;;  %v351_v14 = vld [vmem:[%s9415_s30 + $0x48] sm:$0xff]  ;;  %v353_v15 = vld [vmem:[%s9415_s30 + $0x58] sm:$0xff]  ;;  %s9212_s13 = smov 18   ;;  %s9213_s14 = smov 21  }
  0x19   : > { %282 = vst.msk [vmem:[#allocation2 + $0x8] sm:$0xff] %vm16464_vm1, %v16411_v0  ;;  %285 = vst.msk [vmem:[#allocation2 + $0x18] sm:$0xff] %vm16464_vm1, %v16411_v0  ;;  %v354_v16 = vld [vmem:[%s9415_s30 + $0x60] sm:$0xff]  ;;  %v355_v17 = vld [vmem:[%s9415_s30 + $0x68] sm:$0xff]  ;;  %s9214_s15 = smov 24   ;;  %vm1535_vm5 = vcmask 121856  }
  0x1a   : > { %288 = vst.msk [vmem:[#allocation2 + $0x30] sm:$0xff] %vm16464_vm1, %v16411_v0  ;;  %289 = vst.msk [vmem:[#allocation2 + $0x38] sm:$0xff] %vm16464_vm1, %v16411_v0  ;;  %v356_v18 = vld [vmem:[%s9415_s30 + $0x70] sm:$0xff]  ;;  %v357_v19 = vld [vmem:[%s9415_s30 + $0x78] sm:$0xff]  ;;  %vm1572_vm6 = vcmask 146432   ;;  %vm1609_vm7 = vcmask 171008  }
  0x1b   : > { %291 = vst.msk [vmem:[#allocation2 + $0x48] sm:$0xff] %vm16464_vm1, %v16411_v0  ;;  %292 = vst.msk [vmem:[#allocation2 + $0x50] sm:$0xff] %vm16464_vm1, %v16411_v0  ;;  %v360_v20 = vld [vmem:[%s9415_s30 + $0x90] sm:$0xff]  ;;  %v358_v21 = vld [vmem:[%s9415_s30 + $0x80] sm:$0xff]  ;;  %vm1646_vm8 = vcmask 195584   ;;  %s9215_s16 = smov 108  }
  0x1c   : > { %294 = vst.msk [vmem:[#allocation2 + $0x60] sm:$0xff] %vm16464_vm1, %v16411_v0  ;;  %295 = vst.msk [vmem:[#allocation2 + $0x68] sm:$0xff] %vm16464_vm1, %v16411_v0  ;;  %v359_v22 = vld [vmem:[%s9415_s30 + $0x88] sm:$0xff]  ;;  %v361_v23 = vld [vmem:[%s9415_s30 + $0x98] sm:$0xff]  ;;  %vm2155_vm9 = vcmask 1042432   ;;  %vm16465_vm10 = vcmask 1043456  }
  0x1d   : > { %297 = vst.msk [vmem:[#allocation2 + $0x78] sm:$0xff] %vm16464_vm1, %v16411_v0  ;;  %298 = vst.msk [vmem:[#allocation2 + $0x80] sm:$0xff] %vm16464_vm1, %v16411_v0  ;;  %v362_v28 = vld [vmem:[%s9415_s30 + $0xa0] sm:$0xff]  ;;  %v363_v35 = vld [vmem:[%s9415_s30 + $0xa8] sm:$0xff]  ;;  %s9216_s17 = smov 7   ;;  %s9217_s18 = smov 27  }
  0x1e   : > { %300 = vst.msk [vmem:[#allocation2 + $0x90] sm:$0xff] %vm16464_vm1, %v16411_v0  ;;  %301 = vst.msk [vmem:[#allocation2 + $0x98] sm:$0xff] %vm16464_vm1, %v16411_v0  ;;  %v364_v37 = vld [vmem:[%s9415_s30 + $0xb0] sm:$0xff]  ;;  %v365_v38 = vld [vmem:[%s9415_s30 + $0xb8] sm:$0xff]  ;;  %vm2288_vm11 = vcmask 1041408   ;;  %vm1707_vm12 = vcmask 1046528  }
  0x1f   : > { %303 = vst.msk [vmem:[#allocation2 + $0xa8] sm:$0xff] %vm16464_vm1, %v16411_v0  ;;  %304 = vst.msk [vmem:[#allocation2 + $0xb0] sm:$0xff] %vm16464_vm1, %v16411_v0  ;;  %v411_v8 = vld [vmem:[#allocation2 + $0x20] sm:$0xff]  ;;  %v367_v63 = vld [vmem:[%s9415_s30 + $0xc8] sm:$0xff]  ;;  %s9218_s19 = smov 34   ;;  %s9219_s29 = smov 54  }
  0x20   : > { %306 = vst.msk [vmem:[#allocation2 + $0xc0] sm:$0xff] %vm16464_vm1, %v16411_v0  ;;  %307 = vst.msk [vmem:[#allocation2 + $0xc8] sm:$0xff] %vm16464_vm1, %v16411_v0  ;;  %505 = vrot.lane.b32.xlu0 %v411_v8, %s9207_s8  ;;  %v410_v11 = vld [vmem:[#allocation2 + $0x18] sm:$0xff]  ;;  %v366_v62 = vld [vmem:[%s9415_s30 + $0xc0] sm:$0xff]  ;;  %vm1816_vm13 = vcmask 1045504   ;;  %vm2421_vm14 = vcmask 1040384  }
  0x21   : > { %309 = vst.msk [vmem:[#allocation2 + $0xd8] sm:$0xff] %vm16464_vm1, %v16411_v0  ;;  %310 = vst.msk [vmem:[#allocation2 + $0xe0] sm:$0xff] %vm16464_vm1, %v16411_v0  ;;  %s9220_s22 = smov 61   ;;  %vm16474_vm15 = vcmask 1044480   ;;  %s9222_s23 = smov 88   ;;  %vm2726_vm0 = vcmask 56320  }
  0x22   : > { %312 = vst.msk [vmem:[#allocation2 + $0xf0] sm:$0xff] %vm16464_vm1, %v16411_v0  ;;  %313 = vst.msk [vmem:[#allocation2 + $0xf8] sm:$0xff] %vm16464_vm1, %v16411_v0 }
  0x23   : > { %315 = vst.msk [vmem:[#allocation2 + $0x108] sm:$0xff] %vm16464_vm1, %v16411_v0  ;;  %316 = vst.msk [vmem:[#allocation2 + $0x110] sm:$0xff] %vm16464_vm1, %v16411_v0 }
  0x24   : > { %318 = vst.msk [vmem:[#allocation2 + $0x120] sm:$0xff] %vm16464_vm1, %v16411_v0  ;;  %319 = vst.msk [vmem:[#allocation2 + $0x128] sm:$0xff] %vm16464_vm1, %v16411_v0 }
  0x25   : > { %321 = vst.msk [vmem:[#allocation2 + $0x138] sm:$0xff] %vm16464_vm1, %v16411_v0  ;;  %322 = vst.msk [vmem:[#allocation2 + $0x140] sm:$0xff] %vm16464_vm1, %v16411_v0 }
  0x26   : > { %324 = vst.msk [vmem:[#allocation2 + $0x150] sm:$0xff] %vm16464_vm1, %v16411_v0  ;;  %325 = vst.msk [vmem:[#allocation2 + $0x158] sm:$0xff] %vm16464_vm1, %v16411_v0 }
  0x27   : > { %327 = vst.msk [vmem:[#allocation2 + $0x168] sm:$0xff] %vm16464_vm1, %v16411_v0  ;;  %328 = vst.msk [vmem:[#allocation2 + $0x170] sm:$0xff] %vm16464_vm1, %v16411_v0 }
  0x28   : > { %330 = vst.msk [vmem:[#allocation2 + $0x180] sm:$0xff] %vm16464_vm1, %v16411_v0  ;;  %331 = vst.msk [vmem:[#allocation2 + $0x188] sm:$0xff] %vm16464_vm1, %v16411_v0 }
  0x29   : > { %333 = vst.msk [vmem:[#allocation2 + $0x198] sm:$0xff] %vm16464_vm1, %v16411_v0  ;;  %334 = vst.msk [vmem:[#allocation2 + $0x1a0] sm:$0xff] %vm16464_vm1, %v16411_v0 }
  0x2a   : > { %336 = vst.msk [vmem:[#allocation2 + $0x1b0] sm:$0xff] %vm16464_vm1, %v16411_v0  ;;  %337 = vst.msk [vmem:[#allocation2 + $0x1b8] sm:$0xff] %vm16464_vm1, %v16411_v0 }
  0x2b   : > { %339 = vst.msk [vmem:[#allocation2 + $0x1c8] sm:$0xff] %vm16464_vm1, %v16411_v0  ;;  %340 = vst.msk [vmem:[#allocation2 + $0x1d0] sm:$0xff] %vm16464_vm1, %v16411_v0 }
  0x2c   : > { %375 = vst.msk [vmem:[#allocation2 + $0x32] sm:$0xff] %vm16464_vm1, %v342_v1  ;;  %377 = vst.msk [vmem:[#allocation2 + $0x4a] sm:$0xff] %vm16464_vm1, %v344_v2 }
  0x2d   : > { %376 = vst.msk [vmem:[#allocation2 + $0x3a] sm:$0xff] %vm16464_vm1, %v343_v3  ;;  %378 = vst.msk [vmem:[#allocation2 + $0x52] sm:$0xff] %vm16464_vm1, %v345_v4 }
  0x2e   : > { %379 = vst.msk [vmem:[#allocation2 + $0x62] sm:$0xff] %vm16464_vm1, %v346_v5  ;;  %380 = vst.msk [vmem:[#allocation2 + $0x6a] sm:$0xff] %vm16464_vm1, %v347_v6 }
  0x2f   : > { %381 = vst.msk [vmem:[#allocation2 + $0x7a] sm:$0xff] %vm16464_vm1, %v348_v9  ;;  %385 = vst.msk [vmem:[#allocation2 + $0xaa] sm:$0xff] %vm16464_vm1, %v352_v10  ;;  %v368_v9 = vld [vmem:[%s9415_s30 + $0xd0] sm:$0xff] }
  0x30   : > { %382 = vst.msk [vmem:[#allocation2 + $0x82] sm:$0xff] %vm16464_vm1, %v349_v12  ;;  %383 = vst.msk [vmem:[#allocation2 + $0x92] sm:$0xff] %vm16464_vm1, %v350_v13  ;;  %v369_v13 = vld [vmem:[%s9415_s30 + $0xd8] sm:$0xff] }
  0x31   : > { %384 = vst.msk [vmem:[#allocation2 + $0x9a] sm:$0xff] %vm16464_vm1, %v351_v14  ;;  %386 = vst.msk [vmem:[#allocation2 + $0xb2] sm:$0xff] %vm16464_vm1, %v353_v15 }
  0x32   : > { %387 = vst.msk [vmem:[#allocation2 + $0xc2] sm:$0xff] %vm16464_vm1, %v354_v16  ;;  %388 = vst.msk [vmem:[#allocation2 + $0xca] sm:$0xff] %vm16464_vm1, %v355_v17 }
  0x33   : > { %389 = vst.msk [vmem:[#allocation2 + $0xda] sm:$0xff] %vm16464_vm1, %v356_v18  ;;  %390 = vst.msk [vmem:[#allocation2 + $0xe2] sm:$0xff] %vm16464_vm1, %v357_v19  ;;  %v9456_v24 = vld [vmem:[#allocation2 + $0x30] sm:$0xff]  ;;  %v9458_v25 = vld [vmem:[#allocation2 + $0x48] sm:$0xff] }
  0x34   : > { %393 = vst.msk [vmem:[#allocation2 + $0x10a] sm:$0xff] %vm16464_vm1, %v360_v20  ;;  %391 = vst.msk [vmem:[#allocation2 + $0xf2] sm:$0xff] %vm16464_vm1, %v358_v21  ;;  %509 = vrot.lane.b32.xlu1 %v9456_v24, %s9207_s8  ;;  %v7897_v26 = vpack.i.bf16 %v9458_v25, %v410_v11  ;;  %v9466_v27 = vld [vmem:[#allocation2 + $0x40] sm:$0xf]  ;;  %v9470_v29 = vld [vmem:[#allocation2 + $0x38] sm:$0xff] }
  0x35   : > { %392 = vst.msk [vmem:[#allocation2 + $0xfa] sm:$0xff] %vm16464_vm1, %v359_v22  ;;  %394 = vst.msk [vmem:[#allocation2 + $0x112] sm:$0xff] %vm16464_vm1, %v361_v23  ;;  %v9475_v30 = vld [vmem:[#allocation2 + $0x58] sm:$0xf]  ;;  %v9479_v31 = vld [vmem:[#allocation2 + $0x50] sm:$0xff] }
  0x36   : > { %7898 = vrot.lane.b32.xlu0 %v7897_v26, %s9207_s8  ;;  %395 = vst.msk [vmem:[#allocation2 + $0x122] sm:$0xff] %vm16464_vm1, %v362_v28  ;;  %v9483_v32 = vld [vmem:[#allocation2 + $0x68] sm:$0xff]  ;;  %v9485_v33 = vld [vmem:[#allocation2 + $0x78] sm:$0xff]  ;;  %v9492_v36 = vld [vmem:[#allocation2 + $0x60] sm:$0xff] }
  0x37   : > { %v9487_v34 = vld [vmem:[#allocation2 + $0xa8] sm:$0xff]  ;;  %396 = vst.msk [vmem:[#allocation2 + $0x12a] sm:$0xff] %vm16464_vm1, %v363_v35  ;;  %397 = vst.msk [vmem:[#allocation2 + $0x13a] sm:$0xff] %vm16464_vm1, %v364_v37  ;;  %v9505_v40 = vld [vmem:[#allocation2 + $0x70] sm:$0xf]  ;;  %v7912_v2 = vpack.i.bf16 %v9492_v36, %v9456_v24  ;;  %v7927_v20 = vpack.i.bf16 %v9485_v33, %v9458_v25 }
  0x38   : > { %513 = vrot.lane.b32.xlu1 %v9466_v27, %s9207_s8  ;;  %v9502_v39 = vpack.i.bf16 %v9487_v34, %v9485_v33  ;;  %398 = vst.msk [vmem:[#allocation2 + $0x142] sm:$0xff] %vm16464_vm1, %v365_v38  ;;  %v9511_v41 = vld [vmem:[#allocation2 + $0x88] sm:$0xf]  ;;  %v9515_v42 = vld [vmem:[#allocation2 + $0x80] sm:$0xff]  ;;  %v9517_v43 = vld [vmem:[#allocation2 + $0x98] sm:$0xff] }
  0x39   : > { %16665 = vst [vmem:[#allocation4_spill] sm:$0xff] %v9511_v41  ;;  %16666 = vst [vmem:[#allocation5_spill] sm:$0xff] %v9515_v42  ;;  %v9521_v44 = vld [vmem:[#allocation2 + $0x90] sm:$0xff]  ;;  %v9529_v46 = vld [vmem:[#allocation2 + $0xa0] sm:$0xf] }
  0x3a   : > { %511 = vrot.lane.b32.xlu0 %v9470_v29, %s9207_s8  ;;  %v9525_v45 = vld [vmem:[#allocation2 + $0xb0] sm:$0xff]  ;;  %v9533_v47 = vld [vmem:[#allocation2 + $0xc0] sm:$0xff]  ;;  %v9537_v48 = vld [vmem:[#allocation2 + $0xb8] sm:$0xf]  ;;  %399 = vst.msk [vmem:[#allocation2 + $0x152] sm:$0xff] %vm16464_vm1, %v366_v62 }
  0x3b   : > { %16667 = vst [vmem:[#allocation6_spill] sm:$0xff] %v9533_v47  ;;  %16668 = vst [vmem:[#allocation7_spill] sm:$0xff] %v9537_v48  ;;  %v9541_v49 = vld [vmem:[#allocation2 + $0xd0] sm:$0xf]  ;;  %v9545_v50 = vld [vmem:[#allocation2 + $0xc8] sm:$0xff]  ;;  %v9632_v4 = vpack.i.bf16 %v9533_v47, %v9521_v44 }
  0x3c   : > { %519 = vrot.lane.b32.xlu1 %v9475_v30, %s9207_s8  ;;  %v9547_v51 = vld [vmem:[#allocation2 + $0xd8] sm:$0xff]  ;;  %v9549_v52 = vld [vmem:[#allocation2 + $0x108] sm:$0xff]  ;;  %v9553_v53 = vld [vmem:[#allocation2 + $0xe0] sm:$0xff]  ;;  %400 = vst.msk [vmem:[#allocation2 + $0x15a] sm:$0xff] %vm16464_vm1, %v367_v63 }
  0x3d   : > { %16669 = vst [vmem:[#allocation8_spill] sm:$0xff] %v9547_v51  ;;  %16670 = vst [vmem:[#allocation9_spill] sm:$0xff] %v9549_v52  ;;  %v9561_v54 = vpack.i.bf16 %v9549_v52, %v9547_v51  ;;  %v9563_v55 = vld [vmem:[#allocation2 + $0xf0] sm:$0xff]  ;;  %v9567_v56 = vld [vmem:[#allocation2 + $0xe8] sm:$0xf]  ;;  %v7932_v38 = vpack.i.bf16 %v9547_v51, %v9487_v34 }
  0x3e   : > { %517 = vrot.lane.b32.xlu0 %v9479_v31, %s9207_s8  ;;  %16671 = vst [vmem:[#allocation10_spill] sm:$0xff] %v9553_v53  ;;  %16672 = vst [vmem:[#allocation11_spill] sm:$0xff] %v9563_v55  ;;  %v9571_v57 = vld [vmem:[#allocation2 + $0x100] sm:$0xf]  ;;  %v9577_v58 = vld [vmem:[#allocation2 + $0xf8] sm:$0xff] }
  0x3f   : > { %v9579_v59 = vld [vmem:[#allocation2 + $0x118] sm:$0xf]  ;;  %v9583_v60 = vld [vmem:[#allocation2 + $0x110] sm:$0xff]  ;;  %v9587_v61 = vld [vmem:[#allocation2 + $0x128] sm:$0xff]  ;;  %401 = vst.msk [vmem:[#allocation2 + $0x16a] sm:$0xff] %vm16464_vm1, %v368_v9 }
  0x40   : > { %523 = vrot.lane.b32.xlu1 %v9483_v32, %s9207_s8  ;;  %16673 = vst [vmem:[#allocation12_spill] sm:$0xff] %v9583_v60  ;;  %v9595_v1 = vld [vmem:[#allocation2 + $0x120] sm:$0xff]  ;;  %v9605_v3 = vld [vmem:[#allocation2 + $0x130] sm:$0xf]  ;;  %v9682_v11 = vld [vmem:[#allocation2 + $0x138] sm:$0xff] }
  0x41   : > { %v9654_v5 = vpack.i.bf16 %v9595_v1, %v9563_v55  ;;  %402 = vst.msk [vmem:[#allocation2 + $0x172] sm:$0xff] %vm16464_vm1, %v369_v13  ;;  %v9694_v15 = vld [vmem:[#allocation2 + $0x148] sm:$0xf]  ;;  %v9700_v17 = vld [vmem:[#allocation2 + $0x140] sm:$0xff] }
  0x42   : > { %521 = vrot.lane.b32.xlu0 %v9492_v36, %s9207_s8 }
  0x43   : > { %16674 = vst [vmem:[#allocation13_spill] sm:$0xff] %v9654_v5 }
  0x44   : > { %7903 = vrot.lane.b32.xlu1 %v9502_v39, %s9207_s8 }
  0x46   : > { %525 = vrot.lane.b32.xlu0 %v9505_v40, %s9207_s8 }
  0x48   : > { %531 = vrot.lane.b32.xlu1 %v9511_v41, %s9207_s8 }
  0x4a   : > { %529 = vrot.lane.b32.xlu0 %v9515_v42, %s9207_s8 }
  0x4c   : > { %535 = vrot.lane.b32.xlu1 %v9517_v43, %s9207_s8 }
  0x4e   : > { %533 = vrot.lane.b32.xlu0 %v9521_v44, %s9207_s8 }
  0x50   : > { %541 = vrot.lane.b32.xlu1 %v9525_v45, %s9207_s8 }
  0x52   : > { %537 = vrot.lane.b32.xlu0 %v9529_v46, %s9207_s8 }
  0x54   : > { %545 = vrot.lane.b32.xlu1 %v9533_v47, %s9207_s8 }
  0x56   : > { %543 = vrot.lane.b32.xlu0 %v9537_v48, %s9207_s8 }
  0x58   : > { %549 = vrot.lane.b32.xlu1 %v9541_v49, %s9207_s8 }
  0x5a   : > { %547 = vrot.lane.b32.xlu0 %v9545_v50, %s9207_s8 }
  0x5c   : > { %553 = vrot.lane.b32.xlu1 %v9553_v53, %s9207_s8 }
  0x5e   : > { %7908 = vrot.lane.b32.xlu0 %v9561_v54, %s9207_s8 }
  0x60   : > { %557 = vrot.lane.b32.xlu1 %v9563_v55, %s9207_s8 }
  0x62   : > { %555 = vrot.lane.b32.xlu0 %v9567_v56, %s9207_s8 }
  0x64   : > { %561 = vrot.lane.b32.xlu1 %v9571_v57, %s9207_s8 }
  0x66   : > { %559 = vrot.lane.b32.xlu0 %v9577_v58, %s9207_s8 }
  0x68   : > { %567 = vrot.lane.b32.xlu1 %v9579_v59, %s9207_s8 }
  0x6a   : > { %565 = vrot.lane.b32.xlu0 %v9583_v60, %s9207_s8 }
  0x6c   : > { %571 = vrot.lane.b32.xlu1 %v9587_v61, %s9207_s8 }
  0x6e   : > { %569 = vrot.lane.b32.xlu0 %v9595_v1, %s9207_s8 }
  0x70   : > { %7913 = vrot.lane.b32.xlu1 %v7912_v2, %s9208_s9 }
  0x72   : > { %573 = vrot.lane.b32.xlu0 %v9605_v3, %s9207_s8 }
  0x74   : > { %618 = vrot.lane.b32.xlu1 %v9466_v27, %s9208_s9 }
  0x76   : > { %616 = vrot.lane.b32.xlu0 %v9470_v29, %s9208_s9 }
  0x78   : > { %622 = vrot.lane.b32.xlu1 %v9479_v31, %s9208_s9 }
  0x7a   : > { %620 = vrot.lane.b32.xlu0 %v9458_v25, %s9208_s9 }
  0x7c   : > { %628 = vrot.lane.b32.xlu1 %v9483_v32, %s9208_s9 }
  0x7e   : > { %624 = vrot.lane.b32.xlu0 %v9475_v30, %s9208_s9 }
  0x80   : > { %632 = vrot.lane.b32.xlu1 %v9485_v33, %s9208_s9 }
  0x82   : > { %630 = vrot.lane.b32.xlu0 %v9505_v40, %s9208_s9 }
  0x84   : > { %636 = vrot.lane.b32.xlu1 %v9511_v41, %s9208_s9 }
  0x86   : > { %634 = vrot.lane.b32.xlu0 %v9515_v42, %s9208_s9 }
  0x88   : > { %640 = vrot.lane.b32.xlu1 %v9517_v43, %s9208_s9  ;;  %v9664_v6 = vpop.permute.xlu1 %507 }
  0x89   : > { %16675 = vst [vmem:[#allocation14_spill] sm:$0xff] %v9664_v6  ;;  %v7937_v6 = vpack.i.bf16 %v9682_v11, %v9549_v52 }
  0x8a   : > { %7918 = vrot.lane.b32.xlu0 %v9632_v4, %s9208_s9 }
  0x8c   : > { %644 = vrot.lane.b32.xlu1 %v9487_v34, %s9208_s9 }
  0x8e   : > { %642 = vrot.lane.b32.xlu0 %v9529_v46, %s9208_s9 }
  0x90   : > { %648 = vrot.lane.b32.xlu1 %v9537_v48, %s9208_s9 }
  0x92   : > { %646 = vrot.lane.b32.xlu0 %v9525_v45, %s9208_s9  ;;  %v9668_v7 = vpop.permute.xlu0 %505 }
  0x93   : > { %16676 = vst [vmem:[#allocation15_spill] sm:$0xff] %v9668_v7 }
  0x94   : > { %654 = vrot.lane.b32.xlu1 %v9541_v49, %s9208_s9 }
  0x96   : > { %652 = vrot.lane.b32.xlu0 %v9545_v50, %s9208_s9 }
  0x98   : > { %658 = vrot.lane.b32.xlu1 %v9553_v53, %s9208_s9 }
  0x9a   : > { %656 = vrot.lane.b32.xlu0 %v9547_v51, %s9208_s9 }
  0x9c   : > { %7923 = vrot.lane.b32.xlu1 %v9654_v5, %s9208_s9 }
  0x9e   : > { %660 = vrot.lane.b32.xlu0 %v9567_v56, %s9208_s9 }
  0xa0   : > { %666 = vrot.lane.b32.xlu1 %v9571_v57, %s9208_s9 }
  0xa2   : > { %664 = vrot.lane.b32.xlu0 %v9577_v58, %s9208_s9 }
  0xa4   : > { %670 = vrot.lane.b32.xlu1 %v9583_v60, %s9208_s9 }
  0xa6   : > { %668 = vrot.lane.b32.xlu0 %v9549_v52, %s9208_s9  ;;  %v9674_v8 = vpop.permute.xlu1 %509 }
  0xa7   : > { %16677 = vst [vmem:[#allocation16_spill] sm:$0xff] %v9674_v8 }
  0xa8   : > { %v9677_v10 = vpop.permute.xlu0 %7898  ;;  %676 = vrot.lane.b32.xlu1 %v9587_v61, %s9208_s9 }
  0xa9   : > { %16678 = vst [vmem:[#allocation17_spill] sm:$0xff] %v9677_v10 }
  0xaa   : > { %672 = vrot.lane.b32.xlu0 %v9579_v59, %s9208_s9  ;;  %v9686_v12 = vpop.permute.xlu1 %513 }
  0xab   : > { %16679 = vst [vmem:[#allocation18_spill] sm:$0xff] %v9686_v12 }
  0xac   : > { %v9689_v14 = vpop.permute.xlu0 %511  ;;  %680 = vrot.lane.b32.xlu1 %v9682_v11, %s9208_s9 }
  0xad   : > { %16680 = vst [vmem:[#allocation19_spill] sm:$0xff] %v9689_v14 }
  0xae   : > { %678 = vrot.lane.b32.xlu0 %v9605_v3, %s9208_s9  ;;  %v9698_v16 = vpop.permute.xlu1 %519 }
  0xb0   : > { %v9702_v18 = vpop.permute.xlu0 %517  ;;  %684 = vrot.lane.b32.xlu1 %v9694_v15, %s9208_s9 }
  0xb1   : > { %16681 = vst [vmem:[#allocation20_spill] sm:$0xff] %v9702_v18 }
  0xb2   : > { %682 = vrot.lane.b32.xlu0 %v9700_v17, %s9208_s9  ;;  %v9708_v19 = vpop.permute.xlu1 %523 }
  0xb4   : > { %v9712_v21 = vpop.permute.xlu0 %521  ;;  %727 = vrot.lane.b32.xlu1 %v9479_v31, %s9209_s10 }
  0xb6   : > { %7928 = vrot.lane.b32.xlu0 %v7927_v20, %s9209_s10  ;;  %v9717_v22 = vpop.permute.xlu1 %7903 }
  0xb8   : > { %v9719_v23 = vpop.permute.xlu0 %525  ;;  %731 = vrot.lane.b32.xlu1 %v9492_v36, %s9209_s10 }
  0xba   : > { %729 = vrot.lane.b32.xlu0 %v9475_v30, %s9209_s10  ;;  %v9725_v24 = vpop.permute.xlu1 %531 }
  0xbc   : > { %v9727_v26 = vpop.permute.xlu0 %529  ;;  %735 = vrot.lane.b32.xlu1 %v9505_v40, %s9209_s10 }
  0xbe   : > { %733 = vrot.lane.b32.xlu0 %v9483_v32, %s9209_s10  ;;  %v9733_v28 = vpop.permute.xlu1 %535 }
  0xbf   : > { %16682 = vst [vmem:[#allocation21_spill] sm:$0xff] %v9733_v28 }
  0xc0   : > { %v9735_v29 = vpop.permute.xlu0 %533  ;;  %741 = vrot.lane.b32.xlu1 %v9511_v41, %s9209_s10 }
  0xc2   : > { %739 = vrot.lane.b32.xlu0 %v9515_v42, %s9209_s10  ;;  %v9741_v35 = vpop.permute.xlu1 %541 }
  0xc3   : > { %16683 = vst [vmem:[#allocation22_spill] sm:$0xff] %v9741_v35 }
  0xc4   : > { %v9743_v37 = vpop.permute.xlu0 %537  ;;  %745 = vrot.lane.b32.xlu1 %v9517_v43, %s9209_s10 }
  0xc5   : > { %16684 = vst [vmem:[#allocation23_spill] sm:$0xff] %v9743_v37 }
  0xc6   : > { %743 = vrot.lane.b32.xlu0 %v9521_v44, %s9209_s10  ;;  %v9751_v62 = vpop.permute.xlu1 %545 }
  0xc7   : > { %16685 = vst [vmem:[#allocation24_spill] sm:$0xff] %v9751_v62 }
  0xc8   : > { %v9753_v63 = vpop.permute.xlu0 %543  ;;  %7933 = vrot.lane.b32.xlu1 %v7932_v38, %s9209_s10 }
  0xc9   : > { %16686 = vst [vmem:[#allocation25_spill] sm:$0xff] %v9753_v63  ;;  %v7947_v63 = vpack.i.bf16 %v9563_v55, %v9533_v47 }
  0xca   : > { %747 = vrot.lane.b32.xlu0 %v9529_v46, %s9209_s10  ;;  %v9758_v2 = vpop.permute.xlu1 %549 }
  0xcb   : > { %16687 = vst [vmem:[#allocation26_spill] sm:$0xff] %v9758_v2 }
  0xcc   : > { %v9760_v9 = vpop.permute.xlu0 %547  ;;  %753 = vrot.lane.b32.xlu1 %v9537_v48, %s9209_s10 }
  0xcd   : > { %16688 = vst [vmem:[#allocation27_spill] sm:$0xff] %v9760_v9 }
  0xce   : > { %751 = vrot.lane.b32.xlu0 %v9525_v45, %s9209_s10  ;;  %v9766_v13 = vpop.permute.xlu1 %553 }
  0xcf   : > { %16689 = vst [vmem:[#allocation28_spill] sm:$0xff] %v9766_v13 }
  0xd0   : > { %v9768_v20 = vpop.permute.xlu0 %7908  ;;  %757 = vrot.lane.b32.xlu1 %v9545_v50, %s9209_s10 }
  0xd1   : > { %16690 = vst [vmem:[#allocation29_spill] sm:$0xff] %v9768_v20 }
  0xd2   : > { %755 = vrot.lane.b32.xlu0 %v9533_v47, %s9209_s10  ;;  %v9774_v38 = vpop.permute.xlu1 %557 }
  0xd3   : > { %16691 = vst [vmem:[#allocation30_spill] sm:$0xff] %v9774_v38  ;;  %v9839_v38 = vld [vmem:[#allocation2 + $0x150] sm:$0xff] }
  0xd4   : > { %v9776_v0 = vpop.permute.xlu0 %555  ;;  %763 = vrot.lane.b32.xlu1 %v9553_v53, %s9209_s10 }
  0xd5   : > { %16692 = vst [vmem:[#allocation31_spill] sm:$0xff] %v9776_v0 }
  0xd6   : > { %759 = vrot.lane.b32.xlu0 %v9541_v49, %s9209_s10  ;;  %v9782_v12 = vpop.permute.xlu1 %561 }
  0xd7   : > { %16693 = vst [vmem:[#allocation32_spill] sm:$0xff] %v9782_v12 }
  0xd8   : > { %v9784_v18 = vpop.permute.xlu0 %559  ;;  %767 = vrot.lane.b32.xlu1 %v9563_v55, %s9209_s10 }
  0xd9   : > { %16694 = vst [vmem:[#allocation33_spill] sm:$0xff] %v9784_v18 }
  0xda   : > { %765 = vrot.lane.b32.xlu0 %v9567_v56, %s9209_s10  ;;  %v9790_v10 = vpop.permute.xlu1 %567 }
  0xdb   : > { %16695 = vst [vmem:[#allocation34_spill] sm:$0xff] %v9790_v10 }
  0xdc   : > { %v9792_v14 = vpop.permute.xlu0 %565  ;;  %771 = vrot.lane.b32.xlu1 %v9571_v57, %s9209_s10 }
  0xdd   : > { %16696 = vst [vmem:[#allocation35_spill] sm:$0xff] %v9792_v14 }
  0xde   : > { %769 = vrot.lane.b32.xlu0 %v9577_v58, %s9209_s10  ;;  %v9798_v8 = vpop.permute.xlu1 %571 }
  0xdf   : > { %16697 = vst [vmem:[#allocation36_spill] sm:$0xff] %v9798_v8 }
  0xe0   : > { %v9802_v7 = vpop.permute.xlu0 %569  ;;  %775 = vrot.lane.b32.xlu1 %v9583_v60, %s9209_s10 }
  0xe1   : > { %16698 = vst [vmem:[#allocation37_spill] sm:$0xff] %v9802_v7 }
  0xe2   : > { %7938 = vrot.lane.b32.xlu0 %v7937_v6, %s9209_s10  ;;  %v9807_v10 = vpop.permute.xlu1 %7913 }
  0xe3   : > { %16699 = vst [vmem:[#allocation38_spill] sm:$0xff] %v9807_v10  ;;  %v370_v10 = vld [vmem:[%s9415_s30 + $0xe0] sm:$0xff] }
  0xe4   : > { %v9809_v12 = vpop.permute.xlu0 %573  ;;  %779 = vrot.lane.b32.xlu1 %v9595_v1, %s9209_s10  ;;  %403 = vst.msk [vmem:[#allocation2 + $0x182] sm:$0xff] %vm16464_vm1, %v370_v10 }
  0xe5   : > { %16700 = vst [vmem:[#allocation39_spill] sm:$0xff] %v9809_v12  ;;  %v371_v12 = vld [vmem:[%s9415_s30 + $0xe8] sm:$0xff] }
  0xe6   : > { %777 = vrot.lane.b32.xlu0 %v9579_v59, %s9209_s10  ;;  %v9815_v8 = vpop.permute.xlu1 %618  ;;  %404 = vst.msk [vmem:[#allocation2 + $0x18a] sm:$0xff] %vm16464_vm1, %v371_v12  ;;  %v9851_v12 = vld [vmem:[#allocation2 + $0x160] sm:$0xf] }
  0xe7   : > { %16701 = vst [vmem:[#allocation40_spill] sm:$0xff] %v9815_v8  ;;  %v9833_v8 = vld [vmem:[#allocation2 + $0x158] sm:$0xff] }
  0xe8   : > { %v9817_v14 = vpop.permute.xlu0 %616  ;;  %783 = vrot.lane.b32.xlu1 %v9605_v3, %s9209_s10  ;;  %16705 = vst [vmem:[#allocation44_spill] sm:$0xff] %v9833_v8 }
  0xe9   : > { %16702 = vst [vmem:[#allocation41_spill] sm:$0xff] %v9817_v14 }
  0xea   : > { %781 = vrot.lane.b32.xlu0 %v9587_v61, %s9209_s10  ;;  %v9823_v6 = vpop.permute.xlu1 %622 }
  0xeb   : > { %16703 = vst [vmem:[#allocation42_spill] sm:$0xff] %v9823_v6 }
  0xec   : > { %v9827_v7 = vpop.permute.xlu0 %620  ;;  %789 = vrot.lane.b32.xlu1 %v9694_v15, %s9209_s10 }
  0xed   : > { %16704 = vst [vmem:[#allocation43_spill] sm:$0xff] %v9827_v7  ;;  %v7942_v7 = vpack.i.bf16 %v9521_v44, %v9492_v36 }
  0xee   : > { %787 = vrot.lane.b32.xlu0 %v9700_v17, %s9209_s10  ;;  %v9837_v14 = vpop.permute.xlu1 %628 }
  0xef   : > { %16706 = vst [vmem:[#allocation45_spill] sm:$0xff] %v9837_v14 }
  0xf0   : > { %v9841_v6 = vpop.permute.xlu0 %624  ;;  %793 = vrot.lane.b32.xlu1 %v9833_v8, %s9209_s10 }
  0xf1   : > { %16707 = vst [vmem:[#allocation46_spill] sm:$0xff] %v9841_v6 }
  0xf2   : > { %791 = vrot.lane.b32.xlu0 %v9839_v38, %s9209_s10  ;;  %v9849_v10 = vpop.permute.xlu1 %632 }
  0xf4   : > { %v9853_v18 = vpop.permute.xlu0 %630  ;;  %7943 = vrot.lane.b32.xlu1 %v7942_v7, %s9210_s11 }
  0xf6   : > { %795 = vrot.lane.b32.xlu0 %v9851_v12, %s9209_s10  ;;  %v9858_v6 = vpop.permute.xlu1 %636 }
  0xf8   : > { %v9860_v14 = vpop.permute.xlu0 %634  ;;  %840 = vrot.lane.b32.xlu1 %v9505_v40, %s9210_s11 }
  0xfa   : > { %838 = vrot.lane.b32.xlu0 %v9483_v32, %s9210_s11  ;;  %v9866_v13 = vpop.permute.xlu1 %640 }
  0xfc   : > { %v9868_v0 = vpop.permute.xlu0 %7918  ;;  %844 = vrot.lane.b32.xlu1 %v9515_v42, %s9210_s11 }
  0xfe   : > { %842 = vrot.lane.b32.xlu0 %v9485_v33, %s9210_s11  ;;  %v9874_v7 = vpop.permute.xlu1 %644 }
 0x100   : > { %v9876_v5 = vpop.permute.xlu0 %642  ;;  %850 = vrot.lane.b32.xlu1 %v9517_v43, %s9210_s11 }
 0x102   : > { %846 = vrot.lane.b32.xlu0 %v9511_v41, %s9210_s11  ;;  %v9882_v2 = vpop.permute.xlu1 %648 }
 0x103   : > { %16708 = vst [vmem:[#allocation47_spill] sm:$0xff] %v9882_v2 }
 0x104   : > { %v9884_v20 = vpop.permute.xlu0 %646  ;;  %854 = vrot.lane.b32.xlu1 %v9487_v34, %s9210_s11 }
 0x105   : > { %16709 = vst [vmem:[#allocation48_spill] sm:$0xff] %v9884_v20 }
 0x106   : > { %852 = vrot.lane.b32.xlu0 %v9529_v46, %s9210_s11  ;;  %v9890_v62 = vpop.permute.xlu1 %654 }
 0x107   : > { %16710 = vst [vmem:[#allocation49_spill] sm:$0xff] %v9890_v62 }
 0x108   : > { %v9892_v9 = vpop.permute.xlu0 %652  ;;  %858 = vrot.lane.b32.xlu1 %v9537_v48, %s9210_s11 }
 0x109   : > { %16711 = vst [vmem:[#allocation50_spill] sm:$0xff] %v9892_v9 }
 0x10a   : > { %856 = vrot.lane.b32.xlu0 %v9525_v45, %s9210_s11  ;;  %v9898_v35 = vpop.permute.xlu1 %658 }
 0x10b   : > { %16712 = vst [vmem:[#allocation51_spill] sm:$0xff] %v9898_v35 }
 0x10c   : > { %v9902_v20 = vpop.permute.xlu0 %656  ;;  %862 = vrot.lane.b32.xlu1 %v9545_v50, %s9210_s11 }
 0x10d   : > { %16713 = vst [vmem:[#allocation52_spill] sm:$0xff] %v9902_v20 }
 0x10e   : > { %7948 = vrot.lane.b32.xlu0 %v7947_v63, %s9210_s11  ;;  %v9907_v34 = vpop.permute.xlu1 %7923 }
 0x10f   : > { %16714 = vst [vmem:[#allocation53_spill] sm:$0xff] %v9907_v34 }
 0x110   : > { %v9909_v9 = vpop.permute.xlu0 %660  ;;  %866 = vrot.lane.b32.xlu1 %v9547_v51, %s9210_s11 }
 0x111   : > { %16715 = vst [vmem:[#allocation54_spill] sm:$0xff] %v9909_v9 }
 0x112   : > { %864 = vrot.lane.b32.xlu0 %v9541_v49, %s9210_s11  ;;  %v9915_v35 = vpop.permute.xlu1 %666 }
 0x113   : > { %16716 = vst [vmem:[#allocation55_spill] sm:$0xff] %v9915_v35 }
 0x114   : > { %v9917_v62 = vpop.permute.xlu0 %664  ;;  %870 = vrot.lane.b32.xlu1 %v9567_v56, %s9210_s11 }
 0x115   : > { %16717 = vst [vmem:[#allocation56_spill] sm:$0xff] %v9917_v62  ;;  %v7952_v62 = vpack.i.bf16 %v9839_v38, %v9595_v1 }
 0x116   : > { %868 = vrot.lane.b32.xlu0 %v9553_v53, %s9210_s11  ;;  %v9923_v63 = vpop.permute.xlu1 %670 }
 0x117   : > { %16718 = vst [vmem:[#allocation57_spill] sm:$0xff] %v9923_v63 }
 0x118   : > { %v9925_v20 = vpop.permute.xlu0 %668  ;;  %876 = vrot.lane.b32.xlu1 %v9571_v57, %s9210_s11 }
 0x119   : > { %16719 = vst [vmem:[#allocation58_spill] sm:$0xff] %v9925_v20 }
 0x11a   : > { %874 = vrot.lane.b32.xlu0 %v9577_v58, %s9210_s11  ;;  %v9931_v9 = vpop.permute.xlu1 %676 }
 0x11b   : > { %16720 = vst [vmem:[#allocation59_spill] sm:$0xff] %v9931_v9 }
 0x11c   : > { %v9933_v35 = vpop.permute.xlu0 %672  ;;  %880 = vrot.lane.b32.xlu1 %v9583_v60, %s9210_s11 }
 0x11d   : > { %16721 = vst [vmem:[#allocation60_spill] sm:$0xff] %v9933_v35 }
 0x11e   : > { %878 = vrot.lane.b32.xlu0 %v9549_v52, %s9210_s11  ;;  %v9941_v20 = vpop.permute.xlu1 %680 }
 0x11f   : > { %16722 = vst [vmem:[#allocation61_spill] sm:$0xff] %v9941_v20 }
 0x120   : > { %v9943_v63 = vpop.permute.xlu0 %678  ;;  %7953 = vrot.lane.b32.xlu1 %v7952_v62, %s9210_s11 }
 0x121   : > { %16723 = vst [vmem:[#allocation62_spill] sm:$0xff] %v9943_v63  ;;  %v9972_v63 = vld [vmem:[#allocation2 + $0x168] sm:$0xff] }
 0x122   : > { %882 = vrot.lane.b32.xlu0 %v9579_v59, %s9210_s11  ;;  %v9948_v35 = vpop.permute.xlu1 %684  ;;  %16730 = vst [vmem:[#allocation69_spill] sm:$0xff] %v9972_v63 }
 0x123   : > { %16724 = vst [vmem:[#allocation63_spill] sm:$0xff] %v9948_v35  ;;  %v372_v35 = vld [vmem:[%s9415_s30 + $0xf0] sm:$0xff] }
 0x124   : > { %v9950_v9 = vpop.permute.xlu0 %682  ;;  %888 = vrot.lane.b32.xlu1 %v9605_v3, %s9210_s11  ;;  %405 = vst.msk [vmem:[#allocation2 + $0x19a] sm:$0xff] %vm16464_vm1, %v372_v35 }
 0x125   : > { %16725 = vst [vmem:[#allocation64_spill] sm:$0xff] %v9950_v9 }
 0x126   : > { %886 = vrot.lane.b32.xlu0 %v9587_v61, %s9210_s11  ;;  %v9956_v52 = vpop.permute.xlu1 %727 }
 0x127   : > { %16726 = vst [vmem:[#allocation65_spill] sm:$0xff] %v9956_v52  ;;  %v373_v52 = vld [vmem:[%s9415_s30 + $0xf8] sm:$0xff] }
 0x128   : > { %v9958_v20 = vpop.permute.xlu0 %7928  ;;  %892 = vrot.lane.b32.xlu1 %v9700_v17, %s9210_s11  ;;  %406 = vst.msk [vmem:[#allocation2 + $0x1a2] sm:$0xff] %vm16464_vm1, %v373_v52 }
 0x129   : > { %16727 = vst [vmem:[#allocation66_spill] sm:$0xff] %v9958_v20 }
 0x12a   : > { %890 = vrot.lane.b32.xlu0 %v9682_v11, %s9210_s11  ;;  %v9964_v62 = vpop.permute.xlu1 %731 }
 0x12b   : > { %16728 = vst [vmem:[#allocation67_spill] sm:$0xff] %v9964_v62  ;;  %v9984_v62 = vld [vmem:[#allocation2 + $0x178] sm:$0xf] }
 0x12c   : > { %v9967_v9 = vpop.permute.xlu0 %729  ;;  %898 = vrot.lane.b32.xlu1 %v9833_v8, %s9210_s11  ;;  %16733 = vst [vmem:[#allocation72_spill] sm:$0xff] %v9984_v62 }
 0x12d   : > { %16729 = vst [vmem:[#allocation68_spill] sm:$0xff] %v9967_v9  ;;  %v9990_v9 = vld [vmem:[#allocation2 + $0x170] sm:$0xff] }
 0x12e   : > { %894 = vrot.lane.b32.xlu0 %v9694_v15, %s9210_s11  ;;  %v9976_v20 = vpop.permute.xlu1 %735 }
 0x12f   : > { %16731 = vst [vmem:[#allocation70_spill] sm:$0xff] %v9976_v20 }
 0x130   : > { %v9979_v34 = vpop.permute.xlu0 %733  ;;  %902 = vrot.lane.b32.xlu1 %v9972_v63, %s9210_s11 }
 0x131   : > { %16732 = vst [vmem:[#allocation71_spill] sm:$0xff] %v9979_v34 }
 0x132   : > { %900 = vrot.lane.b32.xlu0 %v9851_v12, %s9210_s11  ;;  %v9988_v35 = vpop.permute.xlu1 %741 }
 0x134   : > { %v9992_v51 = vpop.permute.xlu0 %739  ;;  %906 = vrot.lane.b32.xlu1 %v9984_v62, %s9210_s11 }
 0x135   : > { %16734 = vst [vmem:[#allocation73_spill] sm:$0xff] %v9992_v51 }
 0x136   : > { %904 = vrot.lane.b32.xlu0 %v9990_v9, %s9210_s11  ;;  %v9998_v20 = vpop.permute.xlu1 %745 }
 0x138   : > { %v10000_v52 = vpop.permute.xlu0 %743  ;;  %949 = vrot.lane.b32.xlu1 %v9515_v42, %s9211_s12 }
 0x13a   : > { %7958 = vrot.lane.b32.xlu0 %v9502_v39, %s9211_s12  ;;  %v10006_v34 = vpop.permute.xlu1 %7933 }
 0x13c   : > { %v10008_v51 = vpop.permute.xlu0 %747  ;;  %953 = vrot.lane.b32.xlu1 %v9521_v44, %s9211_s12 }
 0x13e   : > { %951 = vrot.lane.b32.xlu0 %v9511_v41, %s9211_s12  ;;  %v10014_v28 = vpop.permute.xlu1 %753 }
 0x13f   : > { %16735 = vst [vmem:[#allocation74_spill] sm:$0xff] %v10014_v28 }
 0x140   : > { %v10016_v2 = vpop.permute.xlu0 %751  ;;  %957 = vrot.lane.b32.xlu1 %v9529_v46, %s9211_s12 }
 0x142   : > { %955 = vrot.lane.b32.xlu0 %v9517_v43, %s9211_s12  ;;  %v10022_v39 = vpop.permute.xlu1 %757 }
 0x143   : > { %16736 = vst [vmem:[#allocation75_spill] sm:$0xff] %v10022_v39 }
 0x144   : > { %v10024_v42 = vpop.permute.xlu0 %755  ;;  %963 = vrot.lane.b32.xlu1 %v9537_v48, %s9211_s12 }
 0x146   : > { %961 = vrot.lane.b32.xlu0 %v9525_v45, %s9211_s12  ;;  %v10030_v41 = vpop.permute.xlu1 %763 }
 0x147   : > { %16737 = vst [vmem:[#allocation76_spill] sm:$0xff] %v10030_v41 }
 0x148   : > { %v10032_v28 = vpop.permute.xlu0 %759  ;;  %967 = vrot.lane.b32.xlu1 %v9545_v50, %s9211_s12 }
 0x14a   : > { %965 = vrot.lane.b32.xlu0 %v9533_v47, %s9211_s12  ;;  %v10038_v37 = vpop.permute.xlu1 %767 }
 0x14b   : > { %16738 = vst [vmem:[#allocation77_spill] sm:$0xff] %v10038_v37 }
 0x14c   : > { %v10040_v39 = vpop.permute.xlu0 %765  ;;  %7963 = vrot.lane.b32.xlu1 %v9561_v54, %s9211_s12 }
 0x14e   : > { %969 = vrot.lane.b32.xlu0 %v9541_v49, %s9211_s12  ;;  %v10046_v48 = vpop.permute.xlu1 %771 }
 0x14f   : > { %16739 = vst [vmem:[#allocation78_spill] sm:$0xff] %v10046_v48 }
 0x150   : > { %v10048_v41 = vpop.permute.xlu0 %769  ;;  %975 = vrot.lane.b32.xlu1 %v9567_v56, %s9211_s12 }
 0x152   : > { %973 = vrot.lane.b32.xlu0 %v9553_v53, %s9211_s12  ;;  %v10054_v47 = vpop.permute.xlu1 %775 }
 0x153   : > { %16740 = vst [vmem:[#allocation79_spill] sm:$0xff] %v10054_v47 }
 0x154   : > { %v10056_v37 = vpop.permute.xlu0 %7938  ;;  %979 = vrot.lane.b32.xlu1 %v9577_v58, %s9211_s12 }
 0x156   : > { %977 = vrot.lane.b32.xlu0 %v9563_v55, %s9211_s12  ;;  %v10062_v54 = vpop.permute.xlu1 %779 }
 0x157   : > { %16741 = vst [vmem:[#allocation80_spill] sm:$0xff] %v10062_v54 }
 0x158   : > { %v10064_v48 = vpop.permute.xlu0 %777  ;;  %985 = vrot.lane.b32.xlu1 %v9583_v60, %s9211_s12 }
 0x15a   : > { %981 = vrot.lane.b32.xlu0 %v9571_v57, %s9211_s12  ;;  %v10070_v53 = vpop.permute.xlu1 %783 }
 0x15b   : > { %16742 = vst [vmem:[#allocation81_spill] sm:$0xff] %v10070_v53  ;;  %v7967_v53 = vpack.i.bf16 %v9972_v63, %v9682_v11 }
 0x15c   : > { %v10072_v47 = vpop.permute.xlu0 %781  ;;  %989 = vrot.lane.b32.xlu1 %v9595_v1, %s9211_s12 }
 0x15d   : > { %16743 = vst [vmem:[#allocation82_spill] sm:$0xff] %v10072_v47 }
 0x15e   : > { %987 = vrot.lane.b32.xlu0 %v9579_v59, %s9211_s12  ;;  %v10078_v55 = vpop.permute.xlu1 %789 }
 0x15f   : > { %16744 = vst [vmem:[#allocation83_spill] sm:$0xff] %v10078_v55 }
 0x160   : > { %v10080_v54 = vpop.permute.xlu0 %787  ;;  %993 = vrot.lane.b32.xlu1 %v9605_v3, %s9211_s12 }
 0x162   : > { %991 = vrot.lane.b32.xlu0 %v9587_v61, %s9211_s12  ;;  %v10086_v60 = vpop.permute.xlu1 %793 }
 0x163   : > { %16745 = vst [vmem:[#allocation84_spill] sm:$0xff] %v10086_v60 }
 0x164   : > { %v10090_v47 = vpop.permute.xlu0 %791  ;;  %997 = vrot.lane.b32.xlu1 %v9700_v17, %s9211_s12 }
 0x166   : > { %7968 = vrot.lane.b32.xlu0 %v7967_v53, %s9211_s12  ;;  %v10095_v1 = vpop.permute.xlu1 %7943 }
 0x167   : > { %16746 = vst [vmem:[#allocation85_spill] sm:$0xff] %v10095_v1 }
 0x168   : > { %v10097_v55 = vpop.permute.xlu0 %795  ;;  %1001 = vrot.lane.b32.xlu1 %v9839_v38, %s9211_s12 }
 0x169   : > { %16747 = vst [vmem:[#allocation86_spill] sm:$0xff] %v10097_v55  ;;  %v10117_v55 = vld [vmem:[#allocation2 + $0x188] sm:$0xff] }
 0x16a   : > { %999 = vrot.lane.b32.xlu0 %v9694_v15, %s9211_s12  ;;  %v10103_v60 = vpop.permute.xlu1 %840 }
 0x16b   : > { %16748 = vst [vmem:[#allocation87_spill] sm:$0xff] %v10103_v60 }
 0x16c   : > { %v10105_v63 = vpop.permute.xlu0 %838  ;;  %1005 = vrot.lane.b32.xlu1 %v9851_v12, %s9211_s12 }
 0x16d   : > { %16749 = vst [vmem:[#allocation88_spill] sm:$0xff] %v10105_v63  ;;  %v10123_v63 = vld [vmem:[#allocation2 + $0x180] sm:$0xff] }
 0x16e   : > { %1003 = vrot.lane.b32.xlu0 %v9833_v8, %s9211_s12  ;;  %v10111_v53 = vpop.permute.xlu1 %844  ;;  %v1397_v8 = vsel %vm16464_vm1, %v9458_v25, %v9712_v21 }
 0x16f   : > { %16750 = vst [vmem:[#allocation89_spill] sm:$0xff] %v10111_v53 }
 0x170   : > { %v10113_v1 = vpop.permute.xlu0 %842  ;;  %1011 = vrot.lane.b32.xlu1 %v9984_v62, %s9211_s12 }
 0x171   : > { %16751 = vst [vmem:[#allocation90_spill] sm:$0xff] %v10113_v1  ;;  %v1434_v1 = vsel %vm1424_vm2, %v1397_v8, %v9849_v10  ;;  %v10146_v8 = vld [vmem:[#allocation2 + $0x190] sm:$0xf] }
 0x172   : > { %1009 = vrot.lane.b32.xlu0 %v9990_v9, %s9211_s12  ;;  %v10121_v60 = vpop.permute.xlu1 %850  ;;  %v1471_v62 = vsel %vm1461_vm3, %v1434_v1, %v10000_v52  ;;  %v7906_v52 = vunpack.i.h.bf16 %v9717_v22 }
 0x173   : > { %16752 = vst [vmem:[#allocation91_spill] sm:$0xff] %v10121_v60  ;;  %v1396_v60 = vsel %vm16464_vm1, %v9466_v27, %v9698_v16  ;;  %v1399_v27 = vsel %vm16464_vm1, %v9475_v30, %v9719_v23 }
 0x174   : > { %v10128_v53 = vpop.permute.xlu0 %846  ;;  %1015 = vrot.lane.b32.xlu1 %v10117_v55, %s9211_s12  ;;  %v1433_v21 = vsel %vm1424_vm2, %v1396_v60, %v9853_v18  ;;  %v1436_v60 = vsel %vm1424_vm2, %v1399_v27, %v9858_v6 }
 0x175   : > { %16753 = vst [vmem:[#allocation92_spill] sm:$0xff] %v10128_v53  ;;  %v1470_v16 = vsel %vm1461_vm3, %v1433_v21, %v9988_v35  ;;  %v1473_v30 = vsel %vm1461_vm3, %v1436_v60, %v10008_v51  ;;  %v7905_v35 = vunpack.i.l.bf16 %v9717_v22  ;;  %v7920_v51 = vunpack.i.l.bf16 %v9868_v0 }
 0x176   : > { %1013 = vrot.lane.b32.xlu0 %v10123_v63, %s9211_s12  ;;  %v855_v25 = vpop.permute.xlu1 %854  ;;  %v7936_v21 = vunpack.i.h.bf16 %v10006_v34 }
 0x177   : > { %v10144_v53 = vsel %vm1498_vm4, %v1471_v62, %v855_v25  ;;  %v1398_v62 = vsel %vm16464_vm1, %v9479_v31, %v9708_v19  ;;  %v1401_v31 = vsel %vm16464_vm1, %v9483_v32, %v9727_v26  ;;  %v7921_v25 = vunpack.i.h.bf16 %v9868_v0 }
 0x178   : > { %v853_v10 = vpop.permute.xlu0 %852  ;;  %7973 = vrot.lane.b32.xlu1 %v9632_v4, %s9212_s13  ;;  %v1435_v4 = vsel %vm1424_vm2, %v1398_v62, %v9860_v14  ;;  %v1438_v14 = vsel %vm1424_vm2, %v1401_v31, %v9866_v13  ;;  %v7935_v32 = vunpack.i.l.bf16 %v10006_v34  ;;  %v1400_v27 = vsel %vm16464_vm1, %v9492_v36, %v7905_v35 }
 0x179   : > { %v10158_v18 = vsel %vm1498_vm4, %v1470_v16, %v853_v10  ;;  %v1472_v19 = vsel %vm1461_vm3, %v1435_v4, %v9998_v20  ;;  %v1475_v26 = vsel %vm1461_vm3, %v1438_v14, %v10016_v2  ;;  %v1406_v0 = vsel %vm16464_vm1, %v9521_v44, %v7906_v52  ;;  %v16754_v52 = vld [vmem:[#allocation23_spill] sm:$0xff] }
 0x17a   : > { %1017 = vrot.lane.b32.xlu0 %v10146_v8, %s9211_s12  ;;  %v859_v23 = vpop.permute.xlu1 %858  ;;  %v1403_v34 = vsel %vm16464_vm1, %v9485_v33, %v9735_v29  ;;  %v1437_v16 = vsel %vm1424_vm2, %v1400_v27, %v7920_v51  ;;  %v1443_v10 = vsel %vm1424_vm2, %v1406_v0, %v7921_v25  ;;  %v1402_v44 = vsel %vm16464_vm1, %v9505_v40, %v9725_v24  ;;  %v16756_v51 = vld [vmem:[#allocation74_spill] sm:$0xff]  ;;  %v16760_v27 = vld [vmem:[#allocation7_spill] sm:$0xff]  ;;  %s9221_s12 = smov 81  }
 0x17b   : > { %v10171_v6 = vsel %vm1498_vm4, %v1473_v30, %v859_v23  ;;  %v1440_v36 = vsel %vm1424_vm2, %v1403_v34, %v9874_v7  ;;  %v1474_v30 = vsel %vm1461_vm3, %v1437_v16, %v7935_v32  ;;  %v1480_v33 = vsel %vm1461_vm3, %v1443_v10, %v7936_v21  ;;  %v10217_v23 = vld [vmem:[#allocation2 + $0xa8] sm:$0xff]  ;;  %v16761_v34 = vld [vmem:[#allocation48_spill] sm:$0xff] }
 0x17c   : > { %v857_v1 = vpop.permute.xlu0 %856  ;;  %1062 = vrot.lane.b32.xlu1 %v9529_v46, %s9212_s13  ;;  %v1477_v29 = vsel %vm1461_vm3, %v1440_v36, %v10024_v42  ;;  %v1439_v7 = vsel %vm1424_vm2, %v1402_v44, %v9876_v5  ;;  %v16755_v42 = vld [vmem:[#allocation4_spill] sm:$0xff]  ;;  %v16757_v5 = vld [vmem:[#allocation47_spill] sm:$0xff]  ;;  %v16758_v21 = vld [vmem:[#allocation21_spill] sm:$0xff] }
 0x17d   : > { %v10186_v22 = vsel %vm1498_vm4, %v1472_v19, %v857_v1  ;;  %v1405_v31 = vsel %vm16464_vm1, %v16755_v42, %v16754_v52  ;;  %v1476_v19 = vsel %vm1461_vm3, %v1439_v7, %v16756_v51  ;;  %v16759_v32 = vld [vmem:[#allocation5_spill] sm:$0xff]  ;;  %v16767_v42 = vld [vmem:[#allocation50_spill] sm:$0xff] }
 0x17e   : > { %1060 = vrot.lane.b32.xlu0 %v9517_v43, %s9212_s13  ;;  %v863_v20 = vpop.permute.xlu1 %862  ;;  %v1442_v14 = vsel %vm1424_vm2, %v1405_v31, %v16757_v5  ;;  %v16762_v10 = vld [vmem:[#allocation25_spill] sm:$0xff]  ;;  %v16769_v5 = vld [vmem:[#allocation76_spill] sm:$0xff] }
 0x17f   : > { %v10197_v13 = vsel %vm1498_vm4, %v1475_v26, %v863_v20  ;;  %v1404_v26 = vsel %vm16464_vm1, %v16759_v32, %v16758_v21  ;;  %v1479_v20 = vsel %vm1461_vm3, %v1442_v14, %v10032_v28  ;;  %v1408_v36 = vsel %vm16464_vm1, %v9529_v46, %v16762_v10  ;;  %v16764_v28 = vld [vmem:[#allocation8_spill] sm:$0xff]  ;;  %v16771_v32 = vld [vmem:[#allocation29_spill] sm:$0xff] }
 0x180   : > { %v7949_v2 = vpop.permute.xlu0 %7948  ;;  %1066 = vrot.lane.b32.xlu1 %v9525_v45, %s9212_s13  ;;  %v1441_v16 = vsel %vm1424_vm2, %v1404_v26, %v16761_v34  ;;  %v7911_v26 = vunpack.i.h.bf16 %v16771_v32 }
 0x181   : > { %v7951_v60 = vunpack.i.h.bf16 %v7949_v2  ;;  %v7950_v62 = vunpack.i.l.bf16 %v7949_v2 }
 0x182   : > { %1064 = vrot.lane.b32.xlu0 %v10217_v23, %s9212_s13  ;;  %v867_v35 = vpop.permute.xlu1 %866 }
 0x183   : > { %v10224_v4 = vsel %vm1498_vm4, %v1474_v30, %v7950_v62  ;;  %v10227_v40 = vsel %vm1498_vm4, %v1480_v33, %v7951_v60  ;;  %v10230_v24 = vsel %vm1498_vm4, %v1477_v29, %v867_v35  ;;  %v16763_v60 = vld [vmem:[#allocation75_spill] sm:$0xff]  ;;  %v16765_v30 = vld [vmem:[#allocation49_spill] sm:$0xff]  ;;  %v16766_v35 = vld [vmem:[#allocation22_spill] sm:$0xff] }
 0x184   : > { %v865_v1 = vpop.permute.xlu0 %864  ;;  %1072 = vrot.lane.b32.xlu1 %v9545_v50, %s9212_s13  ;;  %v1478_v62 = vsel %vm1461_vm3, %v1441_v16, %v16763_v60  ;;  %v1445_v33 = vsel %vm1424_vm2, %v1408_v36, %v16765_v30  ;;  %v1407_v7 = vsel %vm16464_vm1, %v9517_v43, %v16766_v35  ;;  %v16773_v16 = vld [vmem:[#allocation53_spill] sm:$0xff]  ;;  %v16774_v60 = vld [vmem:[#allocation10_spill] sm:$0xff] }
 0x185   : > { %v10242_v25 = vsel %vm1498_vm4, %v1476_v19, %v865_v1  ;;  %v1482_v46 = vsel %vm1461_vm3, %v1445_v33, %v10040_v39  ;;  %v1444_v31 = vsel %vm1424_vm2, %v1407_v7, %v16767_v42  ;;  %v16768_v19 = vld [vmem:[#allocation27_spill] sm:$0xff]  ;;  %v16770_v39 = vld [vmem:[#allocation24_spill] sm:$0xff]  ;;  %v7926_v10 = vunpack.i.h.bf16 %v16773_v16  ;;  %v16776_v35 = vld [vmem:[#allocation77_spill] sm:$0xff] }
 0x186   : > { %1068 = vrot.lane.b32.xlu0 %v16760_v27, %s9212_s13  ;;  %v871_v0 = vpop.permute.xlu1 %870  ;;  %v1410_v1 = vsel %vm16464_vm1, %v9525_v45, %v16768_v19  ;;  %v1481_v43 = vsel %vm1461_vm3, %v1444_v31, %v16769_v5  ;;  %v1409_v21 = vsel %vm16464_vm1, %v10217_v23, %v16770_v39  ;;  %v7910_v45 = vunpack.i.l.bf16 %v16771_v32  ;;  %v16777_v42 = vld [vmem:[#allocation11_spill] sm:$0xff] }
 0x187   : > { %v10254_v2 = vsel %vm1498_vm4, %v1479_v20, %v871_v0  ;;  %v16772_v20 = vld [vmem:[#allocation51_spill] sm:$0xff]  ;;  %v7925_v30 = vunpack.i.l.bf16 %v16773_v16  ;;  %v1418_v31 = vsel %vm16464_vm1, %v16777_v42, %v7911_v26 }
 0x188   : > { %v869_v44 = vpop.permute.xlu0 %868  ;;  %1076 = vrot.lane.b32.xlu1 %v16764_v28, %s9212_s13  ;;  %v1447_v0 = vsel %vm1424_vm2, %v1410_v1, %v16772_v20  ;;  %v16778_v1 = vld [vmem:[#allocation26_spill] sm:$0xff]  ;;  %v1455_v39 = vsel %vm1424_vm2, %v1418_v31, %v7926_v10  ;;  %v16789_v31 = vld [vmem:[#allocation28_spill] sm:$0xff] }
 0x189   : > { %v10266_v29 = vsel %vm1498_vm4, %v1478_v62, %v869_v44  ;;  %v1484_v36 = vsel %vm1461_vm3, %v1447_v0, %v10048_v41  ;;  %v16775_v44 = vld [vmem:[#allocation52_spill] sm:$0xff]  ;;  %v1411_v5 = vsel %vm16464_vm1, %v16760_v27, %v16778_v1  ;;  %v16781_v20 = vld [vmem:[#allocation54_spill] sm:$0xff] }
 0x18a   : > { %1074 = vrot.lane.b32.xlu0 %v9541_v49, %s9212_s13  ;;  %v877_v52 = vpop.permute.xlu1 %876  ;;  %v1446_v28 = vsel %vm1424_vm2, %v1409_v21, %v16775_v44  ;;  %v1448_v26 = vsel %vm1424_vm2, %v1411_v5, %v16781_v20  ;;  %v16790_v5 = vld [vmem:[#allocation56_spill] sm:$0xff] }
 0x18b   : > { %v10278_v51 = vsel %vm1498_vm4, %v1482_v46, %v877_v52  ;;  %v1483_v7 = vsel %vm1461_vm3, %v1446_v28, %v16776_v35  ;;  %v7941_v46 = vunpack.i.h.bf16 %v10056_v37  ;;  %v7940_v52 = vunpack.i.l.bf16 %v10056_v37  ;;  %v16780_v37 = vld [vmem:[#allocation13_spill] sm:$0xff] }
 0x18c   : > { %v875_v14 = vpop.permute.xlu0 %874  ;;  %1080 = vrot.lane.b32.xlu1 %v9567_v56, %s9212_s13  ;;  %v16784_v35 = vld [vmem:[#allocation9_spill] sm:$0xff] }
 0x18d   : > { %v10294_v34 = vsel %vm1498_vm4, %v1481_v43, %v875_v14  ;;  %v16779_v43 = vld [vmem:[#allocation6_spill] sm:$0xff]  ;;  %v1492_v44 = vsel %vm1461_vm3, %v1455_v39, %v7941_v46  ;;  %v1413_v46 = vsel %vm16464_vm1, %v9545_v50, %v16789_v31  ;;  %v16792_v39 = vld [vmem:[#allocation33_spill] sm:$0xff] }
 0x18e   : > { %1078 = vrot.lane.b32.xlu0 %v16774_v60, %s9212_s13  ;;  %v881_v62 = vpop.permute.xlu1 %880  ;;  %v1412_v14 = vsel %vm16464_vm1, %v16779_v43, %v7910_v45  ;;  %v1450_v43 = vsel %vm1424_vm2, %v1413_v46, %v16790_v5 }
 0x18f   : > { %v10306_v33 = vsel %vm1498_vm4, %v1484_v36, %v881_v62  ;;  %v1449_v32 = vsel %vm1424_vm2, %v1412_v14, %v7925_v30  ;;  %v16782_v36 = vld [vmem:[#allocation31_spill] sm:$0xff]  ;;  %v16783_v62 = vld [vmem:[#allocation78_spill] sm:$0xff] }
 0x190   : > { %v879_v41 = vpop.permute.xlu0 %878  ;;  %1084 = vrot.lane.b32.xlu1 %v9577_v58, %s9212_s13  ;;  %v1414_v27 = vsel %vm16464_vm1, %v9541_v49, %v16782_v36  ;;  %v1485_v45 = vsel %vm1461_vm3, %v1448_v26, %v16783_v62  ;;  %v1486_v10 = vsel %vm1461_vm3, %v1449_v32, %v7940_v52  ;;  %v16785_v30 = vld [vmem:[#allocation55_spill] sm:$0xff]  ;;  %v16798_v62 = vld [vmem:[#allocation12_spill] sm:$0xff] }
 0x191   : > { %v10317_v19 = vsel %vm1498_vm4, %v1483_v7, %v879_v41  ;;  %v1451_v7 = vsel %vm1424_vm2, %v1414_v27, %v16785_v30 }
 0x192   : > { %7978 = vrot.lane.b32.xlu0 %v16780_v37, %s9212_s13  ;;  %v7954_v21 = vpop.permute.xlu1 %7953  ;;  %v1488_v52 = vsel %vm1461_vm3, %v1451_v7, %v10064_v48  ;;  %v1416_v37 = vsel %vm16464_vm1, %v16774_v60, %v16792_v39  ;;  %v16794_v48 = vld [vmem:[#allocation57_spill] sm:$0xff]  ;;  %v16797_v60 = vld [vmem:[#allocation82_spill] sm:$0xff]  ;;  %v16802_v7 = vld [vmem:[#allocation80_spill] sm:$0xff] }
 0x193   : > { %v7956_v0 = vunpack.i.h.bf16 %v7954_v21  ;;  %v7955_v16 = vunpack.i.l.bf16 %v7954_v21  ;;  %v16793_v21 = vld [vmem:[#allocation79_spill] sm:$0xff]  ;;  %v1453_v20 = vsel %vm1424_vm2, %v1416_v37, %v16794_v48  ;;  %v16808_v48 = vld [vmem:[#allocation37_spill] sm:$0xff] }
 0x194   : > { %v883_v28 = vpop.permute.xlu0 %882  ;;  %1088 = vrot.lane.b32.xlu1 %v16784_v35, %s9212_s13  ;;  %v1487_v50 = vsel %vm1461_vm3, %v1450_v43, %v16793_v21  ;;  %v1490_v27 = vsel %vm1461_vm3, %v1453_v20, %v16797_v60  ;;  %v16801_v35 = vld [vmem:[#allocation35_spill] sm:$0xff]  ;;  %v16805_v43 = vld [vmem:[#allocation32_spill] sm:$0xff] }
 0x195   : > { %v10342_v41 = vsel %vm1498_vm4, %v1486_v10, %v7955_v16  ;;  %v10345_v42 = vsel %vm1498_vm4, %v1492_v44, %v7956_v0  ;;  %v10348_v49 = vsel %vm1498_vm4, %v1485_v45, %v883_v28  ;;  %v10374_v0 = vld [vmem:[#allocation2 + $0xd8] sm:$0xff]  ;;  %v16796_v16 = vld [vmem:[#allocation30_spill] sm:$0xff]  ;;  %v1419_v30 = vsel %vm16464_vm1, %v9577_v58, %v16801_v35  ;;  %v16806_v21 = vld [vmem:[#allocation60_spill] sm:$0xff] }
 0x196   : > { %16786 = vst [vmem:[#allocation23_spill] sm:$0xff] %v10342_v41  ;;  %16787 = vst [vmem:[#allocation4_spill] sm:$0xff] %v10345_v42  ;;  %1086 = vrot.lane.b32.xlu0 %v9571_v57, %s9212_s13  ;;  %v889_v1 = vpop.permute.xlu1 %888  ;;  %v1415_v36 = vsel %vm16464_vm1, %v10374_v0, %v16796_v16  ;;  %v16799_v10 = vld [vmem:[#allocation58_spill] sm:$0xff]  ;;  %v1417_v39 = vsel %vm16464_vm1, %v9567_v56, %v16805_v43  ;;  %v16809_v56 = vld [vmem:[#allocation81_spill] sm:$0xff] }
 0x197   : > { %16788 = vst [vmem:[#allocation74_spill] sm:$0xff] %v10348_v49  ;;  %v10360_v14 = vsel %vm1498_vm4, %v1488_v52, %v889_v1  ;;  %v1452_v44 = vsel %vm1424_vm2, %v1415_v36, %v16799_v10  ;;  %v16803_v52 = vld [vmem:[#allocation59_spill] sm:$0xff]  ;;  %v16810_v36 = vld [vmem:[#allocation61_spill] sm:$0xff] }
 0x198   : > { %16791 = vst [vmem:[#allocation47_spill] sm:$0xff] %v10360_v14  ;;  %v887_v32 = vpop.permute.xlu0 %886  ;;  %1092 = vrot.lane.b32.xlu1 %v9579_v59, %s9212_s13  ;;  %v1489_v31 = vsel %vm1461_vm3, %v1452_v44, %v16802_v7  ;;  %v1456_v1 = vsel %vm1424_vm2, %v1419_v30, %v16803_v52  ;;  %v16813_v30 = vld [vmem:[#allocation62_spill] sm:$0xff] }
 0x199   : > { %v10372_v26 = vsel %vm1498_vm4, %v1487_v50, %v887_v32  ;;  %v1493_v58 = vsel %vm1461_vm3, %v1456_v1, %v10080_v54  ;;  %v10412_v32 = vld [vmem:[#allocation2 + $0x108] sm:$0xff]  ;;  %v16816_v1 = vld [vmem:[#allocation83_spill] sm:$0xff] }
 0x19a   : > { %16795 = vst [vmem:[#allocation21_spill] sm:$0xff] %v10372_v26  ;;  %1090 = vrot.lane.b32.xlu0 %v16798_v62, %s9212_s13  ;;  %v893_v45 = vpop.permute.xlu1 %892  ;;  %v1421_v20 = vsel %vm16464_vm1, %v10412_v32, %v16808_v48  ;;  %v10582_v26 = vld [vmem:[#allocation2 + $0x120] sm:$0xff] }
 0x19b   : > { %v10386_v28 = vsel %vm1498_vm4, %v1490_v27, %v893_v45  ;;  %v1458_v60 = vsel %vm1424_vm2, %v1421_v20, %v16810_v36  ;;  %v16812_v45 = vld [vmem:[#allocation34_spill] sm:$0xff]  ;;  %v16821_v20 = vld [vmem:[#allocation64_spill] sm:$0xff] }
 0x19c   : > { %16800 = vst [vmem:[#allocation5_spill] sm:$0xff] %v10386_v28  ;;  %v891_v46 = vpop.permute.xlu0 %890  ;;  %1098 = vrot.lane.b32.xlu1 %v9605_v3, %s9212_s13  ;;  %v1454_v3 = vsel %vm1424_vm2, %v1417_v39, %v16806_v21  ;;  %v1420_v10 = vsel %vm16464_vm1, %v9571_v57, %v16812_v45  ;;  %v1495_v44 = vsel %vm1461_vm3, %v1458_v60, %v10090_v47  ;;  %v16817_v47 = vld [vmem:[#allocation63_spill] sm:$0xff]  ;;  %v16825_v60 = vld [vmem:[#allocation44_spill] sm:$0xff]  ;;  %v10578_v28 = vld [vmem:[#allocation2 + $0x128] sm:$0xff] }
 0x19d   : > { %v10398_v5 = vsel %vm1498_vm4, %v1489_v31, %v891_v46  ;;  %v1491_v16 = vsel %vm1461_vm3, %v1454_v3, %v16809_v56  ;;  %v1457_v7 = vsel %vm1424_vm2, %v1420_v10, %v16813_v30  ;;  %v16815_v46 = vld [vmem:[#allocation39_spill] sm:$0xff]  ;;  %v16820_v3 = vld [vmem:[#allocation86_spill] sm:$0xff] }
 0x19e   : > { %16804 = vst [vmem:[#allocation7_spill] sm:$0xff] %v10398_v5  ;;  %1096 = vrot.lane.b32.xlu0 %v9587_v61, %s9212_s13  ;;  %v899_v37 = vpop.permute.xlu1 %898  ;;  %v7982_v61 = vpack.i.bf16 %v10123_v63, %v9839_v38  ;;  %v1423_v52 = vsel %vm16464_vm1, %v9579_v59, %v16815_v46  ;;  %v1494_v57 = vsel %vm1461_vm3, %v1457_v7, %v16816_v1  ;;  %v10486_v7 = vld [vmem:[#allocation2 + $0x198] sm:$0xff]  ;;  %v16832_v46 = vld [vmem:[#allocation72_spill] sm:$0xff] }
 0x19f   : > { %v10410_v50 = vsel %vm1498_vm4, %v1493_v58, %v899_v37  ;;  %v1460_v39 = vsel %vm1424_vm2, %v1423_v52, %v16817_v47  ;;  %v16819_v37 = vld [vmem:[#allocation36_spill] sm:$0xff]  ;;  %16831 = vst [vmem:[#allocation29_spill] sm:$0xff] %v10486_v7 }
 0x1a0   : > { %16807 = vst [vmem:[#allocation48_spill] sm:$0xff] %v10410_v50  ;;  %v895_v54 = vpop.permute.xlu0 %894  ;;  %1102 = vrot.lane.b32.xlu1 %v9700_v17, %s9212_s13  ;;  %v1422_v21 = vsel %vm16464_vm1, %v16798_v62, %v16819_v37  ;;  %v1497_v48 = vsel %vm1461_vm3, %v1460_v39, %v16820_v3  ;;  %v10502_v47 = vld [vmem:[#allocation2 + $0x1a0] sm:$0xff]  ;;  %v9061_v50 = vld [vmem:[#allocation2 + $0x110] sm:$0xff] }
 0x1a1   : > { %v10426_v27 = vsel %vm1498_vm4, %v1491_v16, %v895_v54  ;;  %v1459_v56 = vsel %vm1424_vm2, %v1422_v21, %v16821_v20  ;;  %v16823_v54 = vld [vmem:[#allocation84_spill] sm:$0xff]  ;;  %v7987_v21 = vpack.i.bf16 %v10374_v0, %v10217_v23 }
 0x1a2   : > { %16811 = vst [vmem:[#allocation25_spill] sm:$0xff] %v10426_v27  ;;  %1100 = vrot.lane.b32.xlu0 %v9682_v11, %s9212_s13  ;;  %v903_v35 = vpop.permute.xlu1 %902 }
 0x1a3   : > { %v10438_v31 = vsel %vm1498_vm4, %v1495_v44, %v903_v35  ;;  %v16828_v44 = vld [vmem:[#allocation69_spill] sm:$0xff] }
 0x1a4   : > { %16814 = vst [vmem:[#allocation75_spill] sm:$0xff] %v10438_v31  ;;  %v901_v43 = vpop.permute.xlu0 %900  ;;  %7983 = vrot.lane.b32.xlu1 %v7982_v61, %s9212_s13  ;;  %v1496_v61 = vsel %vm1461_vm3, %v1459_v56, %v16823_v54  ;;  %v10522_v56 = vld [vmem:[#allocation2 + $0xc0] sm:$0xff]  ;;  %v9052_v54 = vld [vmem:[#allocation2 + $0xb8] sm:$0xf] }
 0x1a5   : > { %v10449_v58 = vsel %vm1498_vm4, %v1494_v57, %v901_v43  ;;  %v10496_v57 = vld [vmem:[#allocation2 + $0x1a8] sm:$0xf] }
 0x1a6   : > { %16818 = vst [vmem:[#allocation8_spill] sm:$0xff] %v10449_v58  ;;  %1104 = vrot.lane.b32.xlu0 %v9694_v15, %s9212_s13  ;;  %v907_v59 = vpop.permute.xlu1 %906  ;;  %v10561_v58 = vld [vmem:[#allocation2 + $0x100] sm:$0xf] }
 0x1a7   : > { %v10461_v16 = vsel %vm1498_vm4, %v1497_v48, %v907_v59  ;;  %v9050_v48 = vld [vmem:[#allocation2 + $0xb0] sm:$0xff] }
 0x1a8   : > { %16822 = vst [vmem:[#allocation49_spill] sm:$0xff] %v10461_v16  ;;  %v905_v36 = vpop.permute.xlu0 %904  ;;  %1110 = vrot.lane.b32.xlu1 %v9851_v12, %s9212_s13 }
 0x1a9   : > { %v10468_v62 = vsel %vm1498_vm4, %v1496_v61, %v905_v36  ;;  %v9053_v36 = vld [vmem:[#allocation2 + $0xd0] sm:$0xf] }
 0x1aa   : > { %16824 = vst [vmem:[#allocation22_spill] sm:$0xff] %v10468_v62  ;;  %1108 = vrot.lane.b32.xlu0 %v16825_v60, %s9212_s13  ;;  %v10472_v45 = vpop.permute.xlu1 %949 }
 0x1ab   : > { %16826 = vst [vmem:[#allocation50_spill] sm:$0xff] %v10472_v45  ;;  %v10552_v45 = vld [vmem:[#allocation2 + $0xf0] sm:$0xff] }
 0x1ac   : > { %v10474_v10 = vpop.permute.xlu0 %7958  ;;  %1114 = vrot.lane.b32.xlu1 %v9990_v9, %s9212_s13 }
 0x1ad   : > { %16827 = vst [vmem:[#allocation27_spill] sm:$0xff] %v10474_v10 }
 0x1ae   : > { %1112 = vrot.lane.b32.xlu0 %v16828_v44, %s9212_s13  ;;  %v10480_v35 = vpop.permute.xlu1 %953 }
 0x1af   : > { %16829 = vst [vmem:[#allocation76_spill] sm:$0xff] %v10480_v35 }
 0x1b0   : > { %v10482_v30 = vpop.permute.xlu0 %951  ;;  %1120 = vrot.lane.b32.xlu1 %v10117_v55, %s9212_s13 }
 0x1b1   : > { %16830 = vst [vmem:[#allocation24_spill] sm:$0xff] %v10482_v30  ;;  %v7992_v30 = vpack.i.bf16 %v9682_v11, %v10412_v32  ;;  %v10569_v11 = vld [vmem:[#allocation2 + $0x118] sm:$0xf] }
 0x1b2   : > { %1116 = vrot.lane.b32.xlu0 %v16832_v46, %s9212_s13  ;;  %v10490_v52 = vpop.permute.xlu1 %957 }
 0x1b3   : > { %16833 = vst [vmem:[#allocation51_spill] sm:$0xff] %v10490_v52 }
 0x1b4   : > { %v10492_v1 = vpop.permute.xlu0 %955  ;;  %1124 = vrot.lane.b32.xlu1 %v10486_v7, %s9212_s13 }
 0x1b5   : > { %16834 = vst [vmem:[#allocation53_spill] sm:$0xff] %v10492_v1  ;;  %v10546_v1 = vld [vmem:[#allocation2 + $0xf8] sm:$0xff] }
 0x1b6   : > { %1122 = vrot.lane.b32.xlu0 %v10146_v8, %s9212_s13  ;;  %v10500_v43 = vpop.permute.xlu1 %963 }
 0x1b8   : > { %v10504_v39 = vpop.permute.xlu0 %961  ;;  %1128 = vrot.lane.b32.xlu1 %v10496_v57, %s9212_s13 }
 0x1b9   : > { %16835 = vst [vmem:[#allocation10_spill] sm:$0xff] %v10504_v39  ;;  %v10537_v39 = vld [vmem:[#allocation2 + $0xe8] sm:$0xf] }
 0x1ba   : > { %1126 = vrot.lane.b32.xlu0 %v10502_v47, %s9212_s13  ;;  %v10510_v37 = vpop.permute.xlu1 %967 }
 0x1bc   : > { %v10514_v3 = vpop.permute.xlu0 %965  ;;  %1171 = vrot.lane.b32.xlu1 %v9050_v48, %s9213_s14 }
 0x1be   : > { %7988 = vrot.lane.b32.xlu0 %v7987_v21, %s9213_s14  ;;  %v10518_v59 = vpop.permute.xlu1 %7963  ;;  %v9054_v21 = vld [vmem:[#allocation2 + $0xc8] sm:$0xff] }
 0x1c0   : > { %v10520_v20 = vpop.permute.xlu0 %969  ;;  %1175 = vrot.lane.b32.xlu1 %v10522_v56, %s9213_s14 }
 0x1c2   : > { %1173 = vrot.lane.b32.xlu0 %v9052_v54, %s9213_s14  ;;  %v10527_v23 = vpop.permute.xlu1 %975  ;;  %v9056_v54 = vld [vmem:[#allocation2 + $0xe0] sm:$0xff] }
 0x1c4   : > { %v10529_v61 = vpop.permute.xlu0 %973  ;;  %1179 = vrot.lane.b32.xlu1 %v9053_v36, %s9213_s14 }
 0x1c6   : > { %1177 = vrot.lane.b32.xlu0 %v9054_v21, %s9213_s14  ;;  %v10533_v48 = vpop.permute.xlu1 %979 }
 0x1c8   : > { %v10535_v52 = vpop.permute.xlu0 %977  ;;  %1185 = vrot.lane.b32.xlu1 %v10537_v39, %s9213_s14 }
 0x1ca   : > { %1183 = vrot.lane.b32.xlu0 %v9056_v54, %s9213_s14  ;;  %v10542_v10 = vpop.permute.xlu1 %985 }
 0x1cc   : > { %v10544_v35 = vpop.permute.xlu0 %981  ;;  %1189 = vrot.lane.b32.xlu1 %v10546_v1, %s9213_s14 }
 0x1ce   : > { %1187 = vrot.lane.b32.xlu0 %v10552_v45, %s9213_s14  ;;  %v10556_v62 = vpop.permute.xlu1 %989 }
 0x1d0   : > { %v10558_v16 = vpop.permute.xlu0 %987  ;;  %7993 = vrot.lane.b32.xlu1 %v7992_v30, %s9213_s14 }
 0x1d2   : > { %1191 = vrot.lane.b32.xlu0 %v10561_v58, %s9213_s14  ;;  %v10565_v31 = vpop.permute.xlu1 %993 }
 0x1d4   : > { %v10567_v27 = vpop.permute.xlu0 %991  ;;  %1197 = vrot.lane.b32.xlu1 %v10569_v11, %s9213_s14 }
 0x1d6   : > { %1195 = vrot.lane.b32.xlu0 %v9061_v50, %s9213_s14  ;;  %v10574_v5 = vpop.permute.xlu1 %997 }
 0x1d7   : > { %16836 = vst [vmem:[#allocation52_spill] sm:$0xff] %v10574_v5  ;;  %v10592_v5 = vld [vmem:[#allocation2 + $0x130] sm:$0xf] }
 0x1d8   : > { %v10576_v30 = vpop.permute.xlu0 %7968  ;;  %1201 = vrot.lane.b32.xlu1 %v10578_v28, %s9213_s14 }
 0x1da   : > { %1199 = vrot.lane.b32.xlu0 %v10582_v26, %s9213_s14  ;;  %v10586_v14 = vpop.permute.xlu1 %1001 }
 0x1db   : > { %16837 = vst [vmem:[#allocation77_spill] sm:$0xff] %v10586_v14 }
 0x1dc   : > { %v10588_v42 = vpop.permute.xlu0 %999  ;;  %1207 = vrot.lane.b32.xlu1 %v9700_v17, %s9213_s14  ;;  %v7997_v17 = vpack.i.bf16 %v10486_v7, %v16828_v44 }
 0x1dd   : > { %16838 = vst [vmem:[#allocation11_spill] sm:$0xff] %v10588_v42 }
 0x1de   : > { %1203 = vrot.lane.b32.xlu0 %v10592_v5, %s9213_s14  ;;  %v10596_v41 = vpop.permute.xlu1 %1005 }
 0x1df   : > { %16839 = vst [vmem:[#allocation26_spill] sm:$0xff] %v10596_v41 }
 0x1e0   : > { %v10598_v49 = vpop.permute.xlu0 %1003  ;;  %1211 = vrot.lane.b32.xlu1 %v9839_v38, %s9213_s14 }
 0x1e1   : > { %16840 = vst [vmem:[#allocation6_spill] sm:$0xff] %v10598_v49 }
 0x1e2   : > { %1209 = vrot.lane.b32.xlu0 %v9694_v15, %s9213_s14  ;;  %v10604_v14 = vpop.permute.xlu1 %1011 }
 0x1e3   : > { %16841 = vst [vmem:[#allocation13_spill] sm:$0xff] %v10604_v14 }
 0x1e4   : > { %v10606_v42 = vpop.permute.xlu0 %1009  ;;  %1215 = vrot.lane.b32.xlu1 %v9851_v12, %s9213_s14 }
 0x1e6   : > { %1213 = vrot.lane.b32.xlu0 %v16825_v60, %s9213_s14  ;;  %v10614_v41 = vpop.permute.xlu1 %1015 }
 0x1e8   : > { %v10616_v49 = vpop.permute.xlu0 %1013  ;;  %1219 = vrot.lane.b32.xlu1 %v9990_v9, %s9213_s14 }
 0x1ea   : > { %7998 = vrot.lane.b32.xlu0 %v7997_v17, %s9213_s14  ;;  %v10621_v15 = vpop.permute.xlu1 %7973 }
 0x1eb   : > { %16842 = vst [vmem:[#allocation54_spill] sm:$0xff] %v10621_v15 }
 0x1ec   : > { %v10623_v14 = vpop.permute.xlu0 %1017  ;;  %1223 = vrot.lane.b32.xlu1 %v10123_v63, %s9213_s14 }
 0x1ee   : > { %1221 = vrot.lane.b32.xlu0 %v16832_v46, %s9213_s14  ;;  %v10629_v12 = vpop.permute.xlu1 %1062 }
 0x1ef   : > { %16843 = vst [vmem:[#allocation31_spill] sm:$0xff] %v10629_v12 }
 0x1f0   : > { %v10631_v60 = vpop.permute.xlu0 %1060  ;;  %1227 = vrot.lane.b32.xlu1 %v10146_v8, %s9213_s14 }
 0x1f2   : > { %1225 = vrot.lane.b32.xlu0 %v10117_v55, %s9213_s14  ;;  %v10637_v17 = vpop.permute.xlu1 %1066  ;;  %v1545_v55 = vsel %vm1535_vm5, %v10144_v53, %v10514_v3 }
 0x1f4   : > { %v10639_v7 = vpop.permute.xlu0 %1064  ;;  %1284 = vrot.lane.b32.xlu1 %v9053_v36, %s9214_s15  ;;  %v8002_v36 = vpack.i.bf16 %v10552_v45, %v10522_v56  ;;  %v7966_v56 = vunpack.i.h.bf16 %v10518_v59 }
 0x1f6   : > { %1282 = vrot.lane.b32.xlu0 %v9054_v21, %s9214_s15  ;;  %v10643_v15 = vpop.permute.xlu1 %1072 }
 0x1f8   : > { %v10645_v12 = vpop.permute.xlu0 %1068  ;;  %1288 = vrot.lane.b32.xlu1 %v9056_v54, %s9214_s15  ;;  %v1544_v54 = vsel %vm1535_vm5, %v10158_v18, %v10500_v43  ;;  %v1546_v18 = vsel %vm1535_vm5, %v10186_v22, %v10510_v37 }
 0x1f9   : > { %16844 = vst [vmem:[#allocation78_spill] sm:$0xff] %v10645_v12 }
 0x1fa   : > { %1286 = vrot.lane.b32.xlu0 %v10374_v0, %s9214_s15  ;;  %v1077_v8 = vpop.permute.xlu1 %1076  ;;  %v1547_v0 = vsel %vm1535_vm5, %v10171_v6, %v10520_v20  ;;  %v7965_v6 = vunpack.i.l.bf16 %v10518_v59  ;;  %v1549_v20 = vsel %vm1535_vm5, %v10197_v13, %v10529_v61  ;;  %v1551_v13 = vsel %vm1535_vm5, %v10230_v24, %v10535_v52  ;;  %v10718_v52 = vld [vmem:[#allocation2 + $0x1b0] sm:$0xff] }
 0x1fb   : > { %v10656_v21 = vsel %vm1572_vm6, %v1545_v55, %v1077_v8  ;;  %v1554_v8 = vsel %vm1535_vm5, %v10227_v40, %v7966_v56  ;;  %v9065_v56 = vld [vmem:[#allocation2 + $0x140] sm:$0xff] }
 0x1fc   : > { %v1075_v12 = vpop.permute.xlu0 %1074  ;;  %1290 = vrot.lane.b32.xlu1 %v10537_v39, %s9214_s15  ;;  %v1548_v59 = vsel %vm1535_vm5, %v10224_v4, %v7965_v6  ;;  %v1550_v4 = vsel %vm1535_vm5, %v10242_v25, %v10527_v23  ;;  %v1552_v25 = vsel %vm1535_vm5, %v10266_v29, %v10533_v48  ;;  %v1555_v29 = vsel %vm1535_vm5, %v10294_v34, %v10542_v10 }
 0x1fd   : > { %v10664_v53 = vsel %vm1572_vm6, %v1544_v54, %v1075_v12  ;;  %v1557_v34 = vsel %vm1535_vm5, %v10317_v19, %v10556_v62  ;;  %v7970_v10 = vunpack.i.l.bf16 %v10576_v30  ;;  %v8007_v6 = vpack.i.bf16 %v9839_v38, %v10582_v26  ;;  %v16847_v62 = vld [vmem:[#allocation74_spill] sm:$0xff] }
 0x1fe   : > { %8003 = vrot.lane.b32.xlu0 %v8002_v36, %s9214_s15  ;;  %v1081_v45 = vpop.permute.xlu1 %1080 }
 0x1ff   : > { %v10671_v3 = vsel %vm1572_vm6, %v1547_v0, %v1081_v45 }
 0x200   : > { %v1079_v43 = vpop.permute.xlu0 %1078  ;;  %1300 = vrot.lane.b32.xlu1 %v9061_v50, %s9214_s15 }
 0x201   : > { %v10678_v39 = vsel %vm1572_vm6, %v1546_v18, %v1079_v43 }
 0x202   : > { %1294 = vrot.lane.b32.xlu0 %v10546_v1, %s9214_s15  ;;  %v1085_v12 = vpop.permute.xlu1 %1084 }
 0x203   : > { %v10688_v22 = vsel %vm1572_vm6, %v1549_v20, %v1085_v12  ;;  %v16848_v12 = vld [vmem:[#allocation23_spill] sm:$0xff] }
 0x204   : > { %v7979_v37 = vpop.permute.xlu0 %7978  ;;  %1298 = vrot.lane.b32.xlu1 %v10412_v32, %s9214_s15 }
 0x205   : > { %v7981_v50 = vunpack.i.h.bf16 %v7979_v37  ;;  %v7980_v55 = vunpack.i.l.bf16 %v7979_v37  ;;  %v1560_v37 = vsel %vm1535_vm5, %v16848_v12, %v7970_v10  ;;  %v16867_v12 = vld [vmem:[#allocation26_spill] sm:$0xff] }
 0x206   : > { %1302 = vrot.lane.b32.xlu0 %v10569_v11, %s9214_s15  ;;  %v1089_v1 = vpop.permute.xlu1 %1088  ;;  %v1553_v11 = vsel %vm1535_vm5, %v10254_v2, %v10544_v35  ;;  %v1556_v2 = vsel %vm1535_vm5, %v10278_v51, %v10558_v16  ;;  %v1558_v51 = vsel %vm1535_vm5, %v10306_v33, %v10567_v27 }
 0x207   : > { %v10702_v61 = vsel %vm1572_vm6, %v1548_v59, %v7980_v55  ;;  %v10705_v32 = vsel %vm1572_vm6, %v1554_v8, %v7981_v50  ;;  %v10708_v36 = vsel %vm1572_vm6, %v1551_v13, %v1089_v1  ;;  %v16849_v50 = vld [vmem:[#allocation4_spill] sm:$0xff]  ;;  %v9067_v8 = vld [vmem:[#allocation2 + $0x148] sm:$0xf]  ;;  %v16853_v1 = vld [vmem:[#allocation11_spill] sm:$0xff] }
 0x208   : > { %v1087_v40 = vpop.permute.xlu0 %1086  ;;  %1231 = vrot.lane.b32.xlu1 %v10502_v47, %s9213_s14 }
 0x209   : > { %v10716_v24 = vsel %vm1572_vm6, %v1550_v4, %v1087_v40  ;;  %v16854_v4 = vld [vmem:[#allocation47_spill] sm:$0xff] }
 0x20a   : > { %1296 = vrot.lane.b32.xlu0 %v10561_v58, %s9214_s15  ;;  %v1093_v54 = vpop.permute.xlu1 %1092  ;;  %v1562_v40 = vsel %vm1535_vm5, %v16854_v4, %v16853_v1 }
 0x20b   : > { %v10726_v0 = vsel %vm1572_vm6, %v1553_v11, %v1093_v54 }
 0x20c   : > { %v1091_v23 = vpop.permute.xlu0 %1090  ;;  %1235 = vrot.lane.b32.xlu1 %v10718_v52, %s9213_s14 }
 0x20d   : > { %v10734_v45 = vsel %vm1572_vm6, %v1552_v25, %v1091_v23  ;;  %v16856_v25 = vld [vmem:[#allocation52_spill] sm:$0xff]  ;;  %v16857_v23 = vld [vmem:[#allocation21_spill] sm:$0xff] }
 0x20e   : > { %1233 = vrot.lane.b32.xlu0 %v10496_v57, %s9213_s14  ;;  %v1099_v58 = vpop.permute.xlu1 %1098 }
 0x20f   : > { %v10742_v35 = vsel %vm1572_vm6, %v1556_v2, %v1099_v58  ;;  %v1561_v2 = vsel %vm1535_vm5, %v16857_v23, %v16856_v25 }
 0x210   : > { %v1097_v48 = vpop.permute.xlu0 %1096  ;;  %1308 = vrot.lane.b32.xlu1 %v10592_v5, %s9214_s15  ;;  %v7971_v5 = vunpack.i.h.bf16 %v10576_v30  ;;  %v1559_v30 = vsel %vm1535_vm5, %v16847_v62, %v10565_v31  ;;  %v10789_v31 = vld [vmem:[#allocation2 + $0x1b8] sm:$0xff] }
 0x211   : > { %v10750_v18 = vsel %vm1572_vm6, %v1555_v29, %v1097_v48  ;;  %v16859_v48 = vld [vmem:[#allocation6_spill] sm:$0xff] }
 0x212   : > { %1306 = vrot.lane.b32.xlu0 %v10578_v28, %s9214_s15  ;;  %v1103_v16 = vpop.permute.xlu1 %1102  ;;  %v9066_v28 = vld [vmem:[#allocation2 + $0x138] sm:$0xff]  ;;  %v1566_v55 = vsel %vm1535_vm5, %v16849_v50, %v7971_v5 }
 0x213   : > { %v10758_v57 = vsel %vm1572_vm6, %v1558_v51, %v1103_v16  ;;  %v16860_v51 = vld [vmem:[#allocation5_spill] sm:$0xff] }
 0x214   : > { %16845 = vst [vmem:[#allocation9_spill] sm:$0xff] %v10758_v57  ;;  %v1101_v43 = vpop.permute.xlu0 %1100  ;;  %1312 = vrot.lane.b32.xlu1 %v9065_v56, %s9214_s15  ;;  %v1564_v16 = vsel %vm1535_vm5, %v16860_v51, %v16859_v48  ;;  %v16863_v56 = vld [vmem:[#allocation7_spill] sm:$0xff]  ;;  %v16877_v48 = vld [vmem:[#allocation22_spill] sm:$0xff] }
 0x215   : > { %v10767_v33 = vsel %vm1572_vm6, %v1557_v34, %v1101_v43  ;;  %v9068_v34 = vld [vmem:[#allocation2 + $0x158] sm:$0xff]  ;;  %v16862_v43 = vld [vmem:[#allocation77_spill] sm:$0xff]  ;;  %v1570_v51 = vsel %vm1535_vm5, %v16877_v48, %v10614_v41  ;;  %v409_v48 = vld [vmem:[#allocation2 + $0x10] sm:$0xf] }
 0x216   : > { %16846 = vst [vmem:[#allocation55_spill] sm:$0xff] %v10767_v33  ;;  %1310 = vrot.lane.b32.xlu0 %v9066_v28, %s9214_s15  ;;  %v7984_v27 = vpop.permute.xlu1 %7983  ;;  %v1563_v28 = vsel %vm1535_vm5, %v16863_v56, %v16862_v43  ;;  %v16937_v57 = vld [vmem:[#allocation70_spill] sm:$0xff] }
 0x217   : > { %v7986_v20 = vunpack.i.h.bf16 %v7984_v27  ;;  %v7985_v19 = vunpack.i.l.bf16 %v7984_v27 }
 0x218   : > { %v1105_v59 = vpop.permute.xlu0 %1104  ;;  %1314 = vrot.lane.b32.xlu1 %v9067_v8, %s9214_s15 }
 0x219   : > { %v10781_v13 = vsel %vm1572_vm6, %v1560_v37, %v7985_v19  ;;  %v10784_v38 = vsel %vm1572_vm6, %v1566_v55, %v7986_v20  ;;  %v10787_v26 = vsel %vm1572_vm6, %v1559_v30, %v1105_v59  ;;  %v16865_v20 = vld [vmem:[#allocation48_spill] sm:$0xff]  ;;  %v16868_v37 = vld [vmem:[#allocation25_spill] sm:$0xff] }
 0x21a   : > { %16850 = vst [vmem:[#allocation28_spill] sm:$0xff] %v10781_v13  ;;  %16851 = vst [vmem:[#allocation56_spill] sm:$0xff] %v10784_v38  ;;  %8008 = vrot.lane.b32.xlu0 %v8007_v6, %s9214_s15  ;;  %v1111_v11 = vpop.permute.xlu1 %1110  ;;  %v1567_v19 = vsel %vm1535_vm5, %v16865_v20, %v10606_v42  ;;  %v1565_v50 = vsel %vm1535_vm5, %v16868_v37, %v16867_v12  ;;  %v9069_v59 = vld [vmem:[#allocation2 + $0x160] sm:$0xf]  ;;  %v16889_v13 = vld [vmem:[#allocation41_spill] sm:$0xff] }
 0x21b   : > { %16852 = vst [vmem:[#allocation33_spill] sm:$0xff] %v10787_v26  ;;  %v10796_v54 = vsel %vm1572_vm6, %v1562_v40, %v1111_v11  ;;  %v10846_v40 = vld [vmem:[#allocation2 + $0x1c0] sm:$0xf] }
 0x21c   : > { %16855 = vst [vmem:[#allocation79_spill] sm:$0xff] %v10796_v54  ;;  %v1109_v58 = vpop.permute.xlu0 %1108  ;;  %1237 = vrot.lane.b32.xlu1 %v10789_v31, %s9213_s14  ;;  %v16891_v54 = vld [vmem:[#allocation19_spill] sm:$0xff] }
 0x21d   : > { %v10804_v29 = vsel %vm1572_vm6, %v1561_v2, %v1109_v58 }
 0x21e   : > { %16858 = vst [vmem:[#allocation57_spill] sm:$0xff] %v10804_v29  ;;  %1318 = vrot.lane.b32.xlu0 %v9068_v34, %s9214_s15  ;;  %v1115_v5 = vpop.permute.xlu1 %1114 }
 0x21f   : > { %v10811_v10 = vsel %vm1572_vm6, %v1564_v16, %v1115_v5 }
 0x220   : > { %16861 = vst [vmem:[#allocation30_spill] sm:$0xff] %v10811_v10  ;;  %v1113_v27 = vpop.permute.xlu0 %1112  ;;  %1326 = vrot.lane.b32.xlu1 %v16832_v46, %s9214_s15  ;;  %v8012_v46 = vpack.i.bf16 %v10718_v52, %v10123_v63  ;;  %v16872_v63 = vld [vmem:[#allocation13_spill] sm:$0xff]  ;;  %v16873_v52 = vld [vmem:[#allocation8_spill] sm:$0xff] }
 0x221   : > { %v10819_v6 = vsel %vm1572_vm6, %v1563_v28, %v1113_v27  ;;  %v1568_v11 = vsel %vm1535_vm5, %v16873_v52, %v16872_v63  ;;  %v16890_v10 = vld [vmem:[#allocation16_spill] sm:$0xff] }
 0x222   : > { %16864 = vst [vmem:[#allocation82_spill] sm:$0xff] %v10819_v6  ;;  %1324 = vrot.lane.b32.xlu0 %v9990_v9, %s9214_s15  ;;  %v1121_v62 = vpop.permute.xlu1 %1120  ;;  %v16870_v9 = vld [vmem:[#allocation75_spill] sm:$0xff] }
 0x223   : > { %v10827_v30 = vsel %vm1572_vm6, %v1567_v19, %v1121_v62  ;;  %v1569_v8 = vsel %vm1535_vm5, %v16870_v9, %v10616_v49  ;;  %v16875_v49 = vld [vmem:[#allocation49_spill] sm:$0xff]  ;;  %v9070_v6 = vld [vmem:[#allocation2 + $0x18] sm:$0xff] }
 0x224   : > { %16866 = vst [vmem:[#allocation12_spill] sm:$0xff] %v10827_v30  ;;  %v1117_v55 = vpop.permute.xlu0 %1116  ;;  %1320 = vrot.lane.b32.xlu1 %v9069_v59, %s9214_s15  ;;  %v16913_v30 = vld [vmem:[#allocation20_spill] sm:$0xff] }
 0x225   : > { %v10836_v42 = vsel %vm1572_vm6, %v1565_v50, %v1117_v55 }
 0x226   : > { %16869 = vst [vmem:[#allocation58_spill] sm:$0xff] %v10836_v42  ;;  %1322 = vrot.lane.b32.xlu0 %v16828_v44, %s9214_s15  ;;  %v1125_v1 = vpop.permute.xlu1 %1124  ;;  %v1571_v44 = vsel %vm1535_vm5, %v16875_v49, %v10623_v14 }
 0x227   : > { %v10844_v4 = vsel %vm1572_vm6, %v1569_v8, %v1125_v1 }
 0x228   : > { %16871 = vst [vmem:[#allocation35_spill] sm:$0xff] %v10844_v4  ;;  %v1123_v25 = vpop.permute.xlu0 %1122  ;;  %8013 = vrot.lane.b32.xlu1 %v8012_v46, %s9214_s15 }
 0x229   : > { %v10853_v23 = vsel %vm1572_vm6, %v1568_v11, %v1123_v25 }
 0x22a   : > { %16874 = vst [vmem:[#allocation80_spill] sm:$0xff] %v10853_v23  ;;  %1239 = vrot.lane.b32.xlu0 %v10846_v40, %s9213_s14  ;;  %v1129_v2 = vpop.permute.xlu1 %1128  ;;  %v16897_v23 = vld [vmem:[#allocation88_spill] sm:$0xff] }
 0x22b   : > { %v10861_v58 = vsel %vm1572_vm6, %v1571_v44, %v1129_v2  ;;  %v408_v2 = vld [vmem:[#allocation2 + $0x8] sm:$0xff] }
 0x22c   : > { %16876 = vst [vmem:[#allocation59_spill] sm:$0xff] %v10861_v58  ;;  %v1127_v16 = vpop.permute.xlu0 %1126  ;;  %v16888_v58 = vld [vmem:[#allocation14_spill] sm:$0xff] }
 0x22d   : > { %v10867_v34 = vsel %vm1572_vm6, %v1570_v51, %v1127_v16  ;;  %v16886_v16 = vld [vmem:[#allocation15_spill] sm:$0xff]  ;;  %v1390_v42 = vsel %vm16464_vm1, %v409_v48, %v16888_v58  ;;  %v16895_v58 = vld [vmem:[#allocation42_spill] sm:$0xff] }
 0x22e   : > { %16878 = vst [vmem:[#allocation32_spill] sm:$0xff] %v10867_v34  ;;  %v1172_v5 = vpop.permute.xlu1 %1171  ;;  %v1389_v4 = vsel %vm16464_vm1, %v408_v2, %v16886_v16  ;;  %v16893_v2 = vld [vmem:[#allocation65_spill] sm:$0xff] }
 0x22f   : > { %v1426_v38 = vsel %vm1424_vm2, %v1389_v4, %v16889_v13  ;;  %v16896_v13 = vld [vmem:[#allocation68_spill] sm:$0xff] }
 0x230   : > { %v10869_v43 = vpop.permute.xlu0 %7988  ;;  %v1463_v16 = vsel %vm1461_vm3, %v1426_v38, %v16893_v2  ;;  %v16901_v2 = vld [vmem:[#allocation50_spill] sm:$0xff] }
 0x232   : > { %v10871_v56 = vpop.permute.xlu1 %1175 }
 0x234   : > { %v1174_v14 = vpop.permute.xlu0 %1173 }
 0x236   : > { %v10873_v28 = vpop.permute.xlu1 %1179 }
 0x238   : > { %v1178_v27 = vpop.permute.xlu0 %1177 }
 0x23a   : > { %v10875_v20 = vpop.permute.xlu1 %1185 }
 0x23c   : > { %v10877_v19 = vpop.permute.xlu0 %1183 }
 0x23e   : > { %v10879_v62 = vpop.permute.xlu1 %1189 }
 0x240   : > { %v10881_v41 = vpop.permute.xlu0 %1187 }
 0x242   : > { %v10883_v12 = vpop.permute.xlu1 %7993 }
 0x244   : > { %v10885_v37 = vpop.permute.xlu0 %1191 }
 0x246   : > { %v10887_v50 = vpop.permute.xlu1 %1197 }
 0x248   : > { %v10889_v46 = vpop.permute.xlu0 %1195 }
 0x24a   : > { %v10891_v55 = vpop.permute.xlu1 %1201 }
 0x24c   : > { %v10893_v59 = vpop.permute.xlu0 %1199 }
 0x24e   : > { %v10895_v9 = vpop.permute.xlu1 %1207 }
 0x250   : > { %v10897_v8 = vpop.permute.xlu0 %1203 }
 0x252   : > { %v10899_v1 = vpop.permute.xlu1 %1211 }
 0x253   : > { %16879 = vst [vmem:[#allocation60_spill] sm:$0xff] %v10899_v1 }
 0x254   : > { %v10901_v63 = vpop.permute.xlu0 %1209 }
 0x256   : > { %v10903_v52 = vpop.permute.xlu1 %1215 }
 0x257   : > { %16880 = vst [vmem:[#allocation37_spill] sm:$0xff] %v10903_v52 }
 0x258   : > { %v10905_v11 = vpop.permute.xlu0 %1213 }
 0x259   : > { %16881 = vst [vmem:[#allocation81_spill] sm:$0xff] %v10905_v11 }
 0x25a   : > { %v10907_v25 = vpop.permute.xlu1 %1219 }
 0x25b   : > { %16882 = vst [vmem:[#allocation61_spill] sm:$0xff] %v10907_v25 }
 0x25c   : > { %v10909_v49 = vpop.permute.xlu0 %7998 }
 0x25d   : > { %16883 = vst [vmem:[#allocation34_spill] sm:$0xff] %v10909_v49  ;;  %v1391_v49 = vsel %vm16464_vm1, %v9070_v6, %v16890_v10  ;;  %v1500_v10 = vsel %vm1498_vm4, %v1463_v16, %v16897_v23  ;;  %v16898_v6 = vld [vmem:[#allocation43_spill] sm:$0xff] }
 0x25e   : > { %v10911_v44 = vpop.permute.xlu1 %1223 }
 0x25f   : > { %16884 = vst [vmem:[#allocation62_spill] sm:$0xff] %v10911_v44  ;;  %v9071_v44 = vld [vmem:[#allocation2 + $0x20] sm:$0xff] }
 0x260   : > { %v10913_v51 = vpop.permute.xlu0 %1221  ;;  %v1392_v29 = vsel %vm16464_vm1, %v9071_v44, %v16891_v54  ;;  %v1428_v54 = vsel %vm1424_vm2, %v1391_v49, %v16898_v6  ;;  %v16899_v44 = vld [vmem:[#allocation71_spill] sm:$0xff]  ;;  %v16905_v6 = vld [vmem:[#allocation53_spill] sm:$0xff] }
 0x261   : > { %16885 = vst [vmem:[#allocation39_spill] sm:$0xff] %v10913_v51  ;;  %v16892_v51 = vld [vmem:[#allocation40_spill] sm:$0xff]  ;;  %v1429_v48 = vsel %vm1424_vm2, %v1392_v29, %v16895_v58  ;;  %v16902_v58 = vld [vmem:[#allocation89_spill] sm:$0xff]  ;;  %v16904_v49 = vld [vmem:[#allocation67_spill] sm:$0xff] }
 0x262   : > { %v10917_v34 = vpop.permute.xlu1 %1227  ;;  %v1427_v25 = vsel %vm1424_vm2, %v1390_v42, %v16892_v51  ;;  %v1466_v42 = vsel %vm1461_vm3, %v1429_v48, %v16899_v44  ;;  %v16900_v51 = vld [vmem:[#allocation87_spill] sm:$0xff]  ;;  %v1465_v48 = vsel %vm1461_vm3, %v1428_v54, %v16904_v49  ;;  %v16908_v54 = vld [vmem:[#allocation76_spill] sm:$0xff] }
 0x263   : > { %16887 = vst [vmem:[#allocation83_spill] sm:$0xff] %v10917_v34  ;;  %v1464_v4 = vsel %vm1461_vm3, %v1427_v25, %v16896_v13  ;;  %v1503_v25 = vsel %vm1498_vm4, %v1466_v42, %v16902_v58  ;;  %v16903_v13 = vld [vmem:[#allocation24_spill] sm:$0xff]  ;;  %v16906_v44 = vld [vmem:[#allocation31_spill] sm:$0xff]  ;;  %v16907_v42 = vld [vmem:[#allocation90_spill] sm:$0xff] }
 0x264   : > { %v10931_v34 = vpop.permute.xlu0 %1225  ;;  %v1501_v38 = vsel %vm1498_vm4, %v1464_v4, %v16900_v51  ;;  %v1540_v4 = vsel %vm1535_vm5, %v1503_v25, %v16905_v6  ;;  %v1502_v58 = vsel %vm1498_vm4, %v1465_v48, %v16907_v42  ;;  %v16909_v48 = vld [vmem:[#allocation17_spill] sm:$0xff]  ;;  %v16910_v42 = vld [vmem:[#allocation38_spill] sm:$0xff] }
 0x265   : > { %16894 = vst [vmem:[#allocation63_spill] sm:$0xff] %v10931_v34  ;;  %v1537_v34 = vsel %vm1535_vm5, %v1500_v10, %v16901_v2  ;;  %v1538_v23 = vsel %vm1535_vm5, %v1501_v38, %v16903_v13  ;;  %v1577_v38 = vsel %vm1572_vm6, %v1540_v4, %v10637_v17  ;;  %v1539_v25 = vsel %vm1535_vm5, %v1502_v58, %v16908_v54 }
 0x266   : > { %v1285_v29 = vpop.permute.xlu1 %1284  ;;  %v1574_v16 = vsel %vm1572_vm6, %v1537_v34, %v10631_v60  ;;  %v1575_v10 = vsel %vm1572_vm6, %v1538_v23, %v16906_v44  ;;  %v1614_v13 = vsel %vm1609_vm7, %v1577_v38, %v1178_v27  ;;  %v1576_v49 = vsel %vm1572_vm6, %v1539_v25, %v10639_v7 }
 0x267   : > { %v1611_v51 = vsel %vm1609_vm7, %v1574_v16, %v1172_v5  ;;  %v1612_v60 = vsel %vm1609_vm7, %v1575_v10, %v1174_v14  ;;  %v7901_v6 = vunpack.i.h.bf16 %v16909_v48  ;;  %v1613_v4 = vsel %vm1609_vm7, %v1576_v49, %v10871_v56  ;;  %v407_v10 = vld [vmem:[#allocation2] sm:$0xff]  ;;  %v9072_v49 = vld [vmem:[#allocation2 + $0x30] sm:$0xff] }
 0x268   : > { %v1283_v2 = vpop.permute.xlu0 %1282  ;;  %v10972_v23 = vsel %vm1646_vm8, %v1612_v60, %v1285_v29  ;;  %v7900_v29 = vunpack.i.l.bf16 %v16909_v48  ;;  %v7916_v58 = vunpack.i.h.bf16 %v16910_v42  ;;  %v7915_v38 = vunpack.i.l.bf16 %v16910_v42  ;;  %v16912_v42 = vld [vmem:[#allocation85_spill] sm:$0xff] }
 0x269   : > { %v10966_v34 = vsel %vm1646_vm8, %v1611_v51, %v1283_v2  ;;  %v2159_v7 = vrot.slane %v10972_v23, 5  ;;  %v1394_v48 = vsel %vm16464_vm1, %v9072_v49, %v7901_v6  ;;  %v16914_v49 = vld [vmem:[#allocation45_spill] sm:$0xff] }
 0x26a   : > { %v1289_v5 = vpop.permute.xlu1 %1288  ;;  %v16443_v16 = vrot.slane %v10966_v34, 4  ;;  %v16442_v14 = vrot.slane %v10966_v34, 5 }
 0x26b   : > { %v10978_v17 = vsel %vm1646_vm8, %v1614_v13, %v1289_v5  ;;  %v1388_v5 = vsel %vm16464_vm1, %v407_v10, %v7900_v29  ;;  %v1431_v10 = vsel %vm1424_vm2, %v1394_v48, %v7916_v58  ;;  %v7946_v58 = vunpack.i.h.bf16 %v16912_v42  ;;  %v16915_v48 = vld [vmem:[#allocation73_spill] sm:$0xff] }
 0x26c   : > { %v1287_v27 = vpop.permute.xlu0 %1286  ;;  %2073 = vrot.lane.b32.xlu0 %v16443_v16, %s9215_s16  ;;  %v16444_v2 = vrot.slane %v10978_v17, 4  ;;  %v2160_v60 = vsel %vm2155_vm9, %v16442_v14, %v2159_v7  ;;  %v7945_v14 = vunpack.i.l.bf16 %v16912_v42  ;;  %v16446_v16 = vrot.slane %v10966_v34, 1  ;;  %v16917_v42 = vld [vmem:[#allocation27_spill] sm:$0xff] }
 0x26d   : > { %v10990_v44 = vsel %vm1646_vm8, %v1613_v4, %v1287_v27  ;;  %v16911_v4 = vld [vmem:[#allocation66_spill] sm:$0xff]  ;;  %v1425_v6 = vsel %vm1424_vm2, %v1388_v5, %v7915_v38  ;;  %v2292_v38 = vrot.slane %v10972_v23, 6 }
 0x26e   : > { %v10992_v51 = vpop.permute.xlu1 %1290  ;;  %v2038_v56 = vrot.slane %v10990_v44, 4  ;;  %v2161_v13 = vrot.slane %v10990_v44, 5  ;;  %v7930_v27 = vunpack.i.l.bf16 %v16911_v4  ;;  %v7931_v7 = vunpack.i.h.bf16 %v16911_v4 }
 0x270   : > { %v11001_v54 = vpop.permute.xlu0 %8003  ;;  %2218 = vrot.lane.b32.xlu0 %v2160_v60, %s9216_s17  ;;  %v2040_v25 = vsel %vm16465_vm10, %v2038_v56, %v16444_v2  ;;  %v16445_v56 = vrot.slane %v10978_v17, 5  ;;  %v9073_v2 = vld [vmem:[#allocation2 + $0x38] sm:$0xff]  ;;  %v1468_v5 = vsel %vm1461_vm3, %v1431_v10, %v7931_v7  ;;  %v16919_v10 = vld [vmem:[#allocation54_spill] sm:$0xff] }
 0x271   : > { %2075 = vrot.lane.b32.xlu1 %v2040_v25, %s9215_s16  ;;  %v1395_v29 = vsel %vm16464_vm1, %v9073_v2, %v16913_v30  ;;  %v1711_v30 = vrot.slane %v10990_v44, 1  ;;  %v1462_v2 = vsel %vm1461_vm3, %v1425_v6, %v7930_v27  ;;  %v7961_v6 = vunpack.i.h.bf16 %v16917_v42 }
 0x272   : > { %v11014_v60 = vpop.permute.xlu1 %1300  ;;  %v1432_v4 = vsel %vm1424_vm2, %v1395_v29, %v16914_v49  ;;  %v2163_v1 = vsel %vm2155_vm9, %v2161_v13, %v16445_v56  ;;  %v1499_v49 = vsel %vm1498_vm4, %v1462_v2, %v7945_v14  ;;  %v16447_v56 = vrot.slane %v10978_v17, 1 }
 0x273   : > { %v1469_v29 = vsel %vm1461_vm3, %v1432_v4, %v16915_v48  ;;  %v7960_v25 = vunpack.i.l.bf16 %v16917_v42  ;;  %v7976_v26 = vunpack.i.h.bf16 %v16919_v10  ;;  %v7975_v4 = vunpack.i.l.bf16 %v16919_v10  ;;  %v16920_v48 = vld [vmem:[#allocation10_spill] sm:$0xff] }
 0x274   : > { %v1295_v33 = vpop.permute.xlu0 %1294  ;;  %1746 = vrot.lane.b32.xlu0 %v16446_v16, %s9217_s18  ;;  %v16916_v16 = vld [vmem:[#allocation91_spill] sm:$0xff]  ;;  %v1713_v14 = vsel %vm1707_vm12, %v1711_v30, %v16447_v56  ;;  %v1505_v2 = vsel %vm1498_vm4, %v1468_v5, %v7946_v58  ;;  %v7990_v42 = vunpack.i.l.bf16 %v10869_v43  ;;  %v8006_v30 = vunpack.i.h.bf16 %v11001_v54 }
 0x275   : > { %2220 = vrot.lane.b32.xlu1 %v2163_v1, %s9216_s17  ;;  %v1506_v27 = vsel %vm1498_vm4, %v1469_v29, %v16916_v16  ;;  %v16918_v1 = vrot.slane %v10966_v34, 6  ;;  %v2294_v16 = vrot.slane %v10990_v44, 6  ;;  %v8005_v10 = vunpack.i.l.bf16 %v11001_v54 }
 0x276   : > { %v11040_v13 = vpop.permute.xlu1 %1298  ;;  %v1543_v29 = vsel %vm1535_vm5, %v1506_v27, %v16920_v48  ;;  %v16449_v58 = vrot.slane %v10978_v17, 6  ;;  %v1536_v5 = vsel %vm1535_vm5, %v1499_v49, %v7960_v25  ;;  %v1542_v27 = vsel %vm1535_vm5, %v1505_v2, %v7961_v6  ;;  %v8978_v2 = vld [vmem:[%s16404_s1] sm:$0xff]  }
 0x277   : > { %v2293_v7 = vsel %vm2288_vm11, %v16918_v1, %v2292_v38  ;;  %v7991_v38 = vunpack.i.h.bf16 %v10869_v43  ;;  %v1579_v48 = vsel %vm1572_vm6, %v1542_v27, %v7976_v26  ;;  %v8977_v26 = vld [vmem:[%s16404_s1 + $0x40] sm:$0xff]   ;;  %v16450_v27 = vrot.slane %v10966_v34, 2 }
 0x278   : > { %2351 = vrot.lane.b32.xlu0 %v2293_v7, %s9218_s19  ;;  %v11062_v1 = vpop.permute.xlu0 %1302  ;;  %v1580_v7 = vsel %vm1572_vm6, %v1543_v29, %v10643_v15  ;;  %v9074_v29 = vld [vmem:[#allocation2 + $0x188] sm:$0xff]  ;;  %v2296_v54 = vsel %vm2288_vm11, %v2294_v16, %v16449_v58  ;;  %7334 = vmatprep.subr.bf16.mxu0 %v8977_v26  ;;  %v2425_v58 = vrot.slane %v10972_v23, 7 }
 0x279   : > { %1748 = vrot.lane.b32.xlu1 %v1713_v14, %s9217_s18  ;;  %v1617_v43 = vsel %vm1609_vm7, %v1580_v7, %v10877_v19  ;;  %v1573_v14 = vsel %vm1572_vm6, %v1536_v5, %v7975_v4  ;;  %v1616_v49 = vsel %vm1609_vm7, %v1579_v48, %v7991_v38  ;;  %v16924_v38 = vld [vmem:[#allocation29_spill] sm:$0xff]  ;;  %v9075_v7 = vld [vmem:[#allocation2 + $0x190] sm:$0xf]  ;;  %7335 = vmatpush3.bf16.msra.mxu0 %v8978_v2 }
 0x27a   : > { %v11069_v56 = vpop.permute.xlu1 %1231  ;;  %v11079_v15 = vsel %vm1646_vm8, %v1617_v43, %v1295_v33  ;;  %v1610_v25 = vsel %vm1609_vm7, %v1573_v14, %v7990_v42  ;;  %v11095_v19 = vsel %vm1646_vm8, %v1616_v49, %v8006_v30  ;;  %v1618_v42 = vsel %vm1609_vm7, %v10664_v53, %v10875_v20  ;;  %v8979_v43 = vld [vmem:[%s16404_s1 + $0x48] sm:$0xff]   ;;  %v8981_v2 = vld [vmem:[%s16404_s1 + $0x50] sm:$0xff]  }
 0x27b   : > { %16921 = vst [vmem:[#allocation36_spill] sm:$0xff] %v11069_v56  ;;  %16922 = vst [vmem:[#allocation86_spill] sm:$0xff] %v11079_v15  ;;  %v11092_v33 = vsel %vm1646_vm8, %v1610_v25, %v8005_v10  ;;  %v16448_v16 = vrot.slane %v11079_v15, 4  ;;  %v2041_v10 = vrot.slane %v11095_v19, 4  ;;  %v1820_v20 = vrot.slane %v10990_v44, 2  ;;  %7336 = vmatprep.subr.bf16.mxu0 %v8979_v43 }
 0x27c   : > { %1330 = vrot.lane.b32.xlu0 %v9074_v29, %s9214_s15  ;;  %v1297_v4 = vpop.permute.xlu0 %1296  ;;  %v2035_v30 = vrot.slane %v11092_v33, 4  ;;  %v2167_v48 = vrot.slane %v11079_v15, 5  ;;  %v16451_v49 = vrot.slane %v10978_v17, 2  ;;  %v2156_v26 = vrot.slane %v11092_v33, 5 }
 0x27d   : > { %2353 = vrot.lane.b32.xlu1 %v2296_v54, %s9218_s19  ;;  %v11112_v5 = vsel %vm1646_vm8, %v1618_v42, %v1297_v4  ;;  %v2043_v53 = vsel %vm16465_vm10, %v2041_v10, %v16448_v16  ;;  %v16925_v54 = vrot.slane %v10966_v34, 4  ;;  %v8980_v4 = vld [vmem:[%s16404_s1 + $0x8] sm:$0xff]   ;;  %v2300_v16 = vrot.slane %v11079_v15, 6 }
 0x27e   : > { %v11097_v6 = vpop.permute.xlu1 %1235  ;;  %v2169_v29 = vrot.slane %v11112_v5, 5  ;;  %7337 = vmatpush3.bf16.msra.mxu0 %v8980_v4  ;;  %v1822_v43 = vsel %vm1816_vm13, %v1820_v20, %v16451_v49  ;;  %v1708_v4 = vrot.slane %v11092_v33, 1  ;;  %v1714_v20 = vrot.slane %v11095_v19, 1 }
 0x27f   : > { %16923 = vst [vmem:[#allocation64_spill] sm:$0xff] %v11097_v6  ;;  %v2037_v25 = vsel %vm16465_vm10, %v2035_v30, %v16925_v54  ;;  %7338 = vmatprep.subr.bf16.mxu0 %v8981_v2 }
 0x280   : > { %1334 = vrot.lane.b32.xlu0 %v16924_v38, %s9214_s15  ;;  %v2302_v38 = vrot.slane %v11112_v5, 6  ;;  %v8017_v42 = vpack.i.bf16 %v2043_v53, %v2037_v25  ;;  %v16454_v53 = vrot.slane %v11079_v15, 7  ;;  %v8982_v25 = vld [vmem:[%s16404_s1 + $0x10] sm:$0xff]   ;;  %v11180_v6 = vpop.permute.xlu0 %1233 }
 0x281   : > { %1332 = vrot.lane.b32.xlu1 %v9075_v7, %s9214_s15  ;;  %v2166_v7 = vrot.slane %v11095_v19, 5  ;;  %16927 = vst [vmem:[#allocation84_spill] sm:$0xff] %v11180_v6  ;;  %v8990_v6 = vld [vmem:[%s16404_s1 + $0x30] sm:$0xff]  }
 0x282   : > { %v11118_v14 = vpop.permute.xlu1 %1308  ;;  %v11170_v10 = vsel %vm2288_vm11, %v2300_v16, %v2302_v38  ;;  %7339 = vmatpush3.bf16.msra.mxu0 %v8982_v25  ;;  %v8985_v25 = vld [vmem:[%s16404_s1 + $0x60] sm:$0xff]  }
 0x283   : > { %v2168_v54 = vsel %vm2155_vm9, %v2166_v7, %v2167_v48  ;;  %v16926_v7 = vrot.slane %v10966_v34, 5 }
 0x284   : > { %1855 = vrot.lane.b32.xlu0 %v16450_v27, %s9219_s29 }
 0x285   : > { %1336 = vrot.lane.b32.xlu1 %v10502_v47, %s9214_s15  ;;  %v2435_v47 = vrot.slane %v11112_v5, 7  ;;  %v2158_v49 = vsel %vm2155_vm9, %v2156_v26, %v16926_v7  ;;  %v16929_v26 = vrot.slane %v11079_v15, 1  ;;  %v2427_v7 = vrot.slane %v10990_v44, 7 }
 0x286   : > { %v11158_v27 = vpop.permute.xlu1 %1312  ;;  %v8022_v2 = vpack.i.bf16 %v2168_v54, %v2158_v49 }
 0x287   : > { %v11175_v30 = vsel %vm2421_vm14, %v16454_v53, %v2435_v47  ;;  %v1716_v38 = vsel %vm1707_vm12, %v1714_v20, %v16929_v26  ;;  %v8984_v47 = vld [vmem:[%s16404_s1 + $0x18] sm:$0xff]   ;;  %v16452_v20 = vrot.slane %v10978_v17, 7  ;;  %v8986_v26 = vld [vmem:[%s16404_s1 + $0x20] sm:$0xff]  }
 0x288   : > { %8018 = vrot.lane.b32.xlu0 %v8017_v42, %s9215_s16  ;;  %v11164_v42 = vsel %vm2155_vm9, %v2167_v48, %v2169_v29  ;;  %v16928_v48 = vrot.slane %v10966_v34, 7 }
 0x289   : > { %1857 = vrot.lane.b32.xlu1 %v1822_v43, %s9219_s29  ;;  %v8983_v43 = vld [vmem:[%s16404_s1 + $0x58] sm:$0xff]  }
 0x28a   : > { %v2426_v29 = vsel %vm2421_vm14, %v16928_v48, %v2425_v58  ;;  %7340 = vmatprep.subr.bf16.mxu0 %v8983_v43  ;;  %v16930_v58 = vrot.slane %v10966_v34, 1  ;;  %v11201_v48 = vpop.permute.xlu1 %1314  ;;  %v2429_v43 = vsel %vm2421_vm14, %v2427_v7, %v16452_v20  ;;  %v2299_v7 = vrot.slane %v11095_v19, 6 }
 0x28b   : > { %7341 = vmatpush3.bf16.msra.mxu0 %v8984_v47  ;;  %v2289_v47 = vrot.slane %v11092_v33, 6 }
 0x28c   : > { %2484 = vrot.lane.b32.xlu0 %v2426_v29, %s9220_s22  ;;  %v1710_v49 = vsel %vm1707_vm12, %v1708_v4, %v16930_v58  ;;  %v1929_v29 = vrot.slane %v10990_v44, 3  ;;  %7342 = vmatprep.subr.bf16.mxu0 %v8985_v25  ;;  %v11208_v4 = vpop.permute.xlu0 %1306  ;;  %v8988_v25 = vld [vmem:[%s16404_s1 + $0x28] sm:$0xff]  }
 0x28d   : > { %8023 = vrot.lane.b32.xlu1 %v8022_v2, %s9216_s17  ;;  %v8027_v54 = vpack.i.bf16 %v1716_v38, %v1710_v49  ;;  %v16453_v2 = vrot.slane %v10978_v17, 3  ;;  %v8987_v38 = vld [vmem:[%s16404_s1 + $0x68] sm:$0xff]   ;;  %v1927_v49 = vrot.slane %v10966_v34, 3 }
 0x28e   : > { %v11230_v20 = vpop.permute.xlu1 %1237 }
 0x28f   : > { %v1931_v58 = vsel %vm16474_vm15, %v1929_v29, %v16453_v2  ;;  %7343 = vmatpush3.bf16.msra.mxu0 %v8986_v26  ;;  %16931 = vst [vmem:[#allocation44_spill] sm:$0xff] %v11230_v20  ;;  %v1817_v29 = vrot.slane %v11092_v33, 2  ;;  %v1823_v2 = vrot.slane %v11095_v19, 2  ;;  %v16932_v26 = vrot.slane %v10966_v34, 6  ;;  %v16936_v20 = vld [vmem:[#allocation46_spill] sm:$0xff] }
 0x290   : > { %8028 = vrot.lane.b32.xlu0 %v8027_v54, %s9217_s18  ;;  %7344 = vmatprep.subr.bf16.mxu0 %v8987_v38  ;;  %v8989_v54 = vld [vmem:[%s16404_s1 + $0x70] sm:$0xff]   ;;  %v16933_v38 = vrot.slane %v11079_v15, 2 }
 0x291   : > { %2486 = vrot.lane.b32.xlu1 %v2429_v43, %s9220_s22  ;;  %v2301_v43 = vsel %vm2288_vm11, %v2299_v7, %v2300_v16  ;;  %v2291_v53 = vsel %vm2288_vm11, %v2289_v47, %v16932_v26  ;;  %v9076_v47 = vld [vmem:[#allocation2 + $0x28] sm:$0xf]  ;;  %v16934_v26 = vld [vmem:[#allocation18_spill] sm:$0xff] }
 0x292   : > { %v8032_v16 = vpack.i.bf16 %v2301_v43, %v2291_v53  ;;  %v1825_v7 = vsel %vm1816_vm13, %v1823_v2, %v16933_v38  ;;  %v1393_v53 = vsel %vm16464_vm1, %v9076_v47, %v16934_v26  ;;  %v16935_v2 = vrot.slane %v10966_v34, 2 }
 0x293   : > { %7345 = vmatpush3.bf16.msra.mxu0 %v8988_v25  ;;  %v1926_v25 = vrot.slane %v11092_v33, 3  ;;  %v1932_v38 = vrot.slane %v11095_v19, 3  ;;  %v1430_v56 = vsel %vm1424_vm2, %v1393_v53, %v16936_v20  ;;  %v16938_v26 = vrot.slane %v11079_v15, 3  ;;  %v16941_v53 = vld [vmem:[#allocation51_spill] sm:$0xff] }
 0x294   : > { %1966 = vrot.lane.b32.xlu0 %v1931_v58, %s9221_s12  ;;  %v11241_v58 = vpop.permute.xlu0 %1310  ;;  %7346 = vmatprep.subr.bf16.mxu0 %v8989_v54  ;;  %v1819_v43 = vsel %vm1816_vm13, %v1817_v29, %v16935_v2  ;;  %v2432_v54 = vrot.slane %v11095_v19, 7  ;;  %v1467_v47 = vsel %vm1461_vm3, %v1430_v56, %v16937_v57  ;;  %v16939_v2 = vld [vmem:[#allocation92_spill] sm:$0xff]  ;;  %v16940_v20 = vrot.slane %v11079_v15, 7 }
 0x295   : > { %1964 = vrot.lane.b32.xlu1 %v1927_v49, %s9221_s12  ;;  %v8037_v52 = vpack.i.bf16 %v1825_v7, %v1819_v43  ;;  %v1934_v29 = vsel %vm16474_vm15, %v1932_v38, %v16938_v26  ;;  %v1504_v11 = vsel %vm1498_vm4, %v1467_v47, %v16939_v2  ;;  %v1928_v56 = vsel %vm16474_vm15, %v1926_v25, %v1927_v49  ;;  %v8991_v49 = vld [vmem:[%s16404_s1 + $0x78] ss:$0 sps:$4 sm:$0x33]  }
 0x296   : > { %v2434_v7 = vsel %vm2421_vm14, %v2432_v54, %v16940_v20  ;;  %v1541_v43 = vsel %vm1535_vm5, %v1504_v11, %v16941_v53  ;;  %v8047_v47 = vpack.i.bf16 %v1934_v29, %v1928_v56  ;;  %v9223_v29 = vmov 65535  }
 0x297   : > { %7347 = vmatpush3.bf16.msra.mxu0 %v8990_v6  ;;  %v16942_v6 = vld [vmem:[#allocation78_spill] sm:$0xff]  ;;  %v3159_v20 = vsel %vm2421_vm14, 4294967295, %v9223_v29  ;;  %v16948_v29 = vrot.slane %v10978_v17, 2  ;;  %vm2626_vm2 = vcmask 220160   ;;  %vm2751_vm3 = vcmask 277504  }
 0x298   : > { %2556 = vrot.lane.b32.xlu0 %v10972_v23, %s9222_s23  ;;  %v2422_v23 = vrot.slane %v11092_v33, 7  ;;  %v11279_v57 = vpop.permute.xlu0 %8008  ;;  %v1578_v38 = vsel %vm1572_vm6, %v1541_v43, %v16942_v6  ;;  %v3160_v53 = vsel %vm2288_vm11, %v3159_v20, 0  ;;  %v8992_v43 = vld [vmem:[%s16404_s1 + $0x38] sm:$0xff]   ;;  %v16944_v6 = vrot.slane %v10978_v17, 1 }
 0x299   : > { %8033 = vrot.lane.b32.xlu1 %v8032_v16, %s9218_s19  ;;  %v11266_v16 = vpop.permute.xlu1 %1326  ;;  %v1615_v54 = vsel %vm1609_vm7, %v1578_v38, %v10873_v28  ;;  %v1630_v28 = vsel %vm1609_vm7, %v10742_v35, %v10901_v63  ;;  %v3162_v38 = vand.u32 %v8991_v49, %v3160_v53  ;;  %v1629_v35 = vsel %vm1609_vm7, %v10750_v18, %v10895_v9 }
 0x29a   : > { %v1652_v11 = vsel %vm1646_vm8, %v1615_v54, %v10992_v51  ;;  %v8052_v51 = vpack.i.bf16 %v11079_v15, %v10966_v34  ;;  %v16947_v9 = vrot.slane %v10978_v17, 6  ;;  %vm2651_vm4 = vcmask 441344  }
 0x29b   : > { %7348 = vmatprep.subr.bf16.mxu0 %v3162_v38  ;;  %v2430_v20 = vrot.slane %v1652_v11, 7  ;;  %vm2776_vm5 = vcmask 498688   ;;  %vm2676_vm6 = vcmask 662528   ;;  %vm16476_vm1 = vcmask 883712  }
 0x29c   : > { %8038 = vrot.lane.b32.xlu0 %v8037_v52, %s9219_s29  ;;  %v16943_v52 = vrot.slane %v10966_v34, 7  ;;  %7349 = vmatpush3.bf16.msra.mxu0 %v8992_v43 }
 0x29d   : > { %2558 = vrot.lane.b32.xlu1 %v10978_v17, %s9222_s23  ;;  %v1321_v25 = vpop.permute.xlu1 %1320 }
 0x29e   : > { %v2424_v26 = vsel %vm2421_vm14, %v2422_v23, %v16943_v52  ;;  %v2164_v23 = vrot.slane %v1652_v11, 5  ;;  %v11309_v56 = vsel %vm1646_vm8, %v1630_v28, %v1321_v25  ;;  %v16949_v28 = vrot.slane %v10978_v17, 3 }
 0x29f   : > { %v8042_v2 = vpack.i.bf16 %v2434_v7, %v2424_v26  ;;  %v1319_v7 = vpop.permute.xlu0 %1318  ;;  %v2189_v52 = vrot.slane %v11309_v56, 5  ;;  %v16945_v26 = vrot.slane %v10978_v17, 5 }
 0x2a0   : > { %8048 = vrot.lane.b32.xlu0 %v8047_v47, %s9221_s12  ;;  %v11319_v63 = vsel %vm1646_vm8, %v1629_v35, %v1319_v7  ;;  %v2297_v47 = vrot.slane %v1652_v11, 6  ;;  %v1620_v7 = vsel %vm1609_vm7, %v10678_v39, %v10879_v62  ;;  %v1619_v62 = vsel %vm1609_vm7, %v10656_v21, %v10881_v41 }
 0x2a1   : > { %8043 = vrot.lane.b32.xlu1 %v8042_v2, %s9220_s22  ;;  %v2165_v54 = vsel %vm2155_vm9, %v16945_v26, %v2164_v23  ;;  %v16946_v2 = vrot.slane %v10978_v17, 4  ;;  %v2187_v18 = vrot.slane %v11319_v63, 5  ;;  %v9077_v23 = vld [vmem:[#allocation2 + $0x1a8] sm:$0xf]  ;;  %v11354_v53 = vsel %vm1646_vm8, %v1620_v7, %v11014_v60 }
 0x2a2   : > { %v2298_v49 = vsel %vm2288_vm11, %v16947_v9, %v2297_v47  ;;  %v1718_v39 = vrot.slane %v11354_v53, 1  ;;  %v2172_v60 = vrot.slane %v11354_v53, 5  ;;  %v1827_v21 = vrot.slane %v11354_v53, 2 }
 0x2a3   : > { %v11336_v25 = vsel %vm2155_vm9, %v2187_v18, %v2189_v52 }
 0x2a4   : > { %1750 = vrot.lane.b32.xlu0 %v16944_v6, %s9217_s18  ;;  %v16950_v6 = vrot.slane %v10978_v17, 7 }
 0x2a5   : > { %8053 = vrot.lane.b32.xlu1 %v8052_v51, %s9222_s23  ;;  %v1621_v51 = vsel %vm1609_vm7, %v10671_v3, %v10885_v37  ;;  %v11373_v37 = vsel %vm1646_vm8, %v1619_v62, %v11040_v13  ;;  %v2438_v62 = vrot.slane %v11354_v53, 7 }
 0x2a6   : > { %v11358_v43 = vsel %vm1646_vm8, %v1621_v51, %v11062_v1  ;;  %v2431_v38 = vsel %vm2421_vm14, %v16950_v6, %v2430_v20  ;;  %v1717_v35 = vrot.slane %v11373_v37, 1  ;;  %v2171_v41 = vrot.slane %v11373_v37, 5 }
 0x2a7   : > { %v2174_v3 = vrot.slane %v11358_v43, 5  ;;  %v2044_v13 = vrot.slane %v11373_v37, 4  ;;  %v2307_v52 = vrot.slane %v11358_v43, 6  ;;  %v1826_v9 = vrot.slane %v11373_v37, 2 }
 0x2a8   : > { %2222 = vrot.lane.b32.xlu0 %v2165_v54, %s9216_s17  ;;  %v2173_v47 = vsel %vm2155_vm9, %v2171_v41, %v2172_v60  ;;  %v465_v54 = vld [vmem:[#allocation2 + $0x1d0] sm:$0xff]  ;;  %v2304_v7 = vrot.slane %v11373_v37, 6  ;;  %v16951_v51 = vrot.slane %v11079_v15, 4 }
 0x2a9   : > { %2077 = vrot.lane.b32.xlu1 %v16946_v2, %s9215_s16  ;;  %v2175_v1 = vsel %vm2155_vm9, %v2172_v60, %v2174_v3  ;;  %v2305_v2 = vrot.slane %v11354_v53, 6  ;;  %v1828_v20 = vsel %vm1816_vm13, %v1826_v9, %v1827_v21  ;;  %v464_v3 = vld [vmem:[#allocation2 + $0x1c8] sm:$0xff]  ;;  %v1935_v60 = vrot.slane %v11373_v37, 3 }
 0x2ab   : > { %v2306_v6 = vsel %vm2288_vm11, %v2304_v7, %v2305_v2 }
 0x2ac   : > { %2355 = vrot.lane.b32.xlu0 %v2298_v49, %s9218_s19  ;;  %v2308_v49 = vsel %vm2288_vm11, %v2305_v2, %v2307_v52  ;;  %v1623_v2 = vsel %vm1609_vm7, %v10688_v22, %v10889_v46  ;;  %v1624_v22 = vsel %vm1609_vm7, %v10716_v24, %v10887_v50 }
 0x2ad   : > { %1859 = vrot.lane.b32.xlu1 %v16948_v29, %s9219_s29  ;;  %v466_v29 = vld [vmem:[#allocation2 + $0x1d8] sm:$0xf] }
 0x2b0   : > { %1968 = vrot.lane.b32.xlu0 %v16949_v28, %s9221_s12  ;;  %v11402_v28 = vpop.permute.xlu0 %1324 }
 0x2b1   : > { %1338 = vrot.lane.b32.xlu1 %v9077_v23, %s9214_s15  ;;  %v1936_v23 = vrot.slane %v11354_v53, 3 }
 0x2b4   : > { %2560 = vrot.lane.b32.xlu0 %v1652_v11, %s9222_s23  ;;  %v2045_v11 = vrot.slane %v11354_v53, 4 }
 0x2b5   : > { %2488 = vrot.lane.b32.xlu1 %v2431_v38, %s9220_s22  ;;  %v2440_v38 = vrot.slane %v11358_v43, 7 }
 0x2b6   : > { %v2046_v26 = vsel %vm16465_vm10, %v2044_v13, %v2045_v11 }
 0x2b8   : > { %1758 = vrot.lane.b32.xlu0 %v1718_v39, %s9217_s18 }
 0x2b9   : > { %1342 = vrot.lane.b32.xlu1 %v10789_v31, %s9214_s15  ;;  %v1719_v31 = vsel %vm1707_vm12, %v1717_v35, %v1718_v39  ;;  %v11412_v39 = vpop.permute.xlu0 %1322  ;;  %v1937_v35 = vsel %vm16474_vm15, %v1935_v60, %v1936_v23 }
 0x2bc   : > { %2230 = vrot.lane.b32.xlu0 %v2175_v1, %s9216_s17  ;;  %v2441_v1 = vsel %vm2421_vm14, %v2438_v62, %v2440_v38  ;;  %v8011_v38 = vunpack.i.h.bf16 %v11279_v57 }
 0x2bd   : > { %2085 = vrot.lane.b32.xlu1 %v2045_v11, %s9215_s16  ;;  %v11422_v11 = vpop.permute.xlu0 %1239 }
 0x2be   : > { %16952 = vst [vmem:[#allocation69_spill] sm:$0xff] %v11422_v11 }
 0x2c0   : > { %1867 = vrot.lane.b32.xlu0 %v1827_v21, %s9219_s29  ;;  %v2437_v21 = vrot.slane %v11373_v37, 7 }
 0x2c1   : > { %1756 = vrot.lane.b32.xlu1 %v1719_v31, %s9217_s18  ;;  %v11432_v31 = vpop.permute.xlu1 %8013 }
 0x2c2   : > { %16954 = vst [vmem:[#allocation72_spill] sm:$0xff] %v11432_v31  ;;  %v2439_v13 = vsel %vm2421_vm14, %v2437_v21, %v2438_v62 }
 0x2c4   : > { %2228 = vrot.lane.b32.xlu0 %v2173_v47, %s9216_s17 }
 0x2c5   : > { %2083 = vrot.lane.b32.xlu1 %v2046_v26, %s9215_s16 }
 0x2c8   : > { %1348 = vrot.lane.b32.xlu0 %v465_v54, %s9214_s15 }
 0x2c9   : > { %2363 = vrot.lane.b32.xlu1 %v2308_v49, %s9218_s19  ;;  %v16956_v49 = vrot.slane %v11079_v15, 3 }
 0x2cc   : > { %1865 = vrot.lane.b32.xlu0 %v1828_v20, %s9219_s29 }
 0x2cd   : > { %1350 = vrot.lane.b32.xlu1 %v466_v29, %s9214_s15 }
 0x2d0   : > { %2081 = vrot.lane.b32.xlu0 %v16951_v51, %s9215_s16 }
 0x2d1   : > { %1976 = vrot.lane.b32.xlu1 %v1936_v23, %s9221_s12 }
 0x2d4   : > { %2361 = vrot.lane.b32.xlu0 %v2306_v6, %s9218_s19  ;;  %v7995_v6 = vunpack.i.l.bf16 %v10883_v12 }
 0x2d5   : > { %2226 = vrot.lane.b32.xlu1 %v11164_v42, %s9216_s17  ;;  %v16953_v42 = vrot.slane %v11079_v15, 1 }
 0x2d8   : > { %1346 = vrot.lane.b32.xlu0 %v464_v3, %s9214_s15  ;;  %v8010_v3 = vunpack.i.l.bf16 %v11279_v57  ;;  %v1622_v57 = vsel %vm1609_vm7, %v10702_v61, %v7995_v6 }
 0x2d9   : > { %2496 = vrot.lane.b32.xlu1 %v2441_v1, %s9220_s22 }
 0x2dc   : > { %1974 = vrot.lane.b32.xlu0 %v1937_v35, %s9221_s12 }
 0x2dd   : > { %1754 = vrot.lane.b32.xlu1 %v16953_v42, %s9217_s18 }
 0x2de   : > { %v11430_v41 = vpop.permute.xlu0 %2073 }
 0x2e0   : > { %2494 = vrot.lane.b32.xlu0 %v2439_v13, %s9220_s22 }
 0x2e1   : > { %2359 = vrot.lane.b32.xlu1 %v11170_v10, %s9218_s19  ;;  %v16955_v10 = vrot.slane %v11079_v15, 2 }
 0x2e2   : > { %v11438_v47 = vpop.permute.xlu0 %2218 }
 0x2e3   : > { %v11440_v52 = vpop.permute.xlu1 %2075 }
 0x2e4   : > { %1344 = vrot.lane.b32.xlu0 %v10846_v40, %s9214_s15  ;;  %v11462_v40 = vsel %vm1646_vm8, %v1623_v2, %v11208_v4  ;;  %v1626_v4 = vsel %vm1609_vm7, %v10734_v45, %v10891_v55  ;;  %v11540_v2 = vsel %vm1646_vm8, %v1622_v57, %v8010_v3 }
 0x2e5   : > { %2568 = vrot.lane.b32.xlu1 %v11358_v43, %s9222_s23  ;;  %v2048_v29 = vrot.slane %v11462_v40, 4  ;;  %v11493_v24 = vsel %vm1646_vm8, %v1626_v4, %v11158_v27  ;;  %v1721_v60 = vrot.slane %v11462_v40, 1  ;;  %v16466_v21 = vrot.slane %v11462_v40, 6 }
 0x2e6   : > { %v11446_v26 = vpop.permute.xlu0 %1746  ;;  %v16456_v20 = vrot.slane %v11493_v24, 4  ;;  %v16459_v1 = vrot.slane %v11493_v24, 5  ;;  %v16457_v6 = vrot.slane %v11493_v24, 6 }
 0x2e7   : > { %v11448_v54 = vpop.permute.xlu1 %2220 }
 0x2e8   : > { %2492 = vrot.lane.b32.xlu0 %v11175_v30, %s9220_s22  ;;  %v1625_v30 = vsel %vm1609_vm7, %v10708_v36, %v10893_v59  ;;  %v11486_v36 = vsel %vm1646_vm8, %v1624_v22, %v11118_v14  ;;  %v16460_v22 = vrot.slane %v11493_v24, 1 }
 0x2e9   : > { %1863 = vrot.lane.b32.xlu1 %v16955_v10, %s9219_s29  ;;  %v11477_v46 = vsel %vm1646_vm8, %v1625_v30, %v11241_v58  ;;  %v2177_v58 = vrot.slane %v11462_v40, 5  ;;  %v2179_v55 = vrot.slane %v11486_v36, 5  ;;  %v2312_v10 = vrot.slane %v11486_v36, 6 }
 0x2ea   : > { %v11458_v9 = vpop.permute.xlu0 %2351  ;;  %16957 = vst [vmem:[#allocation74_spill] sm:$0xff] %v11477_v46  ;;  %v2050_v45 = vrot.slane %v11477_v46, 4  ;;  %v2181_v51 = vrot.slane %v11477_v46, 5  ;;  %v1723_v42 = vrot.slane %v11477_v46, 1 }
 0x2eb   : > { %v11464_v43 = vpop.permute.xlu1 %1748  ;;  %v2180_v27 = vsel %vm2155_vm9, %v2177_v58, %v2179_v55  ;;  %v2313_v61 = vsel %vm2288_vm11, %v16466_v21, %v2312_v10  ;;  %v2314_v55 = vrot.slane %v11477_v46, 6 }
 0x2ec   : > { %1972 = vrot.lane.b32.xlu0 %v16956_v49, %s9221_s12  ;;  %v2052_v7 = vsel %vm16465_vm10, %v2050_v45, %v16456_v20  ;;  %v1725_v45 = vsel %vm1707_vm12, %v1723_v42, %v16460_v22  ;;  %v1832_v42 = vrot.slane %v11477_v46, 2  ;;  %v16467_v22 = vrot.slane %v11319_v63, 6 }
 0x2ed   : > { %2566 = vrot.lane.b32.xlu1 %v11354_v53, %s9222_s23 }
 0x2ee   : > { %v11488_v59 = vpop.permute.xlu0 %1330 }
 0x2ef   : > { %v11495_v50 = vpop.permute.xlu1 %2353 }
 0x2f0   : > { %2089 = vrot.lane.b32.xlu0 %v2048_v29, %s9215_s16 }
 0x2f1   : > { %2564 = vrot.lane.b32.xlu1 %v11112_v5, %s9222_s23  ;;  %v7996_v5 = vunpack.i.h.bf16 %v10883_v12  ;;  %v2183_v12 = vsel %vm2155_vm9, %v2181_v51, %v16459_v1  ;;  %v2447_v1 = vrot.slane %v11477_v46, 7 }
 0x2f2   : > { %v11503_v14 = vpop.permute.xlu0 %1334 }
 0x2f3   : > { %v11506_v23 = vpop.permute.xlu1 %1332  ;;  %v1628_v13 = vsel %vm1609_vm7, %v10705_v32, %v7996_v5  ;;  %v16455_v32 = vrot.slane %v11319_v63, 4  ;;  %v16463_v5 = vrot.slane %v11462_v40, 2 }
 0x2f4   : > { %2234 = vrot.lane.b32.xlu0 %v2180_v27, %s9216_s17  ;;  %v11543_v30 = vsel %vm1646_vm8, %v1628_v13, %v8011_v38  ;;  %v2047_v27 = vrot.slane %v11540_v2, 4  ;;  %v16458_v13 = vrot.slane %v11493_v24, 2 }
 0x2f5   : > { %2091 = vrot.lane.b32.xlu1 %v2052_v7, %s9215_s16  ;;  %v2053_v7 = vrot.slane %v11543_v30, 4  ;;  %v1944_v15 = vrot.slane %v11543_v30, 3 }
 0x2f6   : > { %v11521_v62 = vpop.permute.xlu0 %1855  ;;  %v2049_v57 = vsel %vm16465_vm10, %v2047_v27, %v2048_v29  ;;  %v1834_v29 = vsel %vm1816_vm13, %v1832_v42, %v16458_v13 }
 0x2f7   : > { %v11525_v35 = vpop.permute.xlu1 %1336  ;;  %v2055_v3 = vsel %vm16465_vm10, %v2053_v7, %v16455_v32  ;;  %v2186_v7 = vrot.slane %v11543_v30, 5  ;;  %v16461_v32 = vrot.slane %v11319_v63, 1  ;;  %vm2801_vm10 = vcmask 719872  }
 0x2f8   : > { %1762 = vrot.lane.b32.xlu0 %v1721_v60, %s9217_s18 }
 0x2f9   : > { %2236 = vrot.lane.b32.xlu1 %v2183_v12, %s9216_s17  ;;  %v2316_v12 = vsel %vm2288_vm11, %v2314_v55, %v16457_v6  ;;  %v16462_v55 = vrot.slane %v11462_v40, 7  ;;  %v2188_v27 = vsel %vm2155_vm9, %v2186_v7, %v2187_v18 }
 0x2fa   : > { %v11545_v49 = vpop.permute.xlu0 %8018 }
 0x2fb   : > { %v11548_v4 = vpop.permute.xlu1 %1857 }
 0x2fc   : > { %2367 = vrot.lane.b32.xlu0 %v2313_v61, %s9218_s19  ;;  %v8057_v61 = vpack.i.bf16 %v2055_v3, %v2049_v57  ;;  %v1720_v3 = vrot.slane %v11540_v2, 1  ;;  %v2445_v57 = vrot.slane %v11486_v36, 7 }
 0x2fd   : > { %1764 = vrot.lane.b32.xlu1 %v1725_v45, %s9217_s18  ;;  %v2176_v45 = vrot.slane %v11540_v2, 5 }
 0x2fe   : > { %v11562_v51 = vpop.permute.xlu0 %2484  ;;  %v2446_v18 = vsel %vm2421_vm14, %v16462_v55, %v2445_v57  ;;  %v2319_v57 = vrot.slane %v11543_v30, 6 }
 0x2ff   : > { %v11566_v38 = vpop.permute.xlu1 %8023 }
 0x300   : > { %1871 = vrot.lane.b32.xlu0 %v16463_v5, %s9219_s29  ;;  %v16473_v5 = vrot.slane %v11493_v24, 3 }
 0x301   : > { %2369 = vrot.lane.b32.xlu1 %v2316_v12, %s9218_s19  ;;  %v1726_v12 = vrot.slane %v11543_v30, 1 }
 0x302   : > { %v11581_v10 = vpop.permute.xlu0 %8028 }
 0x303   : > { %v11586_v20 = vpop.permute.xlu1 %2486  ;;  %v1728_v42 = vsel %vm1707_vm12, %v1726_v12, %v16461_v32  ;;  %v16469_v12 = vrot.slane %v11493_v24, 7  ;;  %v8030_v31 = vunpack.i.l.bf16 %v11581_v10 }
 0x304   : > { %8058 = vrot.lane.b32.xlu0 %v8057_v61, %s9215_s16  ;;  %v2178_v61 = vsel %vm2155_vm9, %v2176_v45, %v2177_v58  ;;  %v16468_v58 = vrot.slane %v11319_v63, 2 }
 0x305   : > { %1873 = vrot.lane.b32.xlu1 %v1834_v29, %s9219_s29  ;;  %v8062_v7 = vpack.i.bf16 %v2188_v27, %v2178_v61  ;;  %v1722_v29 = vsel %vm1707_vm12, %v1720_v3, %v1721_v60  ;;  %v2309_v27 = vrot.slane %v11540_v2, 6  ;;  %v1829_v60 = vrot.slane %v11540_v2, 2 }
 0x306   : > { %v11600_v6 = vpop.permute.xlu0 %1966  ;;  %v8067_v45 = vpack.i.bf16 %v1728_v42, %v1722_v29  ;;  %v1835_v3 = vrot.slane %v11543_v30, 2  ;;  %v1938_v42 = vrot.slane %v11540_v2, 3  ;;  %v2321_v29 = vsel %vm2288_vm11, %v2319_v57, %v16467_v22 }
 0x307   : > { %v11608_v13 = vpop.permute.xlu1 %1964  ;;  %v16959_v22 = vrot.slane %v11462_v40, 2 }
 0x308   : > { %2500 = vrot.lane.b32.xlu0 %v2446_v18, %s9220_s22  ;;  %v1941_v18 = vrot.slane %v11477_v46, 3  ;;  %v1837_v55 = vsel %vm1816_vm13, %v1835_v3, %v16468_v58 }
 0x309   : > { %8063 = vrot.lane.b32.xlu1 %v8062_v7, %s9216_s17  ;;  %v2449_v7 = vsel %vm2421_vm14, %v2447_v1, %v16469_v12  ;;  %v16958_v1 = vrot.slane %v11462_v40, 6  ;;  %v1831_v3 = vsel %vm1816_vm13, %v1829_v60, %v16959_v22  ;;  %v2729_v22 = vsel %vm2726_vm0, %v11440_v52, %v11448_v54 }
 0x30a   : > { %v11620_v32 = vpop.permute.xlu0 %2556  ;;  %v8077_v11 = vpack.i.bf16 %v1837_v55, %v1831_v3  ;;  %v2452_v55 = vrot.slane %v11543_v30, 7  ;;  %v2629_v54 = vsel %vm2626_vm2, %v10990_v44, %v11464_v43  ;;  %v2627_v44 = vsel %vm2626_vm2, %v11092_v33, %v8030_v31 }
 0x30b   : > { %v11626_v61 = vpop.permute.xlu1 %8033  ;;  %v2311_v57 = vsel %vm2288_vm11, %v2309_v27, %v16958_v1  ;;  %v1945_v27 = vrot.slane %v11319_v63, 3  ;;  %v2442_v1 = vrot.slane %v11540_v2, 7 }
 0x30c   : > { %8068 = vrot.lane.b32.xlu0 %v8067_v45, %s9217_s18  ;;  %v1939_v45 = vrot.slane %v11462_v40, 3  ;;  %v8072_v12 = vpack.i.bf16 %v2321_v29, %v2311_v57  ;;  %v2628_v29 = vsel %vm2626_vm2, %v10966_v34, %v11446_v26  ;;  %v2754_v57 = vsel %vm2751_vm3, %v2729_v22, %v11495_v50 }
 0x30d   : > { %2502 = vrot.lane.b32.xlu1 %v2449_v7, %s9220_s22  ;;  %v1943_v7 = vsel %vm16474_vm15, %v1941_v18, %v16473_v5  ;;  %v2453_v18 = vrot.slane %v11319_v63, 7  ;;  %v2653_v3 = vsel %vm2651_vm4, %v2628_v29, %v11521_v62  ;;  %v8035_v50 = vunpack.i.l.bf16 %v11626_v61 }
 0x30e   : > { %v11643_v21 = vpop.permute.xlu0 %8038  ;;  %v1940_v46 = vsel %vm16474_vm15, %v1938_v42, %v1939_v45  ;;  %v2728_v42 = vsel %vm2726_vm0, %v11430_v41, %v11438_v47  ;;  %v8025_v47 = vunpack.i.l.bf16 %v11566_v38  ;;  %v2678_v43 = vsel %vm2676_vm6, %v2653_v3, %v11608_v13 }
 0x30f   : > { %v2559_v58 = vpop.permute.xlu1 %2558  ;;  %v8040_v60 = vunpack.i.l.bf16 %v11643_v21  ;;  %v8020_v62 = vunpack.i.l.bf16 %v11545_v49  ;;  %v2753_v31 = vsel %vm2751_vm3, %v2728_v42, %v11458_v9  ;;  %v2703_v9 = vsel %vm16476_vm1, %v2678_v43, %v11430_v41 }
 0x310   : > { %1982 = vrot.lane.b32.xlu0 %v1943_v7, %s9221_s12  ;;  %v2654_v7 = vsel %vm2651_vm4, %v2629_v54, %v11548_v4  ;;  %v2779_v4 = vsel %vm2776_vm5, %v2754_v57, %v11586_v20  ;;  %v2778_v20 = vsel %vm2776_vm5, %v2753_v31, %v11562_v51  ;;  %v2454_v51 = vsel %vm2421_vm14, %v2452_v55, %v2453_v18 }
 0x311   : > { %1980 = vrot.lane.b32.xlu1 %v1939_v45, %s9221_s12  ;;  %v2679_v26 = vsel %vm2676_vm6, %v2654_v7, %v11600_v6  ;;  %v2652_v22 = vsel %vm2651_vm4, %v2627_v44, %v8040_v60  ;;  %v11706_v6 = vsel %vm2801_vm10, %v2779_v4, %v2559_v58  ;;  %v2727_v60 = vsel %vm2726_vm0, %v8020_v62, %v8025_v47 }
 0x312   : > { %v11678_v45 = vpop.permute.xlu0 %8048  ;;  %v2803_v42 = vsel %vm2801_vm10, %v2778_v20, %v11620_v32  ;;  %v16960_v3 = vrot.slane %v11462_v40, 7  ;;  %v1627_v47 = vsel %vm1609_vm7, %v10726_v0, %v10897_v8  ;;  %v8092_v0 = vpack.i.bf16 %v11319_v63, %v11462_v40 }
 0x313   : > { %v8050_v5 = vunpack.i.l.bf16 %v11678_v45  ;;  %v11686_v34 = vpop.permute.xlu1 %8043  ;;  %v16961_v8 = vrot.slane %v11493_v24, 1 }
 0x314   : > { %2572 = vrot.lane.b32.xlu0 %v11486_v36, %s9222_s23  ;;  %v8045_v33 = vunpack.i.l.bf16 %v11686_v34  ;;  %v1946_v36 = vsel %vm16474_vm15, %v1944_v15, %v1945_v27  ;;  %vm16475_vm15 = vcmask 941056   ;;  %v2444_v55 = vsel %vm2421_vm14, %v2442_v1, %v16960_v3 }
 0x315   : > { %8073 = vrot.lane.b32.xlu1 %v8072_v12, %s9218_s19  ;;  %v2677_v29 = vsel %vm2676_vm6, %v2652_v22, %v8050_v5  ;;  %v11717_v12 = vsel %vm16476_vm1, %v2679_v26, %v11440_v52  ;;  %v2752_v5 = vsel %vm2751_vm3, %v2727_v60, %v8035_v50  ;;  %v7201_v52 = vcombine.low %v2803_v42, %v11706_v6  ;;  %v16963_v60 = vld [vmem:[#allocation81_spill] sm:$0xff] }
 0x316   : > { %v1751_v13 = vpop.permute.xlu0 %1750  ;;  %v2777_v41 = vsel %vm2776_vm5, %v2752_v5, %v8045_v33  ;;  %v2702_v32 = vsel %vm16476_vm1, %v2677_v29, %v8020_v62  ;;  %v7200_v54 = vcombine.low %v2703_v9, %v11717_v12  ;;  %v8082_v26 = vpack.i.bf16 %v2454_v51, %v2444_v55  ;;  %v16964_v9 = vld [vmem:[#allocation9_spill] sm:$0xff] }
 0x317   : > { %v11721_v58 = vpop.permute.xlu1 %8053  ;;  %v11746_v50 = vsel %vm1646_vm8, %v1627_v47, %v11201_v48  ;;  %v2630_v33 = vsel %vm2626_vm2, %v10978_v17, %v1751_v13  ;;  %v1632_v42 = vsel %vm1609_vm7, %v16964_v9, %v16963_v60  ;;  %v16965_v17 = vrot.slane %v11493_v24, 4 }
 0x318   : > { %v8055_v15 = vunpack.i.l.bf16 %v11721_v58  ;;  %8078 = vrot.lane.b32.xlu0 %v8077_v11, %s9219_s29  ;;  %v8087_v11 = vpack.i.bf16 %v1946_v36, %v1940_v46  ;;  %v2982_v46 = vpack.c.bf16 %v7200_v54, %v2702_v32  ;;  %v2184_v62 = vrot.slane %v11746_v50, 5 }
 0x319   : > { %2574 = vrot.lane.b32.xlu1 %v11493_v24, %s9222_s23  ;;  %v2317_v22 = vrot.slane %v11746_v50, 6  ;;  %v16962_v36 = vrot.slane %v11493_v24, 5  ;;  %v2450_v13 = vrot.slane %v11746_v50, 7  ;;  %v8026_v5 = vunpack.i.h.bf16 %v11566_v38 }
 0x31a   : > { %v2223_v57 = vpop.permute.xlu0 %2222  ;;  %v2802_v7 = vsel %vm2801_vm10, %v2777_v41, %v8055_v15  ;;  %v8031_v15 = vunpack.i.h.bf16 %v11581_v10  ;;  %v8041_v41 = vunpack.i.h.bf16 %v11643_v21  ;;  %v8036_v54 = vunpack.i.h.bf16 %v11626_v61 }
 0x31b   : > { %v2078_v44 = vpop.permute.xlu1 %2077  ;;  %v2983_v43 = vpack.c.bf16 %v7201_v52, %v2802_v7  ;;  %v2185_v29 = vsel %vm2155_vm9, %v16962_v36, %v2184_v62  ;;  %v16966_v55 = vrot.slane %v11493_v24, 6  ;;  %v8021_v47 = vunpack.i.h.bf16 %v11545_v49 }
 0x31c   : > { %8088 = vrot.lane.b32.xlu0 %v8087_v11, %s9221_s12  ;;  %v2730_v52 = vsel %vm2726_vm0, %v2078_v44, %v2223_v57  ;;  %v8051_v11 = vunpack.i.h.bf16 %v11678_v45  ;;  %v8046_v38 = vunpack.i.h.bf16 %v11686_v34  ;;  %v2631_v61 = vsel %vm2626_vm2, %v11095_v19, %v8031_v15 }
 0x31d   : > { %8083 = vrot.lane.b32.xlu1 %v8082_v26, %s9220_s22  ;;  %7241 = vmatprep.mubr.msk.bf16.mxu0 %vm16475_vm15, %v2983_v43  ;;  %v2318_v7 = vsel %vm2288_vm11, %v16966_v55, %v2317_v22  ;;  %v2878_v45 = vcombine.high %v11717_v12, %v11706_v6  ;;  %v8056_v26 = vunpack.i.h.bf16 %v11721_v58  ;;  %v16967_v49 = vrot.slane %v11493_v24, 2  ;;  %v16969_v22 = vld [vmem:[#allocation37_spill] sm:$0xff] }
 0x31e   : > { %v2356_v1 = vpop.permute.xlu0 %2355  ;;  %3197 = vmatmul.mubr.bf16.vlgmr.msra.gmra.mrb[0].mxu0 %v2982_v46  ;;  %v11802_v34 = vsel %vm1646_vm8, %v1632_v42, %v11402_v28  ;;  %v2656_v46 = vsel %vm2651_vm4, %v2631_v61, %v8041_v41  ;;  %v16973_v41 = vld [vmem:[#allocation55_spill] sm:$0xff] }
 0x31f   : > { %v1860_v4 = vpop.permute.xlu1 %1859  ;;  %v2755_v10 = vsel %vm2751_vm3, %v2730_v52, %v2356_v1 }
 0x320   : > { %1766 = vrot.lane.b32.xlu0 %v16961_v8, %s9217_s18  ;;  %v2655_v20 = vsel %vm2651_vm4, %v2630_v33, %v1860_v4  ;;  %v16968_v4 = vrot.slane %v11493_v24, 7  ;;  %v2681_v8 = vsel %vm2676_vm6, %v2656_v46, %v8051_v11  ;;  %v16970_v33 = vld [vmem:[#allocation33_spill] sm:$0xff] }
 0x321   : > { %8093 = vrot.lane.b32.xlu1 %v8092_v0, %s9222_s23  ;;  %v1633_v36 = vsel %vm1609_vm7, %v16970_v33, %v16969_v22  ;;  %v2706_v15 = vsel %vm16476_vm1, %v2681_v8, %v8021_v47  ;;  %v1948_v8 = vrot.slane %v11802_v34, 3 }
 0x322   : > { %v1969_v48 = vpop.permute.xlu0 %1968  ;;  %v2451_v0 = vsel %vm2421_vm14, %v16968_v4, %v2450_v13  ;;  %v11827_v60 = vsel %vm1646_vm8, %v1633_v36, %v11266_v16  ;;  %v2192_v13 = vrot.slane %v11802_v34, 5 }
 0x323   : > { %v11761_v31 = vpop.permute.xlu1 %1338  ;;  %v2680_v51 = vsel %vm2676_vm6, %v2655_v20, %v1969_v48  ;;  %v16971_v20 = vrot.slane %v11493_v24, 3  ;;  %v2194_v16 = vrot.slane %v11827_v60, 5 }
 0x324   : > { %2238 = vrot.lane.b32.xlu0 %v2185_v29, %s9216_s17  ;;  %v2705_v21 = vsel %vm16476_vm1, %v2680_v51, %v2078_v44  ;;  %v2731_v44 = vsel %vm2726_vm0, %v8021_v47, %v8026_v5  ;;  %v16972_v5 = vld [vmem:[#allocation60_spill] sm:$0xff] }
 0x325   : > { %2093 = vrot.lane.b32.xlu1 %v16965_v17, %s9215_s16  ;;  %v2756_v12 = vsel %vm2751_vm3, %v2731_v44, %v8036_v54  ;;  %v7202_v58 = vcombine.low %v2878_v45, %v2705_v21  ;;  %v1631_v52 = vsel %vm1609_vm7, %v16973_v41, %v16972_v5  ;;  %v2327_v44 = vrot.slane %v11827_v60, 6 }
 0x326   : > { %v2561_v32 = vpop.permute.xlu0 %2560  ;;  %v2781_v28 = vsel %vm2776_vm5, %v2756_v12, %v8046_v38 }
 0x327   : > { %v2489_v3 = vpop.permute.xlu1 %2488  ;;  %v2806_v29 = vsel %vm2801_vm10, %v2781_v28, %v8056_v26  ;;  %v2984_v17 = vpack.c.bf16 %v2706_v15, %v7202_v58 }
 0x328   : > { %v2780_v57 = vsel %vm2776_vm5, %v2755_v10, %v2489_v3  ;;  %2371 = vrot.lane.b32.xlu0 %v2318_v7, %s9218_s19  ;;  %v2195_v10 = vsel %vm2155_vm9, %v2192_v13, %v2194_v16  ;;  %v2057_v3 = vrot.slane %v11802_v34, 4  ;;  %v1839_v7 = vrot.slane %v11802_v34, 2 }
 0x329   : > { %v2805_v43 = vsel %vm2801_vm10, %v2780_v57, %v2561_v32  ;;  %1875 = vrot.lane.b32.xlu1 %v16967_v49, %s9219_s29  ;;  %v11844_v32 = vsel %vm1646_vm8, %v1631_v52, %v11412_v39  ;;  %v2325_v49 = vrot.slane %v11802_v34, 6 }
 0x32a   : > { %v2879_v19 = vcombine.low %v2705_v21, %v2805_v43  ;;  %v11806_v1 = vpop.permute.xlu0 %1758  ;;  %v1729_v55 = vrot.slane %v11844_v32, 1  ;;  %v2191_v47 = vrot.slane %v11844_v32, 5  ;;  %v2056_v21 = vrot.slane %v11844_v32, 4 }
 0x32b   : > { %v11809_v62 = vpop.permute.xlu1 %1342  ;;  %v1838_v26 = vrot.slane %v11844_v32, 2  ;;  %v2328_v58 = vsel %vm2288_vm11, %v2325_v49, %v2327_v44  ;;  %v2324_v28 = vrot.slane %v11844_v32, 6  ;;  %v1947_v5 = vrot.slane %v11844_v32, 3  ;;  %v16982_v44 = vld [vmem:[#allocation80_spill] sm:$0xff] }
 0x32c   : > { %v7203_v48 = vcombine.high %v11706_v6, %v2879_v19  ;;  %2504 = vrot.lane.b32.xlu0 %v2451_v0, %s9220_s22  ;;  %v1730_v6 = vrot.slane %v11802_v34, 1  ;;  %v2193_v45 = vsel %vm2155_vm9, %v2191_v47, %v2192_v13 }
 0x32d   : > { %1984 = vrot.lane.b32.xlu1 %v16971_v20, %s9221_s12  ;;  %v1840_v12 = vsel %vm1816_vm13, %v1838_v26, %v1839_v7  ;;  %v2326_v36 = vsel %vm2288_vm11, %v2324_v28, %v2325_v49  ;;  %v2460_v20 = vrot.slane %v11827_v60, 7  ;;  %v16981_v49 = vld [vmem:[#allocation84_spill] sm:$0xff]  ;;  %v16984_v28 = vld [vmem:[#allocation57_spill] sm:$0xff] }
 0x32e   : > { %v11829_v9 = vpop.permute.xlu0 %2230  ;;  %v2985_v42 = vpack.c.bf16 %v2806_v29, %v7203_v48  ;;  %v1731_v38 = vsel %vm1707_vm12, %v1729_v55, %v1730_v6  ;;  %v16975_v48 = vrot.slane %v11319_v63, 4  ;;  %v2458_v29 = vrot.slane %v11802_v34, 7 }
 0x32f   : > { %v11833_v51 = vpop.permute.xlu1 %2085 }
 0x330   : > { %1774 = vrot.lane.b32.xlu0 %v1730_v6, %s9217_s18  ;;  %7242 = vmatprep.mubr.msk.bf16.mxu0 %vm16475_vm15, %v2985_v42  ;;  %vm16974_vm15 = vcmask 1043456   ;;  %v2322_v42 = vrot.slane %v11309_v56, 6  ;;  %v2461_v13 = vsel %vm2421_vm14, %v2458_v29, %v2460_v20  ;;  %v16986_v20 = vld [vmem:[#allocation79_spill] sm:$0xff] }
 0x331   : > { %2576 = vrot.lane.b32.xlu1 %v11746_v50, %s9222_s23  ;;  %3205 = vmatmul.mubr.bf16.gmra.mrb[4].mxu0 %v2984_v17  ;;  %v2058_v43 = vsel %vm16974_vm15, %v2056_v21, %v2057_v3  ;;  %v16976_v17 = vrot.slane %v11319_v63, 1  ;;  %vm16978_vm15 = vcmask 1044480   ;;  %v16980_v21 = vld [vmem:[#allocation12_spill] sm:$0xff] }
 0x332   : > { %v11848_v54 = vpop.permute.xlu0 %1867 }
 0x333   : > { %v11850_v11 = vpop.permute.xlu1 %1756 }
 0x334   : > { %2246 = vrot.lane.b32.xlu0 %v2195_v10, %s9216_s17  ;;  %v1949_v10 = vsel %vm16978_vm15, %v1947_v5, %v1948_v8  ;;  %vm16993_vm15 = vcmask 1043456  }
 0x335   : > { %2101 = vrot.lane.b32.xlu1 %v2057_v3, %s9215_s16  ;;  %v2457_v3 = vrot.slane %v11844_v32, 7 }
 0x336   : > { %v11857_v39 = vpop.permute.xlu0 %2228 }
 0x337   : > { %v11860_v50 = vpop.permute.xlu1 %2083  ;;  %v2459_v26 = vsel %vm2421_vm14, %v2457_v3, %v2458_v29 }
 0x338   : > { %1883 = vrot.lane.b32.xlu0 %v1839_v7, %s9219_s29  ;;  %v2455_v7 = vrot.slane %v11309_v56, 7 }
 0x339   : > { %1772 = vrot.lane.b32.xlu1 %v1731_v38, %s9217_s18  ;;  %v16979_v38 = vld [vmem:[#allocation36_spill] sm:$0xff] }
 0x33a   : > { %v11867_v57 = vpop.permute.xlu0 %1348 }
 0x33b   : > { %v11869_v61 = vpop.permute.xlu1 %2363 }
 0x33c   : > { %2244 = vrot.lane.b32.xlu0 %v2193_v45, %s9216_s17  ;;  %v1641_v45 = vsel %vm1609_vm7, %v16980_v21, %v16979_v38  ;;  %v16990_v21 = vld [vmem:[#allocation62_spill] sm:$0xff] }
 0x33d   : > { %2099 = vrot.lane.b32.xlu1 %v2058_v43, %s9215_s16  ;;  %v11931_v43 = vsel %vm1646_vm8, %v1641_v45, %v11809_v62  ;;  %v16991_v45 = vld [vmem:[#allocation82_spill] sm:$0xff] }
 0x33e   : > { %v11878_v46 = vpop.permute.xlu0 %1865 }
 0x33f   : > { %v11880_v19 = vpop.permute.xlu1 %1350 }
 0x340   : > { %1881 = vrot.lane.b32.xlu0 %v1840_v12, %s9219_s29  ;;  %v1642_v12 = vsel %vm1609_vm7, %v16982_v44, %v16981_v49 }
 0x341   : > { %2379 = vrot.lane.b32.xlu1 %v2328_v58, %s9218_s19 }
 0x342   : > { %v11886_v4 = vpop.permute.xlu0 %2081 }
 0x343   : > { %v11888_v0 = vpop.permute.xlu1 %1976 }
 0x344   : > { %2097 = vrot.lane.b32.xlu0 %v16975_v48, %s9215_s16 }
 0x345   : > { %1992 = vrot.lane.b32.xlu1 %v1948_v8, %s9221_s12  ;;  %v16983_v8 = vld [vmem:[#allocation61_spill] sm:$0xff] }
 0x346   : > { %v11896_v22 = vpop.permute.xlu0 %2361  ;;  %v1635_v48 = vsel %vm1609_vm7, %v16984_v28, %v16983_v8 }
 0x347   : > { %v11898_v33 = vpop.permute.xlu1 %2226 }
 0x348   : > { %2377 = vrot.lane.b32.xlu0 %v2326_v36, %s9218_s19  ;;  %v16985_v36 = vld [vmem:[#allocation39_spill] sm:$0xff] }
 0x349   : > { %2242 = vrot.lane.b32.xlu1 %v11336_v25, %s9216_s17  ;;  %v16977_v25 = vrot.slane %v11319_v63, 6 }
 0x34a   : > { %v11906_v6 = vpop.permute.xlu0 %1346 }
 0x34b   : > { %v2497_v15 = vpop.permute.xlu1 %2496  ;;  %v2323_v16 = vsel %vm2288_vm11, %v16977_v25, %v2322_v42  ;;  %v2456_v42 = vsel %vm2421_vm14, %v2453_v18, %v2455_v7  ;;  %v11954_v25 = vsel %vm1646_vm8, %v1635_v48, %v11488_v59  ;;  %v16989_v7 = vrot.slane %v11319_v63, 2 }
 0x34c   : > { %1770 = vrot.lane.b32.xlu0 %v16976_v17, %s9217_s18  ;;  %v16987_v17 = vld [vmem:[#allocation63_spill] sm:$0xff]  ;;  %v2060_v49 = vrot.slane %v11954_v25, 4 }
 0x34d   : > { %2512 = vrot.lane.b32.xlu1 %v2461_v13, %s9220_s22  ;;  %v16988_v13 = vld [vmem:[#allocation30_spill] sm:$0xff] }
 0x34e   : > { %v1975_v41 = vpop.permute.xlu0 %1974  ;;  %v1638_v5 = vsel %vm1609_vm7, %v16988_v13, %v16987_v17 }
 0x34f   : > { %v1755_v52 = vpop.permute.xlu1 %1754  ;;  %v11965_v18 = vsel %vm1646_vm8, %v1638_v5, %v11525_v35 }
 0x350   : > { %2375 = vrot.lane.b32.xlu0 %v2323_v16, %s9218_s19  ;;  %v2063_v8 = vrot.slane %v11965_v18, 4 }
 0x351   : > { %1990 = vrot.lane.b32.xlu1 %v1949_v10, %s9221_s12  ;;  %v2207_v10 = vrot.slane %v11931_v43, 5 }
 0x352   : > { %v2495_v55 = vpop.permute.xlu0 %2494 }
 0x353   : > { %v2360_v47 = vpop.permute.xlu1 %2359 }
 0x354   : > { %2584 = vrot.lane.b32.xlu0 %v11827_v60, %s9222_s23  ;;  %v1636_v60 = vsel %vm1609_vm7, %v16986_v20, %v16985_v36 }
 0x355   : > { %2510 = vrot.lane.b32.xlu1 %v2459_v26, %s9220_s22  ;;  %v11961_v3 = vsel %vm1646_vm8, %v1636_v60, %v11506_v23  ;;  %v1637_v26 = vsel %vm1609_vm7, %v16991_v45, %v16990_v21  ;;  %v2633_v23 = vsel %vm2626_vm2, %v11373_v37, %v11850_v11  ;;  %v2634_v37 = vsel %vm2626_vm2, %v11354_v53, %v11806_v1  ;;  %v16992_v1 = vld [vmem:[#allocation86_spill] sm:$0xff] }
 0x356   : > { %v1345_v58 = vpop.permute.xlu0 %1344  ;;  %v11984_v44 = vsel %vm1646_vm8, %v1637_v26, %v11503_v14  ;;  %v2734_v14 = vsel %vm2726_vm0, %v11833_v51, %v11829_v9  ;;  %v2733_v11 = vsel %vm2726_vm0, %v11860_v50, %v11857_v39  ;;  %v2632_v9 = vsel %vm2626_vm2, %v16992_v1, %v1755_v52 }
 0x357   : > { %v11944_v29 = vsel %vm1646_vm8, %v1642_v12, %v1345_v58  ;;  %v2569_v62 = vpop.permute.xlu1 %2568  ;;  %v2199_v12 = vrot.slane %v11961_v3, 5  ;;  %v2658_v58 = vsel %vm2651_vm4, %v2633_v23, %v11878_v46  ;;  %v2759_v28 = vsel %vm2751_vm3, %v2734_v14, %v11869_v61  ;;  %v16995_v23 = vld [vmem:[#allocation72_spill] sm:$0xff] }
 0x358   : > { %v2209_v16 = vrot.slane %v11944_v29, 5  ;;  %2508 = vrot.lane.b32.xlu0 %v2456_v42, %s9220_s22  ;;  %v2683_v46 = vsel %vm2676_vm6, %v2658_v58, %v1975_v41  ;;  %v2758_v53 = vsel %vm2751_vm3, %v2733_v11, %v11896_v22  ;;  %v2784_v41 = vsel %vm2776_vm5, %v2759_v28, %v2497_v15 }
 0x359   : > { %1879 = vrot.lane.b32.xlu1 %v16989_v7, %s9219_s29  ;;  %v2783_v36 = vsel %vm2776_vm5, %v2758_v53, %v2495_v55  ;;  %v2708_v61 = vsel %vm16476_vm1, %v2683_v46, %v11860_v50  ;;  %v2809_v60 = vsel %vm2801_vm10, %v2784_v41, %v2569_v62  ;;  %v2197_v50 = vrot.slane %v11954_v25, 5 }
 0x35a   : > { %v2493_v59 = vpop.permute.xlu0 %2492  ;;  %v11973_v38 = vsel %vm2155_vm9, %v2207_v10, %v2209_v16  ;;  %v2062_v17 = vrot.slane %v11984_v44, 4  ;;  %v2202_v7 = vrot.slane %v11965_v18, 5  ;;  %v2201_v14 = vrot.slane %v11984_v44, 5 }
 0x35b   : > { %v1864_v35 = vpop.permute.xlu1 %1863  ;;  %v2332_v46 = vrot.slane %v11961_v3, 6  ;;  %v8015_v53 = vunpack.i.l.bf16 %v16995_v23 }
 0x35c   : > { %1988 = vrot.lane.b32.xlu0 %v1945_v27, %s9221_s12  ;;  %v2659_v27 = vsel %vm2651_vm4, %v2634_v37, %v11848_v54  ;;  %v2657_v20 = vsel %vm2651_vm4, %v2632_v9, %v1864_v35  ;;  %v8016_v35 = vunpack.i.h.bf16 %v16995_v23  ;;  %v1733_v37 = vrot.slane %v11954_v25, 1  ;;  %v8994_v23 = vld [vmem:[%s16406_s3 + $0x8] sm:$0xff]  }
 0x35d   : > { %2582 = vrot.lane.b32.xlu1 %v11802_v34, %s9222_s23  ;;  %v2684_v39 = vsel %vm2676_vm6, %v2659_v27, %v11888_v0  ;;  %v2732_v0 = vsel %vm2726_vm0, %v11886_v4, %v11898_v33  ;;  %v2203_v1 = vsel %vm2155_vm9, %v2201_v14, %v2202_v7  ;;  %v1844_v14 = vrot.slane %v11984_v44, 2 }
 0x35e   : > { %v1973_v48 = vpop.permute.xlu0 %1972  ;;  %v2757_v55 = vsel %vm2751_vm3, %v2732_v0, %v2360_v47  ;;  %v2709_v62 = vsel %vm16476_vm1, %v2684_v39, %v11833_v51  ;;  %v2064_v51 = vsel %vm16993_vm15, %v2062_v17, %v2063_v8  ;;  %v16996_v39 = vld [vmem:[#allocation56_spill] sm:$0xff]  ;;  %vm16997_vm15 = vcmask 941056  }
 0x35f   : > { %v2567_v54 = vpop.permute.xlu1 %2566  ;;  %v2682_v22 = vsel %vm2676_vm6, %v2657_v20, %v1973_v48  ;;  %v2885_v13 = vcombine.low %v2709_v62, %v2809_v60  ;;  %v2782_v5 = vsel %vm2776_vm5, %v2757_v55, %v2493_v59  ;;  %v16994_v59 = vld [vmem:[#allocation34_spill] sm:$0xff]  ;;  %v1736_v48 = vrot.slane %v11965_v18, 1  ;;  %v16998_v60 = vld [vmem:[#allocation28_spill] sm:$0xff] }
 0x360   : > { %v2808_v52 = vsel %vm2801_vm10, %v2783_v36, %v2567_v54  ;;  %2105 = vrot.lane.b32.xlu0 %v2060_v49, %s9215_s16  ;;  %v2707_v33 = vsel %vm16476_vm1, %v2682_v22, %v11886_v4  ;;  %v8001_v45 = vunpack.i.h.bf16 %v16994_v59  ;;  %v8000_v11 = vunpack.i.l.bf16 %v16994_v59 }
 0x361   : > { %v2884_v15 = vcombine.high %v2708_v61, %v2808_v52  ;;  %2580 = vrot.lane.b32.xlu1 %v11309_v56, %s9222_s23  ;;  %v2200_v56 = vsel %vm2155_vm9, %v2197_v50, %v2199_v12  ;;  %v7207_v26 = vcombine.high %v2808_v52, %v2885_v13  ;;  %v7204_v12 = vcombine.low %v2707_v33, %v2708_v61 }
 0x362   : > { %v12035_v42 = vpop.permute.xlu0 %2089  ;;  %v1640_v41 = vsel %vm1609_vm7, %v16996_v39, %v8001_v45  ;;  %v2330_v36 = vrot.slane %v11954_v25, 6  ;;  %v1735_v61 = vrot.slane %v11984_v44, 1  ;;  %v1634_v22 = vsel %vm1609_vm7, %v16998_v60, %v8000_v11 }
 0x363   : > { %v2565_v16 = vpop.permute.xlu1 %2564  ;;  %v7206_v21 = vcombine.low %v2884_v15, %v2709_v62  ;;  %v12075_v20 = vsel %vm1646_vm8, %v1640_v41, %v8016_v35  ;;  %v2066_v15 = vrot.slane %v11931_v43, 4  ;;  %v12089_v55 = vsel %vm1646_vm8, %v1634_v22, %v8015_v53 }
 0x364   : > { %v2807_v47 = vsel %vm2801_vm10, %v2782_v5, %v2565_v16  ;;  %2250 = vrot.lane.b32.xlu0 %v2200_v56, %s9216_s17  ;;  %v2333_v0 = vsel %vm2288_vm11, %v2330_v36, %v2332_v46  ;;  %v1737_v62 = vsel %vm1707_vm12, %v1735_v61, %v1736_v48  ;;  %v2335_v17 = vrot.slane %v11965_v18, 6  ;;  %v8993_v56 = vld [vmem:[%s16406_s3] sm:$0xff]  }
 0x365   : > { %v7205_v4 = vcombine.low %v2807_v47, %v2808_v52  ;;  %2107 = vrot.lane.b32.xlu1 %v2064_v51, %s9215_s16  ;;  %v2986_v9 = vpack.c.bf16 %v7206_v21, %v7204_v12  ;;  %v2065_v13 = vrot.slane %v12075_v20, 4  ;;  %v1842_v33 = vrot.slane %v11954_v25, 2  ;;  %7772 = vmatpush3.bf16.msra.mxu1 %v8993_v56 }
 0x366   : > { %v12053_v58 = vpop.permute.xlu0 %2234  ;;  %v2334_v16 = vrot.slane %v11984_v44, 6  ;;  %v2059_v51 = vrot.slane %v12089_v55, 4  ;;  %v1845_v45 = vrot.slane %v11965_v18, 2  ;;  %v2206_v11 = vrot.slane %v12075_v20, 5 }
 0x367   : > { %v2987_v27 = vpack.c.bf16 %v7207_v26, %v7205_v4  ;;  %v12059_v28 = vpop.permute.xlu1 %2091  ;;  %v17001_v4 = vmov 0.0   ;;  %v2465_v46 = vrot.slane %v11961_v3, 7  ;;  %v1739_v53 = vrot.slane %v11931_v43, 1 }
 0x368   : > { %1778 = vrot.lane.b32.xlu0 %v1733_v37, %s9217_s18  ;;  %v2336_v59 = vsel %vm2288_vm11, %v2334_v16, %v2335_v17  ;;  %7773 = vmatprep.subr.bf16.mxu1 %v17001_v4  ;;  %v2463_v39 = vrot.slane %v11954_v25, 7  ;;  %v1738_v41 = vrot.slane %v12075_v20, 1  ;;  %v2468_v16 = vrot.slane %v11965_v18, 7 }
 0x369   : > { %2252 = vrot.lane.b32.xlu1 %v2203_v1, %s9216_s17  ;;  %7243 = vmatprep.mubr.msk.bf16.mxu0 %vm16997_vm15, %v2987_v27  ;;  %vm16999_vm15 = vcmask 1043456   ;;  %v2196_v1 = vrot.slane %v12089_v55, 5 }
 0x36a   : > { %v12077_v54 = vpop.permute.xlu0 %1762  ;;  %3213 = vmatmul.mubr.bf16.gmra.mrb[8].mxu0 %v2986_v9  ;;  %v2067_v21 = vsel %vm16999_vm15, %v2065_v13, %v2066_v15  ;;  %vm17000_vm1 = vmmov %vm16999_vm15  ;;  %v2208_v9 = vsel %vm2155_vm9, %v2206_v11, %v2207_v10  ;;  %7774 = vmatpush3.bf16.msra.mxu1 %v8994_v23  ;;  %v2466_v10 = vsel %vm2421_vm14, %v2463_v39, %v2465_v46  ;;  %v8995_v23 = vld [vmem:[%s16406_s3 + $0x10] sm:$0xff]   ;;  %v8996_v11 = vld [vmem:[%s16406_s3 + $0x18] sm:$0xff]   ;;  %vm17002_vm15 = vcmask 1044480  }
 0x36b   : > { %v12082_v52 = vpop.permute.xlu1 %2236  ;;  %v2061_v26 = vsel %vm17000_vm1, %v2059_v51, %v2060_v49  ;;  %v1846_v49 = vsel %vm1816_vm13, %v1844_v14, %v1845_v45  ;;  %7775 = vmatprep.subr.bf16.mxu1 %v17001_v4  ;;  %v2198_v60 = vsel %vm2155_vm9, %v2196_v1, %v2197_v50  ;;  %v1740_v13 = vsel %vm1707_vm12, %v1738_v41, %v1739_v53 }
 0x36c   : > { %2383 = vrot.lane.b32.xlu0 %v2333_v0, %s9218_s19  ;;  %v8097_v12 = vpack.i.bf16 %v2067_v21, %v2061_v26  ;;  %v8102_v0 = vpack.i.bf16 %v2208_v9, %v2198_v60  ;;  %v2467_v21 = vrot.slane %v11984_v44, 7  ;;  %v1954_v26 = vrot.slane %v11965_v18, 3 }
 0x36d   : > { %1780 = vrot.lane.b32.xlu1 %v1737_v62, %s9217_s18  ;;  %v1732_v62 = vrot.slane %v12089_v55, 1  ;;  %v1953_v14 = vrot.slane %v11984_v44, 3  ;;  %vm16481_vm1 = vmmov 0   ;;  %v1951_v41 = vrot.slane %v11954_v25, 3 }
 0x36e   : > { %v12098_v5 = vpop.permute.xlu0 %2367  ;;  %7776 = vmatpush3.bf16.msra.mxu1 %v8995_v23  ;;  %7779 = vmatprep.mubr.msk.bf16.mxu1 %vm16481_vm1, %v17001_v4  ;;  %v16477_v60 = vrot.slane %v11931_v43, 2  ;;  %v1841_v23 = vrot.slane %v12089_v55, 2 }
 0x36f   : > { %v12105_v47 = vpop.permute.xlu1 %1764  ;;  %v1734_v50 = vsel %vm1707_vm12, %v1732_v62, %v1733_v37  ;;  %v16478_v37 = vrot.slane %v11931_v43, 6  ;;  %7777 = vmatprep.subr.bf16.mxu1 %v17001_v4  ;;  %v1955_v9 = vsel %vm17002_vm15, %v1953_v14, %v1954_v26  ;;  %v1847_v62 = vrot.slane %v12075_v20, 2 }
 0x370   : > { %1887 = vrot.lane.b32.xlu0 %v1842_v33, %s9219_s29  ;;  %v8107_v51 = vpack.i.bf16 %v1740_v13, %v1734_v50  ;;  %v16479_v14 = vrot.slane %v11931_v43, 3 }
 0x371   : > { %2385 = vrot.lane.b32.xlu1 %v2336_v59, %s9218_s19 }
 0x372   : > { %v12126_v35 = vpop.permute.xlu0 %1871  ;;  %7778 = vmatpush3.bf16.msra.mxu1 %v8996_v11  ;;  %v16480_v11 = vrot.slane %v11931_v43, 7 }
 0x373   : > { %v12131_v27 = vpop.permute.xlu1 %2369 }
 0x374   : > { %8098 = vrot.lane.b32.xlu0 %v8097_v12, %s9215_s16  ;;  %v2469_v12 = vsel %vm2421_vm14, %v2467_v21, %v2468_v16 }
 0x375   : > { %1889 = vrot.lane.b32.xlu1 %v1846_v49, %s9219_s29  ;;  %v2339_v49 = vrot.slane %v12075_v20, 6 }
 0x376   : > { %v12146_v61 = vpop.permute.xlu0 %8058 }
 0x377   : > { %v12151_v22 = vpop.permute.xlu1 %1873 }
 0x378   : > { %2516 = vrot.lane.b32.xlu0 %v2466_v10, %s9220_s22  ;;  %v2329_v10 = vrot.slane %v12089_v55, 6 }
 0x379   : > { %8103 = vrot.lane.b32.xlu1 %v8102_v0, %s9216_s17  ;;  %v2341_v0 = vsel %vm2288_vm11, %v2339_v49, %v16478_v37  ;;  %v1956_v49 = vrot.slane %v12075_v20, 3 }
 0x37a   : > { %v12166_v56 = vpop.permute.xlu0 %2500  ;;  %v2331_v50 = vsel %vm2288_vm11, %v2329_v10, %v2330_v36  ;;  %v1843_v36 = vsel %vm1816_vm13, %v1841_v23, %v1842_v33  ;;  %v2462_v33 = vrot.slane %v12089_v55, 7 }
 0x37b   : > { %v12169_v59 = vpop.permute.xlu1 %8063  ;;  %v8112_v21 = vpack.i.bf16 %v2341_v0, %v2331_v50  ;;  %v2472_v0 = vrot.slane %v12075_v20, 7  ;;  %v1950_v50 = vrot.slane %v12089_v55, 3 }
 0x37c   : > { %8108 = vrot.lane.b32.xlu0 %v8107_v51, %s9217_s18 }
 0x37d   : > { %2518 = vrot.lane.b32.xlu1 %v2469_v12, %s9220_s22  ;;  %v1849_v12 = vsel %vm1816_vm13, %v1847_v62, %v16477_v60  ;;  %v17003_v60 = vld [vmem:[#allocation83_spill] sm:$0xff]  ;;  %v2474_v23 = vsel %vm2421_vm14, %v2472_v0, %v16480_v11 }
 0x37e   : > { %v12185_v46 = vpop.permute.xlu0 %8068  ;;  %v8117_v10 = vpack.i.bf16 %v1849_v12, %v1843_v36  ;;  %v1952_v36 = vsel %vm17002_vm15, %v1950_v50, %v1951_v41  ;;  %v2736_v50 = vsel %vm2726_vm0, %v12035_v42, %v12053_v58  ;;  %v8065_v58 = vunpack.i.l.bf16 %v12169_v59 }
 0x37f   : > { %v12191_v1 = vpop.permute.xlu1 %2502  ;;  %v8070_v11 = vunpack.i.l.bf16 %v12185_v46 }
 0x380   : > { %1998 = vrot.lane.b32.xlu0 %v1955_v9, %s9221_s12 }
 0x381   : > { %1996 = vrot.lane.b32.xlu1 %v1951_v41, %s9221_s12 }
 0x382   : > { %v1983_v13 = vpop.permute.xlu0 %1982 }
 0x383   : > { %v1981_v51 = vpop.permute.xlu1 %1980 }
 0x384   : > { %2588 = vrot.lane.b32.xlu0 %v11961_v3, %s9222_s23  ;;  %v1958_v3 = vsel %vm17002_vm15, %v1956_v49, %v16479_v14  ;;  %vm17006_vm15 = vcmask 883712  }
 0x385   : > { %8113 = vrot.lane.b32.xlu1 %v8112_v21, %s9218_s19  ;;  %v17004_v21 = vld [vmem:[#allocation58_spill] sm:$0xff]  ;;  %vm17007_vm1 = vmmov %vm17006_vm15 }
 0x386   : > { %v2573_v9 = vpop.permute.xlu0 %2572  ;;  %v1639_v37 = vsel %vm1609_vm7, %v17004_v21, %v17003_v60  ;;  %v8127_v60 = vpack.i.bf16 %v1958_v3, %v1952_v36  ;;  %v2737_v3 = vsel %vm2726_vm0, %v12059_v28, %v12082_v52 }
 0x387   : > { %v12222_v62 = vpop.permute.xlu1 %8073  ;;  %v12238_v12 = vsel %vm1646_vm8, %v1639_v37, %v11761_v31  ;;  %v2636_v37 = vsel %vm2626_vm2, %v11462_v40, %v12077_v54 }
 0x388   : > { %8118 = vrot.lane.b32.xlu0 %v8117_v10, %s9219_s29  ;;  %v2464_v10 = vsel %vm2421_vm14, %v2462_v33, %v2463_v39  ;;  %v2204_v0 = vrot.slane %v12238_v12, 5  ;;  %v2337_v31 = vrot.slane %v12238_v12, 6  ;;  %v8132_v39 = vpack.i.bf16 %v11931_v43, %v11954_v25  ;;  %v17005_v33 = vld [vmem:[#allocation74_spill] sm:$0xff] }
 0x389   : > { %2590 = vrot.lane.b32.xlu1 %v11965_v18, %s9222_s23  ;;  %v8122_v14 = vpack.i.bf16 %v2474_v23, %v2464_v10  ;;  %v2637_v23 = vsel %vm2626_vm2, %v17005_v33, %v12105_v47  ;;  %v2661_v40 = vsel %vm2651_vm4, %v2636_v37, %v12126_v35  ;;  %v2635_v47 = vsel %vm2626_vm2, %v11540_v2, %v8070_v11 }
 0x38a   : > { %v12243_v49 = vpop.permute.xlu0 %8078  ;;  %v2662_v36 = vsel %vm2651_vm4, %v2637_v23, %v12151_v22  ;;  %v2686_v35 = vsel %vm2676_vm6, %v2661_v40, %v1981_v51  ;;  %v8075_v37 = vunpack.i.l.bf16 %v12222_v62  ;;  %v2761_v2 = vsel %vm2751_vm3, %v2736_v50, %v12098_v5 }
 0x38b   : > { %v2575_v21 = vpop.permute.xlu1 %2574  ;;  %v8080_v41 = vunpack.i.l.bf16 %v12243_v49  ;;  %v2687_v10 = vsel %vm2676_vm6, %v2662_v36, %v1983_v13  ;;  %v2711_v5 = vsel %vm17007_vm1, %v2686_v35, %v12035_v42 }
 0x38c   : > { %8128 = vrot.lane.b32.xlu0 %v8127_v60, %s9221_s12 }
 0x38d   : > { %8123 = vrot.lane.b32.xlu1 %v8122_v14, %s9220_s22  ;;  %v2762_v14 = vsel %vm2751_vm3, %v2737_v3, %v12131_v27  ;;  %v8060_v27 = vunpack.i.l.bf16 %v12146_v61  ;;  %v2660_v3 = vsel %vm2651_vm4, %v2635_v47, %v8080_v41 }
 0x38e   : > { %v12270_v54 = vpop.permute.xlu0 %8088  ;;  %v2787_v22 = vsel %vm2776_vm5, %v2762_v14, %v12191_v1  ;;  %v2786_v1 = vsel %vm2776_vm5, %v2761_v2, %v12166_v56  ;;  %v2470_v14 = vrot.slane %v12238_v12, 7 }
 0x38f   : > { %v8090_v60 = vunpack.i.l.bf16 %v12270_v54  ;;  %v12278_v52 = vpop.permute.xlu1 %8083  ;;  %v12297_v13 = vsel %vm2801_vm10, %v2787_v22, %v2575_v21  ;;  %v2735_v41 = vsel %vm2726_vm0, %v8060_v27, %v8065_v58  ;;  %v2811_v50 = vsel %vm2801_vm10, %v2786_v1, %v2573_v9 }
 0x390   : > { %1782 = vrot.lane.b32.xlu0 %v1736_v48, %s9217_s18  ;;  %v8085_v33 = vunpack.i.l.bf16 %v12278_v52  ;;  %v2205_v48 = vsel %vm2155_vm9, %v2202_v7, %v2204_v0  ;;  %v2760_v7 = vsel %vm2751_vm3, %v2735_v41, %v8075_v37  ;;  %v7209_v56 = vcombine.low %v2811_v50, %v12297_v13  ;;  %v17012_v37 = vld [vmem:[#allocation44_spill] sm:$0xff] }
 0x391   : > { %8133 = vrot.lane.b32.xlu1 %v8132_v39, %s9222_s23  ;;  %v2685_v11 = vsel %vm2676_vm6, %v2660_v3, %v8090_v60  ;;  %v12308_v39 = vsel %vm17006_vm15, %v2687_v10, %v12059_v28  ;;  %vm17008_vm15 = vmmov %vm17007_vm1  ;;  %v2338_v58 = vsel %vm2288_vm11, %v2335_v17, %v2337_v31  ;;  %v17009_v10 = vld [vmem:[#allocation69_spill] sm:$0xff]  ;;  %vm17011_vm1 = vcmask 941056  }
 0x392   : > { %v1767_v51 = vpop.permute.xlu0 %1766  ;;  %v2785_v23 = vsel %vm2776_vm5, %v2760_v7, %v8085_v33  ;;  %v2710_v42 = vsel %vm17008_vm15, %v2685_v11, %v8060_v27  ;;  %v7208_v28 = vcombine.low %v2711_v5, %v12308_v39  ;;  %v17013_v27 = vld [vmem:[#allocation32_spill] sm:$0xff] }
 0x393   : > { %v12312_v21 = vpop.permute.xlu1 %8093  ;;  %v1644_v22 = vsel %vm1609_vm7, %v17013_v27, %v17012_v37 }
 0x394   : > { %v8095_v0 = vunpack.i.l.bf16 %v12312_v21  ;;  %2254 = vrot.lane.b32.xlu0 %v2205_v48, %s9216_s17  ;;  %v2988_v47 = vpack.c.bf16 %v7208_v28, %v2710_v42  ;;  %v12347_v3 = vsel %vm1646_vm8, %v1644_v22, %v11867_v57  ;;  %v17015_v48 = vld [vmem:[#allocation35_spill] sm:$0xff]  ;;  %v2638_v57 = vsel %vm2626_vm2, %v11493_v24, %v1767_v51 }
 0x395   : > { %2109 = vrot.lane.b32.xlu1 %v2063_v8, %s9215_s16  ;;  %v17010_v8 = vld [vmem:[#allocation59_spill] sm:$0xff]  ;;  %v1742_v41 = vrot.slane %v12347_v3, 1  ;;  %v2212_v7 = vrot.slane %v12347_v3, 5  ;;  %v2069_v24 = vrot.slane %v12347_v3, 4  ;;  %v8066_v51 = vunpack.i.h.bf16 %v12169_v59 }
 0x396   : > { %v2810_v9 = vsel %vm2801_vm10, %v2785_v23, %v8095_v0  ;;  %v2239_v40 = vpop.permute.xlu0 %2238  ;;  %v1645_v35 = vsel %vm1609_vm7, %v17010_v8, %v17009_v10  ;;  %v8076_v42 = vunpack.i.h.bf16 %v12222_v62  ;;  %v8061_v59 = vunpack.i.h.bf16 %v12146_v61 }
 0x397   : > { %v2094_v36 = vpop.permute.xlu1 %2093  ;;  %v2989_v60 = vpack.c.bf16 %v7209_v56, %v2810_v9  ;;  %v12343_v17 = vsel %vm1646_vm8, %v1645_v35, %v11880_v19  ;;  %v17014_v19 = vld [vmem:[#allocation64_spill] sm:$0xff]  ;;  %v8081_v56 = vunpack.i.h.bf16 %v12243_v49  ;;  %v8086_v49 = vunpack.i.h.bf16 %v12278_v52 }
 0x398   : > { %2387 = vrot.lane.b32.xlu0 %v2338_v58, %s9218_s19  ;;  %v2214_v2 = vrot.slane %v12343_v17, 5  ;;  %v1643_v11 = vsel %vm1609_vm7, %v17015_v48, %v17014_v19  ;;  %vm17016_vm7 = vmmov %vm17008_vm15  ;;  %v2739_v61 = vsel %vm2726_vm0, %v8061_v59, %v8066_v51 }
 0x399   : > { %1891 = vrot.lane.b32.xlu1 %v1845_v45, %s9219_s29  ;;  %7244 = vmatprep.mubr.msk.bf16.mxu0 %vm17011_vm1, %v2989_v60  ;;  %v2471_v45 = vsel %vm2421_vm14, %v2468_v16, %v2470_v14  ;;  %v12365_v16 = vsel %vm1646_vm8, %v1643_v11, %v11906_v6  ;;  %v2738_v6 = vsel %vm2726_vm0, %v2094_v36, %v2239_v40  ;;  %v8096_v60 = vunpack.i.h.bf16 %v12312_v21  ;;  %vm17017_vm8 = vmmov %vm17016_vm7 }
 0x39a   : > { %v2372_v31 = vpop.permute.xlu0 %2371  ;;  %3221 = vmatmul.mubr.bf16.gmra.mrb[12].mxu0 %v2988_v47  ;;  %v2215_v23 = vsel %vm2155_vm9, %v2212_v7, %v2214_v2  ;;  %v1741_v14 = vrot.slane %v12365_v16, 1  ;;  %v2211_v22 = vrot.slane %v12365_v16, 5  ;;  %vm17018_vm15 = vmmov %vm17011_vm1  ;;  %vm17019_vm1 = vcmask 1043456  }
 0x39b   : > { %v1876_v33 = vpop.permute.xlu1 %1875  ;;  %v2763_v28 = vsel %vm2751_vm3, %v2738_v6, %v2372_v31 }
 0x39c   : > { %2520 = vrot.lane.b32.xlu0 %v2471_v45, %s9220_s22  ;;  %v2663_v5 = vsel %vm2651_vm4, %v2638_v57, %v1876_v33  ;;  %v1743_v33 = vsel %vm1707_vm12, %v1741_v14, %v1742_v41  ;;  %v2068_v45 = vrot.slane %v12365_v16, 4  ;;  %v2213_v57 = vsel %vm2155_vm9, %v2211_v22, %v2212_v7 }
 0x39d   : > { %2000 = vrot.lane.b32.xlu1 %v1954_v26, %s9221_s12  ;;  %v8071_v26 = vunpack.i.h.bf16 %v12185_v46  ;;  %v8091_v46 = vunpack.i.h.bf16 %v12270_v54  ;;  %v2890_v54 = vcombine.high %v12308_v39, %v12297_v13  ;;  %v1851_v39 = vrot.slane %v12347_v3, 2 }
 0x39e   : > { %v2505_v1 = vpop.permute.xlu0 %2504  ;;  %v2480_v14 = vrot.slane %v12343_v17, 7  ;;  %vm17021_vm9 = vcmask 1044480  }
 0x39f   : > { %v1985_v50 = vpop.permute.xlu1 %1984  ;;  %v2788_v40 = vsel %vm2776_vm5, %v2763_v28, %v2505_v1  ;;  %v2639_v62 = vsel %vm2626_vm2, %v11543_v30, %v8071_v26  ;;  %v1850_v1 = vrot.slane %v12365_v16, 2  ;;  %v2345_v26 = vrot.slane %v12347_v3, 6 }
 0x3a0   : > { %v2688_v0 = vsel %vm2676_vm6, %v2663_v5, %v1985_v50  ;;  %1790 = vrot.lane.b32.xlu0 %v1742_v41, %s9217_s18  ;;  %v2664_v52 = vsel %vm2651_vm4, %v2639_v62, %v8081_v56  ;;  %v2347_v5 = vrot.slane %v12343_v17, 6  ;;  %v2070_v41 = vsel %vm17019_vm1, %v2068_v45, %v2069_v24 }
 0x3a1   : > { %2592 = vrot.lane.b32.xlu1 %v12238_v12, %s9222_s23  ;;  %v2713_v12 = vsel %vm17016_vm7, %v2688_v0, %v2094_v36  ;;  %v2764_v36 = vsel %vm2751_vm3, %v2739_v61, %v8076_v42  ;;  %v2689_v21 = vsel %vm2676_vm6, %v2664_v52, %v8091_v46  ;;  %v1852_v51 = vsel %vm1816_vm13, %v1850_v1, %v1851_v39 }
 0x3a2   : > { %v12382_v9 = vpop.permute.xlu0 %1774  ;;  %v7210_v8 = vcombine.low %v2890_v54, %v2713_v12  ;;  %v2789_v35 = vsel %vm2776_vm5, %v2764_v36, %v8086_v49  ;;  %v2714_v19 = vsel %vm17017_vm8, %v2689_v21, %v8061_v59  ;;  %v2348_v7 = vsel %vm2288_vm11, %v2345_v26, %v2347_v5  ;;  %vm17027_vm8 = vmmov %vm17018_vm15 }
 0x3a3   : > { %v2577_v58 = vpop.permute.xlu1 %2576  ;;  %v2814_v31 = vsel %vm2801_vm10, %v2789_v35, %v8096_v60  ;;  %v2478_v49 = vrot.slane %v12347_v3, 7  ;;  %v2477_v61 = vrot.slane %v12365_v16, 7  ;;  %v2475_v52 = vrot.slane %v11944_v29, 7 }
 0x3a4   : > { %v2813_v47 = vsel %vm2801_vm10, %v2788_v40, %v2577_v58  ;;  %2262 = vrot.lane.b32.xlu0 %v2215_v23, %s9216_s17  ;;  %v1960_v23 = vrot.slane %v12347_v3, 3  ;;  %v2342_v40 = vrot.slane %v11944_v29, 6  ;;  %v17022_v21 = vrot.slane %v11931_v43, 7 }
 0x3a5   : > { %v2891_v10 = vcombine.low %v2713_v12, %v2813_v47  ;;  %2117 = vrot.lane.b32.xlu1 %v2069_v24, %s9215_s16  ;;  %v2344_v24 = vrot.slane %v12365_v16, 6  ;;  %v2481_v58 = vsel %vm2421_vm14, %v2478_v49, %v2480_v14  ;;  %v1959_v12 = vrot.slane %v12365_v16, 3 }
 0x3a6   : > { %v12400_v30 = vpop.permute.xlu0 %2246  ;;  %v2479_v36 = vsel %vm2421_vm14, %v2477_v61, %v2478_v49  ;;  %v2476_v35 = vsel %vm2421_vm14, %v17022_v21, %v2475_v52  ;;  %v17024_v45 = vrot.slane %v11931_v43, 3  ;;  %vm17026_vm14 = vmmov %vm17016_vm7  ;;  %vm17028_vm1 = vmmov 0  }
 0x3a7   : > { %v7211_v37 = vcombine.high %v12297_v13, %v2891_v10  ;;  %v12406_v27 = vpop.permute.xlu1 %2101  ;;  %v2990_v13 = vpack.c.bf16 %v2714_v19, %v7210_v8  ;;  %v2346_v28 = vsel %vm2288_vm11, %v2344_v24, %v2345_v26  ;;  %v1961_v47 = vsel %vm17021_vm9, %v1959_v12, %v1960_v23  ;;  %vm17029_vm9 = vmmov %vm17016_vm7 }
 0x3a8   : > { %1899 = vrot.lane.b32.xlu0 %v1851_v39, %s9219_s29  ;;  %v2742_v19 = vsel %vm2726_vm0, %v12406_v27, %v12400_v30 }
 0x3a9   : > { %v2991_v2 = vpack.c.bf16 %v2814_v31, %v7211_v37  ;;  %1788 = vrot.lane.b32.xlu1 %v1743_v33, %s9217_s18  ;;  %v17023_v37 = vrot.slane %v11931_v43, 2 }
 0x3aa   : > { %v12415_v48 = vpop.permute.xlu0 %1883 }
 0x3ab   : > { %v1773_v11 = vpop.permute.xlu1 %1772  ;;  %7245 = vmatprep.mubr.msk.bf16.mxu0 %vm17018_vm15, %v2991_v2  ;;  %v2642_v2 = vsel %vm2626_vm2, %v11802_v34, %v12382_v9  ;;  %vm3335_vm15 = vcmask 523264  }
 0x3ac   : > { %2260 = vrot.lane.b32.xlu0 %v2213_v57, %s9216_s17  ;;  %3229 = vmatmul.mubr.bf16.gmra.mrb[16].mxu0 %v2990_v13 }
 0x3ad   : > { %2115 = vrot.lane.b32.xlu1 %v2070_v41, %s9215_s16 }
 0x3ae   : > { %v2245_v50 = vpop.permute.xlu0 %2244 }
 0x3af   : > { %v12425_v0 = vpop.permute.xlu1 %2099 }
 0x3b0   : > { %1897 = vrot.lane.b32.xlu0 %v1852_v51, %s9219_s29  ;;  %v2741_v13 = vsel %vm2726_vm0, %v12425_v0, %v2245_v50 }
 0x3b1   : > { %2395 = vrot.lane.b32.xlu1 %v2348_v7, %s9218_s19 }
 0x3b2   : > { %v1882_v56 = vpop.permute.xlu0 %1881 }
 0x3b3   : > { %v2380_v6 = vpop.permute.xlu1 %2379 }
 0x3b4   : > { %2113 = vrot.lane.b32.xlu0 %v2066_v15, %s9215_s16  ;;  %v2767_v57 = vsel %vm2751_vm3, %v2742_v19, %v2380_v6 }
 0x3b5   : > { %2008 = vrot.lane.b32.xlu1 %v1960_v23, %s9221_s12 }
 0x3b6   : > { %v12437_v42 = vpop.permute.xlu0 %2097 }
 0x3b7   : > { %v1993_v46 = vpop.permute.xlu1 %1992 }
 0x3b8   : > { %2393 = vrot.lane.b32.xlu0 %v2346_v28, %s9218_s19 }
 0x3b9   : > { %2258 = vrot.lane.b32.xlu1 %v11973_v38, %s9216_s17  ;;  %v17020_v38 = vrot.slane %v11931_v43, 6 }
 0x3ba   : > { %v2378_v59 = vpop.permute.xlu0 %2377 }
 0x3bb   : > { %v2243_v15 = vpop.permute.xlu1 %2242  ;;  %v2343_v60 = vsel %vm2288_vm11, %v17020_v38, %v2342_v40  ;;  %v2766_v1 = vsel %vm2751_vm3, %v2741_v13, %v2378_v59  ;;  %vm17025_vm11 = vmmov %vm17016_vm7 }
 0x3bc   : > { %1786 = vrot.lane.b32.xlu0 %v1739_v53, %s9217_s18 }
 0x3bd   : > { %2528 = vrot.lane.b32.xlu1 %v2481_v58, %s9220_s22 }
 0x3be   : > { %v1771_v62 = vpop.permute.xlu0 %1770 }
 0x3bf   : > { %v2513_v54 = vpop.permute.xlu1 %2512  ;;  %v2640_v34 = vsel %vm2626_vm2, %v11319_v63, %v1771_v62  ;;  %v2740_v63 = vsel %vm2726_vm0, %v12437_v42, %v2243_v15 }
 0x3c0   : > { %2391 = vrot.lane.b32.xlu0 %v2343_v60, %s9218_s19  ;;  %v2792_v5 = vsel %vm2776_vm5, %v2767_v57, %v2513_v54 }
 0x3c1   : > { %2006 = vrot.lane.b32.xlu1 %v1961_v47, %s9221_s12 }
 0x3c2   : > { %v2376_v53 = vpop.permute.xlu0 %2375 }
 0x3c3   : > { %v1991_v10 = vpop.permute.xlu1 %1990  ;;  %v2765_v23 = vsel %vm2751_vm3, %v2740_v63, %v2376_v53 }
 0x3c4   : > { %2600 = vrot.lane.b32.xlu0 %v12343_v17, %s9222_s23  ;;  %v2641_v17 = vsel %vm2626_vm2, %v11844_v32, %v1773_v11  ;;  %v2667_v11 = vsel %vm2651_vm4, %v2642_v2, %v12415_v48 }
 0x3c5   : > { %2526 = vrot.lane.b32.xlu1 %v2479_v36, %s9220_s22  ;;  %v2666_v33 = vsel %vm2651_vm4, %v2641_v17, %v1882_v56  ;;  %v2692_v30 = vsel %vm2676_vm6, %v2667_v11, %v1993_v46 }
 0x3c6   : > { %v2585_v8 = vpop.permute.xlu0 %2584  ;;  %v2691_v32 = vsel %vm2676_vm6, %v2666_v33, %v1991_v10  ;;  %v2717_v24 = vsel %vm17026_vm14, %v2692_v30, %v12406_v27  ;;  %vm17031_vm14 = vmmov %vm17016_vm7 }
 0x3c7   : > { %v2511_v39 = vpop.permute.xlu1 %2510  ;;  %v2716_v48 = vsel %vm17025_vm11, %v2691_v32, %v12425_v0  ;;  %v2817_v51 = vsel %vm2801_vm10, %v2792_v5, %v2585_v8  ;;  %vm17030_vm11 = vmmov %vm17016_vm7 }
 0x3c8   : > { %2524 = vrot.lane.b32.xlu0 %v2476_v35, %s9220_s22  ;;  %v2791_v41 = vsel %vm2776_vm5, %v2766_v1, %v2511_v39  ;;  %v2897_v0 = vcombine.low %v2717_v24, %v2817_v51  ;;  %s9226_s22 = smov 64  }
 0x3c9   : > { %1895 = vrot.lane.b32.xlu1 %v17023_v37, %s9219_s29  ;;  %s9225_s29 = smov 32  }
 0x3ca   : > { %v2509_v22 = vpop.permute.xlu0 %2508 }
 0x3cb   : > { %v1880_v31 = vpop.permute.xlu1 %1879  ;;  %v2790_v28 = vsel %vm2776_vm5, %v2765_v23, %v2509_v22  ;;  %v12528_v22 = vld [vmem:[%s16405_s2] ss:$0 sm:$0xff] }
 0x3cc   : > { %2004 = vrot.lane.b32.xlu0 %v17024_v45, %s9221_s12  ;;  %v2665_v50 = vsel %vm2651_vm4, %v2640_v34, %v1880_v31  ;;  %s9227_s12 = smov 96  }
 0x3cd   : > { %2598 = vrot.lane.b32.xlu1 %v12347_v3, %s9222_s23 }
 0x3ce   : > { %v1989_v9 = vpop.permute.xlu0 %1988 }
 0x3cf   : > { %v2583_v26 = vpop.permute.xlu1 %2582  ;;  %v2690_v7 = vsel %vm2676_vm6, %v2665_v50, %v1989_v9 }
 0x3d0   : > { %v2816_v56 = vsel %vm2801_vm10, %v2791_v41, %v2583_v26  ;;  %v2715_v14 = vsel %vm17016_vm7, %v2690_v7, %v12437_v42  ;;  %vm17032_vm7 = vmmov %vm17027_vm8 }
 0x3d1   : > { %v2896_v6 = vcombine.high %v2716_v48, %v2816_v56  ;;  %2596 = vrot.lane.b32.xlu1 %v11944_v29, %s9222_s23  ;;  %v7215_v15 = vcombine.high %v2816_v56, %v2897_v0  ;;  %v7212_v29 = vcombine.low %v2715_v14, %v2716_v48 }
 0x3d2   : > { %v12510_v46 = vpop.permute.xlu0 %2105 }
 0x3d3   : > { %v2581_v59 = vpop.permute.xlu1 %2580  ;;  %v7214_v40 = vcombine.low %v2896_v6, %v2717_v24 }
 0x3d4   : > { %v2815_v49 = vsel %vm2801_vm10, %v2790_v28, %v2581_v59 }
 0x3d5   : > { %v7213_v58 = vcombine.low %v2815_v49, %v2816_v56  ;;  %v2992_v27 = vpack.c.bf16 %v7214_v40, %v7212_v29 }
 0x3d6   : > { %v2251_v12 = vpop.permute.xlu0 %2250 }
 0x3d7   : > { %v2993_v62 = vpack.c.bf16 %v7215_v15, %v7213_v58  ;;  %v12516_v54 = vpop.permute.xlu1 %2107  ;;  %v2744_v48 = vsel %vm2726_vm0, %v12510_v46, %v2251_v12 }
 0x3d9   : > { %7246 = vmatprep.mubr.msk.bf16.mxu0 %vm17027_vm8, %v2993_v62  ;;  %vm17033_vm8 = vmmov %vm17029_vm9 }
 0x3da   : > { %v1779_v38 = vpop.permute.xlu0 %1778  ;;  %3237 = vmatmul.mubr.bf16.gmra.mrb[20].mxu0 %v2992_v27 }
 0x3db   : > { %v2253_v60 = vpop.permute.xlu1 %2252  ;;  %v2644_v50 = vsel %vm2626_vm2, %v11954_v25, %v1779_v38 }
 0x3dc   : > { %v2745_v51 = vsel %vm2726_vm0, %v12516_v54, %v2253_v60 }
 0x3de   : > { %v2384_v47 = vpop.permute.xlu0 %2383 }
 0x3df   : > { %v1781_v61 = vpop.permute.xlu1 %1780  ;;  %v2769_v29 = vsel %vm2751_vm3, %v2744_v48, %v2384_v47 }
 0x3e0   : > { %v2645_v7 = vsel %vm2626_vm2, %v11984_v44, %v1781_v61 }
 0x3e2   : > { %v1888_v42 = vpop.permute.xlu0 %1887 }
 0x3e3   : > { %v2386_v53 = vpop.permute.xlu1 %2385  ;;  %v2669_v56 = vsel %vm2651_vm4, %v2644_v50, %v1888_v42 }
 0x3e4   : > { %v2770_v25 = vsel %vm2751_vm3, %v2745_v51, %v2386_v53 }
 0x3e6   : > { %v12519_v52 = vpop.permute.xlu0 %8098 }
 0x3e7   : > { %v1890_v10 = vpop.permute.xlu1 %1889  ;;  %v8100_v49 = vunpack.i.l.bf16 %v12519_v52 }
 0x3e8   : > { %v2670_v6 = vsel %vm2651_vm4, %v2645_v7, %v1890_v10 }
 0x3ea   : > { %v2517_v36 = vpop.permute.xlu0 %2516 }
 0x3eb   : > { %v12521_v8 = vpop.permute.xlu1 %8103  ;;  %v2794_v27 = vsel %vm2776_vm5, %v2769_v29, %v2517_v36 }
 0x3ec   : > { %v8105_v23 = vunpack.i.l.bf16 %v12521_v8 }
 0x3ee   : > { %v12523_v39 = vpop.permute.xlu0 %8108  ;;  %v2743_v38 = vsel %vm2726_vm0, %v8100_v49, %v8105_v23  ;;  %v8106_v23 = vunpack.i.h.bf16 %v12521_v8 }
 0x3ef   : > { %v2519_v21 = vpop.permute.xlu1 %2518  ;;  %v8110_v41 = vunpack.i.l.bf16 %v12523_v39 }
 0x3f0   : > { %v2795_v40 = vsel %vm2776_vm5, %v2770_v25, %v2519_v21  ;;  %v8111_v25 = vunpack.i.h.bf16 %v12523_v39 }
 0x3f1   : > { %v7350_v35 = vpop.f32.mrb[0].mxu0  ;;  %v2643_v44 = vsel %vm2626_vm2, %v12089_v55, %v8110_v41 }
 0x3f2   : > { %v1999_v37 = vpop.permute.xlu0 %1998  ;;  %v7351_v17 = vpop.f32.mrb[1].mxu0 }
 0x3f3   : > { %v7352_v31 = vadd.f32 %v7351_v17, %v7350_v35  ;;  %v1997_v33 = vpop.permute.xlu1 %1996  ;;  %v7353_v45 = vpop.f32.mrb[2].mxu0  ;;  %v2695_v28 = vsel %vm2676_vm6, %v2670_v6, %v1999_v37 }
 0x3f4   : > { %v7354_v2 = vpop.f32.mrb[3].mxu0  ;;  %v2694_v14 = vsel %vm2676_vm6, %v2669_v56, %v1997_v33  ;;  %v2720_v60 = vsel %vm17029_vm9, %v2695_v28, %v12516_v54  ;;  %vm17034_vm9 = vmmov %vm17033_vm8 }
 0x3f5   : > { %v3199_v19 = vadd.f32 %v7352_v31, %v12528_v22  ;;  %v7355_v13 = vadd.f32 %v7354_v2, %v7353_v45  ;;  %v2719_v61 = vsel %vm17030_vm11, %v2694_v14, %v12510_v46  ;;  %vm17035_vm11 = vmmov %vm17032_vm7 }
 0x3f6   : > { %v2589_v32 = vpop.permute.xlu0 %2588  ;;  %v7216_v54 = vcombine.low %v2719_v61, %v2720_v60 }
 0x3f7   : > { %v3202_v11 = vadd.f32 %v7355_v13, %v12528_v22  ;;  %v12532_v57 = vpop.permute.xlu1 %8113  ;;  %v3269_v1 = vmax.f32 %v3199_v19, 0.0  ;;  %v2819_v47 = vsel %vm2801_vm10, %v2794_v27, %v2589_v32 }
 0x3f8   : > { %v8115_v59 = vunpack.i.l.bf16 %v12532_v57 }
 0x3f9   : > { %v3270_v34 = vmax.f32 %v3202_v11, 0.0 }
 0x3fa   : > { %v12534_v9 = vpop.permute.xlu0 %8118  ;;  %v2768_v53 = vsel %vm2751_vm3, %v2743_v38, %v8115_v59  ;;  %v8101_v59 = vunpack.i.h.bf16 %v12519_v52 }
 0x3fb   : > { %v3287_v30 = vpack.c.bf16 %v3270_v34, %v3269_v1  ;;  %v2591_v5 = vpop.permute.xlu1 %2590  ;;  %v8120_v26 = vunpack.i.l.bf16 %v12534_v9 }
 0x3fc   : > { %v12569_v12 = vsel %vm2801_vm10, %v2795_v40, %v2591_v5  ;;  %v2747_v29 = vsel %vm2726_vm0, %v8101_v59, %v8106_v23 }
 0x3fd   : > { %7780 = vmatmul.mubr.msk.bf16.vlgmr.msra.gmra.mrb[0].mxu1 %vm3335_vm15, %v3287_v30  ;;  %v2668_v15 = vsel %vm2651_vm4, %v2643_v44, %v8120_v26  ;;  %v7217_v35 = vcombine.low %v2819_v47, %v12569_v12 }
 0x3fe   : > { %v12548_v63 = vpop.permute.xlu0 %8128  ;;  %7783 = vmatprep.mubr.msk.bf16.mxu1 %vm17028_vm1, %v17001_v4 }
 0x3ff   : > { %v8130_v24 = vunpack.i.l.bf16 %v12548_v63  ;;  %v12556_v0 = vpop.permute.xlu1 %8123  ;;  %v8131_v28 = vunpack.i.h.bf16 %v12548_v63 }
 0x400   : > { %v8125_v58 = vunpack.i.l.bf16 %v12556_v0 }
 0x401   : > { %v2693_v62 = vsel %vm2676_vm6, %v2668_v15, %v8130_v24  ;;  %v8121_v24 = vunpack.i.h.bf16 %v12534_v9  ;;  %v2647_v15 = vsel %vm2626_vm2, %v12075_v20, %v8111_v25 }
 0x402   : > { %v1783_v55 = vpop.permute.xlu0 %1782  ;;  %v2793_v36 = vsel %vm2776_vm5, %v2768_v53, %v8125_v58  ;;  %v2718_v17 = vsel %vm17031_vm14, %v2693_v62, %v8100_v49  ;;  %v8126_v49 = vunpack.i.h.bf16 %v12556_v0  ;;  %v2902_v58 = vcombine.high %v2720_v60, %v12569_v12 }
 0x403   : > { %v12578_v42 = vpop.permute.xlu1 %8133  ;;  %v2994_v1 = vpack.c.bf16 %v7216_v54, %v2718_v17  ;;  %v2646_v26 = vsel %vm2626_vm2, %v11965_v18, %v1783_v55  ;;  %v8116_v18 = vunpack.i.h.bf16 %v12532_v57  ;;  %v2672_v52 = vsel %vm2651_vm4, %v2647_v15, %v8121_v24 }
 0x404   : > { %v8135_v10 = vunpack.i.l.bf16 %v12578_v42  ;;  %v7356_v21 = vpop.f32.mrb[4].mxu0  ;;  %v8136_v57 = vunpack.i.h.bf16 %v12578_v42  ;;  %v2697_v38 = vsel %vm2676_vm6, %v2672_v52, %v8131_v28 }
 0x405   : > { %v7357_v37 = vpop.f32.mrb[5].mxu0  ;;  %v2772_v0 = vsel %vm2751_vm3, %v2747_v29, %v8116_v18  ;;  %v2722_v53 = vsel %vm17034_vm9, %v2697_v38, %v8101_v59 }
 0x406   : > { %v2818_v31 = vsel %vm2801_vm10, %v2793_v36, %v8135_v10  ;;  %v7358_v46 = vadd.f32 %v7357_v37, %v7356_v21  ;;  %v2255_v33 = vpop.permute.xlu0 %2254  ;;  %v7359_v45 = vpop.f32.mrb[6].mxu0  ;;  %v2797_v61 = vsel %vm2776_vm5, %v2772_v0, %v8126_v49 }
 0x407   : > { %v2110_v2 = vpop.permute.xlu1 %2109  ;;  %v7360_v19 = vpop.f32.mrb[7].mxu0  ;;  %v2995_v13 = vpack.c.bf16 %v7217_v35, %v2818_v31  ;;  %v2822_v42 = vsel %vm2801_vm10, %v2797_v61, %v8136_v57 }
 0x408   : > { %v3207_v32 = vadd.f32 %v7358_v46, %v12528_v22  ;;  %v7361_v11 = vadd.f32 %v7360_v19, %v7359_v45  ;;  %v2746_v44 = vsel %vm2726_vm0, %v2110_v2, %v2255_v33 }
 0x409   : > { %7247 = vmatprep.mubr.msk.bf16.mxu0 %vm17032_vm7, %v2995_v13 }
 0x40a   : > { %v3210_v34 = vadd.f32 %v7361_v11, %v12528_v22  ;;  %v2388_v30 = vpop.permute.xlu0 %2387  ;;  %3245 = vmatmul.mubr.bf16.gmra.mrb[24].mxu0 %v2994_v1  ;;  %v3271_v41 = vmax.f32 %v3207_v32, 0.0  ;;  %v3306_v1 = vlaneseq }
 0x40b   : > { %v1892_v5 = vpop.permute.xlu1 %1891  ;;  %v2771_v14 = vsel %vm2751_vm3, %v2746_v44, %v2388_v30 }
 0x40c   : > { %v3272_v50 = vmax.f32 %v3210_v34, 0.0  ;;  %v2671_v7 = vsel %vm2651_vm4, %v2646_v26, %v1892_v5 }
 0x40e   : > { %v3288_v48 = vpack.c.bf16 %v3272_v50, %v3271_v41  ;;  %v2521_v51 = vpop.permute.xlu0 %2520  ;;  %v12626_v50 = vshrl.u32 %v3306_v1, 7 }
 0x40f   : > { %v2001_v56 = vpop.permute.xlu1 %2000  ;;  %v2796_v8 = vsel %vm2776_vm5, %v2771_v14, %v2521_v51  ;;  %v12643_v14 = vld [vmem:[%s16407_s4] sm:$0x1] }
 0x410   : > { %v2696_v6 = vsel %vm2676_vm6, %v2671_v7, %v2001_v56  ;;  %7784 = vmatmul.mubr.msk.bf16.gmra.mrb[4].mxu1 %vm3335_vm15, %v3288_v48 }
 0x411   : > { %7787 = vmatprep.mubr.msk.bf16.mxu1 %vm17028_vm1, %v17001_v4  ;;  %v2721_v9 = vsel %vm17033_vm8, %v2696_v6, %v2110_v2 }
 0x412   : > { %v1791_v39 = vpop.permute.xlu0 %1790  ;;  %v7218_v62 = vcombine.low %v2902_v58, %v2721_v9 }
 0x413   : > { %v2593_v40 = vpop.permute.xlu1 %2592  ;;  %v2650_v30 = vsel %vm2626_vm2, %v12347_v3, %v1791_v39  ;;  %v3308_v3 = vsub.s32 0, %v12626_v50 }
 0x414   : > { %v2821_v63 = vsel %vm2801_vm10, %v2796_v8, %v2593_v40  ;;  %v2996_v21 = vpack.c.bf16 %v2722_v53, %v7218_v62 }
 0x415   : > { %v2903_v55 = vcombine.low %v2721_v9, %v2821_v63 }
 0x416   : > { %v2263_v27 = vpop.permute.xlu0 %2262 }
 0x417   : > { %v7219_v20 = vcombine.high %v12569_v12, %v2903_v55  ;;  %v2118_v60 = vpop.permute.xlu1 %2117 }
 0x418   : > { %v2750_v26 = vsel %vm2726_vm0, %v2118_v60, %v2263_v27 }
 0x419   : > { %v2997_v47 = vpack.c.bf16 %v2822_v42, %v7219_v20 }
 0x41a   : > { %v1900_v10 = vpop.permute.xlu0 %1899 }
 0x41b   : > { %v1789_v35 = vpop.permute.xlu1 %1788  ;;  %7248 = vmatprep.mubr.msk.bf16.mxu0 %vm17035_vm11, %v2997_v47  ;;  %v2675_v48 = vsel %vm2651_vm4, %v2650_v30, %v1900_v10 }
 0x41c   : > { %3253 = vmatmul.mubr.bf16.gmra.mrb[28].mxu0 %v2996_v21  ;;  %v2649_v5 = vsel %vm2626_vm2, %v12365_v16, %v1789_v35 }
 0x41e   : > { %v2261_v36 = vpop.permute.xlu0 %2260 }
 0x41f   : > { %v2116_v37 = vpop.permute.xlu1 %2115 }
 0x420   : > { %v2749_v7 = vsel %vm2726_vm0, %v2116_v37, %v2261_v36 }
 0x422   : > { %v1898_v17 = vpop.permute.xlu0 %1897 }
 0x423   : > { %v2396_v54 = vpop.permute.xlu1 %2395  ;;  %v2674_v51 = vsel %vm2651_vm4, %v2649_v5, %v1898_v17 }
 0x424   : > { %v2775_v56 = vsel %vm2751_vm3, %v2750_v26, %v2396_v54 }
 0x426   : > { %v2114_v31 = vpop.permute.xlu0 %2113 }
 0x427   : > { %v2009_v46 = vpop.permute.xlu1 %2008 }
 0x428   : > { %v2700_v16 = vsel %vm2676_vm6, %v2675_v48, %v2009_v46 }
 0x42a   : > { %v2394_v33 = vpop.permute.xlu0 %2393 }
 0x42b   : > { %v2259_v12 = vpop.permute.xlu1 %2258  ;;  %v2774_v23 = vsel %vm2751_vm3, %v2749_v7, %v2394_v33 }
 0x42c   : > { %v2748_v29 = vsel %vm2726_vm0, %v2114_v31, %v2259_v12  ;;  %vm17039_vm0 = vmmov %vm17032_vm7 }
 0x42e   : > { %v1787_v45 = vpop.permute.xlu0 %1786 }
 0x42f   : > { %v2529_v2 = vpop.permute.xlu1 %2528  ;;  %v2648_v24 = vsel %vm2626_vm2, %v11931_v43, %v1787_v45  ;;  %v12650_v43 = vrot.slane %v12643_v14, %v3308_v3  ;;  %vm17036_vm2 = vmmov %vm17033_vm8 }
 0x430   : > { %v2800_v44 = vsel %vm2776_vm5, %v2775_v56, %v2529_v2  ;;  %vm17038_vm14 = vmmov %vm17036_vm2 }
 0x432   : > { %v2392_v19 = vpop.permute.xlu0 %2391 }
 0x433   : > { %v2007_v13 = vpop.permute.xlu1 %2006  ;;  %v2773_v55 = vsel %vm2751_vm3, %v2748_v29, %v2392_v19  ;;  %vm3490_vm3 = vcmask 257024  }
 0x434   : > { %v2699_v25 = vsel %vm2676_vm6, %v2674_v51, %v2007_v13  ;;  %3503 = vst.msk [vmem:[#allocation3 + $0x70] sm:$0xf] %vm3490_vm3, %v17001_v4  ;;  %3491 = vst.msk [vmem:[#allocation3 + $0x10] sm:$0xf] %vm3490_vm3, %v17001_v4 }
 0x435   : > { %v2724_v9 = vsel %vm17036_vm2, %v2699_v25, %v2116_v37  ;;  %3494 = vst.msk [vmem:[#allocation3 + $0x28] sm:$0xf] %vm3490_vm3, %v17001_v4  ;;  %3497 = vst.msk [vmem:[#allocation3 + $0x40] sm:$0xf] %vm3490_vm3, %v17001_v4 }
 0x436   : > { %v2601_v32 = vpop.permute.xlu0 %2600  ;;  %3500 = vst.msk [vmem:[#allocation3 + $0x58] sm:$0xf] %vm3490_vm3, %v17001_v4  ;;  %3506 = vst.msk [vmem:[#allocation3 + $0x88] sm:$0xf] %vm3490_vm3, %v17001_v4 }
 0x437   : > { %v2527_v11 = vpop.permute.xlu1 %2526  ;;  %v2825_v15 = vsel %vm2801_vm10, %v2800_v44, %v2601_v32  ;;  %3509 = vst.msk [vmem:[#allocation3 + $0xa0] sm:$0xf] %vm3490_vm3, %v17001_v4  ;;  %3512 = vst.msk [vmem:[#allocation3 + $0xb8] sm:$0xf] %vm3490_vm3, %v17001_v4 }
 0x438   : > { %v2799_v39 = vsel %vm2776_vm5, %v2774_v23, %v2527_v11  ;;  %3515 = vst.msk [vmem:[#allocation3 + $0xd0] sm:$0xf] %vm3490_vm3, %v17001_v4  ;;  %3518 = vst.msk [vmem:[#allocation3 + $0xe8] sm:$0xf] %vm3490_vm3, %v17001_v4 }
 0x439   : > { %3521 = vst.msk [vmem:[#allocation3 + $0x100] sm:$0xf] %vm3490_vm3, %v17001_v4  ;;  %3524 = vst.msk [vmem:[#allocation3 + $0x118] sm:$0xf] %vm3490_vm3, %v17001_v4 }
 0x43a   : > { %v2525_v34 = vpop.permute.xlu0 %2524  ;;  %3527 = vst.msk [vmem:[#allocation3 + $0x130] sm:$0xf] %vm3490_vm3, %v17001_v4  ;;  %3530 = vst.msk [vmem:[#allocation3 + $0x148] sm:$0xf] %vm3490_vm3, %v17001_v4 }
 0x43b   : > { %v1896_v41 = vpop.permute.xlu1 %1895  ;;  %v2798_v61 = vsel %vm2776_vm5, %v2773_v55, %v2525_v34  ;;  %3533 = vst.msk [vmem:[#allocation3 + $0x160] sm:$0xf] %vm3490_vm3, %v17001_v4  ;;  %3536 = vst.msk [vmem:[#allocation3 + $0x178] sm:$0xf] %vm3490_vm3, %v17001_v4  ;;  %vm4321_vm5 = vcmask 785408  }
 0x43c   : > { %v2673_v59 = vsel %vm2651_vm4, %v2648_v24, %v1896_v41  ;;  %vm17037_vm4 = vmmov %vm17036_vm2  ;;  %3539 = vst.msk [vmem:[#allocation3 + $0x190] sm:$0xf] %vm3490_vm3, %v17001_v4  ;;  %v12829_v2 = vld [vmem:[#allocation3 + $0x28] sm:$0xf] }
 0x43d   : > { %v7362_v6 = vpop.f32.mrb[8].mxu0  ;;  %v2725_v0 = vsel %vm17037_vm4, %v2700_v16, %v2118_v60  ;;  %3542 = vst.msk [vmem:[#allocation3 + $0x1a8] sm:$0xf] %vm3490_vm3, %v17001_v4  ;;  %3545 = vst.msk [vmem:[#allocation3 + $0x1c0] sm:$0xf] %vm3490_vm3, %v17001_v4 }
 0x43e   : > { %v2005_v18 = vpop.permute.xlu0 %2004  ;;  %v7363_v28 = vpop.f32.mrb[9].mxu0  ;;  %v2909_v38 = vcombine.low %v2725_v0, %v2825_v15  ;;  %3548 = vst.msk [vmem:[#allocation3 + $0x1d8] sm:$0xf] %vm3490_vm3, %v17001_v4 }
 0x43f   : > { %v7364_v49 = vadd.f32 %v7363_v28, %v7362_v6  ;;  %v2599_v8 = vpop.permute.xlu1 %2598  ;;  %v7365_v40 = vpop.f32.mrb[10].mxu0  ;;  %v2698_v58 = vsel %vm2676_vm6, %v2673_v59, %v2005_v18  ;;  %vm17073_vm6 = vcmask 1044480  }
 0x440   : > { %v2824_v57 = vsel %vm2801_vm10, %v2799_v39, %v2599_v8  ;;  %v7366_v63 = vpop.f32.mrb[11].mxu0  ;;  %v2723_v20 = vsel %vm17038_vm14, %v2698_v58, %v2114_v31  ;;  %v3486_v31 = vmax.f32 %v12643_v14, 0.0  ;;  %vm17127_vm14 = vcmask 1043456  }
 0x441   : > { %v2908_v52 = vcombine.high %v2724_v9, %v2824_v57  ;;  %v3215_v62 = vadd.f32 %v7364_v49, %v12528_v22  ;;  %v7367_v27 = vadd.f32 %v7366_v63, %v7365_v40  ;;  %v7223_v21 = vcombine.high %v2824_v57, %v2909_v38 }
 0x442   : > { %v7220_v36 = vcombine.low %v2723_v20, %v2724_v9  ;;  %v3553_v33 = vrot.slane %v3486_v31, %v3308_v3 }
 0x443   : > { %v2597_v42 = vpop.permute.xlu1 %2596  ;;  %v3218_v47 = vadd.f32 %v7367_v27, %v12528_v22  ;;  %v7222_v10 = vcombine.low %v2908_v52, %v2725_v0  ;;  %v3273_v37 = vmax.f32 %v3215_v62, 0.0 }
 0x444   : > { %v2823_v53 = vsel %vm2801_vm10, %v2798_v61, %v2597_v42  ;;  %vm3487_vm10 = vcmask 261120  }
 0x445   : > { %v7221_v35 = vcombine.low %v2823_v53, %v2824_v57  ;;  %v3274_v17 = vmax.f32 %v3218_v47, 0.0  ;;  %v2998_v46 = vpack.c.bf16 %v7222_v10, %v7220_v36  ;;  %3501 = vst.msk [vmem:[#allocation3 + $0x60] sm:$0xff] %vm3487_vm10, %v17001_v4  ;;  %3502 = vst.msk [vmem:[#allocation3 + $0x68] sm:$0xff] %vm3487_vm10, %v17001_v4 }
 0x446   : > { %3488 = vst.msk [vmem:[#allocation3] sm:$0xff] %vm3487_vm10, %v17001_v4  ;;  %3489 = vst.msk [vmem:[#allocation3 + $0x8] sm:$0xff] %vm3487_vm10, %v17001_v4 }
 0x447   : > { %v2999_v60 = vpack.c.bf16 %v7223_v21, %v7221_v35  ;;  %v3289_v54 = vpack.c.bf16 %v3274_v17, %v3273_v37  ;;  %3492 = vst.msk [vmem:[#allocation3 + $0x18] sm:$0xff] %vm3487_vm10, %v17001_v4  ;;  %3493 = vst.msk [vmem:[#allocation3 + $0x20] sm:$0xff] %vm3487_vm10, %v17001_v4 }
 0x448   : > { %3495 = vst.msk [vmem:[#allocation3 + $0x30] sm:$0xff] %vm3487_vm10, %v17001_v4  ;;  %3496 = vst.msk [vmem:[#allocation3 + $0x38] sm:$0xff] %vm3487_vm10, %v17001_v4 }
 0x449   : > { %7249 = vmatprep.mubr.msk.bf16.mxu0 %vm17039_vm0, %v2999_v60  ;;  %7788 = vmatmul.mubr.msk.bf16.gmra.mrb[8].mxu1 %vm3335_vm15, %v3289_v54  ;;  %3498 = vst.msk [vmem:[#allocation3 + $0x48] sm:$0xff] %vm3487_vm10, %v17001_v4  ;;  %3499 = vst.msk [vmem:[#allocation3 + $0x50] sm:$0xff] %vm3487_vm10, %v17001_v4 }
 0x44a   : > { %3261 = vmatmul.mubr.bf16.gmra.mrb[32].mxu0 %v2998_v46  ;;  %7791 = vmatprep.mubr.msk.bf16.mxu1 %vm17028_vm1, %v17001_v4  ;;  %3504 = vst.msk [vmem:[#allocation3 + $0x78] sm:$0xff] %vm3487_vm10, %v17001_v4  ;;  %3505 = vst.msk [vmem:[#allocation3 + $0x80] sm:$0xff] %vm3487_vm10, %v17001_v4 }
 0x44b   : > { %3507 = vst.msk [vmem:[#allocation3 + $0x90] sm:$0xff] %vm3487_vm10, %v17001_v4  ;;  %3508 = vst.msk [vmem:[#allocation3 + $0x98] sm:$0xff] %vm3487_vm10, %v17001_v4 }
 0x44c   : > { %3510 = vst.msk [vmem:[#allocation3 + $0xa8] sm:$0xff] %vm3487_vm10, %v17001_v4  ;;  %3511 = vst.msk [vmem:[#allocation3 + $0xb0] sm:$0xff] %vm3487_vm10, %v17001_v4 }
 0x44d   : > { %3513 = vst.msk [vmem:[#allocation3 + $0xc0] sm:$0xff] %vm3487_vm10, %v17001_v4  ;;  %3514 = vst.msk [vmem:[#allocation3 + $0xc8] sm:$0xff] %vm3487_vm10, %v17001_v4 }
 0x44e   : > { %3516 = vst.msk [vmem:[#allocation3 + $0xd8] sm:$0xff] %vm3487_vm10, %v17001_v4  ;;  %3517 = vst.msk [vmem:[#allocation3 + $0xe0] sm:$0xff] %vm3487_vm10, %v17001_v4  ;;  %v12825_v12 = vld [vmem:[#allocation3 + $0x18] sm:$0xff]  ;;  %v12827_v45 = vld [vmem:[#allocation3 + $0x20] sm:$0xff] }
 0x44f   : > { %3519 = vst.msk [vmem:[#allocation3 + $0xf0] sm:$0xff] %vm3487_vm10, %v17001_v4  ;;  %3520 = vst.msk [vmem:[#allocation3 + $0xf8] sm:$0xff] %vm3487_vm10, %v17001_v4  ;;  %v8137_v19 = vpack.i.bf16 %v12827_v45, %v12825_v12 }
 0x450   : > { %3522 = vst.msk [vmem:[#allocation3 + $0x108] sm:$0xff] %vm3487_vm10, %v17001_v4  ;;  %3523 = vst.msk [vmem:[#allocation3 + $0x110] sm:$0xff] %vm3487_vm10, %v17001_v4 }
 0x451   : > { %3525 = vst.msk [vmem:[#allocation3 + $0x120] sm:$0xff] %vm3487_vm10, %v17001_v4  ;;  %3526 = vst.msk [vmem:[#allocation3 + $0x128] sm:$0xff] %vm3487_vm10, %v17001_v4  ;;  %8138 = vrot.lane.b32.xlu0 %v8137_v19, %s9225_s29 }
 0x452   : > { %3528 = vst.msk [vmem:[#allocation3 + $0x138] sm:$0xff] %vm3487_vm10, %v17001_v4  ;;  %3529 = vst.msk [vmem:[#allocation3 + $0x140] sm:$0xff] %vm3487_vm10, %v17001_v4 }
 0x453   : > { %3531 = vst.msk [vmem:[#allocation3 + $0x150] sm:$0xff] %vm3487_vm10, %v17001_v4  ;;  %3532 = vst.msk [vmem:[#allocation3 + $0x158] sm:$0xff] %vm3487_vm10, %v17001_v4 }
 0x454   : > { %3534 = vst.msk [vmem:[#allocation3 + $0x168] sm:$0xff] %vm3487_vm10, %v17001_v4  ;;  %3535 = vst.msk [vmem:[#allocation3 + $0x170] sm:$0xff] %vm3487_vm10, %v17001_v4 }
 0x455   : > { %3537 = vst.msk [vmem:[#allocation3 + $0x180] sm:$0xff] %vm3487_vm10, %v17001_v4  ;;  %3538 = vst.msk [vmem:[#allocation3 + $0x188] sm:$0xff] %vm3487_vm10, %v17001_v4 }
 0x456   : > { %3540 = vst.msk [vmem:[#allocation3 + $0x198] sm:$0xff] %vm3487_vm10, %v17001_v4  ;;  %3541 = vst.msk [vmem:[#allocation3 + $0x1a0] sm:$0xff] %vm3487_vm10, %v17001_v4 }
 0x457   : > { %3543 = vst.msk [vmem:[#allocation3 + $0x1b0] sm:$0xff] %vm3487_vm10, %v17001_v4  ;;  %3544 = vst.msk [vmem:[#allocation3 + $0x1b8] sm:$0xff] %vm3487_vm10, %v17001_v4 }
 0x458   : > { %3546 = vst.msk [vmem:[#allocation3 + $0x1c8] sm:$0xff] %vm3487_vm10, %v17001_v4  ;;  %3547 = vst.msk [vmem:[#allocation3 + $0x1d0] sm:$0xff] %vm3487_vm10, %v17001_v4 }
 0x459   : > { %3560 = vst.msk [vmem:[#allocation3 + $0x62] sm:$0xff] %vm3487_vm10, %v3553_v33  ;;  %3561 = vst.msk [vmem:[#allocation3 + $0x6a] sm:$0xff] %vm3487_vm10, %v3553_v33 }
 0x45a   : > { %3556 = vst.msk [vmem:[#allocation3 + $0x32] sm:$0xff] %vm3487_vm10, %v3553_v33  ;;  %3557 = vst.msk [vmem:[#allocation3 + $0x3a] sm:$0xff] %vm3487_vm10, %v3553_v33 }
 0x45b   : > { %3558 = vst.msk [vmem:[#allocation3 + $0x4a] sm:$0xff] %vm3487_vm10, %v3553_v33  ;;  %3559 = vst.msk [vmem:[#allocation3 + $0x52] sm:$0xff] %vm3487_vm10, %v3553_v33 }
 0x45c   : > { %3562 = vst.msk [vmem:[#allocation3 + $0x7a] sm:$0xff] %vm3487_vm10, %v3553_v33  ;;  %3563 = vst.msk [vmem:[#allocation3 + $0x82] sm:$0xff] %vm3487_vm10, %v3553_v33 }
 0x45d   : > { %3564 = vst.msk [vmem:[#allocation3 + $0x92] sm:$0xff] %vm3487_vm10, %v3553_v33  ;;  %3565 = vst.msk [vmem:[#allocation3 + $0x9a] sm:$0xff] %vm3487_vm10, %v3553_v33 }
 0x45e   : > { %3566 = vst.msk [vmem:[#allocation3 + $0xaa] sm:$0xff] %vm3487_vm10, %v3553_v33  ;;  %3567 = vst.msk [vmem:[#allocation3 + $0xb2] sm:$0xff] %vm3487_vm10, %v3553_v33 }
 0x45f   : > { %3568 = vst.msk [vmem:[#allocation3 + $0xc2] sm:$0xff] %vm3487_vm10, %v3553_v33  ;;  %3569 = vst.msk [vmem:[#allocation3 + $0xca] sm:$0xff] %vm3487_vm10, %v3553_v33 }
 0x460   : > { %3570 = vst.msk [vmem:[#allocation3 + $0xda] sm:$0xff] %vm3487_vm10, %v3553_v33  ;;  %3571 = vst.msk [vmem:[#allocation3 + $0xe2] sm:$0xff] %vm3487_vm10, %v3553_v33  ;;  %v12877_v46 = vld [vmem:[#allocation3 + $0x70] sm:$0xf] }
 0x461   : > { %3572 = vst.msk [vmem:[#allocation3 + $0xf2] sm:$0xff] %vm3487_vm10, %v3553_v33  ;;  %3573 = vst.msk [vmem:[#allocation3 + $0xfa] sm:$0xff] %vm3487_vm10, %v3553_v33  ;;  %v12833_v13 = vld [vmem:[#allocation3 + $0x30] sm:$0xff]  ;;  %v12842_v34 = vld [vmem:[#allocation3 + $0x38] sm:$0xff] }
 0x462   : > { %3574 = vst.msk [vmem:[#allocation3 + $0x10a] sm:$0xff] %vm3487_vm10, %v3553_v33  ;;  %3575 = vst.msk [vmem:[#allocation3 + $0x112] sm:$0xff] %vm3487_vm10, %v3553_v33  ;;  %v8142_v32 = vpack.i.bf16 %v12833_v13, %v12829_v2  ;;  %v12838_v11 = vld [vmem:[#allocation3 + $0x48] sm:$0xff]  ;;  %v12840_v1 = vld [vmem:[#allocation3 + $0x50] sm:$0xff] }
 0x463   : > { %3576 = vst.msk [vmem:[#allocation3 + $0x122] sm:$0xff] %vm3487_vm10, %v3553_v33  ;;  %3577 = vst.msk [vmem:[#allocation3 + $0x12a] sm:$0xff] %vm3487_vm10, %v3553_v33  ;;  %v12844_v30 = vld [vmem:[#allocation3 + $0x40] sm:$0xf]  ;;  %v12849_v5 = vpack.i.bf16 %v12840_v1, %v12838_v11  ;;  %v12875_v54 = vld [vmem:[#allocation3 + $0x58] sm:$0xf] }
 0x464   : > { %3578 = vst.msk [vmem:[#allocation3 + $0x13a] sm:$0xff] %vm3487_vm10, %v3553_v33  ;;  %3579 = vst.msk [vmem:[#allocation3 + $0x142] sm:$0xff] %vm3487_vm10, %v3553_v33  ;;  %8143 = vrot.lane.b32.xlu1 %v8142_v32, %s9225_s29  ;;  %v8147_v41 = vpack.i.bf16 %v12844_v30, %v12842_v34 }
 0x465   : > { %3580 = vst.msk [vmem:[#allocation3 + $0x152] sm:$0xff] %vm3487_vm10, %v3553_v33  ;;  %3581 = vst.msk [vmem:[#allocation3 + $0x15a] sm:$0xff] %vm3487_vm10, %v3553_v33 }
 0x466   : > { %3582 = vst.msk [vmem:[#allocation3 + $0x16a] sm:$0xff] %vm3487_vm10, %v3553_v33  ;;  %3583 = vst.msk [vmem:[#allocation3 + $0x172] sm:$0xff] %vm3487_vm10, %v3553_v33  ;;  %8148 = vrot.lane.b32.xlu0 %v8147_v41, %s9225_s29 }
 0x467   : > { %3584 = vst.msk [vmem:[#allocation3 + $0x182] sm:$0xff] %vm3487_vm10, %v3553_v33  ;;  %3585 = vst.msk [vmem:[#allocation3 + $0x18a] sm:$0xff] %vm3487_vm10, %v3553_v33 }
 0x468   : > { %3586 = vst.msk [vmem:[#allocation3 + $0x19a] sm:$0xff] %vm3487_vm10, %v3553_v33  ;;  %3587 = vst.msk [vmem:[#allocation3 + $0x1a2] sm:$0xff] %vm3487_vm10, %v3553_v33  ;;  %8153 = vrot.lane.b32.xlu1 %v12849_v5, %s9225_s29 }
 0x469   : > { %vm17129_vm0 = vmmov %vm17127_vm14 }
 0x46d   : > { %v7368_v50 = vpop.f32.mrb[12].mxu0 }
 0x46e   : > { %v7369_v26 = vpop.f32.mrb[13].mxu0 }
 0x46f   : > { %v7370_v48 = vadd.f32 %v7369_v26, %v7368_v50  ;;  %v7371_v51 = vpop.f32.mrb[14].mxu0 }
 0x470   : > { %v7372_v7 = vpop.f32.mrb[15].mxu0 }
 0x471   : > { %v3223_v56 = vadd.f32 %v7370_v48, %v12528_v22  ;;  %v7373_v25 = vadd.f32 %v7372_v7, %v7371_v51 }
 0x473   : > { %v3226_v6 = vadd.f32 %v7373_v25, %v12528_v22  ;;  %v3275_v3 = vmax.f32 %v3223_v56, 0.0 }
 0x475   : > { %v3276_v16 = vmax.f32 %v3226_v6, 0.0 }
 0x477   : > { %v3290_v23 = vpack.c.bf16 %v3276_v16, %v3275_v3 }
 0x479   : > { %7792 = vmatmul.mubr.msk.bf16.gmra.mrb[12].mxu1 %vm3335_vm15, %v3290_v23 }
 0x47a   : > { %7795 = vmatprep.mubr.msk.bf16.mxu1 %vm17028_vm1, %v17001_v4 }
 0x47f   : > { %v7374_v24 = vpop.f32.mrb[16].mxu0 }
 0x480   : > { %v7375_v44 = vpop.f32.mrb[17].mxu0 }
 0x481   : > { %v7376_v18 = vadd.f32 %v7375_v44, %v7374_v24  ;;  %v7377_v28 = vpop.f32.mrb[18].mxu0 }
 0x482   : > { %v7378_v14 = vpop.f32.mrb[19].mxu0 }
 0x483   : > { %v3231_v39 = vadd.f32 %v7376_v18, %v12528_v22  ;;  %v7379_v59 = vadd.f32 %v7378_v14, %v7377_v28 }
 0x485   : > { %v3234_v49 = vadd.f32 %v7379_v59, %v12528_v22  ;;  %v3277_v8 = vmax.f32 %v3231_v39, 0.0 }
 0x487   : > { %v3278_v40 = vmax.f32 %v3234_v49, 0.0 }
 0x489   : > { %v3291_v9 = vpack.c.bf16 %v3278_v40, %v3277_v8 }
 0x48b   : > { %7796 = vmatmul.mubr.msk.bf16.gmra.mrb[16].mxu1 %vm3335_vm15, %v3291_v9 }
 0x48c   : > { %7799 = vmatprep.mubr.msk.bf16.mxu1 %vm17028_vm1, %v17001_v4 }
 0x4ad   : > { %v7380_v15 = vpop.f32.mrb[20].mxu0 }
 0x4ae   : > { %v7381_v58 = vpop.f32.mrb[21].mxu0 }
 0x4af   : > { %v7382_v57 = vadd.f32 %v7381_v58, %v7380_v15  ;;  %v7383_v63 = vpop.f32.mrb[22].mxu0 }
 0x4b0   : > { %v7384_v29 = vpop.f32.mrb[23].mxu0 }
 0x4b1   : > { %v3239_v52 = vadd.f32 %v7382_v57, %v12528_v22  ;;  %v7385_v55 = vadd.f32 %v7384_v29, %v7383_v63 }
 0x4b3   : > { %v3242_v0 = vadd.f32 %v7385_v55, %v12528_v22  ;;  %v3279_v62 = vmax.f32 %v3239_v52, 0.0 }
 0x4b5   : > { %v3280_v27 = vmax.f32 %v3242_v0, 0.0 }
 0x4b7   : > { %v3292_v38 = vpack.c.bf16 %v3280_v27, %v3279_v62 }
 0x4b9   : > { %7800 = vmatmul.mubr.msk.bf16.gmra.mrb[20].mxu1 %vm3335_vm15, %v3292_v38  ;;  %v12917_v38 = vld [vmem:[#allocation3 + $0x88] sm:$0xf] }
 0x4ba   : > { %7803 = vmatprep.mubr.msk.bf16.mxu1 %vm17028_vm1, %v17001_v4  ;;  %17042 = vst [vmem:[#allocation11_spill] sm:$0xff] %v12917_v38 }
 0x4d0   : > { %v3397_v61 = vpop.f32.mrb[0].mxu1 }
 0x4d1   : > { %v3398_v20 = vadd.f32 %v3397_v61, %v12650_v43  ;;  %v7781_v42 = vpop.f32.mrb[1].mxu1 }
 0x4d2   : > { %v3400_v47 = vpop.f32.mrb[2].mxu1 }
 0x4d3   : > { %v3468_v53 = vmax.f32 %v3398_v20, 0.0  ;;  %v3401_v10 = vadd.f32 %v3400_v47, %v12650_v43  ;;  %v7782_v21 = vpop.f32.mrb[3].mxu1 }
 0x4d5   : > { %v3606_v35 = vcombine.high %v3468_v53, %v3468_v53  ;;  %v3469_v36 = vmax.f32 %v3401_v10, 0.0 }
 0x4d7   : > { %v3630_v37 = vcombine.low %v3468_v53, %v3606_v35  ;;  %3656 = vst.msk [vmem:[#allocation3 + $0x6c] sm:$0xf] %vm3490_vm3, %v3469_v36  ;;  %v3607_v24 = vcombine.high %v3469_v36, %v3469_v36 }
 0x4d9   : > { %3655 = vst.msk [vmem:[#allocation3 + $0x64] sm:$0xff] %vm3487_vm10, %v3630_v37 }
 0x4dd   : > { %v7386_v17 = vpop.f32.mrb[24].mxu0 }
 0x4de   : > { %v7387_v60 = vpop.f32.mrb[25].mxu0 }
 0x4df   : > { %v7388_v31 = vadd.f32 %v7387_v60, %v7386_v17  ;;  %v7389_v33 = vpop.f32.mrb[26].mxu0 }
 0x4e0   : > { %v7390_v19 = vpop.f32.mrb[27].mxu0  ;;  %v12879_v32 = vld [vmem:[#allocation3 + $0x60] sm:$0xff]  ;;  %v12881_v41 = vld [vmem:[#allocation3 + $0x68] sm:$0xff] }
 0x4e1   : > { %v3247_v50 = vadd.f32 %v7388_v31, %v12528_v22  ;;  %v7391_v26 = vadd.f32 %v7390_v19, %v7389_v33  ;;  %v12886_v48 = vpack.i.bf16 %v12879_v32, %v12875_v54  ;;  %v12890_v51 = vpack.i.bf16 %v12877_v46, %v12881_v41 }
 0x4e3   : > { %v3250_v7 = vadd.f32 %v7391_v26, %v12528_v22  ;;  %8158 = vrot.lane.b32.xlu0 %v12886_v48, %s9225_s29  ;;  %8163 = vrot.lane.b32.xlu1 %v12890_v51, %s9225_s29  ;;  %v3405_v56 = vpop.f32.mrb[4].mxu1  ;;  %v3281_v3 = vmax.f32 %v3247_v50, 0.0 }
 0x4e4   : > { %v3406_v25 = vadd.f32 %v3405_v56, %v12650_v43  ;;  %v7785_v6 = vpop.f32.mrb[5].mxu1 }
 0x4e5   : > { %v3282_v16 = vmax.f32 %v3250_v7, 0.0  ;;  %v3408_v23 = vpop.f32.mrb[6].mxu1 }
 0x4e6   : > { %v3470_v44 = vmax.f32 %v3406_v25, 0.0  ;;  %v3409_v18 = vadd.f32 %v3408_v23, %v12650_v43  ;;  %v7786_v28 = vpop.f32.mrb[7].mxu1 }
 0x4e7   : > { %v3293_v14 = vpack.c.bf16 %v3282_v16, %v3281_v3 }
 0x4e8   : > { %v3608_v39 = vcombine.high %v3470_v44, %v3470_v44  ;;  %v3631_v59 = vcombine.low %v3607_v24, %v3470_v44  ;;  %v3471_v49 = vmax.f32 %v3409_v18, 0.0  ;;  %v12937_v18 = vld [vmem:[#allocation3 + $0xa0] sm:$0xf] }
 0x4e9   : > { %7804 = vmatmul.mubr.msk.bf16.gmra.mrb[24].mxu1 %vm3335_vm15, %v3293_v14  ;;  %17043 = vst [vmem:[#allocation47_spill] sm:$0xff] %v12937_v18 }
 0x4ea   : > { %3657 = vst.msk [vmem:[#allocation3 + $0x7c] sm:$0xff] %vm3487_vm10, %v3631_v59  ;;  %v3609_v8 = vcombine.high %v3471_v49, %v3471_v49  ;;  %7807 = vmatprep.mubr.msk.bf16.mxu1 %vm17028_vm1, %v17001_v4 }
 0x4eb   : > { %3658 = vst.msk [vmem:[#allocation3 + $0x84] sm:$0xf] %vm3490_vm3, %v3608_v39 }
 0x4ec   : > { %v3632_v40 = vcombine.low %v3471_v49, %v3609_v8 }
 0x4ee   : > { %3659 = vst.msk [vmem:[#allocation3 + $0x94] sm:$0xff] %vm3487_vm10, %v3632_v40 }
 0x4ef   : > { %v7392_v9 = vpop.f32.mrb[28].mxu0 }
 0x4f0   : > { %v7393_v15 = vpop.f32.mrb[29].mxu0 }
 0x4f1   : > { %v7394_v58 = vadd.f32 %v7393_v15, %v7392_v9  ;;  %v7395_v57 = vpop.f32.mrb[30].mxu0  ;;  %v12905_v63 = vld [vmem:[#allocation3 + $0x78] sm:$0xff] }
 0x4f2   : > { %17040 = vst [vmem:[#allocation23_spill] sm:$0xff] %v12905_v63  ;;  %v12907_v29 = vld [vmem:[#allocation3 + $0x80] sm:$0xff]  ;;  %v7396_v52 = vpop.f32.mrb[31].mxu0 }
 0x4f3   : > { %17041 = vst [vmem:[#allocation4_spill] sm:$0xff] %v12907_v29  ;;  %v12911_v55 = vpack.i.bf16 %v12907_v29, %v12905_v63  ;;  %v3255_v0 = vadd.f32 %v7394_v58, %v12528_v22  ;;  %v7397_v62 = vadd.f32 %v7396_v52, %v7395_v57 }
 0x4f5   : > { %8168 = vrot.lane.b32.xlu0 %v12911_v55, %s9225_s29  ;;  %v3258_v27 = vadd.f32 %v7397_v62, %v12528_v22  ;;  %v12919_v61 = vld [vmem:[#allocation3 + $0x90] sm:$0xff]  ;;  %v3283_v42 = vmax.f32 %v3255_v0, 0.0 }
 0x4f6   : > { %v12923_v20 = vpack.i.bf16 %v12919_v61, %v12917_v38 }
 0x4f7   : > { %v3284_v47 = vmax.f32 %v3258_v27, 0.0  ;;  %v12962_v27 = vld [vmem:[#allocation3 + $0xd0] sm:$0xf] }
 0x4f8   : > { %8173 = vrot.lane.b32.xlu1 %v12923_v20, %s9225_s29 }
 0x4f9   : > { %v3294_v53 = vpack.c.bf16 %v3284_v47, %v3283_v42  ;;  %v12964_v42 = vld [vmem:[#allocation3 + $0xb8] sm:$0xf] }
 0x4fb   : > { %7808 = vmatmul.mubr.msk.bf16.gmra.mrb[28].mxu1 %vm3335_vm15, %v3294_v53 }
 0x4fc   : > { %7811 = vmatprep.mubr.msk.bf16.mxu1 %vm17028_vm1, %v17001_v4  ;;  %vm17076_vm1 = vmmov %vm17073_vm6 }
 0x4fd   : > { %vm17089_vm7 = vmmov %vm17076_vm1 }
 0x4fe   : > { %vm17099_vm8 = vmmov %vm17076_vm1 }
 0x4ff   : > { %vm17109_vm9 = vmmov %vm17076_vm1 }
 0x500   : > { %vm17110_vm11 = vmmov %vm17076_vm1 }
 0x501   : > { %vm17117_vm2 = vmmov %vm17076_vm1 }
 0x502   : > { %vm17124_vm4 = vmmov %vm17076_vm1 }
 0x51c   : > { %v3413_v10 = vpop.f32.mrb[8].mxu1 }
 0x51d   : > { %v7398_v21 = vpop.f32.mrb[32].mxu0  ;;  %v3414_v35 = vadd.f32 %v3413_v10, %v12650_v43  ;;  %v7789_v36 = vpop.f32.mrb[9].mxu1 }
 0x51e   : > { %v7399_v37 = vpop.f32.mrb[33].mxu0  ;;  %v3416_v60 = vpop.f32.mrb[10].mxu1 }
 0x51f   : > { %v7400_v17 = vadd.f32 %v7399_v37, %v7398_v21  ;;  %v7401_v31 = vpop.f32.mrb[34].mxu0  ;;  %v3472_v33 = vmax.f32 %v3414_v35, 0.0  ;;  %v3417_v19 = vadd.f32 %v3416_v60, %v12650_v43  ;;  %v7790_v50 = vpop.f32.mrb[11].mxu1 }
 0x520   : > { %v7402_v26 = vpop.f32.mrb[35].mxu0 }
 0x521   : > { %v3263_v7 = vadd.f32 %v7400_v17, %v12528_v22  ;;  %v7403_v56 = vadd.f32 %v7402_v26, %v7401_v31  ;;  %v3610_v25 = vcombine.high %v3472_v33, %v3472_v33  ;;  %3660 = vst.msk [vmem:[#allocation3 + $0x9c] sm:$0xf] %vm3490_vm3, %v3472_v33  ;;  %v3473_v4 = vmax.f32 %v3417_v19, 0.0 }
 0x523   : > { %v3266_v6 = vadd.f32 %v7403_v56, %v12528_v22  ;;  %v3611_v3 = vcombine.high %v3473_v4, %v3473_v4  ;;  %v3633_v16 = vcombine.low %v3610_v25, %v3473_v4  ;;  %v3285_v23 = vmax.f32 %v3263_v7, 0.0 }
 0x525   : > { %v3286_v24 = vmax.f32 %v3266_v6, 0.0  ;;  %3661 = vst.msk [vmem:[#allocation3 + $0xac] sm:$0xff] %vm3487_vm10, %v3633_v16  ;;  %v12997_v16 = vld [vmem:[#allocation3 + $0xe8] sm:$0xf] }
 0x526   : > { %3662 = vst.msk [vmem:[#allocation3 + $0xb4] sm:$0xf] %vm3490_vm3, %v3611_v3 }
 0x527   : > { %v3295_v44 = vpack.c.bf16 %v3286_v24, %v3285_v23 }
 0x528   : > { %v12940_v28 = vld [vmem:[#allocation3 + $0x98] sm:$0xff] }
 0x529   : > { %7812 = vmatmul.mubr.msk.bf16.gmra.mrb[32].mxu1 %vm3335_vm15, %v3295_v44  ;;  %v12944_v14 = vpack.i.bf16 %v12937_v18, %v12940_v28 }
 0x52b   : > { %8178 = vrot.lane.b32.xlu0 %v12944_v14, %s9225_s29 }
 0x52c   : > { %v12948_v22 = vld [vmem:[#allocation3 + $0xa8] sm:$0xff] }
 0x52d   : > { %v12950_v39 = vld [vmem:[#allocation3 + $0xb0] sm:$0xff] }
 0x52e   : > { %v12954_v59 = vpack.i.bf16 %v12950_v39, %v12948_v22 }
 0x530   : > { %8183 = vrot.lane.b32.xlu1 %v12954_v59, %s9225_s29 }
 0x54c   : > { %v3421_v49 = vpop.f32.mrb[12].mxu1 }
 0x54d   : > { %v3422_v8 = vadd.f32 %v3421_v49, %v12650_v43  ;;  %v7793_v40 = vpop.f32.mrb[13].mxu1 }
 0x54e   : > { %v3424_v9 = vpop.f32.mrb[14].mxu1 }
 0x54f   : > { %v3474_v15 = vmax.f32 %v3422_v8, 0.0  ;;  %v3425_v58 = vadd.f32 %v3424_v9, %v12650_v43  ;;  %v7794_v57 = vpop.f32.mrb[15].mxu1 }
 0x551   : > { %v3612_v52 = vcombine.high %v3474_v15, %v3474_v15  ;;  %v3475_v0 = vmax.f32 %v3425_v58, 0.0 }
 0x553   : > { %v3634_v62 = vcombine.low %v3474_v15, %v3612_v52  ;;  %3664 = vst.msk [vmem:[#allocation3 + $0xcc] sm:$0xf] %vm3490_vm3, %v3475_v0  ;;  %v3613_v60 = vcombine.high %v3475_v0, %v3475_v0 }
 0x555   : > { %3663 = vst.msk [vmem:[#allocation3 + $0xc4] sm:$0xff] %vm3487_vm10, %v3634_v62 }
 0x55c   : > { %v12966_v47 = vld [vmem:[#allocation3 + $0xc0] sm:$0xff]  ;;  %v12968_v53 = vld [vmem:[#allocation3 + $0xc8] sm:$0xff] }
 0x55d   : > { %17044 = vst [vmem:[#allocation52_spill] sm:$0xff] %v12966_v47  ;;  %v12972_v10 = vpack.i.bf16 %v12966_v47, %v12964_v42  ;;  %v12976_v21 = vpack.i.bf16 %v12962_v27, %v12968_v53 }
 0x55e   : > { %v3429_v35 = vpop.f32.mrb[16].mxu1 }
 0x55f   : > { %v3430_v36 = vadd.f32 %v3429_v35, %v12650_v43  ;;  %8188 = vrot.lane.b32.xlu0 %v12972_v10, %s9225_s29  ;;  %8193 = vrot.lane.b32.xlu1 %v12976_v21, %s9225_s29  ;;  %v7797_v37 = vpop.f32.mrb[17].mxu1  ;;  %v13012_v35 = vld [vmem:[#allocation3 + $0x100] sm:$0xf] }
 0x560   : > { %v3432_v17 = vpop.f32.mrb[18].mxu1 }
 0x561   : > { %v3476_v31 = vmax.f32 %v3430_v36, 0.0  ;;  %v3433_v33 = vadd.f32 %v3432_v17, %v12650_v43  ;;  %v7798_v19 = vpop.f32.mrb[19].mxu1 }
 0x563   : > { %v3614_v50 = vcombine.high %v3476_v31, %v3476_v31  ;;  %v3635_v26 = vcombine.low %v3613_v60, %v3476_v31  ;;  %v3477_v7 = vmax.f32 %v3433_v33, 0.0 }
 0x565   : > { %3665 = vst.msk [vmem:[#allocation3 + $0xdc] sm:$0xff] %vm3487_vm10, %v3635_v26  ;;  %v3615_v56 = vcombine.high %v3477_v7, %v3477_v7 }
 0x566   : > { %3666 = vst.msk [vmem:[#allocation3 + $0xe4] sm:$0xf] %vm3490_vm3, %v3614_v50 }
 0x567   : > { %v3636_v25 = vcombine.low %v3477_v7, %v3615_v56 }
 0x569   : > { %3667 = vst.msk [vmem:[#allocation3 + $0xf4] sm:$0xff] %vm3487_vm10, %v3636_v25 }
 0x56c   : > { %v12987_v4 = vld [vmem:[#allocation3 + $0xd8] sm:$0xff] }
 0x56d   : > { %v12989_v6 = vld [vmem:[#allocation3 + $0xe0] sm:$0xff] }
 0x56e   : > { %v12993_v3 = vpack.i.bf16 %v12989_v6, %v12987_v4 }
 0x570   : > { %8198 = vrot.lane.b32.xlu0 %v12993_v3, %s9225_s29  ;;  %v12999_v23 = vld [vmem:[#allocation3 + $0xf0] sm:$0xff] }
 0x571   : > { %v13003_v24 = vpack.i.bf16 %v12999_v23, %v12997_v16 }
 0x573   : > { %8203 = vrot.lane.b32.xlu1 %v13003_v24, %s9225_s29 }
 0x58c   : > { %v3437_v44 = vpop.f32.mrb[20].mxu1 }
 0x58d   : > { %v3438_v49 = vadd.f32 %v3437_v44, %v12650_v43  ;;  %v7801_v8 = vpop.f32.mrb[21].mxu1 }
 0x58e   : > { %v3440_v40 = vpop.f32.mrb[22].mxu1 }
 0x58f   : > { %v3478_v9 = vmax.f32 %v3438_v49, 0.0  ;;  %v3441_v15 = vadd.f32 %v3440_v40, %v12650_v43  ;;  %v7802_v58 = vpop.f32.mrb[23].mxu1  ;;  %v13036_v40 = vld [vmem:[#allocation3 + $0x130] sm:$0xf] }
 0x590   : > { %17045 = vst [vmem:[#allocation21_spill] sm:$0xff] %v13036_v40 }
 0x591   : > { %v3616_v57 = vcombine.high %v3478_v9, %v3478_v9  ;;  %3668 = vst.msk [vmem:[#allocation3 + $0xfc] sm:$0xf] %vm3490_vm3, %v3478_v9  ;;  %v3479_v52 = vmax.f32 %v3441_v15, 0.0  ;;  %v13038_v9 = vld [vmem:[#allocation3 + $0x118] sm:$0xf] }
 0x593   : > { %v3617_v0 = vcombine.high %v3479_v52, %v3479_v52  ;;  %v3637_v62 = vcombine.low %v3616_v57, %v3479_v52 }
 0x595   : > { %3669 = vst.msk [vmem:[#allocation3 + $0x10c] sm:$0xff] %vm3487_vm10, %v3637_v62 }
 0x596   : > { %3670 = vst.msk [vmem:[#allocation3 + $0x114] sm:$0xf] %vm3490_vm3, %v3617_v0 }
 0x598   : > { %v13014_v36 = vld [vmem:[#allocation3 + $0xf8] sm:$0xff] }
 0x599   : > { %v13018_v37 = vpack.i.bf16 %v13012_v35, %v13014_v36 }
 0x59b   : > { %8208 = vrot.lane.b32.xlu0 %v13018_v37, %s9225_s29 }
 0x59c   : > { %v13022_v17 = vld [vmem:[#allocation3 + $0x108] sm:$0xff] }
 0x59d   : > { %v13024_v60 = vld [vmem:[#allocation3 + $0x110] sm:$0xff] }
 0x59e   : > { %v13028_v31 = vpack.i.bf16 %v13024_v60, %v13022_v17 }
 0x5a0   : > { %8213 = vrot.lane.b32.xlu1 %v13028_v31, %s9225_s29 }
 0x5bc   : > { %v3445_v33 = vpop.f32.mrb[24].mxu1 }
 0x5bd   : > { %v3446_v19 = vadd.f32 %v3445_v33, %v12650_v43  ;;  %v7805_v50 = vpop.f32.mrb[25].mxu1 }
 0x5be   : > { %v3448_v26 = vpop.f32.mrb[26].mxu1 }
 0x5bf   : > { %v3480_v7 = vmax.f32 %v3446_v19, 0.0  ;;  %v3449_v56 = vadd.f32 %v3448_v26, %v12650_v43  ;;  %v7806_v25 = vpop.f32.mrb[27].mxu1 }
 0x5c1   : > { %v3618_v44 = vcombine.high %v3480_v7, %v3480_v7  ;;  %v3481_v49 = vmax.f32 %v3449_v56, 0.0 }
 0x5c3   : > { %v3638_v8 = vcombine.low %v3480_v7, %v3618_v44  ;;  %3672 = vst.msk [vmem:[#allocation3 + $0x12c] sm:$0xf] %vm3490_vm3, %v3481_v49  ;;  %v3619_v50 = vcombine.high %v3481_v49, %v3481_v49 }
 0x5c5   : > { %3671 = vst.msk [vmem:[#allocation3 + $0x124] sm:$0xff] %vm3487_vm10, %v3638_v8 }
 0x5cc   : > { %v13040_v15 = vld [vmem:[#allocation3 + $0x120] sm:$0xff]  ;;  %v13042_v58 = vld [vmem:[#allocation3 + $0x128] sm:$0xff] }
 0x5cd   : > { %17046 = vst [vmem:[#allocation6_spill] sm:$0xff] %v13042_v58  ;;  %v13046_v57 = vpack.i.bf16 %v13040_v15, %v13038_v9  ;;  %v13050_v52 = vpack.i.bf16 %v13036_v40, %v13042_v58 }
 0x5ce   : > { %v3453_v0 = vpop.f32.mrb[28].mxu1 }
 0x5cf   : > { %v3454_v62 = vadd.f32 %v3453_v0, %v12650_v43  ;;  %8218 = vrot.lane.b32.xlu0 %v13046_v57, %s9225_s29  ;;  %8223 = vrot.lane.b32.xlu1 %v13050_v52, %s9225_s29  ;;  %v7809_v33 = vpop.f32.mrb[29].mxu1 }
 0x5d0   : > { %v3456_v19 = vpop.f32.mrb[30].mxu1 }
 0x5d1   : > { %v3482_v26 = vmax.f32 %v3454_v62, 0.0  ;;  %v3457_v7 = vadd.f32 %v3456_v19, %v12650_v43  ;;  %v7810_v56 = vpop.f32.mrb[31].mxu1  ;;  %v13071_v62 = vld [vmem:[#allocation3 + $0x148] sm:$0xf] }
 0x5d3   : > { %v3620_v25 = vcombine.high %v3482_v26, %v3482_v26  ;;  %v3639_v44 = vcombine.low %v3619_v50, %v3482_v26  ;;  %v3483_v8 = vmax.f32 %v3457_v7, 0.0 }
 0x5d5   : > { %3673 = vst.msk [vmem:[#allocation3 + $0x13c] sm:$0xff] %vm3487_vm10, %v3639_v44  ;;  %v3621_v0 = vcombine.high %v3483_v8, %v3483_v8 }
 0x5d6   : > { %3674 = vst.msk [vmem:[#allocation3 + $0x144] sm:$0xf] %vm3490_vm3, %v3620_v25 }
 0x5d7   : > { %v3640_v40 = vcombine.low %v3483_v8, %v3621_v0 }
 0x5d9   : > { %3675 = vst.msk [vmem:[#allocation3 + $0x154] sm:$0xff] %vm3487_vm10, %v3640_v40 }
 0x5dc   : > { %v13061_v58 = vld [vmem:[#allocation3 + $0x138] sm:$0xff] }
 0x5dd   : > { %17047 = vst [vmem:[#allocation5_spill] sm:$0xff] %v13061_v58  ;;  %v13063_v33 = vld [vmem:[#allocation3 + $0x140] sm:$0xff] }
 0x5de   : > { %17048 = vst [vmem:[#allocation77_spill] sm:$0xff] %v13063_v33  ;;  %v13067_v49 = vpack.i.bf16 %v13063_v33, %v13061_v58 }
 0x5e0   : > { %17049 = vst [vmem:[#allocation7_spill] sm:$0xff] %v13067_v49  ;;  %8228 = vrot.lane.b32.xlu0 %v13067_v49, %s9225_s29  ;;  %v13073_v19 = vld [vmem:[#allocation3 + $0x150] sm:$0xff] }
 0x5e1   : > { %17050 = vst [vmem:[#allocation48_spill] sm:$0xff] %v13073_v19  ;;  %v8232_v50 = vpack.i.bf16 %v13073_v19, %v13071_v62 }
 0x5e3   : > { %8233 = vrot.lane.b32.xlu1 %v8232_v50, %s9225_s29  ;;  %v13083_v50 = vld [vmem:[#allocation3 + $0x160] sm:$0xf] }
 0x5e4   : > { %17051 = vst [vmem:[#allocation26_spill] sm:$0xff] %v13083_v50 }
 0x5fc   : > { %v3461_v40 = vpop.f32.mrb[32].mxu1 }
 0x5fd   : > { %v3462_v26 = vadd.f32 %v3461_v40, %v12650_v43  ;;  %v7813_v7 = vpop.f32.mrb[33].mxu1  ;;  %v13087_v40 = vld [vmem:[#allocation3 + $0x178] sm:$0xf] }
 0x5fe   : > { %v3464_v56 = vpop.f32.mrb[34].mxu1  ;;  %17053 = vst [vmem:[#allocation75_spill] sm:$0xff] %v13087_v40  ;;  %v3728_v7 = vld [vmem:[#allocation3 + $0x188] sm:$0xff] }
 0x5ff   : > { %v3484_v25 = vmax.f32 %v3462_v26, 0.0  ;;  %v3465_v44 = vadd.f32 %v3464_v56, %v12650_v43  ;;  %v7814_v8 = vpop.f32.mrb[35].mxu1  ;;  %v3727_v26 = vld [vmem:[#allocation3 + $0x180] sm:$0xff]  ;;  %v3729_v56 = vld [vmem:[#allocation3 + $0x190] sm:$0xf] }
 0x600   : > { %v8252_v8 = vpack.i.bf16 %v3729_v56, %v3728_v7  ;;  %v8997_v56 = vld [vmem:[%s16408_s5 + $0x40] sm:$0xff]  }
 0x601   : > { %v3622_v0 = vcombine.high %v3484_v25, %v3484_v25  ;;  %3676 = vst.msk [vmem:[#allocation3 + $0x15c] sm:$0xf] %vm3490_vm3, %v3484_v25  ;;  %v3485_v33 = vmax.f32 %v3465_v44, 0.0  ;;  %v8257_v44 = vpack.i.bf16 %v12842_v34, %v12833_v13  ;;  %7417 = vmatprep.subr.bf16.mxu1 %v8997_v56 }
 0x603   : > { %v3623_v58 = vcombine.high %v3485_v33, %v3485_v33  ;;  %v3641_v49 = vcombine.low %v3622_v0, %v3485_v33  ;;  %v8247_v33 = vpack.i.bf16 %v3727_v26, %v13087_v40  ;;  %v8262_v0 = vpack.i.bf16 %v12838_v11, %v12844_v30 }
 0x604   : > { %v8277_v26 = vpack.i.bf16 %v12875_v54, %v12840_v1  ;;  %v8292_v11 = vpack.i.bf16 %v12905_v63, %v12877_v46  ;;  %v8307_v1 = vpack.i.bf16 %v12917_v38, %v12907_v29  ;;  %v8322_v54 = vpack.i.bf16 %v12948_v22, %v12937_v18 }
 0x605   : > { %3677 = vst.msk [vmem:[#allocation3 + $0x16c] sm:$0xff] %vm3487_vm10, %v3641_v49 }
 0x606   : > { %3678 = vst.msk [vmem:[#allocation3 + $0x174] sm:$0xf] %vm3490_vm3, %v3623_v58  ;;  %vm17131_vm3 = vmmov %vm17129_vm0 }
 0x608   : > { %v13085_v19 = vld [vmem:[#allocation3 + $0x158] sm:$0xff] }
 0x609   : > { %17052 = vst [vmem:[#allocation25_spill] sm:$0xff] %v13085_v19  ;;  %v13091_v43 = vpack.i.bf16 %v13083_v50, %v13085_v19 }
 0x60b   : > { %17054 = vst [vmem:[#allocation13_spill] sm:$0xff] %v13091_v43  ;;  %8238 = vrot.lane.b32.xlu0 %v13091_v43, %s9225_s29  ;;  %v17075_v43 = vrot.slane %v12877_v46, 3 }
 0x60c   : > { %v13096_v49 = vld [vmem:[#allocation3 + $0x168] sm:$0xff] }
 0x60d   : > { %17055 = vst [vmem:[#allocation8_spill] sm:$0xff] %v13096_v49  ;;  %v3725_v58 = vld [vmem:[#allocation3 + $0x170] sm:$0xff] }
 0x60e   : > { %v13099_v25 = vpack.i.bf16 %v3725_v58, %v13096_v49 }
 0x60f   : > { %8248 = vrot.lane.b32.xlu0 %v8247_v33, %s9225_s29  ;;  %v8287_v33 = vpack.i.bf16 %v12881_v41, %v12879_v32 }
 0x610   : > { %17056 = vst [vmem:[#allocation49_spill] sm:$0xff] %v13099_v25  ;;  %8243 = vrot.lane.b32.xlu1 %v13099_v25, %s9225_s29 }
 0x613   : > { %8258 = vrot.lane.b32.xlu0 %v8257_v44, %s9226_s22  ;;  %v8998_v44 = vld [vmem:[%s16408_s5] sm:$0xff]  }
 0x614   : > { %8253 = vrot.lane.b32.xlu1 %v8252_v8, %s9225_s29  ;;  %7418 = vmatpush3.bf16.msra.mxu1 %v8998_v44  ;;  %v9005_v44 = vld [vmem:[%s16408_s5 + $0x60] sm:$0xff]  }
 0x617   : > { %8268 = vrot.lane.b32.xlu0 %v12849_v5, %s9227_s12  ;;  %v8317_v5 = vpack.i.bf16 %v12940_v28, %v12919_v61 }
 0x618   : > { %8263 = vrot.lane.b32.xlu1 %v8262_v0, %s9226_s22 }
 0x61b   : > { %8278 = vrot.lane.b32.xlu0 %v8277_v26, %s9226_s22  ;;  %v8999_v26 = vld [vmem:[%s16408_s5 + $0x48] sm:$0xff]  }
 0x61c   : > { %8273 = vrot.lane.b32.xlu1 %v12886_v48, %s9227_s12  ;;  %v8337_v48 = vpack.i.bf16 %v12964_v42, %v12950_v39  ;;  %7419 = vmatprep.subr.bf16.mxu1 %v8999_v26  ;;  %v9006_v26 = vld [vmem:[%s16408_s5 + $0x20] sm:$0xff]  }
 0x61f   : > { %8288 = vrot.lane.b32.xlu0 %v8287_v33, %s9226_s22  ;;  %v9000_v33 = vld [vmem:[%s16408_s5 + $0x8] sm:$0xff]  }
 0x620   : > { %8283 = vrot.lane.b32.xlu1 %v12890_v51, %s9227_s12  ;;  %v8347_v51 = vpack.i.bf16 %v12968_v53, %v12966_v47  ;;  %7420 = vmatpush3.bf16.msra.mxu1 %v9000_v33 }
 0x623   : > { %8298 = vrot.lane.b32.xlu0 %v12911_v55, %s9227_s12  ;;  %v8352_v55 = vpack.i.bf16 %v12987_v4, %v12962_v27  ;;  %v13172_v27 = vpop.permute.xlu1 %8143 }
 0x624   : > { %8293 = vrot.lane.b32.xlu1 %v8292_v11, %s9226_s22 }
 0x627   : > { %8308 = vrot.lane.b32.xlu0 %v8307_v1, %s9226_s22 }
 0x628   : > { %8303 = vrot.lane.b32.xlu1 %v12923_v20, %s9227_s12  ;;  %v8367_v20 = vpack.i.bf16 %v12997_v16, %v12989_v6 }
 0x62b   : > { %8318 = vrot.lane.b32.xlu0 %v8317_v5, %s9226_s22  ;;  %v9001_v5 = vld [vmem:[%s16408_s5 + $0x50] sm:$0xff]  }
 0x62c   : > { %8313 = vrot.lane.b32.xlu1 %v12944_v14, %s9227_s12  ;;  %v8382_v14 = vpack.i.bf16 %v13014_v36, %v12999_v23  ;;  %7421 = vmatprep.subr.bf16.mxu1 %v9001_v5 }
 0x62f   : > { %8328 = vrot.lane.b32.xlu0 %v12954_v59, %s9227_s12  ;;  %v13170_v59 = vpop.permute.xlu0 %8138 }
 0x630   : > { %8323 = vrot.lane.b32.xlu1 %v8322_v54, %s9226_s22  ;;  %v9002_v54 = vld [vmem:[%s16408_s5 + $0x10] sm:$0xff]  }
 0x631   : > { %7422 = vmatpush3.bf16.msra.mxu1 %v9002_v54  ;;  %v8141_v54 = vunpack.i.h.bf16 %v13170_v59 }
 0x633   : > { %8338 = vrot.lane.b32.xlu0 %v8337_v48, %s9226_s22 }
 0x634   : > { %8333 = vrot.lane.b32.xlu1 %v12972_v10, %s9227_s12  ;;  %v13174_v10 = vpop.permute.xlu0 %8148 }
 0x637   : > { %8348 = vrot.lane.b32.xlu0 %v8347_v51, %s9226_s22 }
 0x638   : > { %8343 = vrot.lane.b32.xlu1 %v12976_v21, %s9227_s12  ;;  %v13176_v21 = vpop.permute.xlu1 %8153  ;;  %v13178_v4 = vpop.permute.xlu0 %8158 }
 0x63b   : > { %8358 = vrot.lane.b32.xlu0 %v12993_v3, %s9227_s12 }
 0x63c   : > { %8353 = vrot.lane.b32.xlu1 %v8352_v55, %s9226_s22  ;;  %v13180_v6 = vpop.permute.xlu1 %8163  ;;  %v13182_v3 = vpop.permute.xlu0 %8168  ;;  %v9003_v55 = vld [vmem:[%s16408_s5 + $0x58] sm:$0xff]  }
 0x63d   : > { %7423 = vmatprep.subr.bf16.mxu1 %v9003_v55  ;;  %v8155_v55 = vunpack.i.l.bf16 %v13176_v21 }
 0x63f   : > { %8368 = vrot.lane.b32.xlu0 %v8367_v20, %s9226_s22  ;;  %v9004_v20 = vld [vmem:[%s16408_s5 + $0x18] sm:$0xff]  }
 0x640   : > { %8363 = vrot.lane.b32.xlu1 %v13003_v24, %s9227_s12  ;;  %v13184_v16 = vpop.permute.xlu1 %8173  ;;  %v13186_v23 = vpop.permute.xlu0 %8178  ;;  %7424 = vmatpush3.bf16.msra.mxu1 %v9004_v20  ;;  %v3681_v20 = vld [vmem:[#allocation3 + $0x10] sm:$0xf] }
 0x641   : > { %7425 = vmatprep.subr.bf16.mxu1 %v9005_v44  ;;  %v9007_v44 = vld [vmem:[%s16408_s5 + $0x68] sm:$0xff]  }
 0x644   : > { %8373 = vrot.lane.b32.xlu1 %v13018_v37, %s9227_s12  ;;  %v13188_v24 = vpop.permute.xlu1 %8183  ;;  %v13190_v36 = vpop.permute.xlu0 %8188  ;;  %7426 = vmatpush3.bf16.msra.mxu1 %v9006_v26  ;;  %v9008_v26 = vld [vmem:[%s16408_s5 + $0x28] sm:$0xff]  }
 0x645   : > { %7427 = vmatprep.subr.bf16.mxu1 %v9007_v44 }
 0x648   : > { %8383 = vrot.lane.b32.xlu1 %v8382_v14, %s9226_s22  ;;  %v13192_v37 = vpop.permute.xlu1 %8193  ;;  %7428 = vmatpush3.bf16.msra.mxu1 %v9008_v26 }
 0x64c   : > { %8393 = vrot.lane.b32.xlu1 %v13028_v31, %s9227_s12  ;;  %v13194_v31 = vpop.permute.xlu0 %8198  ;;  %v13196_v7 = vpop.permute.xlu1 %8203 }
 0x64d   : > { %17057 = vst [vmem:[#allocation22_spill] sm:$0xff] %v13196_v7 }
 0x650   : > { %v13198_v58 = vpop.permute.xlu0 %8208  ;;  %v13206_v8 = vpop.permute.xlu1 %8213 }
 0x651   : > { %17058 = vst [vmem:[#allocation15_spill] sm:$0xff] %v13198_v58  ;;  %17059 = vst [vmem:[#allocation14_spill] sm:$0xff] %v13206_v8  ;;  %v8150_v8 = vunpack.i.l.bf16 %v13174_v10  ;;  %v4424_v58 = vrot.slane %v12879_v32, 1 }
 0x654   : > { %v13208_v0 = vpop.permute.xlu0 %8218  ;;  %v13216_v11 = vpop.permute.xlu1 %8223 }
 0x655   : > { %17060 = vst [vmem:[#allocation41_spill] sm:$0xff] %v13208_v0  ;;  %17061 = vst [vmem:[#allocation16_spill] sm:$0xff] %v13216_v11  ;;  %v8151_v0 = vunpack.i.h.bf16 %v13174_v10  ;;  %v4808_v10 = vrot.slane %v12879_v32, 2 }
 0x658   : > { %v13218_v1 = vpop.permute.xlu0 %8228  ;;  %v13226_v48 = vpop.permute.xlu1 %8233 }
 0x659   : > { %17062 = vst [vmem:[#allocation19_spill] sm:$0xff] %v13218_v1  ;;  %17063 = vst [vmem:[#allocation40_spill] sm:$0xff] %v13226_v48  ;;  %v3680_v48 = vld [vmem:[#allocation3 + $0x8] sm:$0xff]  ;;  %v8140_v1 = vunpack.i.l.bf16 %v13170_v59 }
 0x65a   : > { %v4226_v7 = vsel %vm3487_vm10, %v3680_v48, %v8141_v54  ;;  %v9009_v48 = vld [vmem:[%s16408_s5 + $0x70] sm:$0xff]  }
 0x65b   : > { %7429 = vmatprep.subr.bf16.mxu1 %v9009_v48 }
 0x67d   : > { %v13228_v51 = vpop.permute.xlu0 %8238 }
 0x67e   : > { %17064 = vst [vmem:[#allocation65_spill] sm:$0xff] %v13228_v51  ;;  %v8145_v51 = vunpack.i.l.bf16 %v13172_v27 }
 0x680   : > { %v4227_v59 = vsel %vm3487_vm10, %v3681_v20, %v8145_v51 }
 0x681   : > { %v13236_v14 = vpop.permute.xlu0 %8248 }
 0x682   : > { %17065 = vst [vmem:[#allocation42_spill] sm:$0xff] %v13236_v14  ;;  %v13238_v56 = vpop.permute.xlu1 %8243  ;;  %v8146_v14 = vunpack.i.h.bf16 %v13172_v27 }
 0x683   : > { %17066 = vst [vmem:[#allocation68_spill] sm:$0xff] %v13238_v56  ;;  %v3679_v56 = vld [vmem:[#allocation3] sm:$0xff] }
 0x684   : > { %v4228_v5 = vsel %vm3487_vm10, %v12825_v12, %v8146_v14  ;;  %v4225_v27 = vsel %vm3487_vm10, %v3679_v56, %v8140_v1  ;;  %v4809_v12 = vrot.slane %v12881_v41, 2  ;;  %v9011_v1 = vld [vmem:[%s16408_s5 + $0x78] sm:$0xff]   ;;  %v4230_v14 = vsel %vm3487_vm10, %v12829_v2, %v8151_v0 }
 0x685   : > { %v8259_v33 = vpop.permute.xlu0 %8258  ;;  %v4229_v56 = vsel %vm3487_vm10, %v12827_v45, %v8150_v8  ;;  %v9012_v2 = vld [vmem:[%s16408_s5 + $0x38] sm:$0xff]   ;;  %v4425_v0 = vrot.slane %v12881_v41, 1 }
 0x686   : > { %v13255_v11 = vpop.permute.xlu1 %8253  ;;  %v8261_v40 = vunpack.i.h.bf16 %v8259_v33  ;;  %v8260_v25 = vunpack.i.l.bf16 %v8259_v33 }
 0x687   : > { %17067 = vst [vmem:[#allocation88_spill] sm:$0xff] %v13255_v11  ;;  %v8156_v11 = vunpack.i.h.bf16 %v13176_v21  ;;  %v9010_v21 = vld [vmem:[%s16408_s5 + $0x30] sm:$0xff]  }
 0x688   : > { %v4274_v44 = vsel %vm3335_vm15, %v4226_v7, %v8261_v40  ;;  %v4273_v26 = vsel %vm3335_vm15, %v4225_v27, %v8260_v25  ;;  %7430 = vmatpush3.bf16.msra.mxu1 %v9010_v21  ;;  %v5192_v40 = vrot.slane %v12879_v32, 3  ;;  %v13315_v7 = vsel %vm1816_vm13, %v4808_v10, %v4809_v12 }
 0x689   : > { %v8269_v50 = vpop.permute.xlu0 %8268  ;;  %v13290_v51 = vsel %vm3487_vm10, %v12842_v34, %v8156_v11  ;;  %7431 = vmatprep.subr.bf16.mxu1 %v9011_v1  ;;  %v17070_v11 = vrot.slane %v12877_v46, 2  ;;  %v5193_v27 = vrot.slane %v12881_v41, 3  ;;  %v9014_v41 = vld [vmem:[%s16408_s5 + $0x80] sm:$0xff]  }
 0x68a   : > { %v8264_v49 = vpop.permute.xlu1 %8263  ;;  %v8271_v33 = vunpack.i.h.bf16 %v8269_v50  ;;  %v8270_v54 = vunpack.i.l.bf16 %v8269_v50  ;;  %v13298_v50 = vsel %vm3487_vm10, %v12833_v13, %v8155_v55 }
 0x68b   : > { %v8265_v20 = vunpack.i.l.bf16 %v8264_v49  ;;  %v13320_v55 = vsel %vm1816_vm13, %v4809_v12, %v17070_v11  ;;  %v8266_v48 = vunpack.i.h.bf16 %v8264_v49  ;;  %v9013_v12 = vld [vmem:[%s16408_s5 + $0xc0] sm:$0xff]   ;;  %v13351_v19 = vsel %vm17076_vm1, %v5193_v27, %v17075_v43  ;;  %vm17136_vm1 = vmmov %vm17129_vm0 }
 0x68c   : > { %v13307_v34 = vsel %vm4321_vm5, %v4273_v26, %v8270_v54  ;;  %v13310_v45 = vsel %vm4321_vm5, %v4274_v44, %v8271_v33  ;;  %7432 = vmatpush3.bf16.msra.mxu1 %v9012_v2  ;;  %v13337_v26 = vsel %vm1707_vm12, %v4424_v58, %v4425_v0  ;;  %7529 = vmatprep.subr.bf16.mxu0 %v9013_v12 }
 0x68d   : > { %17068 = vst [vmem:[#allocation43_spill] sm:$0xff] %v13307_v34  ;;  %17069 = vst [vmem:[#allocation71_spill] sm:$0xff] %v13310_v45  ;;  %v8279_v8 = vpop.permute.xlu0 %8278  ;;  %v4275_v21 = vsel %vm3335_vm15, %v4227_v59, %v8265_v20  ;;  %v4421_v32 = vrot.slane %v13307_v34, 1  ;;  %v4422_v10 = vrot.slane %v13310_v45, 1  ;;  %v4276_v58 = vsel %vm3335_vm15, %v4228_v5, %v8266_v48  ;;  %7530 = vmatpush3.bf16.msra.mxu0 %v9014_v41  ;;  %v9015_v48 = vld [vmem:[%s16408_s5 + $0xc8] sm:$0xff]  }
 0x68e   : > { %v8274_v13 = vpop.permute.xlu1 %8273  ;;  %v8281_v33 = vunpack.i.h.bf16 %v8279_v8  ;;  %v8280_v54 = vunpack.i.l.bf16 %v8279_v8  ;;  %v17072_v8 = vrot.slane %v12877_v46, 1  ;;  %17077 = vst [vmem:[#allocation89_spill] sm:$0xff] %v13351_v19  ;;  %7531 = vmatprep.subr.bf16.mxu0 %v9015_v48 }
 0x68f   : > { %v8275_v25 = vunpack.i.l.bf16 %v8274_v13  ;;  %v8276_v44 = vunpack.i.h.bf16 %v8274_v13  ;;  %v4423_v43 = vsel %vm1707_vm12, %v4421_v32, %v4422_v10  ;;  %v4434_v32 = vrot.slane %v12905_v63, 1 }
 0x690   : > { %v13342_v13 = vsel %vm1707_vm12, %v4425_v0, %v17072_v8  ;;  %v4278_v47 = vsel %vm3335_vm15, %v4230_v14, %v8281_v33  ;;  %v4277_v0 = vsel %vm3335_vm15, %v4229_v56, %v8280_v54  ;;  %v8160_v54 = vunpack.i.l.bf16 %v13178_v4 }
 0x691   : > { %v13325_v1 = vsel %vm4321_vm5, %v4275_v21, %v8275_v25  ;;  %v8289_v59 = vpop.permute.xlu0 %8288  ;;  %v13346_v21 = vsel %vm17073_vm6, %v5192_v40, %v5193_v27  ;;  %vm17133_vm6 = vmmov %vm17129_vm0 }
 0x692   : > { %17071 = vst [vmem:[#allocation87_spill] sm:$0xff] %v13325_v1  ;;  %v4427_v49 = vrot.slane %v13325_v1, 1  ;;  %v8284_v20 = vpop.permute.xlu1 %8283  ;;  %17074 = vst [vmem:[#allocation50_spill] sm:$0xff] %v13346_v21  ;;  %v4233_v21 = vsel %vm3487_vm10, %v12844_v30, %v8160_v54  ;;  %v17081_v30 = vrot.slane %v12917_v38, 1 }
 0x693   : > { %v8286_v25 = vunpack.i.h.bf16 %v8284_v20  ;;  %v8285_v11 = vunpack.i.l.bf16 %v8284_v20  ;;  %v13358_v20 = vsel %vm4321_vm5, %v4276_v58, %v8276_v44  ;;  %v8291_v58 = vunpack.i.h.bf16 %v8289_v59 }
 0x694   : > { %v4428_v8 = vsel %vm1707_vm12, %v4422_v10, %v4427_v49  ;;  %17078 = vst [vmem:[#allocation24_spill] sm:$0xff] %v13358_v20  ;;  %v4435_v10 = vrot.slane %v12907_v29, 1  ;;  %v4431_v49 = vrot.slane %v13358_v20, 1 }
 0x695   : > { %v13361_v40 = vsel %vm4321_vm5, %v4278_v47, %v8286_v25  ;;  %v13364_v46 = vsel %vm4321_vm5, %v4277_v0, %v8285_v11  ;;  %v8377_v14 = vpack.i.bf16 %v4428_v8, %v4423_v43  ;;  %v9016_v47 = vld [vmem:[%s16408_s5 + $0x88] sm:$0xff]   ;;  %v8299_v44 = vpop.permute.xlu0 %8298  ;;  %v4819_v11 = vrot.slane %v12907_v29, 2 }
 0x696   : > { %17079 = vst [vmem:[#allocation67_spill] sm:$0xff] %v13361_v40  ;;  %17080 = vst [vmem:[#allocation53_spill] sm:$0xff] %v13364_v46  ;;  %v4437_v5 = vrot.slane %v13361_v40, 1  ;;  %v13368_v27 = vpop.permute.xlu1 %8293  ;;  %v4432_v25 = vrot.slane %v13364_v46, 1  ;;  %v8290_v0 = vunpack.i.l.bf16 %v8289_v59  ;;  %v8387_v8 = vpack.i.bf16 %v13022_v17, %v13012_v35  ;;  %7532 = vmatpush3.bf16.msra.mxu0 %v9016_v47  ;;  %v9017_v17 = vld [vmem:[%s16408_s5 + $0xd0] sm:$0xff]  }
 0x697   : > { %v8295_v41 = vunpack.i.l.bf16 %v13368_v27  ;;  %8378 = vrot.lane.b32.xlu0 %v8377_v14, %s9225_s29  ;;  %v4818_v43 = vrot.slane %v12905_v63, 2  ;;  %v8301_v33 = vunpack.i.h.bf16 %v8299_v44  ;;  %v8300_v12 = vunpack.i.l.bf16 %v8299_v44  ;;  %v9018_v47 = vld [vmem:[%s16408_s5 + $0x90] sm:$0xff]   ;;  %7533 = vmatprep.subr.bf16.mxu0 %v9017_v17 }
 0x698   : > { %v4433_v14 = vsel %vm1707_vm12, %v4431_v49, %v4432_v25  ;;  %v4438_v56 = vsel %vm1707_vm12, %v4432_v25, %v4437_v5  ;;  %v13400_v59 = vsel %vm1707_vm12, %v4434_v32, %v4435_v10  ;;  %v4445_v35 = vrot.slane %v12940_v28, 1 }
 0x699   : > { %v4281_v5 = vsel %vm3335_vm15, %v4233_v21, %v8295_v41  ;;  %v8402_v44 = vpack.i.bf16 %v4438_v56, %v4433_v14  ;;  %v13414_v54 = vsel %vm1707_vm12, %v4435_v10, %v17081_v30  ;;  %v4444_v32 = vrot.slane %v12919_v61, 1  ;;  %v9020_v14 = vld [vmem:[%s16408_s5 + $0x98] sm:$0xff]  }
 0x69a   : > { %v13392_v2 = vpop.permute.xlu1 %8303  ;;  %v4280_v49 = vsel %vm3335_vm15, %v13290_v51, %v8291_v58  ;;  %v4279_v25 = vsel %vm3335_vm15, %v13298_v50, %v8290_v0  ;;  %v4829_v21 = vrot.slane %v12940_v28, 2  ;;  %7534 = vmatpush3.bf16.msra.mxu0 %v9018_v47  ;;  %v4828_v58 = vrot.slane %v12919_v61, 2  ;;  %v9080_v51 = vld [vmem:[#allocation3 + $0x50] sm:$0xff] }
 0x69b   : > { %v8305_v48 = vunpack.i.l.bf16 %v13392_v2  ;;  %8388 = vrot.lane.b32.xlu0 %v8387_v8, %s9226_s22  ;;  %v13426_v56 = vsel %vm4321_vm5, %v4279_v25, %v8300_v12  ;;  %v13429_v10 = vsel %vm4321_vm5, %v4280_v49, %v8301_v33  ;;  %8403 = vrot.lane.b32.xlu1 %v8402_v44, %s9225_s29  ;;  %v13438_v0 = vsel %vm1707_vm12, %v4444_v32, %v4445_v35  ;;  %v9019_v33 = vld [vmem:[%s16408_s5 + $0xd8] sm:$0xff]  }
 0x69c   : > { %v17082_v12 = vrot.slane %v12937_v18, 1  ;;  %v17083_v61 = vrot.slane %v12917_v38, 2  ;;  %v4442_v44 = vrot.slane %v13429_v10, 1  ;;  %v13467_v32 = vsel %vm1816_vm13, %v4828_v58, %v4829_v21  ;;  %7535 = vmatprep.subr.bf16.mxu0 %v9019_v33 }
 0x69d   : > { %v13422_v19 = vsel %vm4321_vm5, %v4281_v5, %v8305_v48  ;;  %v8309_v48 = vpop.permute.xlu0 %8308  ;;  %v4441_v5 = vrot.slane %v13426_v56, 1  ;;  %v17084_v25 = vrot.slane %v12937_v18, 2  ;;  %v9078_v18 = vld [vmem:[#allocation3 + $0x48] sm:$0xff] }
 0x69e   : > { %v13432_v41 = vpop.permute.xlu1 %8313  ;;  %v4447_v50 = vrot.slane %v13422_v19, 1  ;;  %v13443_v8 = vsel %vm1707_vm12, %v4445_v35, %v17082_v12  ;;  %v13456_v17 = vsel %vm1816_vm13, %v4819_v11, %v17083_v61  ;;  %v13459_v35 = vsel %vm1816_vm13, %v4818_v43, %v4819_v11  ;;  %7536 = vmatpush3.bf16.msra.mxu0 %v9020_v14  ;;  %v17085_v61 = vld [vmem:[#allocation6_spill] sm:$0xff] }
 0x69f   : > { %8398 = vrot.lane.b32.xlu0 %v13046_v57, %s9227_s12  ;;  %v8161_v57 = vunpack.i.h.bf16 %v13178_v4  ;;  %8413 = vrot.lane.b32.xlu1 %v13050_v52, %s9227_s12  ;;  %v8407_v43 = vpack.i.bf16 %v13038_v9, %v13024_v60  ;;  %v13481_v12 = vsel %vm1816_vm13, %v4829_v21, %v17084_v25  ;;  %v9021_v4 = vld [vmem:[%s16408_s5 + $0xe0] sm:$0xff]   ;;  %v4806_v60 = vrot.slane %v13310_v45, 2 }
 0x6a0   : > { %v9022_v52 = vld [vmem:[%s16408_s5 + $0xa0] sm:$0xff]   ;;  %v4448_v58 = vsel %vm1707_vm12, %v4442_v44, %v4447_v50  ;;  %v4805_v9 = vrot.slane %v13307_v34, 2  ;;  %v8166_v21 = vunpack.i.h.bf16 %v13180_v6  ;;  %v8165_v14 = vunpack.i.l.bf16 %v13180_v6  ;;  %7537 = vmatprep.subr.bf16.mxu0 %v9021_v4 }
 0x6a1   : > { %v8422_v25 = vpack.i.bf16 %v17085_v61, %v13040_v15  ;;  %v4811_v50 = vrot.slane %v13325_v1, 2  ;;  %v8311_v47 = vunpack.i.h.bf16 %v8309_v48  ;;  %v8310_v49 = vunpack.i.l.bf16 %v8309_v48  ;;  %v13502_v38 = vpop.permute.xlu0 %8318 }
 0x6a2   : > { %v13472_v11 = vpop.permute.xlu1 %8323  ;;  %v4443_v30 = vsel %vm1707_vm12, %v4441_v5, %v4442_v44  ;;  %v4234_v33 = vsel %vm3487_vm10, %v9078_v18, %v8161_v57  ;;  %v8316_v6 = vunpack.i.h.bf16 %v13432_v41  ;;  %v8315_v15 = vunpack.i.l.bf16 %v13432_v41  ;;  %7538 = vmatpush3.bf16.msra.mxu0 %v9022_v52  ;;  %v9079_v44 = vld [vmem:[#allocation3 + $0x58] sm:$0xf] }
 0x6a3   : > { %8408 = vrot.lane.b32.xlu0 %v8407_v43, %s9226_s22  ;;  %8423 = vrot.lane.b32.xlu1 %v8422_v25, %s9226_s22  ;;  %v8417_v4 = vpack.i.bf16 %v4448_v58, %v4443_v30  ;;  %v8296_v61 = vunpack.i.h.bf16 %v13368_v27  ;;  %v4807_v48 = vsel %vm1816_vm13, %v4805_v9, %v4806_v60  ;;  %v5189_v5 = vrot.slane %v13307_v34, 3  ;;  %v9023_v9 = vld [vmem:[%s16408_s5 + $0xe8] sm:$0xff]  }
 0x6a4   : > { %v16514_v18 = vrot.slane %v13310_v45, 3  ;;  %v4236_v57 = vsel %vm3487_vm10, %v9079_v44, %v8166_v21  ;;  %v4235_v41 = vsel %vm3487_vm10, %v9080_v51, %v8165_v14  ;;  %v8306_v25 = vunpack.i.h.bf16 %v13392_v2  ;;  %v9024_v51 = vld [vmem:[%s16408_s5 + $0xa8] sm:$0xff]   ;;  %7539 = vmatprep.subr.bf16.mxu0 %v9023_v9 }
 0x6a5   : > { %v8171_v30 = vunpack.i.h.bf16 %v13182_v3  ;;  %v4284_v27 = vsel %vm3335_vm15, %v4236_v57, %v8311_v47  ;;  %v4283_v52 = vsel %vm3335_vm15, %v4235_v41, %v8310_v49  ;;  %v4812_v58 = vsel %vm1816_vm13, %v4806_v60, %v4811_v50  ;;  %v17087_v47 = vld [vmem:[#allocation7_spill] sm:$0xff]  ;;  %v17088_v60 = vld [vmem:[#allocation21_spill] sm:$0xff] }
 0x6a6   : > { %v13507_v43 = vpop.permute.xlu1 %8333  ;;  %v8170_v2 = vunpack.i.l.bf16 %v13182_v3  ;;  %v13529_v21 = vsel %vm4321_vm5, %v4284_v27, %v8316_v6  ;;  %v13532_v14 = vsel %vm4321_vm5, %v4283_v52, %v8315_v15  ;;  %v8427_v50 = vpack.i.bf16 %v4807_v48, %v17088_v60  ;;  %v13553_v27 = vpop.permute.xlu0 %8328  ;;  %7540 = vmatpush3.bf16.msra.mxu0 %v9024_v51  ;;  %v9084_v15 = vld [vmem:[#allocation3 + $0x70] sm:$0xf]  ;;  %v9085_v34 = vld [vmem:[#allocation3 + $0x88] sm:$0xf] }
 0x6a7   : > { %8418 = vrot.lane.b32.xlu0 %v8417_v4, %s9225_s29  ;;  %17086 = vst [vmem:[#allocation31_spill] sm:$0xff] %v13532_v14  ;;  %8433 = vrot.lane.b32.xlu1 %v17087_v47, %s9227_s12  ;;  %v9025_v4 = vld [vmem:[%s16408_s5 + $0xf0] sm:$0xff]   ;;  %v4282_v44 = vsel %vm3335_vm15, %v4234_v33, %v8296_v61  ;;  %v5191_v3 = vsel %vm17089_vm7, %v5189_v5, %v16514_v18  ;;  %v8176_v57 = vunpack.i.h.bf16 %v13184_v16  ;;  %v8175_v41 = vunpack.i.l.bf16 %v13184_v16  ;;  %v13560_v5 = vld [vmem:[#allocation3 + $0x68] sm:$0xff]  ;;  %vm17138_vm7 = vmmov %vm17129_vm0 }
 0x6a8   : > { %v13551_v48 = vsel %vm4321_vm5, %v4282_v44, %v8306_v25  ;;  %v8442_v33 = vpack.i.bf16 %v4812_v58, %v13315_v7  ;;  %v9026_v61 = vld [vmem:[%s16408_s5 + $0xb0] sm:$0xff]   ;;  %17091 = vst [vmem:[#allocation76_spill] sm:$0xff] %v13560_v5  ;;  %v13564_v52 = vsel %vm3487_vm10, %v13560_v5, %v8171_v30  ;;  %v8181_v16 = vunpack.i.h.bf16 %v13186_v23  ;;  %7541 = vmatprep.subr.bf16.mxu0 %v9025_v4  ;;  %v13569_v7 = vld [vmem:[#allocation3 + $0x60] sm:$0xff] }
 0x6a9   : > { %17090 = vst [vmem:[#allocation90_spill] sm:$0xff] %v13551_v48  ;;  %v4457_v25 = vrot.slane %v13529_v21, 1  ;;  %v4452_v9 = vrot.slane %v13532_v14, 1  ;;  %17092 = vst [vmem:[#allocation17_spill] sm:$0xff] %v13569_v7  ;;  %v13573_v58 = vsel %vm3487_vm10, %v13569_v7, %v8170_v2  ;;  %v8180_v51 = vunpack.i.l.bf16 %v13186_v23  ;;  %v9027_v23 = vld [vmem:[%s16408_s5 + $0xf8] sm:$0xff]  }
 0x6aa   : > { %v13536_v49 = vpop.permute.xlu1 %8343  ;;  %v8186_v47 = vunpack.i.h.bf16 %v13188_v24  ;;  %v8437_v60 = vpack.i.bf16 %v5191_v3, %v13071_v62  ;;  %v8191_v4 = vunpack.i.h.bf16 %v13190_v36  ;;  %v5195_v44 = vrot.slane %v13325_v1, 3  ;;  %v13588_v2 = vld [vmem:[#allocation3 + $0x78] sm:$0xff]  ;;  %7542 = vmatpush3.bf16.msra.mxu0 %v9026_v61 }
 0x6ab   : > { %8428 = vrot.lane.b32.xlu0 %v8427_v50, %s9226_s22  ;;  %8443 = vrot.lane.b32.xlu1 %v8442_v33, %s9226_s22  ;;  %v8185_v50 = vunpack.i.l.bf16 %v13188_v24  ;;  %v4451_v6 = vrot.slane %v13551_v48, 1  ;;  %17093 = vst [vmem:[#allocation38_spill] sm:$0xff] %v13588_v2  ;;  %v13592_v33 = vsel %vm3487_vm10, %v13588_v2, %v8176_v57  ;;  %v4239_v3 = vsel %vm3487_vm10, %v9084_v15, %v8175_v41  ;;  %v9028_v1 = vld [vmem:[%s16408_s5 + $0xb8] sm:$0xff]  }
 0x6ac   : > { %v8190_v24 = vunpack.i.l.bf16 %v13190_v36  ;;  %v8196_v18 = vunpack.i.h.bf16 %v13192_v37  ;;  %v13602_v5 = vsel %vm3487_vm10, %v9085_v34, %v8181_v16  ;;  %v8195_v57 = vunpack.i.l.bf16 %v13192_v37  ;;  %7543 = vmatprep.subr.bf16.mxu0 %v9027_v23  ;;  %v13607_v36 = vld [vmem:[#allocation3 + $0x80] sm:$0xff]  ;;  %v13618_v16 = vpop.permute.xlu0 %8338 }
 0x6ad   : > { %v4453_v2 = vsel %vm1707_vm12, %v4451_v6, %v4452_v9  ;;  %v4458_v15 = vsel %vm1707_vm12, %v4452_v9, %v4457_v25  ;;  %17094 = vst [vmem:[#allocation66_spill] sm:$0xff] %v13607_v36  ;;  %v13611_v41 = vsel %vm3487_vm10, %v13607_v36, %v8180_v51  ;;  %v13615_v61 = vsel %vm3487_vm10, %v12940_v28, %v8186_v47  ;;  %v17096_v6 = vld [vmem:[#allocation5_spill] sm:$0xff]  ;;  %v13626_v9 = vld [vmem:[#allocation3 + $0x90] sm:$0xff]  ;;  %v9088_v23 = vld [vmem:[#allocation3 + $0xa0] sm:$0xf] }
 0x6ae   : > { %v13578_v30 = vpop.permute.xlu1 %8353  ;;  %v8201_v34 = vunpack.i.h.bf16 %v13194_v31  ;;  %v17095_v37 = vpack.i.bf16 %v13342_v13, %v13337_v26  ;;  %v8447_v25 = vpack.i.bf16 %v17096_v6, %v13320_v55  ;;  %17097 = vst [vmem:[#allocation85_spill] sm:$0xff] %v13626_v9  ;;  %v13630_v51 = vsel %vm3487_vm10, %v13626_v9, %v8185_v50  ;;  %7544 = vmatpush3.bf16.msra.mxu0 %v9028_v1  ;;  %v13653_v6 = vld [vmem:[#allocation3 + $0xb0] sm:$0xff] }
 0x6af   : > { %8438 = vrot.lane.b32.xlu0 %v8437_v60, %s9227_s12  ;;  %v13634_v28 = vsel %vm3487_vm10, %v12948_v22, %v8191_v4  ;;  %v8200_v47 = vunpack.i.l.bf16 %v13194_v31  ;;  %v17098_v26 = vrot.slane %v13310_v45, 3  ;;  %v13643_v55 = vsel %vm3487_vm10, %v9088_v23, %v8190_v24  ;;  %v13650_v4 = vld [vmem:[#allocation3 + $0xa8] sm:$0xff]  ;;  %v17103_v31 = vld [vmem:[#allocation52_spill] sm:$0xff] }
 0x6b0   : > { %8453 = vrot.lane.b32.xlu1 %v17095_v37, %s9225_s29  ;;  %v13647_v50 = vsel %vm3487_vm10, %v12964_v42, %v8196_v18  ;;  %v8462_v37 = vpack.i.bf16 %v4458_v15, %v4453_v2  ;;  %17100 = vst [vmem:[#allocation20_spill] sm:$0xff] %v13650_v4  ;;  %v4821_v24 = vrot.slane %v13361_v40, 2  ;;  %v4816_v18 = vrot.slane %v13364_v46, 2  ;;  %v17101_v15 = vld [vmem:[#allocation48_spill] sm:$0xff]  ;;  %v17102_v23 = vld [vmem:[#allocation77_spill] sm:$0xff] }
 0x6b1   : > { %v5196_v13 = vsel %vm17099_vm8, %v17098_v26, %v5195_v44  ;;  %v13657_v44 = vsel %vm3487_vm10, %v13653_v6, %v8195_v57  ;;  %v8325_v26 = vunpack.i.l.bf16 %v13472_v11  ;;  %v13664_v2 = vsel %vm3487_vm10, %v12968_v53, %v8201_v34  ;;  %vm17145_vm8 = vmmov %vm17129_vm0 }
 0x6b2   : > { %v13637_v60 = vpop.permute.xlu1 %8363  ;;  %v8335_v1 = vunpack.i.l.bf16 %v13507_v43  ;;  %v8467_v57 = vpack.i.bf16 %v13071_v62, %v17102_v23  ;;  %v13673_v36 = vsel %vm3487_vm10, %v17103_v31, %v8200_v47  ;;  %v8321_v45 = vunpack.i.h.bf16 %v13502_v38  ;;  %v17106_v62 = vld [vmem:[#allocation8_spill] sm:$0xff] }
 0x6b3   : > { %8448 = vrot.lane.b32.xlu0 %v8447_v25, %s9226_s22  ;;  %v8457_v25 = vpack.i.bf16 %v17101_v15, %v5196_v13  ;;  %v8320_v7 = vunpack.i.l.bf16 %v13502_v38  ;;  %v5205_v53 = vrot.slane %v13361_v40, 3  ;;  %v8331_v34 = vunpack.i.h.bf16 %v13553_v27  ;;  %v17104_v13 = vld [vmem:[#allocation25_spill] sm:$0xff] }
 0x6b4   : > { %8463 = vrot.lane.b32.xlu1 %v8462_v37, %s9225_s29  ;;  %v8330_v4 = vunpack.i.l.bf16 %v13553_v27  ;;  %v8349_v37 = vpop.permute.xlu0 %8348  ;;  %v4287_v23 = vsel %vm3335_vm15, %v4239_v3, %v8325_v26  ;;  %v4822_v31 = vsel %vm1816_vm13, %v4816_v18, %v4821_v24  ;;  %v5200_v38 = vrot.slane %v13364_v46, 3 }
 0x6b5   : > { %v4815_v40 = vrot.slane %v13358_v20, 2  ;;  %v4831_v9 = vrot.slane %v13422_v19, 2  ;;  %v13691_v27 = vsel %vm4321_vm5, %v4287_v23, %v8335_v1  ;;  %v4286_v3 = vsel %vm3335_vm15, %v13564_v52, %v8321_v45 }
 0x6b6   : > { %v13684_v47 = vpop.permute.xlu1 %8373  ;;  %v4285_v24 = vsel %vm3335_vm15, %v13573_v58, %v8320_v7  ;;  %v5199_v26 = vrot.slane %v13358_v20, 3  ;;  %v13707_v1 = vsel %vm4321_vm5, %v4286_v3, %v8331_v34  ;;  %v8326_v23 = vunpack.i.h.bf16 %v13472_v11 }
 0x6b7   : > { %8458 = vrot.lane.b32.xlu0 %v8457_v25, %s9227_s12  ;;  %v17105_v25 = vld [vmem:[#allocation13_spill] sm:$0xff]  ;;  %v4817_v46 = vsel %vm1816_vm13, %v4815_v40, %v4816_v18  ;;  %v13704_v29 = vsel %vm4321_vm5, %v4285_v24, %v8330_v4  ;;  %17108 = vst [vmem:[#allocation73_spill] sm:$0xff] %v13707_v1  ;;  %v8341_v45 = vunpack.i.h.bf16 %v13618_v16  ;;  %v4467_v52 = vrot.slane %v13691_v27, 1 }
 0x6b8   : > { %8473 = vrot.lane.b32.xlu1 %v17105_v25, %s9227_s12  ;;  %17107 = vst [vmem:[#allocation45_spill] sm:$0xff] %v13704_v29  ;;  %v8482_v25 = vpack.i.bf16 %v13456_v17, %v4822_v31  ;;  %v5201_v7 = vsel %vm17109_vm9, %v5199_v26, %v5200_v38  ;;  %v5206_v40 = vsel %vm17110_vm11, %v5200_v38, %v5205_v53  ;;  %v8346_v18 = vunpack.i.h.bf16 %v13536_v49  ;;  %v8359_v34 = vpop.permute.xlu0 %8358  ;;  %vm17147_vm9 = vmmov %vm17129_vm0 }
 0x6b9   : > { %v8477_v17 = vpack.i.bf16 %v13459_v35, %v4817_v46  ;;  %v8340_v11 = vunpack.i.l.bf16 %v13618_v16  ;;  %v4461_v3 = vrot.slane %v13704_v29, 1  ;;  %v4462_v53 = vrot.slane %v13707_v1, 1  ;;  %vm17149_vm11 = vmmov %vm17129_vm0 }
 0x6ba   : > { %v8384_v31 = vpop.permute.xlu1 %8383  ;;  %v4288_v38 = vsel %vm3335_vm15, %v13592_v33, %v8326_v23  ;;  %v8351_v24 = vunpack.i.h.bf16 %v8349_v37  ;;  %v8350_v26 = vunpack.i.l.bf16 %v8349_v37  ;;  %v8492_v4 = vpack.i.bf16 %v5206_v40, %v5201_v7 }
 0x6bb   : > { %8468 = vrot.lane.b32.xlu0 %v8467_v57, %s9226_s22  ;;  %v8336_v57 = vunpack.i.h.bf16 %v13507_v43  ;;  %v4290_v46 = vsel %vm3335_vm15, %v13602_v5, %v8341_v45  ;;  %v8345_v35 = vunpack.i.l.bf16 %v13536_v49  ;;  %v4468_v43 = vsel %vm1707_vm12, %v4462_v53, %v4467_v52 }
 0x6bc   : > { %8483 = vrot.lane.b32.xlu1 %v8482_v25, %s9226_s22  ;;  %v4826_v16 = vrot.slane %v13429_v10, 2  ;;  %v13734_v25 = vsel %vm4321_vm5, %v4290_v46, %v8346_v18  ;;  %v8361_v63 = vunpack.i.h.bf16 %v8359_v34  ;;  %v8360_v58 = vunpack.i.l.bf16 %v8359_v34  ;;  %v8369_v7 = vpop.permute.xlu0 %8368 }
 0x6bd   : > { %v4825_v33 = vrot.slane %v13426_v56, 2  ;;  %v4289_v37 = vsel %vm3335_vm15, %v13611_v41, %v8340_v11  ;;  %v13741_v5 = vsel %vm4321_vm5, %v4288_v38, %v8336_v57  ;;  %v8356_v49 = vunpack.i.h.bf16 %v13578_v30 }
 0x6be   : > { %17111 = vst [vmem:[#allocation91_spill] sm:$0xff] %v13741_v5  ;;  %v4463_v23 = vsel %vm1707_vm12, %v4461_v3, %v4462_v53  ;;  %v4292_v45 = vsel %vm3335_vm15, %v13615_v61, %v8351_v24  ;;  %v4291_v52 = vsel %vm3335_vm15, %v13630_v51, %v8350_v26  ;;  %v17112_v40 = vpack.i.bf16 %v13414_v54, %v13400_v59 }
 0x6bf   : > { %8478 = vrot.lane.b32.xlu0 %v8477_v17, %s9226_s22  ;;  %v5209_v41 = vrot.slane %v13426_v56, 3  ;;  %v4477_v18 = vrot.slane %v13734_v25, 1  ;;  %v13757_v34 = vsel %vm4321_vm5, %v4289_v37, %v8345_v35  ;;  %v8355_v61 = vunpack.i.l.bf16 %v13578_v30  ;;  %v8394_v17 = vpop.permute.xlu1 %8393 }
 0x6c0   : > { %8493 = vrot.lane.b32.xlu1 %v8492_v4, %s9227_s12  ;;  %v5210_v4 = vrot.slane %v13429_v10, 3  ;;  %17113 = vst [vmem:[#allocation27_spill] sm:$0xff] %v13757_v34  ;;  %v8497_v11 = vpack.i.bf16 %v4468_v43, %v4463_v23  ;;  %v13761_v51 = vsel %vm4321_vm5, %v4291_v52, %v8360_v58  ;;  %v13764_v57 = vsel %vm4321_vm5, %v4292_v45, %v8361_v63  ;;  %v17120_v23 = vld [vmem:[#allocation75_spill] sm:$0xff] }
 0x6c1   : > { %17114 = vst [vmem:[#allocation54_spill] sm:$0xff] %v13761_v51  ;;  %17115 = vst [vmem:[#allocation10_spill] sm:$0xff] %v13764_v57  ;;  %v17116_v59 = vpack.i.bf16 %v17104_v13, %v17101_v15  ;;  %v4832_v54 = vsel %vm1816_vm13, %v4826_v16, %v4831_v9  ;;  %v4827_v3 = vsel %vm1816_vm13, %v4825_v33, %v4826_v16  ;;  %v8370_v53 = vunpack.i.l.bf16 %v8369_v7  ;;  %v17118_v13 = vld [vmem:[#allocation26_spill] sm:$0xff]  ;;  %v17119_v33 = vld [vmem:[#allocation49_spill] sm:$0xff] }
 0x6c2   : > { %v4294_v30 = vsel %vm3335_vm15, %v13634_v28, %v8356_v49  ;;  %v8386_v38 = vunpack.i.h.bf16 %v8384_v31  ;;  %v8385_v24 = vunpack.i.l.bf16 %v8384_v31  ;;  %v8375_v58 = vunpack.i.l.bf16 %v13684_v47 }
 0x6c3   : > { %8488 = vrot.lane.b32.xlu0 %v17112_v40, %s9225_s29  ;;  %v8396_v26 = vunpack.i.h.bf16 %v8394_v17  ;;  %v8395_v63 = vunpack.i.l.bf16 %v8394_v17  ;;  %v5211_v46 = vsel %vm17117_vm2, %v5209_v41, %v5210_v4  ;;  %v4293_v15 = vsel %vm3335_vm15, %v13643_v55, %v8355_v61  ;;  %vm17152_vm2 = vmmov %vm17129_vm0 }
 0x6c4   : > { %8503 = vrot.lane.b32.xlu1 %v17116_v59, %s9226_s22  ;;  %v8522_v9 = vpack.i.bf16 %v4832_v54, %v13467_v32  ;;  %v8507_v35 = vpack.i.bf16 %v4827_v3, %v17118_v13  ;;  %v4472_v28 = vrot.slane %v13757_v34, 1  ;;  %v8371_v43 = vunpack.i.h.bf16 %v8369_v7 }
 0x6c5   : > { %v8366_v31 = vunpack.i.h.bf16 %v13637_v60  ;;  %v8365_v16 = vunpack.i.l.bf16 %v13637_v60  ;;  %v4471_v37 = vrot.slane %v13741_v5, 1  ;;  %v4295_v49 = vsel %vm3335_vm15, %v13657_v44, %v8370_v53 }
 0x6c6   : > { %v4298_v32 = vsel %vm3335_vm15, %v13664_v2, %v8386_v38  ;;  %v4297_v55 = vsel %vm3335_vm15, %v13673_v36, %v8385_v24  ;;  %v8517_v45 = vpack.i.bf16 %v5211_v46, %v17120_v23  ;;  %v8376_v52 = vunpack.i.h.bf16 %v13684_v47  ;;  %v13881_v23 = vld [vmem:[#allocation3 + $0x188] sm:$0xff] }
 0x6c7   : > { %8498 = vrot.lane.b32.xlu0 %v8497_v11, %s9225_s29  ;;  %v13796_v60 = vsel %vm4321_vm5, %v4295_v49, %v8375_v58  ;;  %v13799_v7 = vsel %vm4321_vm5, %v4297_v55, %v8395_v63  ;;  %v13802_v40 = vsel %vm4321_vm5, %v4298_v32, %v8396_v26  ;;  %v4473_v44 = vsel %vm1707_vm12, %v4471_v37, %v4472_v28  ;;  %v14009_v11 = vld [vmem:[#allocation3 + $0x1a0] sm:$0xff] }
 0x6c8   : > { %8513 = vrot.lane.b32.xlu1 %v17119_v33, %s9227_s12  ;;  %17121 = vst [vmem:[#allocation29_spill] sm:$0xff] %v13796_v60  ;;  %17122 = vst [vmem:[#allocation18_spill] sm:$0xff] %v13799_v7  ;;  %v4478_v2 = vsel %vm1707_vm12, %v4472_v28, %v4477_v18  ;;  %v17123_v36 = vrot.slane %v13422_v19, 3  ;;  %v4296_v61 = vsel %vm3335_vm15, %v13647_v50, %v8371_v43  ;;  %v5603_v53 = vrot.slane %v13551_v48, 4 }
 0x6c9   : > { %v13815_v17 = vsel %vm4321_vm5, %v4294_v30, %v8366_v31  ;;  %v13823_v59 = vsel %vm4321_vm5, %v4293_v15, %v8365_v16  ;;  %v13832_v3 = vsel %vm4321_vm5, %v4296_v61, %v8376_v52  ;;  %v8542_v30 = vpack.i.bf16 %v4478_v2, %v4473_v44  ;;  %17140 = vst [vmem:[#allocation37_spill] sm:$0xff] %v13881_v23  ;;  %v13887_v44 = vld [vmem:[#allocation3 + $0x180] sm:$0xff] }
 0x6ca   : > { %v5216_v41 = vsel %vm17124_vm4, %v5210_v4, %v17123_v36  ;;  %17125 = vst [vmem:[#allocation46_spill] sm:$0xff] %v13815_v17  ;;  %v5604_v38 = vrot.slane %v13532_v14, 4  ;;  %v5609_v24 = vrot.slane %v13529_v21, 4  ;;  %v5613_v58 = vrot.slane %v13704_v29, 4  ;;  %17142 = vst [vmem:[#allocation60_spill] sm:$0xff] %v13887_v44 }
 0x6cb   : > { %8508 = vrot.lane.b32.xlu0 %v8507_v35, %s9226_s22  ;;  %v5614_v26 = vrot.slane %v13707_v1, 4  ;;  %v5619_v63 = vrot.slane %v13691_v27, 4  ;;  %v17126_v46 = vpack.i.bf16 %v13443_v8, %v13438_v0  ;;  %v5624_v13 = vrot.slane %v13757_v34, 4  ;;  %vm17156_vm4 = vmmov %vm17129_vm0  ;;  %v13981_v4 = vld [vmem:[#allocation3 + $0xe8] sm:$0xf]  ;;  %17188 = vst [vmem:[#allocation82_spill] sm:$0xff] %v14009_v11 }
 0x6cc   : > { %8523 = vrot.lane.b32.xlu1 %v8522_v9, %s9226_s22  ;;  %v13846_v15 = vsel %vm17127_vm14, %v5603_v53, %v5604_v38  ;;  %v5623_v9 = vrot.slane %v13741_v5, 4  ;;  %v5629_v35 = vrot.slane %v13734_v25, 4  ;;  %v13852_v28 = vsel %vm17129_vm0, %v5604_v38, %v5609_v24  ;;  %17174 = vst [vmem:[#allocation79_spill] sm:$0xff] %v13981_v4 }
 0x6cd   : > { %17128 = vst [vmem:[#allocation70_spill] sm:$0xff] %v13846_v15  ;;  %17130 = vst [vmem:[#allocation92_spill] sm:$0xff] %v13852_v28  ;;  %v13855_v43 = vsel %vm17131_vm3, %v5613_v58, %v5614_v26  ;;  %v13858_v31 = vsel %vm17133_vm6, %v5614_v26, %v5619_v63  ;;  %v5633_v0 = vrot.slane %v13761_v51, 4  ;;  %v17135_v8 = vpack.i.bf16 %v17106_v62, %v13481_v12  ;;  %v13906_v63 = vld [vmem:[#allocation3 + $0x178] sm:$0xf] }
 0x6ce   : > { %17132 = vst [vmem:[#allocation51_spill] sm:$0xff] %v13855_v43  ;;  %17134 = vst [vmem:[#allocation78_spill] sm:$0xff] %v13858_v31  ;;  %v13870_v37 = vsel %vm17136_vm1, %v5623_v9, %v5624_v13  ;;  %v13873_v49 = vsel %vm17138_vm7, %v5624_v13, %v5629_v35  ;;  %v4836_v32 = vrot.slane %v13532_v14, 2  ;;  %v5634_v12 = vrot.slane %v13764_v57, 4  ;;  %v14061_v43 = vld [vmem:[#allocation3 + $0xd8] sm:$0xff] }
 0x6cf   : > { %8518 = vrot.lane.b32.xlu0 %v8517_v45, %s9227_s12  ;;  %17137 = vst [vmem:[#allocation81_spill] sm:$0xff] %v13870_v37  ;;  %17139 = vst [vmem:[#allocation9_spill] sm:$0xff] %v13873_v49  ;;  %v5639_v62 = vrot.slane %v13823_v59, 4  ;;  %v13883_v45 = vld [vmem:[#allocation3 + $0x190] sm:$0xf]  ;;  %v8537_v2 = vpack.i.bf16 %v13887_v44, %v5216_v41  ;;  %v5643_v36 = vrot.slane %v13815_v17, 4 }
 0x6d0   : > { %8533 = vrot.lane.b32.xlu1 %v17126_v46, %s9225_s29  ;;  %17141 = vst [vmem:[#allocation33_spill] sm:$0xff] %v13883_v45  ;;  %v8552_v52 = vpack.i.bf16 %v13883_v45, %v13881_v23  ;;  %v5644_v61 = vrot.slane %v13796_v60, 4  ;;  %v17143_v53 = vrot.slane %v12964_v42, 2  ;;  %v17144_v38 = vrot.slane %v12950_v39, 2  ;;  %v13908_v46 = vld [vmem:[#allocation3 + $0x170] sm:$0xff]  ;;  %vm17160_vm3 = vmmov %vm17136_vm1 }
 0x6d1   : > { %v13898_v24 = vsel %vm17145_vm8, %v5633_v0, %v5634_v12  ;;  %v13901_v58 = vsel %vm17147_vm9, %v5634_v12, %v5639_v62  ;;  %v5649_v26 = vrot.slane %v13832_v3, 4  ;;  %v5225_v41 = vrot.slane %v13529_v21, 3  ;;  %vm17162_vm6 = vmmov %vm17136_vm1  ;;  %v14048_v37 = vld [vmem:[#allocation3 + $0x118] sm:$0xf]  ;;  %17195 = vst [vmem:[#allocation58_spill] sm:$0xff] %v14061_v43 }
 0x6d2   : > { %17146 = vst [vmem:[#allocation55_spill] sm:$0xff] %v13898_v24  ;;  %17148 = vst [vmem:[#allocation36_spill] sm:$0xff] %v13901_v58  ;;  %v8547_v9 = vpack.i.bf16 %v13906_v63, %v13908_v46  ;;  %v13915_v35 = vsel %vm17149_vm11, %v5643_v36, %v5644_v61  ;;  %v17151_v0 = vrot.slane %v13529_v21, 2  ;;  %v5220_v12 = vrot.slane %v13532_v14, 3  ;;  %v14056_v58 = vld [vmem:[#allocation3 + $0xe0] sm:$0xff] }
 0x6d3   : > { %8528 = vrot.lane.b32.xlu0 %v17135_v8, %s9226_s22  ;;  %17150 = vst [vmem:[#allocation12_spill] sm:$0xff] %v13915_v35  ;;  %v4835_v62 = vrot.slane %v13551_v48, 2  ;;  %v16533_v36 = vrot.slane %v13802_v40, 4  ;;  %v5593_v21 = vrot.slane %v13426_v56, 4  ;;  %v5594_v55 = vrot.slane %v13429_v10, 4  ;;  %17194 = vst [vmem:[#allocation83_spill] sm:$0xff] %v14048_v37 }
 0x6d4   : > { %8543 = vrot.lane.b32.xlu1 %v8542_v30, %s9225_s29  ;;  %v4844_v30 = vsel %vm1816_vm13, %v17144_v38, %v17143_v53  ;;  %v4842_v8 = vsel %vm1816_vm13, %v4836_v32, %v17151_v0  ;;  %v5653_v38 = vrot.slane %v13799_v7, 4  ;;  %v5219_v0 = vrot.slane %v13551_v48, 3 }
 0x6d5   : > { %v4837_v13 = vsel %vm1816_vm13, %v4835_v62, %v4836_v32  ;;  %v17155_v53 = vrot.slane %v12948_v22, 2  ;;  %v5223_v16 = vrot.slane %v13653_v6, 3  ;;  %vm17158_vm14 = vcmask 1044480   ;;  %v13956_v62 = vld [vmem:[#allocation3 + $0xd0] sm:$0xf] }
 0x6d6   : > { %v13945_v54 = vsel %vm17156_vm4, %v5653_v38, %v16533_v36  ;;  %v5221_v32 = vsel %vm17158_vm14, %v5219_v0, %v5220_v12  ;;  %vm17159_vm0 = vmmov %vm17158_vm14  ;;  %v4469_v6 = vrot.slane %v13956_v62, 1  ;;  %v17166_v0 = vrot.slane %v12964_v42, 1 }
 0x6d7   : > { %8538 = vrot.lane.b32.xlu0 %v8537_v2, %s9227_s12  ;;  %v13923_v2 = vsel %vm17152_vm2, %v5644_v61, %v5649_v26  ;;  %v5599_v61 = vrot.slane %v13422_v19, 4  ;;  %v8562_v26 = vpack.i.bf16 %v4844_v30, %v4842_v8  ;;  %17157 = vst [vmem:[#allocation80_spill] sm:$0xff] %v13945_v54  ;;  %v5226_v19 = vsel %vm17159_vm0, %v5220_v12, %v5225_v41  ;;  %vm17172_vm1 = vmmov %vm17159_vm0 }
 0x6d8   : > { %17153 = vst [vmem:[#allocation84_spill] sm:$0xff] %v13923_v2  ;;  %8553 = vrot.lane.b32.xlu1 %v8552_v52, %s9227_s12  ;;  %v17154_v52 = vrot.slane %v12950_v39, 2  ;;  %v13950_v30 = vsel %vm17160_vm3, %v5593_v21, %v5594_v55  ;;  %v4487_v41 = vrot.slane %v13823_v59, 1  ;;  %v17164_v12 = vrot.slane %v12950_v39, 1  ;;  %vm17178_vm7 = vmmov %vm17159_vm0 }
 0x6d9   : > { %17161 = vst [vmem:[#allocation61_spill] sm:$0xff] %v13950_v30  ;;  %v17165_v21 = vrot.slane %v12948_v22, 1  ;;  %v8572_v36 = vpack.i.bf16 %v5226_v19, %v5221_v32  ;;  %v17181_v32 = vld [vmem:[#allocation20_spill] sm:$0xff]  ;;  %vm17183_vm8 = vmmov %vm17159_vm0  ;;  %v5237_v18 = vrot.slane %v13956_v62, 3  ;;  %v4851_v22 = vrot.slane %v13691_v27, 2 }
 0x6da   : > { %v4840_v33 = vsel %vm1816_vm13, %v17155_v53, %v17154_v52  ;;  %v4853_v53 = vrot.slane %v13956_v62, 2  ;;  %v17170_v52 = vld [vmem:[#allocation23_spill] sm:$0xff]  ;;  %v17182_v19 = vrot.slane %v17181_v32, 3  ;;  %vm17186_vm9 = vmmov %vm17159_vm0  ;;  %v14031_v30 = vld [vmem:[#allocation3 + $0xc0] sm:$0xff]  ;;  %v4499_v31 = vrot.slane %v14048_v37, 1 }
 0x6db   : > { %8548 = vrot.lane.b32.xlu0 %v8547_v9, %s9226_s22  ;;  %v13953_v9 = vsel %vm17162_vm6, %v5594_v55, %v5599_v61  ;;  %v8557_v8 = vpack.i.bf16 %v4840_v33, %v4837_v13  ;;  %v4456_v55 = vsel %vm1707_vm12, %v17165_v21, %v17164_v12  ;;  %v17167_v33 = vmov %v17164_v12  ;;  %v17168_v61 = vld [vmem:[#allocation4_spill] sm:$0xff]  ;;  %v17175_v12 = vld [vmem:[#allocation11_spill] sm:$0xff]  ;;  %vm17198_vm11 = vmmov %vm17159_vm0 }
 0x6dc   : > { %17163 = vst [vmem:[#allocation57_spill] sm:$0xff] %v13953_v9  ;;  %8563 = vrot.lane.b32.xlu1 %v8562_v26, %s9226_s22  ;;  %v4460_v13 = vsel %vm1707_vm12, %v17167_v33, %v17166_v0  ;;  %v17169_v26 = vrot.slane %v17168_v61, 3  ;;  %v17171_v50 = vrot.slane %v17170_v52, 3  ;;  %v17176_v21 = vrot.slane %v17175_v12, 3  ;;  %v17180_v33 = vld [vmem:[#allocation85_spill] sm:$0xff]  ;;  %17193 = vst [vmem:[#allocation28_spill] sm:$0xff] %v14031_v30 }
 0x6dd   : > { %v4481_v52 = vrot.slane %v13761_v51, 1  ;;  %v8582_v61 = vpack.i.bf16 %v13881_v23, %v13887_v44  ;;  %v4464_v9 = vrot.slane %v14031_v30, 1  ;;  %v4848_v24 = vrot.slane %v14031_v30, 2  ;;  %vm17199_vm2 = vmmov %vm17159_vm0 }
 0x6de   : > { %v13978_v38 = vsel %vm17172_vm1, %v17171_v50, %v17169_v26  ;;  %v17177_v39 = vmov %v17169_v26  ;;  %v4482_v50 = vrot.slane %v13764_v57, 1  ;;  %v17185_v26 = vrot.slane %v12964_v42, 3  ;;  %vm17202_vm4 = vmmov %vm17159_vm0 }
 0x6df   : > { %17173 = vst [vmem:[#allocation39_spill] sm:$0xff] %v13978_v38  ;;  %8558 = vrot.lane.b32.xlu0 %v8557_v8, %s9226_s22  ;;  %v13989_v0 = vsel %vm17178_vm7, %v17177_v39, %v17176_v21  ;;  %v13997_v8 = vsel %vm17183_vm8, %v17182_v19, %v5223_v16  ;;  %v8567_v21 = vpack.i.bf16 %v4460_v13, %v4456_v55  ;;  %v4846_v19 = vrot.slane %v13707_v1, 2  ;;  %v14019_v13 = vld [vmem:[#allocation3 + $0x100] sm:$0xf]  ;;  %vm17209_vm14 = vmmov %vm17159_vm0 }
 0x6e0   : > { %17179 = vst [vmem:[#allocation63_spill] sm:$0xff] %v13989_v0  ;;  %17184 = vst [vmem:[#allocation30_spill] sm:$0xff] %v13997_v8  ;;  %v14002_v12 = vsel %vm17186_vm9, %v5223_v16, %v17185_v26  ;;  %8573 = vrot.lane.b32.xlu1 %v8572_v36, %s9227_s12  ;;  %v4488_v32 = vsel %vm1707_vm12, %v4482_v50, %v4487_v41  ;;  %v4845_v42 = vrot.slane %v13704_v29, 2  ;;  %v14016_v36 = vld [vmem:[#allocation3 + $0xc8] sm:$0xff]  ;;  %v14024_v41 = vld [vmem:[#allocation3 + $0x98] sm:$0xff]  ;;  %v17205_v54 = vrot.slane %v14019_v13, 1 }
 0x6e1   : > { %17187 = vst [vmem:[#allocation62_spill] sm:$0xff] %v14002_v12  ;;  %17189 = vst [vmem:[#allocation86_spill] sm:$0xff] %v14016_v36  ;;  %v4849_v55 = vrot.slane %v14016_v36, 2  ;;  %v14028_v16 = vld [vmem:[#allocation3 + $0x198] sm:$0xff]  ;;  %v4465_v35 = vrot.slane %v14016_v36, 1  ;;  %v5233_v2 = vrot.slane %v14016_v36, 3  ;;  %v4852_v39 = vsel %vm1816_vm13, %v4846_v19, %v4851_v22 }
 0x6e2   : > { %17190 = vst [vmem:[#allocation34_spill] sm:$0xff] %v14019_v13  ;;  %17191 = vst [vmem:[#allocation72_spill] sm:$0xff] %v14024_v41  ;;  %v8592_v47 = vpack.i.bf16 %v14009_v11, %v14028_v16  ;;  %v3733_v36 = vld [vmem:[#allocation3 + $0x1b0] sm:$0xff]  ;;  %v5239_v44 = vrot.slane %v13741_v5, 3  ;;  %v16577_v41 = vrot.slane %v13764_v57, 2 }
 0x6e3   : > { %8568 = vrot.lane.b32.xlu0 %v8567_v21, %s9225_s29  ;;  %17192 = vst [vmem:[#allocation56_spill] sm:$0xff] %v14028_v16  ;;  %v4483_v21 = vsel %vm1707_vm12, %v4481_v52, %v4482_v50  ;;  %v4847_v52 = vsel %vm1816_vm13, %v4845_v42, %v4846_v19  ;;  %v5229_v50 = vrot.slane %v13704_v29, 3  ;;  %v4466_v42 = vsel %vm1707_vm12, %v4464_v9, %v4465_v35  ;;  %v14067_v19 = vld [vmem:[#allocation3 + $0x1a8] sm:$0xf]  ;;  %vm17219_vm3 = vmmov %vm17159_vm0 }
 0x6e4   : > { %8583 = vrot.lane.b32.xlu1 %v8582_v61, %s9226_s22  ;;  %v8577_v26 = vpack.i.bf16 %v4488_v32, %v4483_v21  ;;  %v14046_v61 = vsel %vm1816_vm13, %v4849_v55, %v4853_v53  ;;  %v5232_v21 = vrot.slane %v14031_v30, 3  ;;  %v4470_v49 = vsel %vm1707_vm12, %v4465_v35, %v4469_v6  ;;  %17196 = vst [vmem:[#allocation74_spill] sm:$0xff] %v14067_v19  ;;  %v14146_v30 = vld [vmem:[#allocation3 + $0x148] sm:$0xf]  ;;  %vm17261_vm6 = vmmov %vm17159_vm0 }
 0x6e5   : > { %v8587_v53 = vpack.i.bf16 %v4847_v52, %v13883_v45  ;;  %v4858_v32 = vrot.slane %v14061_v43, 2  ;;  %v4850_v9 = vsel %vm1816_vm13, %v4848_v24, %v4849_v55  ;;  %v17197_v35 = vrot.slane %v13707_v1, 3  ;;  %vm17263_vm1 = vmmov %vm17159_vm0 }
 0x6e6   : > { %v4475_v52 = vrot.slane %v14056_v58, 1  ;;  %v8602_v15 = vpack.i.bf16 %v4852_v39, %v4850_v9  ;;  %v8612_v28 = vpack.i.bf16 %v4470_v49, %v4466_v42  ;;  %v8607_v0 = vpack.i.bf16 %v14028_v16, %v14046_v61  ;;  %v14139_v16 = vld [vmem:[#allocation3 + $0x1c0] sm:$0xf]  ;;  %vm17265_vm7 = vmmov %vm17159_vm0 }
 0x6e7   : > { %8578 = vrot.lane.b32.xlu0 %v8577_v26, %s9225_s29  ;;  %v4859_v26 = vrot.slane %v14056_v58, 2  ;;  %v5231_v6 = vsel %vm17198_vm11, %v5229_v50, %v17197_v35  ;;  %v14078_v22 = vsel %vm17199_vm2, %v5232_v21, %v5233_v2  ;;  %v4497_v24 = vrot.slane %v13832_v3, 1  ;;  %v14095_v21 = vld [vmem:[#allocation3 + $0xf0] sm:$0xff]  ;;  %17207 = vst [vmem:[#allocation32_spill] sm:$0xff] %v14139_v16  ;;  %vm17267_vm8 = vmmov %vm17159_vm0 }
 0x6e8   : > { %8593 = vrot.lane.b32.xlu1 %v8592_v47, %s9227_s12  ;;  %v4474_v47 = vrot.slane %v14061_v43, 1  ;;  %17200 = vst [vmem:[#allocation69_spill] sm:$0xff] %v14078_v22  ;;  %v4492_v55 = vrot.slane %v13796_v60, 1  ;;  %v17201_v50 = vrot.slane %v13981_v4, 2  ;;  %v14088_v39 = vsel %vm17202_vm4, %v5233_v2, %v5237_v18  ;;  %v14117_v22 = vld [vmem:[#allocation3 + $0x110] sm:$0xff]  ;;  %vm17275_vm9 = vmmov %vm17159_vm0 }
 0x6e9   : > { %17203 = vst [vmem:[#allocation59_spill] sm:$0xff] %v14088_v39  ;;  %v8597_v49 = vpack.i.bf16 %v5231_v6, %v14067_v19  ;;  %v14093_v61 = vsel %vm1816_vm13, %v4858_v32, %v4859_v26  ;;  %v4868_v42 = vrot.slane %v14095_v21, 2  ;;  %v4491_v18 = vrot.slane %v13815_v17, 1  ;;  %v14114_v39 = vld [vmem:[#allocation3 + $0x108] sm:$0xff]  ;;  %vm17291_vm11 = vmmov %vm17159_vm0 }
 0x6ea   : > { %v14085_v35 = vsel %vm1816_vm13, %v4859_v26, %v17201_v50  ;;  %v5235_v50 = vrot.slane %v13691_v27, 3  ;;  %v14104_v2 = vsel %vm1707_vm12, %v4474_v47, %v4475_v52  ;;  %v4484_v6 = vrot.slane %v14095_v21, 1  ;;  %vm17305_vm2 = vmmov %vm17159_vm0 }
 0x6eb   : > { %8588 = vrot.lane.b32.xlu0 %v8587_v53, %s9226_s22  ;;  %v14098_v53 = vld [vmem:[#allocation3 + $0xf8] sm:$0xff]  ;;  %v4494_v27 = vrot.slane %v14114_v39, 1  ;;  %v4495_v47 = vrot.slane %v14117_v22, 1  ;;  %v4493_v38 = vsel %vm1707_vm12, %v4491_v18, %v4492_v55  ;;  %v4498_v8 = vsel %vm1707_vm12, %v4492_v55, %v4497_v24  ;;  %vm17306_vm4 = vmmov %vm17159_vm0 }
 0x6ec   : > { %8603 = vrot.lane.b32.xlu1 %v8602_v15, %s9226_s22  ;;  %v4485_v9 = vrot.slane %v14098_v53, 1  ;;  %v17204_v15 = vrot.slane %v13981_v4, 1  ;;  %v4869_v26 = vrot.slane %v14098_v53, 2  ;;  %v4879_v18 = vrot.slane %v14117_v22, 2  ;;  %v14137_v55 = vld [vmem:[#allocation3 + $0x1b8] sm:$0xff] }
 0x6ed   : > { %v4878_v24 = vrot.slane %v14114_v39, 2  ;;  %17206 = vst [vmem:[#allocation44_spill] sm:$0xff] %v14137_v55  ;;  %v8622_v45 = vpack.i.bf16 %v4498_v8, %v4493_v38  ;;  %v14155_v48 = vsel %vm1707_vm12, %v4494_v27, %v4495_v47  ;;  %v17212_v38 = vrot.slane %v14019_v13, 2 }
 0x6ee   : > { %v14109_v32 = vsel %vm1707_vm12, %v4475_v52, %v17204_v15  ;;  %v14122_v52 = vld [vmem:[#allocation3 + $0x130] sm:$0xf]  ;;  %v14128_v12 = vsel %vm1707_vm12, %v4484_v6, %v4485_v9  ;;  %v14133_v29 = vsel %vm1707_vm12, %v4485_v9, %v17205_v54  ;;  %v17208_v15 = vrot.slane %v13707_v1, 3  ;;  %17210 = vst [vmem:[#allocation64_spill] sm:$0xff] %v14155_v48  ;;  %v14182_v1 = vld [vmem:[#allocation3 + $0x120] sm:$0xff] }
 0x6ef   : > { %8598 = vrot.lane.b32.xlu0 %v8597_v49, %s9227_s12  ;;  %v4509_v49 = vrot.slane %v14122_v52, 1  ;;  %v4519_v9 = vrot.slane %v14146_v30, 1  ;;  %v14152_v23 = vsel %vm1816_vm13, %v4868_v42, %v4869_v26  ;;  %v4856_v6 = vrot.slane %v13757_v34, 2 }
 0x6f0   : > { %8613 = vrot.lane.b32.xlu1 %v8612_v28, %s9225_s29  ;;  %v5236_v28 = vsel %vm17209_vm14, %v17208_v15, %v5235_v50  ;;  %v14158_v50 = vsel %vm1707_vm12, %v4495_v47, %v4499_v31  ;;  %v4861_v15 = vrot.slane %v13734_v25, 2  ;;  %v8632_v8 = vpack.i.bf16 %v14139_v16, %v14137_v55  ;;  %v14198_v16 = vld [vmem:[#allocation3 + $0x140] sm:$0xff]  ;;  %vm17325_vm14 = vmmov %vm17159_vm0 }
 0x6f1   : > { %17211 = vst [vmem:[#allocation35_spill] sm:$0xff] %v14158_v50  ;;  %v8617_v42 = vpack.i.bf16 %v3733_v36, %v5236_v28  ;;  %v17213_v31 = vrot.slane %v14048_v37, 2  ;;  %v14178_v47 = vsel %vm1816_vm13, %v4878_v24, %v4879_v18  ;;  %v8627_v28 = vpack.i.bf16 %v14067_v19, %v14009_v11 }
 0x6f2   : > { %17215 = vst [vmem:[#allocation7_spill] sm:$0xff] %v14178_v47  ;;  %v4515_v55 = vrot.slane %v14198_v16, 1  ;;  %v4862_v36 = vsel %vm1816_vm13, %v4856_v6, %v4861_v15  ;;  %v4855_v19 = vrot.slane %v13741_v5, 2  ;;  %v4888_v11 = vrot.slane %v14182_v1, 2 }
 0x6f3   : > { %8608 = vrot.lane.b32.xlu0 %v8607_v0, %s9226_s22  ;;  %v14167_v0 = vsel %vm1816_vm13, %v4869_v26, %v17212_v38  ;;  %v14175_v27 = vsel %vm1816_vm13, %v4879_v18, %v17213_v31  ;;  %v4504_v26 = vrot.slane %v14182_v1, 1  ;;  %v14192_v18 = vld [vmem:[#allocation3 + $0x128] sm:$0xff]  ;;  %v14195_v31 = vld [vmem:[#allocation3 + $0x138] sm:$0xff]  ;;  %v5245_v38 = vrot.slane %v13734_v25, 3 }
 0x6f4   : > { %8623 = vrot.lane.b32.xlu1 %v8622_v45, %s9225_s29  ;;  %17214 = vst [vmem:[#allocation6_spill] sm:$0xff] %v14175_v27  ;;  %v14185_v45 = vld [vmem:[#allocation3 + $0x160] sm:$0xf]  ;;  %v4505_v24 = vrot.slane %v14192_v18, 1  ;;  %v4514_v54 = vrot.slane %v14195_v31, 1  ;;  %v4889_v14 = vrot.slane %v14192_v18, 2  ;;  %v4857_v25 = vsel %vm1816_vm13, %v4855_v19, %v4856_v6 }
 0x6f5   : > { %v4539_v48 = vrot.slane %v13906_v63, 1  ;;  %v4898_v15 = vrot.slane %v14195_v31, 2  ;;  %v8642_v47 = vpack.i.bf16 %v14085_v35, %v4862_v36  ;;  %v4865_v6 = vrot.slane %v13761_v51, 2  ;;  %v17220_v35 = vld [vmem:[#allocation22_spill] sm:$0xff] }
 0x6f6   : > { %v14220_v27 = vsel %vm1707_vm12, %v4505_v24, %v4509_v49  ;;  %v14223_v50 = vsel %vm1707_vm12, %v4514_v54, %v4515_v55  ;;  %v8206_v36 = vunpack.i.h.bf16 %v17220_v35  ;;  %v14233_v49 = vsel %vm1707_vm12, %v4515_v55, %v4519_v9  ;;  %v14252_v9 = vld [vmem:[#allocation3 + $0x150] sm:$0xff] }
 0x6f7   : > { %8618 = vrot.lane.b32.xlu0 %v8617_v42, %s9227_s12  ;;  %v5240_v42 = vrot.slane %v13757_v34, 3  ;;  %v4899_v34 = vrot.slane %v14198_v16, 2  ;;  %17217 = vst [vmem:[#allocation5_spill] sm:$0xff] %v14220_v27  ;;  %17218 = vst [vmem:[#allocation48_spill] sm:$0xff] %v14223_v50 }
 0x6f8   : > { %8633 = vrot.lane.b32.xlu1 %v8632_v8, %s9227_s12  ;;  %v14217_v8 = vsel %vm1707_vm12, %v4504_v26, %v4505_v24  ;;  %v8637_v26 = vpack.i.bf16 %v14093_v61, %v4857_v25  ;;  %17221 = vst [vmem:[#allocation77_spill] sm:$0xff] %v14233_v49  ;;  %v17222_v24 = vrot.slane %v14122_v52, 2  ;;  %v4919_v49 = vrot.slane %v13908_v46, 2 }
 0x6f9   : > { %17216 = vst [vmem:[#allocation21_spill] sm:$0xff] %v14217_v8  ;;  %v5241_v5 = vsel %vm17159_vm0, %v5239_v44, %v5240_v42  ;;  %v5246_v19 = vsel %vm17219_vm3, %v5240_v42, %v5245_v38  ;;  %v14239_v44 = vsel %vm1816_vm13, %v4888_v11, %v4889_v14  ;;  %v14249_v61 = vsel %vm1816_vm13, %v4898_v15, %v4899_v34  ;;  %v14255_v11 = vld [vmem:[#allocation3 + $0x168] sm:$0xff]  ;;  %vm17341_vm3 = vmmov %vm17159_vm0 }
 0x6fa   : > { %v14246_v42 = vsel %vm1816_vm13, %v4889_v14, %v17222_v24  ;;  %17224 = vst [vmem:[#allocation25_spill] sm:$0xff] %v14249_v61  ;;  %v8652_v55 = vpack.i.bf16 %v5246_v19, %v5241_v5  ;;  %v4534_v25 = vrot.slane %v14255_v11, 1  ;;  %v4535_v38 = vrot.slane %v13908_v46, 1  ;;  %v9029_v14 = vld [vmem:[%s16408_s5 + $0x140] sm:$0xff]  }
 0x6fb   : > { %8628 = vrot.lane.b32.xlu0 %v8627_v28, %s9226_s22  ;;  %v14235_v28 = vld [vmem:[#allocation3 + $0x158] sm:$0xff]  ;;  %17223 = vst [vmem:[#allocation52_spill] sm:$0xff] %v14246_v42  ;;  %v4867_v5 = vsel %vm1816_vm13, %v4865_v6, %v16577_v41  ;;  %v17225_v15 = vrot.slane %v14146_v30, 2  ;;  %v4908_v24 = vrot.slane %v14252_v9, 2  ;;  %v14275_v61 = vsel %vm3487_vm10, %v14061_v43, %v8206_v36  ;;  %7851 = vmatprep.subr.bf16.mxu1 %v9029_v14  ;;  %v17228_v36 = vld [vmem:[#allocation14_spill] sm:$0xff] }
 0x6fc   : > { %8643 = vrot.lane.b32.xlu1 %v8642_v47, %s9226_s22  ;;  %v4525_v54 = vrot.slane %v14235_v28, 1  ;;  %v4524_v47 = vrot.slane %v14252_v9, 1  ;;  %v8205_v8 = vunpack.i.l.bf16 %v17220_v35  ;;  %v4909_v6 = vrot.slane %v14235_v28, 2  ;;  %7641 = vmatprep.subr.bf16.mxu0 %v9029_v14  ;;  %v17232_v14 = vld [vmem:[#allocation41_spill] sm:$0xff] }
 0x6fd   : > { %v14268_v19 = vsel %vm1816_vm13, %v4899_v34, %v17225_v15  ;;  %v17227_v34 = vld [vmem:[#allocation15_spill] sm:$0xff]  ;;  %v4918_v50 = vrot.slane %v14255_v11, 2  ;;  %v8216_v43 = vunpack.i.h.bf16 %v17228_v36  ;;  %v8662_v35 = vpack.i.bf16 %v14152_v23, %v4867_v5 }
 0x6fe   : > { %17226 = vst [vmem:[#allocation13_spill] sm:$0xff] %v14268_v19  ;;  %v14281_v41 = vsel %vm1707_vm12, %v4524_v47, %v4525_v54  ;;  %v8211_v15 = vunpack.i.h.bf16 %v17227_v34  ;;  %v17230_v47 = vrot.slane %v14185_v45, 1  ;;  %v8215_v46 = vunpack.i.l.bf16 %v17228_v36 }
 0x6ff   : > { %8638 = vrot.lane.b32.xlu0 %v8637_v26, %s9226_s22  ;;  %v8210_v26 = vunpack.i.l.bf16 %v17227_v34  ;;  %v14299_v34 = vsel %vm1707_vm12, %v4534_v25, %v4535_v38  ;;  %v8221_v27 = vunpack.i.h.bf16 %v17232_v14  ;;  %v8220_v42 = vunpack.i.l.bf16 %v17232_v14 }
 0x700   : > { %8653 = vrot.lane.b32.xlu1 %v8652_v55, %s9227_s12  ;;  %v17229_v55 = vpack.i.bf16 %v14109_v32, %v14104_v2  ;;  %v14296_v19 = vsel %vm1707_vm12, %v4525_v54, %v17230_v47  ;;  %17231 = vst [vmem:[#allocation8_spill] sm:$0xff] %v14299_v34  ;;  %v14305_v23 = vsel %vm1707_vm12, %v4535_v38, %v4539_v48  ;;  %v17234_v32 = vld [vmem:[#allocation16_spill] sm:$0xff]  ;;  %v17235_v25 = vrot.slane %v14185_v45, 2 }
 0x701   : > { %17233 = vst [vmem:[#allocation26_spill] sm:$0xff] %v14305_v23  ;;  %v14309_v2 = vsel %vm3487_vm10, %v13956_v62, %v8205_v8  ;;  %v8226_v5 = vunpack.i.h.bf16 %v17234_v32  ;;  %v14314_v54 = vsel %vm1816_vm13, %v4908_v24, %v4909_v6  ;;  %v14323_v48 = vsel %vm3487_vm10, %v13981_v4, %v8211_v15 }
 0x702   : > { %v14319_v36 = vsel %vm1816_vm13, %v4909_v6, %v17235_v25  ;;  %v14327_v62 = vsel %vm3487_vm10, %v14056_v58, %v8210_v26  ;;  %v14332_v38 = vsel %vm1816_vm13, %v4918_v50, %v4919_v49  ;;  %v14336_v24 = vsel %vm3487_vm10, %v14098_v53, %v8216_v43  ;;  %v17239_v53 = vld [vmem:[#allocation19_spill] sm:$0xff] }
 0x703   : > { %8648 = vrot.lane.b32.xlu0 %v17229_v55, %s9225_s29  ;;  %17236 = vst [vmem:[#allocation49_spill] sm:$0xff] %v14332_v38  ;;  %v8225_v6 = vunpack.i.l.bf16 %v17234_v32  ;;  %v14348_v55 = vsel %vm3487_vm10, %v14095_v21, %v8215_v46  ;;  %v14352_v50 = vsel %vm3487_vm10, %v14114_v39, %v8221_v27  ;;  %v14356_v43 = vsel %vm3487_vm10, %v14019_v13, %v8220_v42  ;;  %v17240_v32 = vld [vmem:[#allocation40_spill] sm:$0xff]  ;;  %v17242_v42 = vld [vmem:[#allocation65_spill] sm:$0xff] }
 0x704   : > { %8663 = vrot.lane.b32.xlu1 %v8662_v35, %s9226_s22  ;;  %v17237_v35 = vrot.slane %v13906_v63, 2  ;;  %v8231_v47 = vunpack.i.h.bf16 %v17239_v53  ;;  %v14361_v14 = vsel %vm3487_vm10, %v14048_v37, %v8226_v5  ;;  %v8236_v25 = vunpack.i.h.bf16 %v17240_v32  ;;  %v17245_v5 = vld [vmem:[#allocation17_spill] sm:$0xff] }
 0x705   : > { %v8235_v21 = vunpack.i.l.bf16 %v17240_v32  ;;  %v17241_v39 = vpack.i.bf16 %v14133_v29, %v14128_v12  ;;  %v8241_v46 = vunpack.i.h.bf16 %v17242_v42  ;;  %v17243_v32 = vld [vmem:[#allocation42_spill] sm:$0xff]  ;;  %v17244_v29 = vld [vmem:[#allocation68_spill] sm:$0xff] }
 0x706   : > { %v14344_v26 = vsel %vm1816_vm13, %v4919_v49, %v17237_v35  ;;  %v8230_v49 = vunpack.i.l.bf16 %v17239_v53  ;;  %v8240_v35 = vunpack.i.l.bf16 %v17242_v42  ;;  %v14378_v53 = vsel %vm3487_vm10, %v14117_v22, %v8225_v6  ;;  %v17247_v6 = vld [vmem:[#allocation76_spill] sm:$0xff] }
 0x707   : > { %17238 = vst [vmem:[#allocation75_spill] sm:$0xff] %v14344_v26  ;;  %v8251_v8 = vunpack.i.h.bf16 %v17243_v32  ;;  %v8250_v37 = vunpack.i.l.bf16 %v17243_v32  ;;  %v8246_v12 = vunpack.i.h.bf16 %v17244_v29  ;;  %v8245_v42 = vunpack.i.l.bf16 %v17244_v29 }
 0x708   : > { %8673 = vrot.lane.b32.xlu1 %v17241_v39, %s9225_s29  ;;  %v14385_v39 = vsel %vm3487_vm10, %v14192_v18, %v8231_v47  ;;  %v14398_v32 = vsel %vm3487_vm10, %v14182_v1, %v8230_v49  ;;  %v14402_v18 = vsel %vm3487_vm10, %v14195_v31, %v8236_v25  ;;  %v14406_v47 = vsel %vm3487_vm10, %v14122_v52, %v8235_v21  ;;  %v17248_v49 = vld [vmem:[#allocation43_spill] sm:$0xff] }
 0x709   : > { %v14370_v27 = vpop.permute.xlu0 %8378  ;;  %v14419_v1 = vsel %vm3487_vm10, %v14198_v16, %v8240_v35  ;;  %v4871_v31 = vrot.slane %v13823_v59, 2  ;;  %v17249_v52 = vld [vmem:[#allocation71_spill] sm:$0xff] }
 0x70a   : > { %v16586_v15 = vunpack.i.l.bf16 %v14370_v27  ;;  %v17246_v22 = vunpack.i.h.bf16 %v14370_v27  ;;  %v5893_v25 = vpack.c.bf16 %v17249_v52, %v17248_v49 }
 0x70c   : > { %v5797_v13 = vsel %vm3487_vm10, %v17245_v5, %v16586_v15  ;;  %v5798_v4 = vsel %vm3487_vm10, %v17247_v6, %v17246_v22  ;;  %v14411_v5 = vld [vmem:[%s16408_s5 + $0x100] sm:$0xff]   ;;  %v14415_v22 = vsel %vm3487_vm10, %v14146_v30, %v8241_v46  ;;  %v14434_v30 = vsel %vm3487_vm10, %v14235_v28, %v8246_v12  ;;  %v14441_v46 = vld [vmem:[%s16408_s5 + $0x148] sm:$0xff]  }
 0x70d   : > { %v8389_v29 = vpop.permute.xlu0 %8388  ;;  %v5894_v34 = vpack.c.bf16 %v5798_v4, %v5797_v13  ;;  %v14426_v4 = vsel %vm3487_vm10, %v14185_v45, %v8250_v37  ;;  %v14430_v13 = vsel %vm3487_vm10, %v14255_v11, %v8251_v8  ;;  %17252 = vst [vmem:[#allocation11_spill] sm:$0xff] %v14434_v30  ;;  %v14436_v21 = vpop.permute.xlu1 %8403  ;;  %v14445_v37 = vsel %vm3487_vm10, %v14252_v9, %v8245_v42  ;;  %v17254_v45 = vld [vmem:[#allocation88_spill] sm:$0xff]  ;;  %v17255_v42 = vld [vmem:[#allocation38_spill] sm:$0xff] }
 0x70e   : > { %17250 = vst [vmem:[#allocation4_spill] sm:$0xff] %v14426_v4  ;;  %17251 = vst [vmem:[#allocation23_spill] sm:$0xff] %v14430_v13  ;;  %v8390_v16 = vunpack.i.l.bf16 %v8389_v29  ;;  %v16588_v8 = vunpack.i.h.bf16 %v14436_v21  ;;  %v16587_v28 = vunpack.i.l.bf16 %v14436_v21  ;;  %v8391_v6 = vunpack.i.h.bf16 %v8389_v29  ;;  %v14481_v29 = vld [vmem:[%s16408_s5 + $0x108] sm:$0xff]  }
 0x70f   : > { %6492 = vmatprep.mubr.bf16.mxu1 %v5894_v34  ;;  %17253 = vst [vmem:[#allocation20_spill] sm:$0xff] %v14445_v37  ;;  %v5255_v34 = vrot.slane %v13823_v59, 3  ;;  %v17257_v59 = vrot.slane %v13764_v57, 2 }
 0x710   : > { %6493 = vmatmul.mubr.bf16.vlgmr.msra.gmra.mrb[36].mxu1 %v5893_v25  ;;  %v5799_v11 = vsel %vm3487_vm10, %v17255_v42, %v16587_v28  ;;  %v17256_v25 = vld [vmem:[#allocation66_spill] sm:$0xff]  ;;  %v4299_v52 = vsel %vm3335_vm15, %v14309_v2, %v8390_v16  ;;  %v17258_v42 = vld [vmem:[#allocation53_spill] sm:$0xff] }
 0x711   : > { %v8399_v15 = vpop.permute.xlu0 %8398  ;;  %7859 = vmatpush3.bf16.msra.mxu1 %v14411_v5  ;;  %v5800_v35 = vsel %vm3487_vm10, %v17256_v25, %v16588_v8  ;;  %v14466_v12 = vsel %vm1816_vm13, %v17257_v59, %v4871_v31  ;;  %v8414_v49 = vpop.permute.xlu1 %8413  ;;  %v5900_v28 = vpack.c.bf16 %v17258_v42, %v13358_v20  ;;  %v4501_v25 = vrot.slane %v13799_v7, 1 }
 0x712   : > { %v8400_v9 = vunpack.i.l.bf16 %v8399_v15  ;;  %7852 = vmatprep.subr.bf16.mxu1 %v14441_v46  ;;  %v5901_v13 = vpack.c.bf16 %v5800_v35, %v5799_v11  ;;  %v8401_v4 = vunpack.i.h.bf16 %v8399_v15  ;;  %v4502_v31 = vrot.slane %v13802_v40, 1 }
 0x713   : > { %v8667_v11 = vpack.i.bf16 %v14167_v0, %v14466_v12  ;;  %v5907_v15 = vpack.c.bf16 %v13429_v10, %v13426_v56  ;;  %v5250_v59 = vrot.slane %v13764_v57, 3  ;;  %v4876_v8 = vrot.slane %v13796_v60, 2 }
 0x714   : > { %v14474_v30 = vsel %vm4321_vm5, %v4299_v52, %v8400_v9  ;;  %6500 = vmatprep.mubr.bf16.mxu1 %v5901_v13  ;;  %v5249_v52 = vrot.slane %v13761_v51, 3  ;;  %v4300_v13 = vsel %vm3335_vm15, %v14275_v61, %v8391_v6  ;;  %v8416_v20 = vunpack.i.h.bf16 %v8414_v49 }
 0x715   : > { %v4507_v2 = vrot.slane %v14474_v30, 1  ;;  %v8409_v16 = vpop.permute.xlu0 %8408  ;;  %7860 = vmatpush3.bf16.msra.mxu1 %v14481_v29  ;;  %v8415_v42 = vunpack.i.l.bf16 %v8414_v49  ;;  %v8424_v37 = vpop.permute.xlu1 %8423  ;;  %v14496_v56 = vsel %vm4321_vm5, %v4300_v13, %v8401_v4  ;;  %v4875_v4 = vrot.slane %v13815_v17, 2  ;;  %v17260_v13 = vld [vmem:[#allocation72_spill] sm:$0xff] }
 0x716   : > { %v8411_v35 = vunpack.i.h.bf16 %v8409_v16  ;;  %v8410_v9 = vunpack.i.l.bf16 %v8409_v16  ;;  %v4503_v16 = vsel %vm1707_vm12, %v4501_v25, %v4502_v31  ;;  %v17262_v57 = vrot.slane %v13832_v3, 2 }
 0x717   : > { %v4508_v0 = vsel %vm1707_vm12, %v4502_v31, %v4507_v2  ;;  %v4877_v23 = vsel %vm1816_vm13, %v4875_v4, %v4876_v8 }
 0x718   : > { %v4302_v10 = vsel %vm3335_vm15, %v14323_v48, %v8411_v35  ;;  %v4301_v12 = vsel %vm3335_vm15, %v14327_v62, %v8410_v9  ;;  %6501 = vmatmul.mubr.bf16.gmra.mrb[40].mxu1 %v5900_v28  ;;  %v8657_v6 = vpack.i.bf16 %v4508_v0, %v4503_v16  ;;  %v5259_v62 = vrot.slane %v13815_v17, 3 }
 0x719   : > { %v14504_v51 = vsel %vm4321_vm5, %v4302_v10, %v8416_v20  ;;  %v14507_v61 = vsel %vm4321_vm5, %v4301_v12, %v8415_v42  ;;  %v14509_v49 = vpop.permute.xlu0 %8418  ;;  %v5260_v28 = vrot.slane %v13796_v60, 3  ;;  %v8434_v25 = vpop.permute.xlu1 %8433  ;;  %v4511_v20 = vrot.slane %v14496_v56, 1 }
 0x71a   : > { %17259 = vst [vmem:[#allocation22_spill] sm:$0xff] %v14504_v51  ;;  %v16597_v2 = vunpack.i.h.bf16 %v14509_v49  ;;  %v16594_v48 = vunpack.i.l.bf16 %v14509_v49  ;;  %8658 = vrot.lane.b32.xlu0 %v8657_v6, %s9225_s29  ;;  %v4512_v42 = vrot.slane %v14507_v61, 1  ;;  %v4517_v31 = vrot.slane %v14504_v51, 1 }
 0x71b   : > { %v4885_v35 = vrot.slane %v13799_v7, 2  ;;  %v5256_v10 = vsel %vm17261_vm6, %v5250_v59, %v5255_v34  ;;  %v17264_v34 = vrot.slane %v13832_v3, 3  ;;  %v8435_v26 = vunpack.i.l.bf16 %v8434_v25  ;;  %vm17345_vm6 = vmmov %vm17159_vm0 }
 0x71c   : > { %v5801_v9 = vsel %vm3487_vm10, %v17180_v33, %v16594_v48  ;;  %v5802_v0 = vsel %vm3487_vm10, %v17260_v13, %v16597_v2  ;;  %v4513_v6 = vsel %vm1707_vm12, %v4511_v20, %v4512_v42  ;;  %v4518_v17 = vsel %vm1707_vm12, %v4512_v42, %v4517_v31  ;;  %v17271_v31 = vld [vmem:[#allocation7_spill] sm:$0xff] }
 0x71d   : > { %v14531_v16 = vpop.permute.xlu0 %8428  ;;  %v5908_v60 = vpack.c.bf16 %v5802_v0, %v5801_v9  ;;  %v4882_v48 = vsel %vm1816_vm13, %v4876_v8, %v17262_v57  ;;  %v8425_v33 = vunpack.i.l.bf16 %v8424_v37  ;;  %v5261_v2 = vsel %vm17263_vm1, %v5259_v62, %v5260_v28  ;;  %v14543_v38 = vpop.permute.xlu1 %8443 }
 0x71e   : > { %v5266_v12 = vsel %vm17265_vm7, %v5260_v28, %v17264_v34  ;;  %v8426_v13 = vunpack.i.h.bf16 %v8424_v37  ;;  %v8430_v20 = vunpack.i.l.bf16 %v14531_v16  ;;  %8668 = vrot.lane.b32.xlu0 %v8667_v11, %s9226_s22  ;;  %v8682_v42 = vpack.i.bf16 %v4518_v17, %v4513_v6  ;;  %v17270_v17 = vld [vmem:[#allocation6_spill] sm:$0xff]  ;;  %vm17367_vm7 = vmmov %vm17159_vm0 }
 0x71f   : > { %6508 = vmatprep.mubr.bf16.mxu1 %v5908_v60  ;;  %v17266_v57 = vunpack.i.h.bf16 %v17254_v45  ;;  %v8436_v4 = vunpack.i.h.bf16 %v8434_v25  ;;  %v5251_v3 = vsel %vm17267_vm8, %v5249_v52, %v5250_v59  ;;  %v17268_v37 = vrot.slane %v13802_v40, 2  ;;  %vm17374_vm8 = vmmov %vm17159_vm0 }
 0x720   : > { %6509 = vmatmul.mubr.bf16.gmra.mrb[44].mxu1 %v5907_v15  ;;  %8683 = vrot.lane.b32.xlu1 %v8682_v42, %s9225_s29  ;;  %v8677_v60 = vpack.i.bf16 %v5256_v10, %v5251_v3  ;;  %v8692_v28 = vpack.i.bf16 %v17270_v17, %v4882_v48  ;;  %v8687_v9 = vpack.i.bf16 %v17271_v31, %v4877_v23  ;;  %v16598_v25 = vrot.slane %v13802_v40, 3  ;;  %v14577_v48 = vld [vmem:[%s16408_s5 + $0x110] sm:$0xff]   ;;  %v9119_v3 = vld [vmem:[#allocation3 + $0xa8] sm:$0xff] }
 0x721   : > { %v14551_v8 = vsel %vm3487_vm10, %v13906_v63, %v17266_v57  ;;  %v14557_v62 = vsel %vm1816_vm13, %v4885_v35, %v17268_v37  ;;  %v14560_v11 = vpop.permute.xlu0 %8438  ;;  %v5269_v63 = vrot.slane %v13799_v7, 3  ;;  %v4303_v15 = vsel %vm3335_vm15, %v14348_v55, %v8425_v33  ;;  %v14572_v35 = vld [vmem:[%s16408_s5 + $0x150] sm:$0xff]  }
 0x722   : > { %17269 = vst [vmem:[#allocation15_spill] sm:$0xff] %v14560_v11  ;;  %v8440_v52 = vunpack.i.l.bf16 %v14560_v11  ;;  %v8702_v59 = vpack.i.bf16 %v5266_v12, %v5261_v2  ;;  %v4304_v23 = vsel %vm3335_vm15, %v14336_v24, %v8426_v13  ;;  %v14582_v33 = vsel %vm4321_vm5, %v4303_v15, %v8435_v26  ;;  %v8454_v2 = vpop.permute.xlu1 %8453  ;;  %8678 = vrot.lane.b32.xlu0 %v8677_v60, %s9227_s12 }
 0x723   : > { %17272 = vst [vmem:[#allocation14_spill] sm:$0xff] %v14582_v33  ;;  %v4305_v55 = vsel %vm3335_vm15, %v14356_v43, %v8430_v20  ;;  %v8712_v0 = vpack.i.bf16 %v14239_v44, %v14557_v62  ;;  %v14590_v10 = vsel %vm4321_vm5, %v4304_v23, %v8436_v4  ;;  %v8456_v12 = vunpack.i.h.bf16 %v8454_v2  ;;  %7853 = vmatprep.subr.bf16.mxu1 %v14572_v35  ;;  %v17276_v4 = vld [vmem:[#allocation60_spill] sm:$0xff] }
 0x724   : > { %17273 = vst [vmem:[#allocation41_spill] sm:$0xff] %v14590_v10  ;;  %v8455_v6 = vunpack.i.l.bf16 %v8454_v2  ;;  %v14593_v34 = vsel %vm4321_vm5, %v4305_v55, %v8440_v52  ;;  %v4891_v24 = vrot.slane %v14474_v30, 2  ;;  %v8445_v26 = vunpack.i.l.bf16 %v14543_v38  ;;  %8693 = vrot.lane.b32.xlu1 %v8692_v28, %s9226_s22  ;;  %7861 = vmatpush3.bf16.msra.mxu1 %v14577_v48 }
 0x725   : > { %17274 = vst [vmem:[#allocation16_spill] sm:$0xff] %v14593_v34  ;;  %v8431_v43 = vunpack.i.h.bf16 %v14531_v16  ;;  %v4527_v13 = vrot.slane %v14593_v34, 1  ;;  %v8449_v44 = vpop.permute.xlu0 %8448  ;;  %v5275_v20 = vrot.slane %v14474_v30, 3  ;;  %v4521_v42 = vrot.slane %v14582_v33, 1 }
 0x726   : > { %v14607_v57 = vsel %vm17275_vm9, %v5269_v63, %v16598_v25  ;;  %v17277_v16 = vunpack.i.l.bf16 %v14370_v27  ;;  %v14614_v60 = vpop.permute.xlu1 %8463  ;;  %v8450_v17 = vunpack.i.l.bf16 %v8449_v44  ;;  %8688 = vrot.lane.b32.xlu0 %v8687_v9, %s9226_s22  ;;  %v4522_v28 = vrot.slane %v14590_v10, 1  ;;  %vm17386_vm9 = vmmov %vm17159_vm0 }
 0x727   : > { %v17278_v31 = vunpack.i.h.bf16 %v14370_v27  ;;  %v16601_v15 = vunpack.i.h.bf16 %v14614_v60  ;;  %v16600_v52 = vunpack.i.l.bf16 %v14614_v60  ;;  %v8451_v23 = vunpack.i.h.bf16 %v8449_v44 }
 0x728   : > { %v4709_v37 = vsel %vm3487_vm10, %v17277_v16, %v8455_v6  ;;  %v8446_v55 = vunpack.i.h.bf16 %v14543_v38  ;;  %8703 = vrot.lane.b32.xlu1 %v8702_v59, %s9227_s12  ;;  %v4528_v6 = vsel %vm1707_vm12, %v4522_v28, %v4527_v13  ;;  %v5093_v9 = vsel %vm3335_vm15, %v8431_v43, %v8445_v26  ;;  %v9120_v59 = vld [vmem:[#allocation3 + $0xb0] sm:$0xff] }
 0x729   : > { %v4710_v63 = vsel %vm3487_vm10, %v17278_v31, %v8456_v12  ;;  %v14625_v2 = vpop.permute.xlu0 %8458  ;;  %v17280_v16 = vrot.slane %v13802_v40, 2  ;;  %v5803_v38 = vsel %vm3487_vm10, %v9119_v3, %v16600_v52  ;;  %v5804_v13 = vsel %vm3487_vm10, %v9120_v59, %v16601_v15 }
 0x72a   : > { %17279 = vst [vmem:[#allocation19_spill] sm:$0xff] %v14625_v2  ;;  %v8461_v12 = vunpack.i.h.bf16 %v14625_v2  ;;  %v5829_v26 = vsel %vm3335_vm15, %v4709_v37, %v8431_v43  ;;  %v5830_v44 = vsel %vm3335_vm15, %v4710_v63, %v8446_v55  ;;  %v8474_v25 = vpop.permute.xlu1 %8473  ;;  %v5915_v31 = vpack.c.bf16 %v5804_v13, %v5803_v38 }
 0x72b   : > { %v4892_v27 = vsel %vm1816_vm13, %v17280_v16, %v4891_v24  ;;  %v17281_v24 = vld [vmem:[#allocation35_spill] sm:$0xff]  ;;  %v17282_v16 = vld [vmem:[#allocation64_spill] sm:$0xff]  ;;  %v5094_v7 = vsel %vm3335_vm15, %v8446_v55, %v8450_v17  ;;  %v4306_v3 = vsel %vm3335_vm15, %v14352_v50, %v8451_v23  ;;  %v4523_v52 = vsel %vm1707_vm12, %v4521_v42, %v4522_v28  ;;  %v17288_v23 = vld [vmem:[#allocation90_spill] sm:$0xff] }
 0x72c   : > { %v17283_v62 = vpack.i.bf16 %v17281_v24, %v17282_v16  ;;  %v17284_v59 = vunpack.i.h.bf16 %v14560_v11  ;;  %v17285_v37 = vunpack.i.l.bf16 %v14625_v2  ;;  %v14657_v15 = vsel %vm4321_vm5, %v4306_v3, %v8461_v12  ;;  %8713 = vrot.lane.b32.xlu1 %v8712_v0, %s9226_s22  ;;  %6516 = vmatprep.mubr.bf16.mxu1 %v5915_v31  ;;  %v17287_v28 = vld [vmem:[#allocation31_spill] sm:$0xff] }
 0x72d   : > { %17286 = vst [vmem:[#allocation40_spill] sm:$0xff] %v14657_v15  ;;  %v8707_v17 = vpack.i.bf16 %v4528_v6, %v4523_v52  ;;  %v4895_v50 = vrot.slane %v14496_v56, 2  ;;  %v5895_v42 = vpack.c.bf16 %v5830_v44, %v5829_v26  ;;  %v17289_v38 = vpack.c.bf16 %v17287_v28, %v17288_v23  ;;  %v17292_v52 = vld [vmem:[#allocation52_spill] sm:$0xff]  ;;  %v14681_v3 = vld [vmem:[%s16408_s5 + $0x158] sm:$0xff]  }
 0x72e   : > { %8698 = vrot.lane.b32.xlu0 %v17283_v62, %s9225_s29  ;;  %v5861_v43 = vsel %vm4321_vm5, %v5093_v9, %v17284_v59  ;;  %v5862_v63 = vsel %vm4321_vm5, %v5094_v7, %v17285_v37  ;;  %v8469_v62 = vpop.permute.xlu0 %8468  ;;  %v17290_v7 = vrot.slane %v13802_v40, 3  ;;  %v8476_v24 = vunpack.i.h.bf16 %v8474_v25  ;;  %v14667_v0 = vpop.permute.xlu1 %8483  ;;  %v17296_v37 = vld [vmem:[#allocation21_spill] sm:$0xff]  ;;  %7854 = vmatprep.subr.bf16.mxu1 %v14681_v3 }
 0x72f   : > { %v5896_v55 = vpack.c.bf16 %v5862_v63, %v5861_v43  ;;  %6517 = vmatmul.mubr.bf16.gmra.mrb[48].mxu1 %v17289_v38  ;;  %v8471_v9 = vunpack.i.h.bf16 %v8469_v62  ;;  %v8470_v13 = vunpack.i.l.bf16 %v8469_v62  ;;  %v8475_v16 = vunpack.i.l.bf16 %v8474_v25 }
 0x730   : > { %v5276_v12 = vsel %vm17291_vm11, %v17290_v7, %v5275_v20  ;;  %v8717_v6 = vpack.i.bf16 %v17292_v52, %v4892_v27  ;;  %v4896_v31 = vrot.slane %v14507_v61, 2  ;;  %v4531_v20 = vrot.slane %v14657_v15, 1  ;;  %vm17387_vm11 = vmmov %vm17159_vm0 }
 0x731   : > { %6653 = vmatprep.mubr.bf16.mxu0 %v5896_v55  ;;  %v4308_v26 = vsel %vm3335_vm15, %v14361_v14, %v8471_v9  ;;  %v4307_v44 = vsel %vm3335_vm15, %v14378_v53, %v8470_v13  ;;  %v4901_v25 = vrot.slane %v14504_v51, 2  ;;  %v8486_v27 = vunpack.i.h.bf16 %v14667_v0  ;;  %v17295_v53 = vld [vmem:[#allocation5_spill] sm:$0xff] }
 0x732   : > { %8708 = vrot.lane.b32.xlu0 %v8707_v17, %s9225_s29  ;;  %6654 = vmatmul.mubr.bf16.vlgmr.msra.gmra.mrb[36].mxu0 %v5895_v42  ;;  %v8485_v59 = vunpack.i.l.bf16 %v14667_v0  ;;  %v14686_v43 = vsel %vm4321_vm5, %v4308_v26, %v8476_v24  ;;  %v14689_v14 = vsel %vm4321_vm5, %v4307_v44, %v8475_v16  ;;  %v17297_v63 = vpack.i.bf16 %v17295_v53, %v17296_v37  ;;  %v8479_v62 = vpop.permute.xlu0 %8478  ;;  %v14700_v23 = vpop.permute.xlu1 %8493  ;;  %v9036_v0 = vld [vmem:[%s16408_s5 + $0x118] sm:$0xff]  }
 0x733   : > { %17293 = vst [vmem:[#allocation65_spill] sm:$0xff] %v14686_v43  ;;  %17294 = vst [vmem:[#allocation42_spill] sm:$0xff] %v14689_v14  ;;  %7642 = vmatpush3.bf16.msra.mxu0 %v14411_v5  ;;  %v8481_v17 = vunpack.i.h.bf16 %v8479_v62  ;;  %v8480_v55 = vunpack.i.l.bf16 %v8479_v62  ;;  %v4532_v42 = vrot.slane %v14689_v14, 1  ;;  %v4537_v28 = vrot.slane %v14686_v43, 1  ;;  %7862 = vmatpush3.bf16.msra.mxu1 %v9036_v0 }
 0x734   : > { %8723 = vrot.lane.b32.xlu1 %v17297_v63, %s9225_s29  ;;  %7643 = vmatprep.subr.bf16.mxu0 %v14441_v46  ;;  %17298 = vst [vmem:[#allocation68_spill] sm:$0xff] %v14700_v23  ;;  %v8727_v38 = vpack.i.bf16 %v5276_v12, %v14607_v57  ;;  %v4897_v9 = vsel %vm1816_vm13, %v4895_v50, %v4896_v31  ;;  %v5280_v5 = vrot.slane %v14507_v61, 3  ;;  %v5285_v13 = vrot.slane %v14504_v51, 3  ;;  %v17300_v63 = vld [vmem:[#allocation33_spill] sm:$0xff] }
 0x735   : > { %v16602_v7 = vunpack.i.h.bf16 %v14700_v23  ;;  %v16603_v24 = vunpack.i.l.bf16 %v14700_v23  ;;  %v4533_v46 = vsel %vm1707_vm12, %v4531_v20, %v4532_v42  ;;  %v4538_v16 = vsel %vm1707_vm12, %v4532_v42, %v4537_v28 }
 0x736   : > { %8718 = vrot.lane.b32.xlu0 %v8717_v6, %s9226_s22  ;;  %v8489_v52 = vpop.permute.xlu0 %8488  ;;  %v8732_v57 = vpack.i.bf16 %v4538_v16, %v4533_v46  ;;  %v5095_v50 = vsel %vm3335_vm15, %v8480_v55, %v8481_v17  ;;  %v5096_v12 = vsel %vm3335_vm15, %v8485_v59, %v8486_v27  ;;  %v4902_v6 = vsel %vm1816_vm13, %v4896_v31, %v4901_v25  ;;  %v8504_v37 = vpop.permute.xlu1 %8503  ;;  %v17299_v25 = vld [vmem:[#allocation37_spill] sm:$0xff] }
 0x737   : > { %7644 = vmatpush3.bf16.msra.mxu0 %v14481_v29  ;;  %v8491_v26 = vunpack.i.h.bf16 %v8489_v52  ;;  %v8490_v44 = vunpack.i.l.bf16 %v8489_v52  ;;  %v5863_v20 = vsel %vm4321_vm5, %v5095_v50, %v16603_v24  ;;  %v5864_v53 = vsel %vm4321_vm5, %v5096_v12, %v16602_v7  ;;  %v17303_v46 = vld [vmem:[#allocation25_spill] sm:$0xff] }
 0x738   : > { %7645 = vmatprep.subr.bf16.mxu0 %v14572_v35  ;;  %8733 = vrot.lane.b32.xlu1 %v8732_v57, %s9225_s29  ;;  %v5903_v31 = vpack.c.bf16 %v5864_v53, %v5863_v20  ;;  %v5279_v29 = vrot.slane %v14496_v56, 3  ;;  %v4545_v27 = vrot.slane %v17299_v25, 1  ;;  %v4549_v62 = vrot.slane %v17300_v63, 1  ;;  %v17304_v57 = vld [vmem:[#allocation13_spill] sm:$0xff] }
 0x739   : > { %v17301_v17 = vunpack.i.h.bf16 %v14436_v21  ;;  %v17302_v28 = vunpack.i.l.bf16 %v14436_v21  ;;  %v8737_v16 = vpack.i.bf16 %v17303_v46, %v4897_v9  ;;  %v8742_v50 = vpack.i.bf16 %v17304_v57, %v4902_v6  ;;  %v14765_v46 = vld [vmem:[#allocation3 + $0x188] sm:$0xff]  ;;  %v14768_v57 = vld [vmem:[#allocation3 + $0x190] sm:$0xf] }
 0x73a   : > { %8728 = vrot.lane.b32.xlu0 %v8727_v38, %s9227_s12  ;;  %v4905_v38 = vrot.slane %v14582_v33, 2  ;;  %6661 = vmatprep.mubr.bf16.mxu0 %v5903_v31  ;;  %v14738_v52 = vpop.permute.xlu0 %8498  ;;  %v5281_v53 = vsel %vm17305_vm2, %v5279_v29, %v5280_v5  ;;  %v4906_v9 = vrot.slane %v14590_v10, 2  ;;  %v8506_v31 = vunpack.i.h.bf16 %v8504_v37  ;;  %v8514_v63 = vpop.permute.xlu1 %8513  ;;  %v17317_v7 = vld [vmem:[#allocation45_spill] sm:$0xff] }
 0x73b   : > { %v4712_v42 = vsel %vm3487_vm10, %v17301_v17, %v8491_v26  ;;  %v4711_v35 = vsel %vm3487_vm10, %v17302_v28, %v8490_v44  ;;  %v16604_v26 = vunpack.i.h.bf16 %v14738_v52  ;;  %v16605_v21 = vunpack.i.l.bf16 %v14738_v52  ;;  %7646 = vmatpush3.bf16.msra.mxu0 %v14577_v48  ;;  %v17308_v48 = vld [vmem:[#allocation86_spill] sm:$0xff] }
 0x73c   : > { %v5831_v12 = vsel %vm3335_vm15, %v4711_v35, %v8480_v55  ;;  %v5832_v20 = vsel %vm3335_vm15, %v4712_v42, %v8485_v59  ;;  %v5286_v44 = vsel %vm17306_vm4, %v5280_v5, %v5285_v13  ;;  %v8505_v25 = vunpack.i.l.bf16 %v8504_v37  ;;  %8743 = vrot.lane.b32.xlu1 %v8742_v50, %s9226_s22  ;;  %v14751_v55 = vld [vmem:[#allocation3 + $0x180] sm:$0xff]  ;;  %7647 = vmatprep.subr.bf16.mxu0 %v14681_v3 }
 0x73d   : > { %v5902_v59 = vpack.c.bf16 %v5832_v20, %v5831_v12  ;;  %v4928_v6 = vrot.slane %v14751_v55, 2  ;;  %v8516_v29 = vunpack.i.h.bf16 %v8514_v63  ;;  %v8515_v17 = vunpack.i.l.bf16 %v8514_v63  ;;  %v17307_v5 = vld [vmem:[#allocation28_spill] sm:$0xff]  ;;  %v14771_v12 = vld [vmem:[#allocation3 + $0x170] sm:$0xff] }
 0x73e   : > { %8738 = vrot.lane.b32.xlu0 %v8737_v16, %s9226_s22  ;;  %v5805_v13 = vsel %vm3487_vm10, %v17307_v5, %v16605_v21  ;;  %v5806_v37 = vsel %vm3487_vm10, %v17308_v48, %v16604_v26  ;;  %v14763_v42 = vpop.permute.xlu0 %8508  ;;  %v8752_v28 = vpack.i.bf16 %v5286_v44, %v5281_v53  ;;  %v4929_v16 = vrot.slane %v14765_v46, 2  ;;  %v9037_v5 = vld [vmem:[%s16408_s5 + $0x160] sm:$0xff]  }
 0x73f   : > { %6662 = vmatmul.mubr.bf16.gmra.mrb[40].mxu0 %v5902_v59  ;;  %v5922_v35 = vpack.c.bf16 %v5806_v37, %v5805_v13  ;;  %v4933_v50 = vrot.slane %v14768_v57, 2  ;;  %v17309_v20 = vunpack.i.l.bf16 %v17254_v45  ;;  %v4907_v63 = vsel %vm1816_vm13, %v4905_v38, %v4906_v9  ;;  %7855 = vmatprep.subr.bf16.mxu1 %v9037_v5 }
 0x740   : > { %v17310_v53 = vrot.slane %v17276_v4, 1  ;;  %v14786_v59 = vsel %vm1707_vm12, %v4545_v27, %v4549_v62  ;;  %7648 = vmatpush3.bf16.msra.mxu0 %v9036_v0  ;;  %v4911_v45 = vrot.slane %v14593_v34, 2  ;;  %v4310_v13 = vsel %vm3335_vm15, %v14385_v39, %v8506_v31  ;;  %v14796_v4 = vpop.permute.xlu1 %8523  ;;  %v17312_v62 = vld [vmem:[#allocation48_spill] sm:$0xff]  ;;  %8753 = vrot.lane.b32.xlu1 %v8752_v28, %s9227_s12  ;;  %v17315_v31 = vld [vmem:[#allocation82_spill] sm:$0xff] }
 0x741   : > { %v14777_v3 = vsel %vm3487_vm10, %v14771_v12, %v17309_v20  ;;  %v4309_v38 = vsel %vm3335_vm15, %v14398_v32, %v8505_v25  ;;  %v8510_v48 = vunpack.i.l.bf16 %v14763_v42  ;;  %v14808_v20 = vsel %vm4321_vm5, %v4310_v13, %v8516_v29  ;;  %6524 = vmatprep.mubr.bf16.mxu1 %v5922_v35  ;;  %v17314_v39 = vld [vmem:[#allocation56_spill] sm:$0xff]  ;;  %7649 = vmatprep.subr.bf16.mxu0 %v9037_v5 }
 0x742   : > { %v14783_v44 = vsel %vm1707_vm12, %v17310_v53, %v4545_v27  ;;  %v17311_v27 = vld [vmem:[#allocation77_spill] sm:$0xff]  ;;  %v14805_v0 = vsel %vm4321_vm5, %v4309_v38, %v8515_v17  ;;  %v4554_v32 = vrot.slane %v17314_v39, 1  ;;  %v4555_v25 = vrot.slane %v17315_v31, 1  ;;  %v9038_v5 = vld [vmem:[%s16408_s5 + $0x120] sm:$0xff]  }
 0x743   : > { %v17313_v37 = vpack.i.bf16 %v17311_v27, %v17312_v62  ;;  %v17316_v53 = vld [vmem:[#allocation73_spill] sm:$0xff]  ;;  %v14815_v27 = vpop.permute.xlu0 %8518  ;;  %v8762_v28 = vpack.i.bf16 %v14314_v54, %v4907_v63  ;;  %v14819_v17 = vsel %vm1816_vm13, %v4928_v6, %v4929_v16  ;;  %v14824_v35 = vsel %vm1816_vm13, %v4929_v16, %v4933_v50  ;;  %7863 = vmatpush3.bf16.msra.mxu1 %v9038_v5 }
 0x744   : > { %v17318_v24 = vpack.c.bf16 %v17316_v53, %v17317_v7  ;;  %17319 = vst [vmem:[#allocation17_spill] sm:$0xff] %v14815_v27  ;;  %v8520_v13 = vunpack.i.l.bf16 %v14815_v27  ;;  %v4541_v54 = vrot.slane %v14805_v0, 1  ;;  %v4542_v6 = vrot.slane %v14808_v20, 1  ;;  %7650 = vmatpush3.bf16.msra.mxu0 %v9038_v5 }
 0x745   : > { %8748 = vrot.lane.b32.xlu0 %v17313_v37, %s9225_s29  ;;  %v4311_v63 = vsel %vm3335_vm15, %v14406_v47, %v8510_v48  ;;  %v8534_v37 = vpop.permute.xlu1 %8533  ;;  %8763 = vrot.lane.b32.xlu1 %v8762_v28, %s9226_s22  ;;  %v4912_v16 = vsel %vm1816_vm13, %v4906_v9, %v4911_v45  ;;  %v5295_v26 = vrot.slane %v14593_v34, 3  ;;  %v8525_v47 = vunpack.i.l.bf16 %v14796_v4 }
 0x746   : > { %6525 = vmatmul.mubr.bf16.gmra.mrb[52].mxu1 %v17318_v24  ;;  %v17320_v24 = vld [vmem:[#allocation74_spill] sm:$0xff]  ;;  %v8536_v50 = vunpack.i.h.bf16 %v8534_v37  ;;  %v8535_v53 = vunpack.i.l.bf16 %v8534_v37  ;;  %v14837_v29 = vsel %vm4321_vm5, %v4311_v63, %v8520_v13  ;;  %v8511_v48 = vunpack.i.h.bf16 %v14763_v42 }
 0x747   : > { %v4559_v62 = vrot.slane %v17320_v24, 1  ;;  %v14840_v24 = vsel %vm1707_vm12, %v4554_v32, %v4555_v25  ;;  %v4547_v9 = vrot.slane %v14837_v29, 1  ;;  %v8529_v45 = vpop.permute.xlu0 %8528  ;;  %v8767_v28 = vpack.i.bf16 %v14319_v36, %v4912_v16 }
 0x748   : > { %v5289_v13 = vrot.slane %v14582_v33, 3  ;;  %v5290_v32 = vrot.slane %v14590_v10, 3  ;;  %v8530_v38 = vunpack.i.l.bf16 %v8529_v45  ;;  %v17321_v42 = vpack.i.bf16 %v14296_v19, %v14281_v41 }
 0x749   : > { %v14853_v63 = vsel %vm1707_vm12, %v4555_v25, %v4559_v62  ;;  %v14856_v21 = vpop.permute.xlu1 %8543  ;;  %v4543_v36 = vsel %vm1707_vm12, %v4541_v54, %v4542_v6  ;;  %v4548_v16 = vsel %vm1707_vm12, %v4542_v6, %v4547_v9  ;;  %v17322_v7 = vunpack.i.l.bf16 %v14509_v49 }
 0x74a   : > { %8773 = vrot.lane.b32.xlu1 %v17321_v42, %s9225_s29  ;;  %v17323_v62 = vunpack.i.h.bf16 %v14509_v49  ;;  %v16609_v37 = vunpack.i.h.bf16 %v14856_v21  ;;  %v16608_v34 = vunpack.i.l.bf16 %v14856_v21  ;;  %v8526_v51 = vunpack.i.h.bf16 %v14796_v4  ;;  %v17326_v49 = vld [vmem:[#allocation58_spill] sm:$0xff] }
 0x74b   : > { %v4713_v25 = vsel %vm3487_vm10, %v17322_v7, %v8535_v53  ;;  %v5097_v41 = vsel %vm3335_vm15, %v8511_v48, %v8525_v47  ;;  %v14874_v19 = vpop.permute.xlu0 %8538  ;;  %v8757_v54 = vpack.i.bf16 %v4548_v16, %v4543_v36  ;;  %v5296_v6 = vsel %vm17325_vm14, %v5290_v32, %v5295_v26 }
 0x74c   : > { %v4714_v5 = vsel %vm3487_vm10, %v17323_v62, %v8536_v50  ;;  %17324 = vst [vmem:[#allocation76_spill] sm:$0xff] %v14874_v19  ;;  %v8531_v9 = vunpack.i.h.bf16 %v8529_v45  ;;  %v16610_v7 = vunpack.i.l.bf16 %v14874_v19  ;;  %v5807_v50 = vsel %vm3487_vm10, %v17326_v49, %v16608_v34 }
 0x74d   : > { %v5808_v4 = vsel %vm3487_vm10, %v14056_v58, %v16609_v37  ;;  %v5098_v53 = vsel %vm3335_vm15, %v8526_v51, %v8530_v38  ;;  %v8554_v47 = vpop.permute.xlu1 %8553  ;;  %8758 = vrot.lane.b32.xlu0 %v8757_v54, %s9225_s29  ;;  %v5833_v26 = vsel %vm3335_vm15, %v4713_v25, %v8511_v48  ;;  %v5834_v45 = vsel %vm3335_vm15, %v4714_v5, %v8526_v51  ;;  %v17328_v51 = vld [vmem:[#allocation27_spill] sm:$0xff] }
 0x74e   : > { %v5929_v42 = vpack.c.bf16 %v5808_v4, %v5807_v50  ;;  %v8541_v36 = vunpack.i.h.bf16 %v14874_v19  ;;  %v17327_v16 = vunpack.i.h.bf16 %v14815_v27  ;;  %v5866_v58 = vsel %vm4321_vm5, %v5098_v53, %v16610_v7  ;;  %v17329_v25 = vld [vmem:[#allocation91_spill] sm:$0xff] }
 0x74f   : > { %v16611_v38 = vrot.slane %v14689_v14, 2  ;;  %v8556_v49 = vunpack.i.h.bf16 %v8554_v47  ;;  %v8555_v34 = vunpack.i.l.bf16 %v8554_v47  ;;  %v8549_v54 = vpop.permute.xlu0 %8548  ;;  %v5291_v48 = vsel %vm17159_vm0, %v5289_v13, %v5290_v32 }
 0x750   : > { %v5865_v62 = vsel %vm4321_vm5, %v5097_v41, %v17327_v16  ;;  %6532 = vmatprep.mubr.bf16.mxu1 %v5929_v42  ;;  %v17330_v5 = vpack.c.bf16 %v17328_v51, %v17329_v25  ;;  %v8551_v4 = vunpack.i.h.bf16 %v8549_v54  ;;  %v8550_v37 = vunpack.i.l.bf16 %v8549_v54  ;;  %v14908_v42 = vld [vmem:[#allocation3 + $0x1a8] sm:$0xf] }
 0x751   : > { %v5910_v50 = vpack.c.bf16 %v5866_v58, %v5865_v62  ;;  %v5909_v41 = vpack.c.bf16 %v5834_v45, %v5833_v26  ;;  %v4915_v16 = vrot.slane %v14657_v15, 2  ;;  %v4312_v53 = vsel %vm3335_vm15, %v14402_v18, %v8531_v9  ;;  %v14905_v7 = vpop.permute.xlu1 %8563  ;;  %8768 = vrot.lane.b32.xlu0 %v8767_v28, %s9226_s22  ;;  %17331 = vst [vmem:[#allocation88_spill] sm:$0xff] %v14908_v42 }
 0x752   : > { %6533 = vmatmul.mubr.bf16.gmra.mrb[56].mxu1 %v17330_v5  ;;  %v8777_v47 = vpack.i.bf16 %v5296_v6, %v5291_v48  ;;  %v14914_v26 = vsel %vm4321_vm5, %v4312_v53, %v8541_v36  ;;  %v4314_v45 = vsel %vm3335_vm15, %v14415_v22, %v8551_v4  ;;  %v4313_v18 = vsel %vm3335_vm15, %v14419_v1, %v8550_v37  ;;  %v9039_v22 = vld [vmem:[%s16408_s5 + $0x168] sm:$0xff]  }
 0x753   : > { %6669 = vmatprep.mubr.bf16.mxu0 %v5910_v50  ;;  %v4917_v28 = vsel %vm1816_vm13, %v4915_v16, %v16611_v38  ;;  %v8566_v6 = vunpack.i.h.bf16 %v14905_v7  ;;  %v8565_v9 = vunpack.i.l.bf16 %v14905_v7  ;;  %v14926_v62 = vsel %vm4321_vm5, %v4314_v45, %v8556_v49  ;;  %v8559_v58 = vpop.permute.xlu0 %8558  ;;  %v9040_v1 = vld [vmem:[%s16408_s5 + $0x128] sm:$0xff]   ;;  %v17332_v7 = vld [vmem:[#allocation44_spill] sm:$0xff]  ;;  %7856 = vmatprep.subr.bf16.mxu1 %v9039_v22 }
 0x754   : > { %6670 = vmatmul.mubr.bf16.gmra.mrb[44].mxu0 %v5909_v41  ;;  %v14929_v36 = vsel %vm4321_vm5, %v4313_v18, %v8555_v34  ;;  %v4557_v37 = vrot.slane %v14926_v62, 1  ;;  %v4921_v54 = vrot.slane %v14686_v43, 2  ;;  %v17333_v49 = vld [vmem:[#allocation32_spill] sm:$0xff]  ;;  %v4551_v34 = vrot.slane %v14914_v26, 1  ;;  %v17335_v53 = vld [vmem:[#allocation49_spill] sm:$0xff]  ;;  %7864 = vmatpush3.bf16.msra.mxu1 %v9040_v1 }
 0x755   : > { %v14942_v51 = vpop.permute.xlu1 %8573  ;;  %v8561_v25 = vunpack.i.h.bf16 %v8559_v58  ;;  %v8560_v5 = vunpack.i.l.bf16 %v8559_v58  ;;  %8778 = vrot.lane.b32.xlu0 %v8777_v47, %s9227_s12  ;;  %v4552_v4 = vrot.slane %v14929_v36, 1  ;;  %v8787_v45 = vpack.i.bf16 %v17335_v53, %v4917_v28  ;;  %7651 = vmatprep.subr.bf16.mxu0 %v9039_v22 }
 0x756   : > { %17334 = vst [vmem:[#allocation38_spill] sm:$0xff] %v14942_v51  ;;  %v16612_v16 = vunpack.i.l.bf16 %v14942_v51  ;;  %v5300_v18 = vrot.slane %v14689_v14, 3  ;;  %v5100_v32 = vsel %vm3335_vm15, %v8565_v9, %v8566_v6  ;;  %7652 = vmatpush3.bf16.msra.mxu0 %v9040_v1  ;;  %v17336_v6 = vunpack.i.h.bf16 %v14942_v51 }
 0x757   : > { %v5099_v50 = vsel %vm3335_vm15, %v8560_v5, %v8561_v25  ;;  %v8569_v58 = vpop.permute.xlu0 %8568  ;;  %v4553_v47 = vsel %vm1707_vm12, %v4551_v34, %v4552_v4  ;;  %v4558_v48 = vsel %vm1707_vm12, %v4552_v4, %v4557_v37  ;;  %v17337_v25 = vrot.slane %v14689_v14, 2  ;;  %v14965_v37 = vld [vmem:[#allocation3 + $0x1b0] sm:$0xff] }
 0x758   : > { %v8571_v13 = vunpack.i.h.bf16 %v8569_v58  ;;  %v8570_v38 = vunpack.i.l.bf16 %v8569_v58  ;;  %v8782_v41 = vpack.i.bf16 %v4558_v48, %v4553_v47  ;;  %v5867_v28 = vsel %vm4321_vm5, %v5099_v50, %v16612_v16 }
 0x759   : > { %v8584_v53 = vpop.permute.xlu1 %8583  ;;  %8788 = vrot.lane.b32.xlu0 %v8787_v45, %s9226_s22  ;;  %v5868_v22 = vsel %vm4321_vm5, %v5100_v32, %v17336_v6  ;;  %v4922_v34 = vsel %vm1816_vm13, %v17337_v25, %v4921_v54  ;;  %v5305_v1 = vrot.slane %v14686_v43, 3  ;;  %v4948_v48 = vrot.slane %v14965_v37, 2 }
 0x75a   : > { %v8586_v4 = vunpack.i.h.bf16 %v8584_v53  ;;  %v17338_v50 = vunpack.i.h.bf16 %v14614_v60  ;;  %v17339_v45 = vunpack.i.l.bf16 %v14614_v60  ;;  %8783 = vrot.lane.b32.xlu1 %v8782_v41, %s9225_s29  ;;  %v5299_v32 = vrot.slane %v14657_v15, 3 }
 0x75b   : > { %v8585_v54 = vunpack.i.l.bf16 %v8584_v53  ;;  %v5917_v6 = vpack.c.bf16 %v5868_v22, %v5867_v28  ;;  %v14976_v25 = vpop.permute.xlu0 %8578  ;;  %v4925_v41 = vrot.slane %v14805_v0, 2  ;;  %v17342_v53 = vld [vmem:[#allocation26_spill] sm:$0xff]  ;;  %v17343_v22 = vld [vmem:[#allocation8_spill] sm:$0xff]  ;;  %vm17363_vm1 = vcmask 1043456  }
 0x75c   : > { %v4716_v58 = vsel %vm3487_vm10, %v17338_v50, %v8571_v13  ;;  %v4715_v47 = vsel %vm3487_vm10, %v17339_v45, %v8570_v38  ;;  %v16615_v13 = vunpack.i.l.bf16 %v14976_v25  ;;  %v17340_v50 = vld [vmem:[#allocation75_spill] sm:$0xff]  ;;  %v5301_v38 = vsel %vm17341_vm3, %v5299_v32, %v5300_v18  ;;  %vm17389_vm2 = vmmov %vm17363_vm1 }
 0x75d   : > { %v5835_v16 = vsel %vm3335_vm15, %v4715_v47, %v8560_v5  ;;  %v5836_v43 = vsel %vm3335_vm15, %v4716_v58, %v8565_v9  ;;  %v8792_v60 = vpack.i.bf16 %v17340_v50, %v4922_v34  ;;  %6677 = vmatprep.mubr.bf16.mxu0 %v5917_v6  ;;  %v8594_v28 = vpop.permute.xlu1 %8593  ;;  %v17344_v5 = vpack.i.bf16 %v17342_v53, %v17343_v22  ;;  %v14992_v34 = vld [vmem:[#allocation3 + $0xf0] sm:$0xff]  ;;  %v14998_v6 = vld [vmem:[#allocation3 + $0xf8] sm:$0xff]  ;;  %vm17393_vm4 = vmmov %vm17363_vm1 }
 0x75e   : > { %v5916_v9 = vpack.c.bf16 %v5836_v43, %v5835_v16  ;;  %v5306_v58 = vsel %vm17345_vm6, %v5300_v18, %v5305_v1  ;;  %v8596_v47 = vunpack.i.h.bf16 %v8594_v28  ;;  %v8595_v19 = vunpack.i.l.bf16 %v8594_v28  ;;  %v17347_v16 = vld [vmem:[#allocation20_spill] sm:$0xff]  ;;  %v17348_v1 = vld [vmem:[#allocation11_spill] sm:$0xff]  ;;  %vm17394_vm14 = vmmov %vm17363_vm1 }
 0x75f   : > { %8798 = vrot.lane.b32.xlu0 %v17344_v5, %s9225_s29  ;;  %8793 = vrot.lane.b32.xlu1 %v8792_v60, %s9226_s22  ;;  %v5809_v32 = vsel %vm3487_vm10, %v14992_v34, %v16615_v13  ;;  %v17346_v50 = vunpack.i.h.bf16 %v14976_v25  ;;  %v4315_v18 = vsel %vm3335_vm15, %v17347_v16, %v8585_v54  ;;  %v4316_v60 = vsel %vm3335_vm15, %v17348_v1, %v8586_v4  ;;  %v15008_v28 = vpop.permute.xlu0 %8588  ;;  %v17355_v1 = vld [vmem:[#allocation54_spill] sm:$0xff]  ;;  %vm17396_vm0 = vmmov %vm17363_vm1 }
 0x760   : > { %6678 = vmatmul.mubr.bf16.gmra.mrb[48].mxu0 %v5916_v9  ;;  %v15013_v5 = vsel %vm4321_vm5, %v4315_v18, %v8595_v19  ;;  %v15016_v13 = vsel %vm4321_vm5, %v4316_v60, %v8596_v47  ;;  %v17349_v45 = vrot.slane %v17315_v31, 2  ;;  %v17350_v54 = vrot.slane %v17314_v39, 2  ;;  %v9041_v9 = vld [vmem:[%s16408_s5 + $0x170] sm:$0xff]   ;;  %vm17397_vm6 = vmmov %vm17396_vm0 }
 0x761   : > { %v5810_v43 = vsel %vm3487_vm10, %v14998_v6, %v17346_v50  ;;  %v8802_v50 = vpack.i.bf16 %v5306_v58, %v5301_v38  ;;  %v9042_v19 = vld [vmem:[%s16408_s5 + $0x130] sm:$0xff]   ;;  %v8590_v47 = vunpack.i.l.bf16 %v15008_v28  ;;  %v17351_v38 = vrot.slane %v14808_v20, 2  ;;  %7857 = vmatprep.subr.bf16.mxu1 %v9041_v9  ;;  %7653 = vmatprep.subr.bf16.mxu0 %v9041_v9 }
 0x762   : > { %v5936_v53 = vpack.c.bf16 %v5810_v43, %v5809_v32  ;;  %v15023_v4 = vsel %vm1816_vm13, %v17350_v54, %v17349_v45  ;;  %v15031_v32 = vpop.permute.xlu1 %8603  ;;  %v17352_v45 = vrot.slane %v14908_v42, 2  ;;  %v17353_v58 = vrot.slane %v17315_v31, 2  ;;  %v17354_v18 = vld [vmem:[#allocation10_spill] sm:$0xff]  ;;  %7865 = vmatpush3.bf16.msra.mxu1 %v9042_v19  ;;  %7654 = vmatpush3.bf16.msra.mxu0 %v9042_v19 }
 0x763   : > { %v4927_v39 = vsel %vm1816_vm13, %v4925_v41, %v17351_v38  ;;  %v5659_v16 = vrot.slane %v14474_v30, 4  ;;  %8803 = vrot.lane.b32.xlu1 %v8802_v50, %s9227_s12  ;;  %v17356_v60 = vpack.c.bf16 %v17354_v18, %v17355_v1  ;;  %v17357_v41 = vrot.slane %v17333_v49, 2  ;;  %v15063_v50 = vld [vmem:[#allocation3 + $0xd8] sm:$0xff]  ;;  %v15067_v18 = vpop.permute.xlu0 %8598 }
 0x764   : > { %6540 = vmatprep.mubr.bf16.mxu1 %v5936_v53  ;;  %v15042_v43 = vsel %vm1816_vm13, %v17353_v58, %v17352_v45  ;;  %v17358_v54 = vrot.slane %v17332_v7, 2  ;;  %v5309_v58 = vrot.slane %v14805_v0, 3  ;;  %17360 = vst [vmem:[#allocation66_spill] sm:$0xff] %v15067_v18  ;;  %v4564_v49 = vrot.slane %v14965_v37, 1  ;;  %v15070_v1 = vld [vmem:[#allocation3 + $0x1b8] sm:$0xff]  ;;  %v17361_v53 = vld [vmem:[#allocation4_spill] sm:$0xff] }
 0x765   : > { %6541 = vmatmul.mubr.bf16.gmra.mrb[60].mxu1 %v17356_v60  ;;  %v4561_v22 = vrot.slane %v15013_v5, 1  ;;  %v4562_v45 = vrot.slane %v15016_v13, 1  ;;  %v4317_v60 = vsel %vm3335_vm15, %v17361_v53, %v8590_v47  ;;  %v17362_v7 = vrot.slane %v13802_v40, 4 }
 0x766   : > { %v15056_v31 = vsel %vm1816_vm13, %v17358_v54, %v17357_v41  ;;  %v17359_v38 = vmov %v17358_v54  ;;  %v4931_v41 = vrot.slane %v14837_v29, 2  ;;  %v8600_v54 = vunpack.i.l.bf16 %v15067_v18  ;;  %v8614_v27 = vpop.permute.xlu1 %8613 }
 0x767   : > { %v15061_v30 = vsel %vm1816_vm13, %v4948_v48, %v17359_v38  ;;  %v5310_v48 = vrot.slane %v14808_v20, 3  ;;  %v8812_v38 = vpack.i.bf16 %v14819_v17, %v4927_v39  ;;  %v15086_v23 = vsel %vm17363_vm1, %v17362_v7, %v5659_v16  ;;  %v8609_v53 = vpop.permute.xlu0 %8608  ;;  %vm17399_vm1 = vmmov %vm17396_vm0 }
 0x768   : > { %17364 = vst [vmem:[#allocation6_spill] sm:$0xff] %v15086_v23  ;;  %v5315_v11 = vrot.slane %v14837_v29, 3  ;;  %v8616_v2 = vunpack.i.h.bf16 %v8614_v27  ;;  %v8615_v17 = vunpack.i.l.bf16 %v8614_v27  ;;  %v15090_v9 = vsel %vm4321_vm5, %v4317_v60, %v8600_v54 }
 0x769   : > { %8813 = vrot.lane.b32.xlu1 %v8812_v38, %s9226_s22  ;;  %v8605_v39 = vunpack.i.l.bf16 %v15031_v32  ;;  %v8591_v47 = vunpack.i.h.bf16 %v15008_v28  ;;  %v4567_v19 = vrot.slane %v15090_v9, 1  ;;  %v17366_v7 = vrot.slane %v14808_v20, 2  ;;  %v15109_v38 = vld [vmem:[#allocation3 + $0x1c0] sm:$0xf] }
 0x76a   : > { %v15102_v27 = vsel %vm17367_vm7, %v5309_v58, %v5310_v48  ;;  %v17368_v60 = vrot.slane %v15070_v1, 1  ;;  %v4569_v28 = vrot.slane %v15109_v38, 1  ;;  %v15113_v10 = vpop.permute.xlu1 %8623  ;;  %v8610_v16 = vunpack.i.l.bf16 %v8609_v53  ;;  %vm17401_vm7 = vmmov %vm17396_vm0 }
 0x76b   : > { %v4932_v14 = vsel %vm1816_vm13, %v17366_v7, %v4931_v41  ;;  %17369 = vst [vmem:[#allocation7_spill] sm:$0xff] %v15113_v10  ;;  %v4563_v51 = vsel %vm1707_vm12, %v4561_v22, %v4562_v45  ;;  %v4568_v41 = vsel %vm1707_vm12, %v4562_v45, %v4567_v19  ;;  %v17370_v58 = vunpack.i.l.bf16 %v14738_v52  ;;  %v15131_v19 = vpop.permute.xlu0 %8618 }
 0x76c   : > { %v15107_v54 = vsel %vm1707_vm12, %v4564_v49, %v17368_v60  ;;  %v17371_v49 = vunpack.i.h.bf16 %v14738_v52  ;;  %v16633_v23 = vunpack.i.h.bf16 %v15113_v10  ;;  %v16632_v33 = vunpack.i.l.bf16 %v15113_v10  ;;  %17373 = vst [vmem:[#allocation60_spill] sm:$0xff] %v15131_v19 }
 0x76d   : > { %v4717_v7 = vsel %vm3487_vm10, %v17370_v58, %v8615_v17  ;;  %v17372_v15 = vpack.i.bf16 %v14786_v59, %v14783_v44  ;;  %v8606_v22 = vunpack.i.h.bf16 %v15031_v32  ;;  %v5101_v45 = vsel %vm3335_vm15, %v8591_v47, %v8605_v39 }
 0x76e   : > { %v4718_v60 = vsel %vm3487_vm10, %v17371_v49, %v8616_v2  ;;  %v8807_v17 = vpack.i.bf16 %v4568_v41, %v4563_v51  ;;  %v5316_v52 = vsel %vm17374_vm8, %v5310_v48, %v5315_v11  ;;  %v8611_v58 = vunpack.i.h.bf16 %v8609_v53  ;;  %v15135_v49 = vld [vmem:[#allocation3 + $0x108] sm:$0xff]  ;;  %v8634_v11 = vpop.permute.xlu1 %8633  ;;  %vm17403_vm8 = vmmov %vm17396_vm0 }
 0x76f   : > { %8823 = vrot.lane.b32.xlu1 %v17372_v15, %s9225_s29  ;;  %v16638_v2 = vunpack.i.l.bf16 %v15131_v19  ;;  %v5811_v44 = vsel %vm3487_vm10, %v15135_v49, %v16632_v33  ;;  %v15141_v15 = vld [vmem:[#allocation3 + $0x110] sm:$0xff]  ;;  %v5102_v51 = vsel %vm3335_vm15, %v8606_v22, %v8610_v16  ;;  %v5837_v48 = vsel %vm3335_vm15, %v4717_v7, %v8591_v47 }
 0x770   : > { %v5812_v59 = vsel %vm3487_vm10, %v15141_v15, %v16633_v23  ;;  %8808 = vrot.lane.b32.xlu0 %v8807_v17, %s9225_s29  ;;  %v5838_v39 = vsel %vm3335_vm15, %v4718_v60, %v8606_v22  ;;  %v8621_v53 = vunpack.i.h.bf16 %v15131_v19  ;;  %v17375_v41 = vunpack.i.h.bf16 %v15067_v18  ;;  %v8629_v17 = vpop.permute.xlu0 %8628  ;;  %v17376_v22 = vld [vmem:[#allocation29_spill] sm:$0xff] }
 0x771   : > { %v5943_v32 = vpack.c.bf16 %v5812_v59, %v5811_v44  ;;  %v5870_v23 = vsel %vm4321_vm5, %v5102_v51, %v16638_v2  ;;  %v8636_v42 = vunpack.i.h.bf16 %v8634_v11  ;;  %v8635_v10 = vunpack.i.l.bf16 %v8634_v11  ;;  %v17377_v44 = vld [vmem:[#allocation46_spill] sm:$0xff]  ;;  %v17379_v2 = vld [vmem:[#allocation23_spill] sm:$0xff] }
 0x772   : > { %v5869_v33 = vsel %vm4321_vm5, %v5101_v45, %v17375_v41  ;;  %v8817_v47 = vpack.i.bf16 %v14824_v35, %v4932_v14  ;;  %v4935_v60 = vrot.slane %v14914_v26, 2  ;;  %v17378_v59 = vpack.c.bf16 %v17376_v22, %v17377_v44  ;;  %v8644_v11 = vpop.permute.xlu1 %8643 }
 0x773   : > { %6548 = vmatprep.mubr.bf16.mxu1 %v5943_v32  ;;  %v5924_v7 = vpack.c.bf16 %v5870_v23, %v5869_v33  ;;  %v8631_v45 = vunpack.i.h.bf16 %v8629_v17  ;;  %v8630_v41 = vunpack.i.l.bf16 %v8629_v17  ;;  %v5923_v19 = vpack.c.bf16 %v5838_v39, %v5837_v48 }
 0x774   : > { %6549 = vmatmul.mubr.bf16.gmra.mrb[64].mxu1 %v17378_v59  ;;  %v5319_v51 = vrot.slane %v14914_v26, 3  ;;  %v4318_v16 = vsel %vm3335_vm15, %v17379_v2, %v8611_v58  ;;  %8818 = vrot.lane.b32.xlu0 %v8817_v47, %s9226_s22  ;;  %v8827_v33 = vpack.i.bf16 %v5316_v52, %v15102_v27  ;;  %v17380_v14 = vrot.slane %v15070_v1, 1 }
 0x775   : > { %6685 = vmatprep.mubr.bf16.mxu0 %v5924_v7  ;;  %v15175_v35 = vsel %vm4321_vm5, %v4318_v16, %v8621_v53  ;;  %v4319_v32 = vsel %vm3335_vm15, %v14777_v3, %v8630_v41  ;;  %v4320_v58 = vsel %vm3335_vm15, %v14551_v8, %v8631_v45  ;;  %v17381_v2 = vrot.slane %v14929_v36, 2  ;;  %v8639_v53 = vpop.permute.xlu0 %8638  ;;  %v9043_v3 = vld [vmem:[%s16408_s5 + $0x178] sm:$0xff]   ;;  %v15208_v41 = vld [vmem:[#allocation3 + $0x1c8] sm:$0xff] }
 0x776   : > { %v15172_v23 = vsel %vm1707_vm12, %v17380_v14, %v4569_v28  ;;  %6686 = vmatmul.mubr.bf16.gmra.mrb[52].mxu0 %v5923_v19  ;;  %v8646_v27 = vunpack.i.h.bf16 %v8644_v11  ;;  %v8645_v52 = vunpack.i.l.bf16 %v8644_v11  ;;  %v15185_v39 = vsel %vm4321_vm5, %v4319_v32, %v8635_v10  ;;  %v9044_v8 = vld [vmem:[%s16408_s5 + $0x138] sm:$0xff]   ;;  %v15201_v47 = vpop.permute.xlu1 %8653  ;;  %7858 = vmatprep.subr.bf16.mxu1 %v9043_v3  ;;  %v15210_v11 = vld [vmem:[#allocation3 + $0x1d0] sm:$0xff] }
 0x777   : > { %v4937_v48 = vsel %vm1816_vm13, %v4935_v60, %v17381_v2  ;;  %v15188_v28 = vsel %vm4321_vm5, %v4320_v58, %v8636_v42  ;;  %v4941_v19 = vrot.slane %v14926_v62, 2  ;;  %v5325_v16 = vrot.slane %v14926_v62, 3  ;;  %7866 = vmatpush3.bf16.msra.mxu1 %v9044_v8  ;;  %7655 = vmatprep.subr.bf16.mxu0 %v9043_v3 }
 0x778   : > { %v4577_v17 = vrot.slane %v15188_v28, 1  ;;  %v5320_v10 = vrot.slane %v14929_v36, 3  ;;  %v4571_v42 = vrot.slane %v15175_v35, 1  ;;  %v8641_v7 = vunpack.i.h.bf16 %v8639_v53  ;;  %8828 = vrot.lane.b32.xlu0 %v8827_v33, %s9227_s12  ;;  %7656 = vmatpush3.bf16.msra.mxu0 %v9044_v8 }
 0x779   : > { %v8640_v60 = vunpack.i.l.bf16 %v8639_v53  ;;  %v4572_v22 = vrot.slane %v15185_v39, 1  ;;  %v16640_v59 = vunpack.i.l.bf16 %v15201_v47  ;;  %v8837_v45 = vpack.i.bf16 %v15023_v4, %v4937_v48  ;;  %v8649_v58 = vpop.permute.xlu0 %8648 }
 0x77a   : > { %v5104_v33 = vsel %vm3335_vm15, %v8645_v52, %v8646_v27  ;;  %v8651_v4 = vunpack.i.h.bf16 %v8649_v58  ;;  %v8650_v48 = vunpack.i.l.bf16 %v8649_v58  ;;  %v17382_v3 = vunpack.i.h.bf16 %v15201_v47 }
 0x77b   : > { %v5103_v32 = vsel %vm3335_vm15, %v8640_v60, %v8641_v7  ;;  %v4573_v2 = vsel %vm1707_vm12, %v4571_v42, %v4572_v22  ;;  %v4578_v53 = vsel %vm1707_vm12, %v4572_v22, %v4577_v17  ;;  %v17383_v7 = vrot.slane %v14929_v36, 2 }
 0x77c   : > { %v8832_v44 = vpack.i.bf16 %v4578_v53, %v4573_v2  ;;  %v5871_v18 = vsel %vm4321_vm5, %v5103_v32, %v16640_v59  ;;  %8838 = vrot.lane.b32.xlu0 %v8837_v45, %s9226_s22  ;;  %v5872_v27 = vsel %vm4321_vm5, %v5104_v33, %v17382_v3  ;;  %v4958_v17 = vrot.slane %v15208_v41, 2 }
 0x77d   : > { %v4942_v42 = vsel %vm1816_vm13, %v17383_v7, %v4941_v19  ;;  %v16641_v8 = vrot.slane %v15210_v11, 2  ;;  %v4951_v22 = vrot.slane %v15090_v9, 2  ;;  %v17384_v58 = vunpack.i.h.bf16 %v14856_v21 }
 0x77e   : > { %v17385_v45 = vunpack.i.l.bf16 %v14856_v21  ;;  %8833 = vrot.lane.b32.xlu1 %v8832_v44, %s9225_s29  ;;  %v5321_v33 = vsel %vm17386_vm9, %v5319_v51, %v5320_v10  ;;  %v5931_v53 = vpack.c.bf16 %v5872_v27, %v5871_v18  ;;  %v5326_v7 = vsel %vm17387_vm11, %v5320_v10, %v5325_v16  ;;  %vm17405_vm9 = vmmov %vm17341_vm3 }
 0x77f   : > { %v4720_v32 = vsel %vm3487_vm10, %v17384_v58, %v8651_v4  ;;  %v4945_v59 = vrot.slane %v15013_v5, 2  ;;  %v4946_v14 = vrot.slane %v15016_v13, 2  ;;  %v8842_v4 = vpack.i.bf16 %v15042_v43, %v4942_v42  ;;  %vm17412_vm11 = vmmov %vm17341_vm3 }
 0x780   : > { %v4719_v2 = vsel %vm3487_vm10, %v17385_v45, %v8650_v48  ;;  %v5840_v3 = vsel %vm3335_vm15, %v4720_v32, %v8645_v52  ;;  %6693 = vmatprep.mubr.bf16.mxu0 %v5931_v53  ;;  %v17388_v44 = vpack.i.bf16 %v14853_v63, %v14840_v24  ;;  %v8872_v18 = vpack.i.bf16 %v15172_v23, %v15107_v54  ;;  %v17390_v32 = vld [vmem:[#allocation62_spill] sm:$0xff] }
 0x781   : > { %v5839_v19 = vsel %vm3335_vm15, %v4719_v2, %v8640_v60  ;;  %v4574_v51 = vrot.slane %v15208_v41, 1  ;;  %v4575_v52 = vrot.slane %v15210_v11, 1  ;;  %v5693_v16 = vrot.slane %v14805_v0, 4 }
 0x782   : > { %v5930_v21 = vpack.c.bf16 %v5840_v3, %v5839_v19  ;;  %8848 = vrot.lane.b32.xlu0 %v17388_v44, %s9225_s29  ;;  %8843 = vrot.lane.b32.xlu1 %v8842_v4, %s9226_s22  ;;  %v8852_v43 = vpack.i.bf16 %v5326_v7, %v5321_v33  ;;  %v4952_v10 = vsel %vm1816_vm13, %v4946_v14, %v4951_v22  ;;  %v5694_v60 = vrot.slane %v14808_v20, 4 }
 0x783   : > { %v5699_v24 = vrot.slane %v14837_v29, 4  ;;  %v5329_v63 = vrot.slane %v15013_v5, 3  ;;  %v5703_v54 = vrot.slane %v14914_v26, 4  ;;  %v5704_v23 = vrot.slane %v14929_v36, 4  ;;  %v17391_v29 = vld [vmem:[#allocation30_spill] sm:$0xff] }
 0x784   : > { %6694 = vmatmul.mubr.bf16.gmra.mrb[56].mxu0 %v5930_v21  ;;  %v5709_v48 = vrot.slane %v14926_v62, 4  ;;  %v5330_v27 = vrot.slane %v15016_v13, 3  ;;  %v5335_v42 = vrot.slane %v15090_v9, 3  ;;  %v4947_v58 = vsel %vm1816_vm13, %v4945_v59, %v4946_v14  ;;  %v17421_v59 = vld [vmem:[#allocation79_spill] sm:$0xff] }
 0x785   : > { %v15266_v22 = vsel %vm17389_vm2, %v5693_v16, %v5694_v60  ;;  %v17392_v45 = vpack.i.bf16 %v17390_v32, %v17391_v29  ;;  %v8867_v2 = vpack.i.bf16 %v15056_v31, %v4952_v10  ;;  %v15274_v33 = vsel %vm17393_vm4, %v5694_v60, %v5699_v24  ;;  %v15296_v10 = vld [vmem:[#allocation3 + $0x1d8] sm:$0xf]  ;;  %v9134_v29 = vld [vmem:[#allocation3 + $0xe0] sm:$0xff]  ;;  %vm17418_vm2 = vmmov %vm17341_vm3 }
 0x786   : > { %v15277_v62 = vsel %vm17394_vm14, %v5703_v54, %v5704_v23  ;;  %v15280_v53 = vsel %vm17396_vm0, %v5704_v23, %v5709_v48  ;;  %8853 = vrot.lane.b32.xlu1 %v8852_v43, %s9227_s12  ;;  %v5713_v19 = vrot.slane %v15013_v5, 4  ;;  %v5714_v31 = vrot.slane %v15016_v13, 4  ;;  %vm17420_vm4 = vmmov %vm17418_vm2 }
 0x787   : > { %8858 = vrot.lane.b32.xlu0 %v17392_v45, %s9227_s12  ;;  %17395 = vst [vmem:[#allocation35_spill] sm:$0xff] %v15277_v62  ;;  %v5719_v3 = vrot.slane %v15090_v9, 4  ;;  %v5723_v7 = vrot.slane %v15175_v35, 4  ;;  %v5724_v4 = vrot.slane %v15185_v39, 4  ;;  %v5729_v21 = vrot.slane %v15188_v28, 4  ;;  %vm17423_vm14 = vmmov %vm17418_vm2 }
 0x788   : > { %v8862_v44 = vpack.i.bf16 %v15061_v30, %v4947_v58  ;;  %v5336_v16 = vsel %vm17341_vm3, %v5330_v27, %v5335_v42  ;;  %v4956_v43 = vrot.slane %v15185_v39, 2  ;;  %v15299_v60 = vsel %vm17397_vm6, %v5713_v19, %v5714_v31  ;;  %v17414_v58 = vld [vmem:[#allocation59_spill] sm:$0xff]  ;;  %vm17424_vm0 = vmmov %vm17418_vm2 }
 0x789   : > { %17398 = vst [vmem:[#allocation64_spill] sm:$0xff] %v15299_v60  ;;  %v4579_v9 = vrot.slane %v15296_v10, 1  ;;  %v15304_v24 = vsel %vm17399_vm1, %v5714_v31, %v5719_v3  ;;  %v15307_v54 = vsel %vm17401_vm7, %v5723_v7, %v5724_v4  ;;  %v15310_v30 = vsel %vm17403_vm8, %v5724_v4, %v5729_v21  ;;  %v17406_v4 = vld [vmem:[#allocation39_spill] sm:$0xff]  ;;  %vm17429_vm3 = vmmov %vm17424_vm0 }
 0x78a   : > { %17400 = vst [vmem:[#allocation31_spill] sm:$0xff] %v15304_v24  ;;  %17402 = vst [vmem:[#allocation90_spill] sm:$0xff] %v15307_v54  ;;  %v4955_v23 = vrot.slane %v15175_v35, 2  ;;  %8863 = vrot.lane.b32.xlu1 %v8862_v44, %s9226_s22  ;;  %v5331_v48 = vsel %vm17405_vm9, %v5329_v63, %v5330_v27  ;;  %v5243_v45 = vrot.slane %v9134_v29, 3  ;;  %v5262_v19 = vrot.slane %v15135_v49, 3  ;;  %v17407_v49 = vld [vmem:[#allocation63_spill] sm:$0xff] }
 0x78b   : > { %8868 = vrot.lane.b32.xlu0 %v8867_v2, %s9226_s22  ;;  %17404 = vst [vmem:[#allocation52_spill] sm:$0xff] %v15310_v30  ;;  %v8877_v32 = vpack.i.bf16 %v5336_v16, %v5331_v48  ;;  %v5253_v2 = vrot.slane %v14998_v6, 3  ;;  %v4960_v63 = vsel %vm1816_vm13, %v4958_v17, %v16641_v8  ;;  %v4963_v27 = vrot.slane %v15296_v10, 2  ;;  %v17408_v44 = vld [vmem:[#allocation72_spill] sm:$0xff]  ;;  %v15341_v17 = vpop.permute.xlu1 %8663  ;;  %vm17432_vm6 = vmmov %vm17424_vm0  ;;  %v15415_v60 = vld [vmem:[#allocation3 + $0x158] sm:$0xff] }
 0x78c   : > { %v4957_v31 = vsel %vm1816_vm13, %v4955_v23, %v4956_v43  ;;  %v5263_v3 = vrot.slane %v15141_v15, 3  ;;  %v4961_v7 = vrot.slane %v15188_v28, 2  ;;  %v5252_v6 = vrot.slane %v14992_v34, 3  ;;  %v17410_v23 = vld [vmem:[#allocation85_spill] sm:$0xff]  ;;  %vm17434_vm1 = vmmov %vm17424_vm0 }
 0x78d   : > { %v17409_v16 = vrot.slane %v17408_v44, 3  ;;  %v17411_v48 = vrot.slane %v17410_v23, 3  ;;  %v17413_v15 = vld [vmem:[#allocation69_spill] sm:$0xff]  ;;  %v4576_v34 = vsel %vm1707_vm12, %v4574_v51, %v4575_v52  ;;  %v17415_v23 = vld [vmem:[#allocation47_spill] sm:$0xff]  ;;  %v17422_v21 = vrot.slane %v17421_v59, 3  ;;  %vm17435_vm7 = vmmov %vm17424_vm0 }
 0x78e   : > { %8873 = vrot.lane.b32.xlu1 %v8872_v18, %s9225_s29  ;;  %v8882_v42 = vpack.i.bf16 %v17414_v58, %v17413_v15  ;;  %v8887_v18 = vpack.i.bf16 %v4960_v63, %v4957_v31  ;;  %v17419_v58 = vrot.slane %v15063_v50, 3  ;;  %v15368_v8 = vsel %vm17424_vm0, %v5252_v6, %v5253_v2  ;;  %v17430_v31 = vld [vmem:[#allocation83_spill] sm:$0xff]  ;;  %vm17436_vm8 = vmmov %vm17424_vm0 }
 0x78f   : > { %8878 = vrot.lane.b32.xlu0 %v8877_v32, %s9227_s12  ;;  %v15339_v29 = vsel %vm17412_vm11, %v17411_v48, %v17409_v16  ;;  %v4580_v32 = vsel %vm1707_vm12, %v4575_v52, %v4579_v9  ;;  %v17416_v16 = vrot.slane %v17415_v23, 3  ;;  %v17417_v48 = vrot.slane %v17408_v44, 3  ;;  %v17426_v44 = vld [vmem:[#allocation34_spill] sm:$0xff]  ;;  %vm17428_vm12 = vmmov %vm17424_vm0 }
 0x790   : > { %v5244_v15 = vsel %vm17420_vm4, %v17419_v58, %v5243_v45  ;;  %v5248_v51 = vsel %vm17423_vm14, %v5243_v45, %v17422_v21  ;;  %v17425_v52 = vrot.slane %v15210_v11, 2  ;;  %v17427_v23 = vrot.slane %v17426_v44, 3  ;;  %vm17439_vm9 = vmmov %vm17424_vm0 }
 0x791   : > { %v15359_v14 = vsel %vm17418_vm2, %v17417_v48, %v17416_v16  ;;  %v15379_v50 = vsel %vm17429_vm3, %v5262_v19, %v5263_v3  ;;  %v17431_v63 = vrot.slane %v17430_v31, 3  ;;  %v5345_v45 = vrot.slane %v15188_v28, 3  ;;  %v9135_v48 = vld [vmem:[#allocation3 + $0x130] sm:$0xf]  ;;  %v15394_v28 = vpop.permute.xlu0 %8658  ;;  %vm17440_vm11 = vmmov %vm17424_vm0 }
 0x792   : > { %v4964_v9 = vsel %vm1816_vm13, %v17425_v52, %v4963_v27  ;;  %v15376_v16 = vsel %vm17428_vm12, %v5253_v2, %v17427_v23  ;;  %v8897_v6 = vpack.i.bf16 %v4580_v32, %v4576_v34  ;;  %v4962_v27 = vsel %vm1816_vm13, %v4956_v43, %v4961_v7  ;;  %8883 = vrot.lane.b32.xlu1 %v8882_v42, %s9227_s12  ;;  %v9136_v52 = vld [vmem:[#allocation3 + $0x148] sm:$0xf]  ;;  %v9137_v7 = vld [vmem:[#allocation3 + $0x120] sm:$0xff]  ;;  %v8674_v32 = vpop.permute.xlu1 %8673  ;;  %vm17433_vm13 = vmmov %vm17424_vm0 }
 0x793   : > { %v15384_v59 = vsel %vm17432_vm6, %v5263_v3, %v17431_v63  ;;  %8888 = vrot.lane.b32.xlu0 %v8887_v18, %s9226_s22  ;;  %v5340_v21 = vrot.slane %v15185_v39, 3  ;;  %v8907_v2 = vpack.i.bf16 %v5248_v51, %v5244_v15  ;;  %v5277_v19 = vrot.slane %v9135_v48, 3  ;;  %v9138_v23 = vld [vmem:[#allocation3 + $0x128] sm:$0xff]  ;;  %v9142_v43 = vld [vmem:[#allocation3 + $0x140] sm:$0xff]  ;;  %vm17443_vm2 = vmmov %vm17424_vm0 }
 0x794   : > { %v5287_v3 = vrot.slane %v9136_v52, 3  ;;  %v5339_v44 = vrot.slane %v15175_v35, 3  ;;  %v8917_v34 = vpack.i.bf16 %v15376_v16, %v15368_v8  ;;  %v5272_v42 = vrot.slane %v9137_v7, 3  ;;  %v9139_v8 = vld [vmem:[#allocation3 + $0x160] sm:$0xf]  ;;  %vm17444_vm4 = vmmov %vm17424_vm0 }
 0x795   : > { %v16646_v18 = vunpack.i.h.bf16 %v15394_v28  ;;  %v16647_v15 = vunpack.i.l.bf16 %v15394_v28  ;;  %v8892_v51 = vpack.i.bf16 %v4964_v9, %v4962_v27  ;;  %v5273_v31 = vrot.slane %v9138_v23, 3  ;;  %v15405_v52 = vld [vmem:[#allocation3 + $0x178] sm:$0xf]  ;;  %v8669_v54 = vpop.permute.xlu0 %8668  ;;  %vm17452_vm14 = vmmov %vm17424_vm0 }
 0x796   : > { %v5341_v63 = vsel %vm17433_vm13, %v5339_v44, %v5340_v21  ;;  %v5346_v48 = vsel %vm17434_vm1, %v5340_v21, %v5345_v45  ;;  %v5297_v16 = vrot.slane %v9139_v8, 3  ;;  %v9141_v27 = vld [vmem:[#allocation3 + $0x138] sm:$0xff]  ;;  %v5283_v45 = vrot.slane %v9142_v43, 3  ;;  %v15429_v62 = vpop.permute.xlu1 %8683  ;;  %vm17457_vm12 = vmmov %vm17424_vm0 }
 0x797   : > { %8898 = vrot.lane.b32.xlu0 %v8897_v6, %s9225_s29  ;;  %8893 = vrot.lane.b32.xlu1 %v8892_v51, %s9226_s22  ;;  %v5813_v9 = vsel %vm3487_vm10, %v9137_v7, %v16647_v15  ;;  %v5814_v6 = vsel %vm3487_vm10, %v9138_v23, %v16646_v18  ;;  %v5282_v44 = vrot.slane %v9141_v27, 3  ;;  %v8676_v21 = vunpack.i.h.bf16 %v8674_v32  ;;  %v15424_v23 = vld [vmem:[#allocation3 + $0x150] sm:$0xff]  ;;  %vm17458_vm3 = vmmov %vm17424_vm0 }
 0x798   : > { %v8675_v8 = vunpack.i.l.bf16 %v8674_v32  ;;  %v5950_v30 = vpack.c.bf16 %v5814_v6, %v5813_v9  ;;  %v5293_v51 = vrot.slane %v15415_v60, 3  ;;  %v8902_v58 = vpack.i.bf16 %v5346_v48, %v5341_v63  ;;  %vm17461_vm6 = vmmov %vm17424_vm0 }
 0x799   : > { %v15419_v24 = vsel %vm17435_vm7, %v5272_v42, %v5273_v31  ;;  %v15422_v7 = vsel %vm17436_vm8, %v5273_v31, %v5277_v19  ;;  %v5292_v18 = vrot.slane %v15424_v23, 3  ;;  %v8666_v15 = vunpack.i.h.bf16 %v15341_v17  ;;  %v17437_v31 = vld [vmem:[#allocation18_spill] sm:$0xff]  ;;  %v15450_v19 = vpop.permute.xlu0 %8678  ;;  %vm17462_vm13 = vmmov %vm17424_vm0 }
 0x79a   : > { %v8665_v32 = vunpack.i.l.bf16 %v15341_v17  ;;  %v8671_v9 = vunpack.i.h.bf16 %v8669_v54  ;;  %v8670_v6 = vunpack.i.l.bf16 %v8669_v54  ;;  %6556 = vmatprep.mubr.bf16.mxu1 %v5950_v30  ;;  %v17438_v63 = vpack.c.bf16 %v13802_v40, %v17437_v31  ;;  %v8694_v31 = vpop.permute.xlu1 %8693  ;;  %vm17465_vm1 = vmmov %vm17424_vm0 }
 0x79b   : > { %8908 = vrot.lane.b32.xlu0 %v8907_v2, %s9227_s12  ;;  %8903 = vrot.lane.b32.xlu1 %v8902_v58, %s9227_s12  ;;  %v15439_v48 = vsel %vm17439_vm9, %v5282_v44, %v5283_v45  ;;  %v15442_v54 = vsel %vm17440_vm11, %v5283_v45, %v5287_v3  ;;  %v17441_v30 = vunpack.i.l.bf16 %v14976_v25  ;;  %v17442_v2 = vunpack.i.h.bf16 %v14976_v25  ;;  %vm17466_vm7 = vmmov %vm17424_vm0 }
 0x79c   : > { %6557 = vmatmul.mubr.bf16.gmra.mrb[68].mxu1 %v17438_v63  ;;  %v15453_v40 = vsel %vm17443_vm2, %v5292_v18, %v5293_v51  ;;  %v15456_v58 = vsel %vm17444_vm4, %v5293_v51, %v5297_v16  ;;  %v16649_v44 = vunpack.i.h.bf16 %v15450_v19  ;;  %v8680_v3 = vunpack.i.l.bf16 %v15450_v19  ;;  %v15469_v18 = vld [vmem:[%s16408_s5 + $0x180] sm:$0xff]   ;;  %vm17467_vm8 = vmmov %vm17424_vm0 }
 0x79d   : > { %v4721_v17 = vsel %vm3487_vm10, %v17441_v30, %v8675_v8  ;;  %v4722_v42 = vsel %vm3487_vm10, %v17442_v2, %v8676_v21  ;;  %v17445_v45 = vunpack.i.l.bf16 %v15429_v62  ;;  %v17446_v25 = vunpack.i.h.bf16 %v15429_v62  ;;  %v17448_v2 = vld [vmem:[#allocation50_spill] sm:$0xff]  ;;  %7815 = vmatprep.subr.bf16.mxu0 %v15469_v18  ;;  %vm17470_vm9 = vmmov %vm17424_vm0 }
 0x79e   : > { %v5105_v16 = vsel %vm3335_vm15, %v8665_v32, %v8666_v15  ;;  %v5106_v51 = vsel %vm3335_vm15, %v8670_v6, %v8671_v9  ;;  %v5842_v30 = vsel %vm3335_vm15, %v4722_v42, %v8670_v6  ;;  %v15485_v9 = vld [vmem:[#allocation3 + $0x168] sm:$0xff]  ;;  %v8696_v6 = vunpack.i.h.bf16 %v8694_v31 }
 0x79f   : > { %v5815_v8 = vsel %vm3487_vm10, %v9141_v27, %v17445_v45  ;;  %v5816_v21 = vsel %vm3487_vm10, %v9142_v43, %v17446_v25  ;;  %8918 = vrot.lane.b32.xlu0 %v8917_v34, %s9227_s12  ;;  %v17447_v27 = vld [vmem:[#allocation89_spill] sm:$0xff]  ;;  %v5873_v43 = vsel %vm4321_vm5, %v5105_v16, %v8680_v3  ;;  %v5874_v15 = vsel %vm4321_vm5, %v5106_v51, %v16649_v44  ;;  %v8689_v25 = vpop.permute.xlu0 %8688  ;;  %v15493_v44 = vpop.permute.xlu1 %8703 }
 0x7a0   : > { %v5957_v63 = vpack.c.bf16 %v5816_v21, %v5815_v8  ;;  %v17449_v45 = vpack.i.bf16 %v17447_v27, %v17448_v2  ;;  %v5302_v34 = vrot.slane %v15485_v9, 3  ;;  %v5303_v8 = vrot.slane %v14771_v12, 3 }
 0x7a1   : > { %v8695_v42 = vunpack.i.l.bf16 %v8694_v31  ;;  %v5938_v21 = vpack.c.bf16 %v5874_v15, %v5873_v43  ;;  %v5841_v27 = vsel %vm3335_vm15, %v4721_v17, %v8665_v32  ;;  %v8691_v16 = vunpack.i.h.bf16 %v8689_v25 }
 0x7a2   : > { %8913 = vrot.lane.b32.xlu1 %v17449_v45, %s9227_s12  ;;  %6564 = vmatprep.mubr.bf16.mxu1 %v5957_v63  ;;  %v8690_v2 = vunpack.i.l.bf16 %v8689_v25  ;;  %v5956_v51 = vpack.c.bf16 %v14507_v61, %v14496_v56  ;;  %v5937_v45 = vpack.c.bf16 %v5842_v30, %v5841_v27  ;;  %v17450_v12 = vpack.i.bf16 %v15384_v59, %v15379_v50 }
 0x7a3   : > { %6701 = vmatprep.mubr.bf16.mxu0 %v5938_v21  ;;  %v8937_v31 = vpack.i.bf16 %v15422_v7, %v15419_v24  ;;  %v8942_v32 = vpack.i.bf16 %v15442_v54, %v15439_v48  ;;  %v5312_v17 = vrot.slane %v14751_v55, 3  ;;  %v5313_v63 = vrot.slane %v14765_v46, 3  ;;  %v8699_v55 = vpop.permute.xlu0 %8698 }
 0x7a4   : > { %8928 = vrot.lane.b32.xlu0 %v17450_v12, %s9227_s12  ;;  %v5107_v30 = vsel %vm3335_vm15, %v8690_v2, %v8691_v16  ;;  %v8706_v43 = vunpack.i.h.bf16 %v15493_v44  ;;  %v8705_v15 = vunpack.i.l.bf16 %v15493_v44  ;;  %6565 = vmatmul.mubr.bf16.gmra.mrb[72].mxu1 %v5956_v51  ;;  %v5317_v50 = vrot.slane %v14768_v57, 3 }
 0x7a5   : > { %6702 = vmatmul.mubr.bf16.gmra.mrb[60].mxu0 %v5937_v45  ;;  %v5108_v59 = vsel %vm3335_vm15, %v8695_v42, %v8696_v6  ;;  %v17451_v24 = vpack.i.bf16 %v17407_v49, %v17406_v4  ;;  %v8947_v46 = vpack.i.bf16 %v15456_v58, %v15453_v40  ;;  %v5304_v7 = vsel %vm17452_vm14, %v5302_v34, %v5303_v8  ;;  %v15526_v49 = vpop.permute.xlu1 %8713 }
 0x7a6   : > { %v17453_v48 = vrot.slane %v15405_v52, 3  ;;  %v8701_v25 = vunpack.i.h.bf16 %v8699_v55  ;;  %v8700_v21 = vunpack.i.l.bf16 %v8699_v55  ;;  %v5875_v57 = vsel %vm4321_vm5, %v5107_v30, %v8705_v15  ;;  %v15551_v55 = vld [vmem:[#allocation3 + $0x1a0] sm:$0xff] }
 0x7a7   : > { %8923 = vrot.lane.b32.xlu1 %v17451_v24, %s9227_s12  ;;  %v5876_v4 = vsel %vm4321_vm5, %v5108_v59, %v8706_v43  ;;  %v5332_v58 = vrot.slane %v14965_v37, 3  ;;  %v5333_v52 = vrot.slane %v15070_v1, 3  ;;  %v5337_v34 = vrot.slane %v15109_v38, 3  ;;  %v15548_v59 = vld [vmem:[#allocation3 + $0x198] sm:$0xff] }
 0x7a8   : > { %v5308_v54 = vsel %vm17424_vm0, %v5303_v8, %v17453_v48  ;;  %8938 = vrot.lane.b32.xlu0 %v8937_v31, %s9227_s12  ;;  %v5945_v40 = vpack.c.bf16 %v5876_v4, %v5875_v57  ;;  %v17454_v8 = vld [vmem:[#allocation7_spill] sm:$0xff]  ;;  %v5314_v45 = vsel %vm17457_vm12, %v5312_v17, %v5313_v63  ;;  %v5318_v12 = vsel %vm17458_vm3, %v5313_v63, %v5317_v50  ;;  %v15544_v31 = vpop.permute.xlu0 %8708 }
 0x7a9   : > { %v17455_v6 = vunpack.i.h.bf16 %v17454_v8  ;;  %v17456_v16 = vunpack.i.l.bf16 %v17454_v8  ;;  %v17459_v37 = vpack.i.bf16 %v15359_v14, %v15339_v29  ;;  %v5322_v24 = vrot.slane %v15548_v59, 3  ;;  %v17460_v29 = vld [vmem:[#allocation88_spill] sm:$0xff] }
 0x7aa   : > { %6709 = vmatprep.mubr.bf16.mxu0 %v5945_v40  ;;  %v5323_v17 = vrot.slane %v15551_v55, 3  ;;  %v8711_v63 = vunpack.i.h.bf16 %v15544_v31  ;;  %v8710_v50 = vunpack.i.l.bf16 %v15544_v31  ;;  %v5327_v48 = vrot.slane %v17460_v29, 3 }
 0x7ab   : > { %v4724_v27 = vsel %vm3487_vm10, %v17455_v6, %v8701_v25  ;;  %v4723_v51 = vsel %vm3487_vm10, %v17456_v16, %v8700_v21  ;;  %8933 = vrot.lane.b32.xlu1 %v17459_v37, %s9227_s12  ;;  %v8724_v25 = vpop.permute.xlu1 %8723  ;;  %v5334_v21 = vsel %vm17461_vm6, %v5332_v58, %v5333_v52  ;;  %v5338_v57 = vsel %vm17462_vm13, %v5333_v52, %v5337_v34  ;;  %v17463_v6 = vld [vmem:[#allocation14_spill] sm:$0xff] }
 0x7ac   : > { %v5843_v38 = vsel %vm3335_vm15, %v4723_v51, %v8690_v2  ;;  %v5844_v30 = vsel %vm3335_vm15, %v4724_v27, %v8695_v42  ;;  %8948 = vrot.lane.b32.xlu0 %v8947_v46, %s9227_s12  ;;  %v8957_v2 = vpack.i.bf16 %v5318_v12, %v5314_v45  ;;  %v8952_v42 = vpack.i.bf16 %v5308_v54, %v5304_v7  ;;  %v8719_v58 = vpop.permute.xlu0 %8718  ;;  %v17464_v27 = vld [vmem:[#allocation41_spill] sm:$0xff] }
 0x7ad   : > { %v5944_v14 = vpack.c.bf16 %v5844_v30, %v5843_v38  ;;  %v5817_v4 = vsel %vm3487_vm10, %v15424_v23, %v8710_v50  ;;  %v5818_v40 = vsel %vm3487_vm10, %v15415_v60, %v8711_v63  ;;  %v5342_v8 = vrot.slane %v15208_v41, 3 }
 0x7ae   : > { %v5343_v46 = vrot.slane %v15210_v11, 3  ;;  %v8726_v7 = vunpack.i.h.bf16 %v8724_v25  ;;  %v8725_v54 = vunpack.i.l.bf16 %v8724_v25  ;;  %v5964_v52 = vpack.c.bf16 %v5818_v40, %v5817_v4 }
 0x7af   : > { %6710 = vmatmul.mubr.bf16.gmra.mrb[64].mxu0 %v5944_v14  ;;  %8943 = vrot.lane.b32.xlu1 %v8942_v32, %s9227_s12  ;;  %v5347_v34 = vrot.slane %v15296_v10, 3  ;;  %v5963_v23 = vpack.c.bf16 %v17464_v27, %v17463_v6  ;;  %v8967_v16 = vpack.i.bf16 %v5338_v57, %v5334_v21  ;;  %v5324_v51 = vsel %vm17465_vm1, %v5322_v24, %v5323_v17 }
 0x7b0   : > { %v5328_v60 = vsel %vm17466_vm7, %v5323_v17, %v5327_v48  ;;  %v8716_v45 = vunpack.i.h.bf16 %v15526_v49  ;;  %v8715_v12 = vunpack.i.l.bf16 %v15526_v49  ;;  %v8721_v37 = vunpack.i.h.bf16 %v8719_v58  ;;  %6572 = vmatprep.mubr.bf16.mxu1 %v5964_v52  ;;  %8958 = vrot.lane.b32.xlu0 %v8957_v2, %s9227_s12  ;;  %v15587_v14 = vpop.permute.xlu0 %8728  ;;  %v15589_v49 = vpop.permute.xlu1 %8733 }
 0x7b1   : > { %v8720_v38 = vunpack.i.l.bf16 %v8719_v58  ;;  %6573 = vmatmul.mubr.bf16.gmra.mrb[76].mxu1 %v5963_v23  ;;  %v5344_v10 = vsel %vm17467_vm8, %v5342_v8, %v5343_v46  ;;  %v17468_v32 = vunpack.i.l.bf16 %v15394_v28  ;;  %v17469_v24 = vunpack.i.h.bf16 %v15394_v28 }
 0x7b2   : > { %v8962_v29 = vpack.i.bf16 %v5328_v60, %v5324_v51  ;;  %v5348_v48 = vsel %vm17470_vm9, %v5343_v46, %v5347_v34  ;;  %v16660_v25 = vunpack.i.h.bf16 %v15587_v14  ;;  %v16661_v2 = vunpack.i.l.bf16 %v15587_v14 }
 0x7b3   : > { %v4725_v30 = vsel %vm3487_vm10, %v17468_v32, %v8725_v54  ;;  %v4726_v17 = vsel %vm3487_vm10, %v17469_v24, %v8726_v7  ;;  %8953 = vrot.lane.b32.xlu1 %v8952_v42, %s9227_s12  ;;  %v8736_v21 = vunpack.i.h.bf16 %v15589_v49  ;;  %v8735_v57 = vunpack.i.l.bf16 %v15589_v49  ;;  %v9148_v7 = vld [vmem:[#allocation3 + $0x170] sm:$0xff] }
 0x7b4   : > { %v5109_v28 = vsel %vm3335_vm15, %v8715_v12, %v8716_v45  ;;  %v5110_v4 = vsel %vm3335_vm15, %v8720_v38, %v8721_v37  ;;  %8968 = vrot.lane.b32.xlu0 %v8967_v16, %s9227_s12  ;;  %v5846_v42 = vsel %vm3335_vm15, %v4726_v17, %v8720_v38  ;;  %v8739_v58 = vpop.permute.xlu0 %8738  ;;  %v8744_v52 = vpop.permute.xlu1 %8743  ;;  %v5845_v16 = vsel %vm3335_vm15, %v4725_v30, %v8715_v12  ;;  %v17471_v45 = vld [vmem:[#allocation40_spill] sm:$0xff]  ;;  %v17472_v37 = vld [vmem:[#allocation42_spill] sm:$0xff] }
 0x7b5   : > { %v5877_v40 = vsel %vm4321_vm5, %v5109_v28, %v16661_v2  ;;  %v5878_v8 = vsel %vm4321_vm5, %v5110_v4, %v16660_v25  ;;  %v5819_v46 = vsel %vm3487_vm10, %v15485_v9, %v8735_v57  ;;  %v5820_v54 = vsel %vm3487_vm10, %v9148_v7, %v8736_v21 }
 0x7b6   : > { %v5952_v34 = vpack.c.bf16 %v5878_v8, %v5877_v40  ;;  %v5971_v23 = vpack.c.bf16 %v5820_v54, %v5819_v46  ;;  %v8972_v51 = vpack.i.bf16 %v5348_v48, %v5344_v10  ;;  %v5951_v60 = vpack.c.bf16 %v5846_v42, %v5845_v16 }
 0x7b7   : > { %8963 = vrot.lane.b32.xlu1 %v8962_v29, %s9227_s12  ;;  %v5970_v38 = vpack.c.bf16 %v17472_v37, %v17471_v45  ;;  %v8741_v32 = vunpack.i.h.bf16 %v8739_v58  ;;  %v8740_v9 = vunpack.i.l.bf16 %v8739_v58  ;;  %v8746_v24 = vunpack.i.h.bf16 %v8744_v52 }
 0x7b8   : > { %v8745_v17 = vunpack.i.l.bf16 %v8744_v52  ;;  %6717 = vmatprep.mubr.bf16.mxu0 %v5952_v34  ;;  %6580 = vmatprep.mubr.bf16.mxu1 %v5971_v23  ;;  %v8749_v29 = vpop.permute.xlu0 %8748  ;;  %v15618_v28 = vpop.permute.xlu1 %8753  ;;  %v17473_v40 = vunpack.i.h.bf16 %v15429_v62  ;;  %v17474_v46 = vunpack.i.l.bf16 %v15429_v62  ;;  %vm17500_vm11 = vcmask 1043456  }
 0x7b9   : > { %6718 = vmatmul.mubr.bf16.gmra.mrb[68].mxu0 %v5951_v60  ;;  %6581 = vmatmul.mubr.bf16.gmra.mrb[80].mxu1 %v5970_v38  ;;  %v8751_v4 = vunpack.i.h.bf16 %v8749_v29  ;;  %v8750_v12 = vunpack.i.l.bf16 %v8749_v29  ;;  %v16654_v10 = vunpack.i.h.bf16 %v15618_v28  ;;  %v16655_v30 = vunpack.i.l.bf16 %v15618_v28  ;;  %v15648_v29 = vld [vmem:[#allocation3 + $0x188] sm:$0xff]  ;;  %vm17501_vm2 = vmmov %vm17500_vm11 }
 0x7ba   : > { %v5111_v48 = vsel %vm3335_vm15, %v8740_v9, %v8741_v32  ;;  %v5112_v42 = vsel %vm3335_vm15, %v8745_v17, %v8746_v24  ;;  %v15642_v24 = vld [vmem:[#allocation3 + $0x180] sm:$0xff]  ;;  %vm17510_vm4 = vmmov %vm17501_vm2 }
 0x7bb   : > { %8973 = vrot.lane.b32.xlu1 %v8972_v51, %s9227_s12  ;;  %v4728_v8 = vsel %vm3487_vm10, %v17473_v40, %v8751_v4  ;;  %v4727_v7 = vsel %vm3487_vm10, %v17474_v46, %v8750_v12  ;;  %v5879_v54 = vsel %vm4321_vm5, %v5111_v48, %v16655_v30  ;;  %v5880_v58 = vsel %vm4321_vm5, %v5112_v42, %v16654_v10  ;;  %v17486_v30 = vld [vmem:[#allocation51_spill] sm:$0xff]  ;;  %vm17518_vm14 = vmmov %vm17501_vm2 }
 0x7bc   : > { %v5959_v52 = vpack.c.bf16 %v5880_v58, %v5879_v54  ;;  %v5847_v34 = vsel %vm3335_vm15, %v4727_v7, %v8740_v9  ;;  %v5848_v23 = vsel %vm3335_vm15, %v4728_v8, %v8745_v17  ;;  %v8764_v51 = vpop.permute.xlu1 %8763  ;;  %v17475_v54 = vpack.c.bf16 %v14808_v20, %v14805_v0  ;;  %vm17523_vm0 = vmmov %vm17501_vm2 }
 0x7bd   : > { %v5958_v16 = vpack.c.bf16 %v5848_v23, %v5847_v34  ;;  %v8766_v40 = vunpack.i.h.bf16 %v8764_v51  ;;  %v8765_v8 = vunpack.i.l.bf16 %v8764_v51  ;;  %vm17524_vm12 = vmmov %vm17523_vm0 }
 0x7be   : > { %6725 = vmatprep.mubr.bf16.mxu0 %v5959_v52  ;;  %vm17528_vm3 = vmmov %vm17523_vm0 }
 0x7bf   : > { %v15638_v62 = vpop.permute.xlu0 %8758  ;;  %v5113_v51 = vsel %vm3335_vm15, %v8765_v8, %v8766_v40  ;;  %vm17529_vm6 = vmmov %vm17523_vm0 }
 0x7c0   : > { %v8761_v60 = vunpack.i.h.bf16 %v15638_v62  ;;  %v8760_v38 = vunpack.i.l.bf16 %v15638_v62  ;;  %v8774_v32 = vpop.permute.xlu1 %8773  ;;  %vm17535_vm13 = vmmov %vm17523_vm0 }
 0x7c1   : > { %6726 = vmatmul.mubr.bf16.gmra.mrb[72].mxu0 %v5958_v16  ;;  %v8776_v48 = vunpack.i.h.bf16 %v8774_v32  ;;  %v8775_v42 = vunpack.i.l.bf16 %v8774_v32  ;;  %vm17549_vm1 = vmmov %vm17523_vm0 }
 0x7c2   : > { %v5821_v9 = vsel %vm3487_vm10, %v15642_v24, %v8760_v38  ;;  %v5822_v17 = vsel %vm3487_vm10, %v15648_v29, %v8761_v60  ;;  %vm17550_vm7 = vmmov %vm17523_vm0 }
 0x7c3   : > { %v8769_v4 = vpop.permute.xlu0 %8768  ;;  %v5978_v12 = vpack.c.bf16 %v5822_v17, %v5821_v9  ;;  %v4729_v52 = vsel %vm3487_vm10, %v8710_v50, %v8775_v42  ;;  %v4730_v34 = vsel %vm3487_vm10, %v8711_v63, %v8776_v48  ;;  %vm17551_vm8 = vmmov %vm17523_vm0 }
 0x7c4   : > { %v8771_v46 = vunpack.i.h.bf16 %v8769_v4  ;;  %v8770_v7 = vunpack.i.l.bf16 %v8769_v4  ;;  %v5849_v9 = vsel %vm3335_vm15, %v4729_v52, %v8765_v8  ;;  %vm17552_vm9 = vmmov %vm17523_vm0 }
 0x7c5   : > { %6588 = vmatprep.mubr.bf16.mxu1 %v5978_v12 }
 0x7c6   : > { %6589 = vmatmul.mubr.bf16.gmra.mrb[84].mxu1 %v17475_v54  ;;  %v5114_v32 = vsel %vm3335_vm15, %v8770_v7, %v8771_v46  ;;  %v5850_v0 = vsel %vm3335_vm15, %v4730_v34, %v8770_v7 }
 0x7c7   : > { %v15657_v58 = vpop.permute.xlu0 %8778  ;;  %v5965_v4 = vpack.c.bf16 %v5850_v0, %v5849_v9 }
 0x7c8   : > { %v16652_v23 = vunpack.i.h.bf16 %v15657_v58  ;;  %v16653_v16 = vunpack.i.l.bf16 %v15657_v58 }
 0x7ca   : > { %v5881_v20 = vsel %vm4321_vm5, %v5113_v51, %v16653_v16  ;;  %v5882_v31 = vsel %vm4321_vm5, %v5114_v32, %v16652_v23 }
 0x7cb   : > { %v8789_v50 = vpop.permute.xlu0 %8788  ;;  %v5966_v63 = vpack.c.bf16 %v5882_v31, %v5881_v20 }
 0x7cc   : > { %v15677_v17 = vpop.permute.xlu1 %8783  ;;  %v8791_v34 = vunpack.i.h.bf16 %v8789_v50  ;;  %v8790_v51 = vunpack.i.l.bf16 %v8789_v50 }
 0x7cd   : > { %v8786_v12 = vunpack.i.h.bf16 %v15677_v17  ;;  %v8785_v48 = vunpack.i.l.bf16 %v15677_v17  ;;  %6733 = vmatprep.mubr.bf16.mxu0 %v5966_v63 }
 0x7ce   : > { %6734 = vmatmul.mubr.bf16.gmra.mrb[76].mxu0 %v5965_v4  ;;  %v5115_v9 = vsel %vm3335_vm15, %v8790_v51, %v8791_v34 }
 0x7cf   : > { %v5823_v40 = vsel %vm3487_vm10, %v15548_v59, %v8785_v48  ;;  %v5824_v8 = vsel %vm3487_vm10, %v15551_v55, %v8786_v12  ;;  %v17476_v55 = vpack.c.bf16 %v14929_v36, %v14914_v26 }
 0x7d0   : > { %v5985_v52 = vpack.c.bf16 %v5824_v8, %v5823_v40 }
 0x7d1   : > { %v8799_v42 = vpop.permute.xlu0 %8798  ;;  %v8794_v54 = vpop.permute.xlu1 %8793 }
 0x7d2   : > { %v8801_v46 = vunpack.i.h.bf16 %v8799_v42  ;;  %v8800_v7 = vunpack.i.l.bf16 %v8799_v42  ;;  %v8796_v32 = vunpack.i.h.bf16 %v8794_v54  ;;  %v8795_v0 = vunpack.i.l.bf16 %v8794_v54  ;;  %6596 = vmatprep.mubr.bf16.mxu1 %v5985_v52  ;;  %v15716_v52 = vld [vmem:[#allocation3 + $0x1b0] sm:$0xff] }
 0x7d3   : > { %6597 = vmatmul.mubr.bf16.gmra.mrb[88].mxu1 %v17476_v55 }
 0x7d4   : > { %v4732_v20 = vsel %vm3487_vm10, %v8736_v21, %v8801_v46  ;;  %v4731_v59 = vsel %vm3487_vm10, %v8735_v57, %v8800_v7  ;;  %v5116_v4 = vsel %vm3335_vm15, %v8795_v0, %v8796_v32 }
 0x7d5   : > { %v15698_v31 = vpop.permute.xlu1 %8803  ;;  %v5851_v21 = vsel %vm3335_vm15, %v4731_v59, %v8790_v51  ;;  %v5852_v49 = vsel %vm3335_vm15, %v4732_v20, %v8795_v0 }
 0x7d6   : > { %v16650_v63 = vunpack.i.h.bf16 %v15698_v31  ;;  %v16651_v50 = vunpack.i.l.bf16 %v15698_v31  ;;  %v5972_v42 = vpack.c.bf16 %v5852_v49, %v5851_v21 }
 0x7d8   : > { %v5883_v57 = vsel %vm4321_vm5, %v5115_v9, %v16651_v50  ;;  %v5884_v26 = vsel %vm4321_vm5, %v5116_v4, %v16650_v63 }
 0x7d9   : > { %v5973_v36 = vpack.c.bf16 %v5884_v26, %v5883_v57  ;;  %v17477_v57 = vpack.c.bf16 %v15016_v13, %v15013_v5 }
 0x7db   : > { %6741 = vmatprep.mubr.bf16.mxu0 %v5973_v36  ;;  %v8814_v40 = vpop.permute.xlu1 %8813 }
 0x7dc   : > { %6742 = vmatmul.mubr.bf16.gmra.mrb[80].mxu0 %v5972_v42  ;;  %v8816_v55 = vunpack.i.h.bf16 %v8814_v40  ;;  %v8815_v9 = vunpack.i.l.bf16 %v8814_v40 }
 0x7de   : > { %v5117_v5 = vsel %vm3335_vm15, %v8815_v9, %v8816_v55 }
 0x7e1   : > { %v8824_v54 = vpop.permute.xlu1 %8823 }
 0x7e2   : > { %v15712_v8 = vpop.permute.xlu0 %8808  ;;  %v8826_v20 = vunpack.i.h.bf16 %v8824_v54  ;;  %v8825_v59 = vunpack.i.l.bf16 %v8824_v54 }
 0x7e3   : > { %v8811_v46 = vunpack.i.h.bf16 %v15712_v8  ;;  %v8810_v7 = vunpack.i.l.bf16 %v15712_v8  ;;  %v7433_v49 = vpop.f32.mrb[36].mxu1 }
 0x7e4   : > { %v7434_v26 = vpop.f32.mrb[37].mxu1  ;;  %v4734_v54 = vsel %vm3487_vm10, %v8761_v60, %v8826_v20  ;;  %v4733_v40 = vsel %vm3487_vm10, %v8760_v38, %v8825_v59 }
 0x7e5   : > { %v5825_v34 = vsel %vm3487_vm10, %v15716_v52, %v8810_v7  ;;  %v5826_v51 = vsel %vm3487_vm10, %v15070_v1, %v8811_v46  ;;  %v15731_v42 = vadd.f32 %v7434_v26, %v7433_v49  ;;  %v7436_v1 = vpop.f32.mrb[38].mxu1  ;;  %v5853_v59 = vsel %vm3335_vm15, %v4733_v40, %v8815_v9 }
 0x7e6   : > { %v8819_v32 = vpop.permute.xlu0 %8818  ;;  %v5992_v0 = vpack.c.bf16 %v5826_v51, %v5825_v34  ;;  %v7437_v13 = vpop.f32.mrb[39].mxu1 }
 0x7e7   : > { %v8821_v4 = vunpack.i.h.bf16 %v8819_v32  ;;  %v8820_v21 = vunpack.i.l.bf16 %v8819_v32 }
 0x7e8   : > { %6604 = vmatprep.mubr.bf16.mxu1 %v5992_v0  ;;  %v15743_v0 = vadd.f32 %v7437_v13, %v7436_v1 }
 0x7e9   : > { %6605 = vmatmul.mubr.bf16.gmra.mrb[92].mxu1 %v17477_v57  ;;  %v5118_v32 = vsel %vm3335_vm15, %v8820_v21, %v8821_v4  ;;  %v5854_v49 = vsel %vm3335_vm15, %v4734_v54, %v8820_v21 }
 0x7ea   : > { %v15729_v36 = vpop.permute.xlu0 %8828  ;;  %v5979_v55 = vpack.c.bf16 %v5854_v49, %v5853_v59 }
 0x7eb   : > { %v16662_v34 = vunpack.i.h.bf16 %v15729_v36  ;;  %v8830_v51 = vunpack.i.l.bf16 %v15729_v36  ;;  %v7439_v21 = vpop.f32.mrb[40].mxu1 }
 0x7ec   : > { %v7440_v1 = vpop.f32.mrb[41].mxu1 }
 0x7ed   : > { %v5885_v60 = vsel %vm4321_vm5, %v5117_v5, %v8830_v51  ;;  %v5886_v62 = vsel %vm4321_vm5, %v5118_v32, %v16662_v34  ;;  %v15757_v13 = vadd.f32 %v7440_v1, %v7439_v21  ;;  %v7442_v5 = vpop.f32.mrb[42].mxu1 }
 0x7ee   : > { %v8839_v38 = vpop.permute.xlu0 %8838  ;;  %v5980_v20 = vpack.c.bf16 %v5886_v62, %v5885_v60  ;;  %v7443_v62 = vpop.f32.mrb[43].mxu1 }
 0x7ef   : > { %v8841_v59 = vunpack.i.h.bf16 %v8839_v38  ;;  %v15767_v21 = vadd.f32 %v7443_v62, %v7442_v5  ;;  %v8840_v1 = vunpack.i.l.bf16 %v8839_v38  ;;  %v17479_v38 = vld [vmem:[#allocation92_spill] sm:$0xff]  ;;  %v17480_v62 = vld [vmem:[#allocation70_spill] sm:$0xff] }
 0x7f0   : > { %v15753_v57 = vpop.permute.xlu1 %8833  ;;  %6749 = vmatprep.mubr.bf16.mxu0 %v5980_v20  ;;  %v17481_v23 = vpack.c.bf16 %v17479_v38, %v17480_v62 }
 0x7f1   : > { %v8836_v4 = vunpack.i.h.bf16 %v15753_v57  ;;  %v8835_v26 = vunpack.i.l.bf16 %v15753_v57  ;;  %6750 = vmatmul.mubr.bf16.gmra.mrb[84].mxu0 %v5979_v55 }
 0x7f3   : > { %v5827_v9 = vsel %vm3487_vm10, %v15208_v41, %v8835_v26  ;;  %v5828_v40 = vsel %vm3487_vm10, %v15210_v11, %v8836_v4 }
 0x7f4   : > { %v8849_v54 = vpop.permute.xlu0 %8848  ;;  %v8844_v60 = vpop.permute.xlu1 %8843  ;;  %v5999_v20 = vpack.c.bf16 %v5828_v40, %v5827_v9 }
 0x7f5   : > { %v8851_v32 = vunpack.i.h.bf16 %v8849_v54  ;;  %v8850_v49 = vunpack.i.l.bf16 %v8849_v54  ;;  %v8845_v55 = vunpack.i.l.bf16 %v8844_v60  ;;  %v8846_v50 = vunpack.i.h.bf16 %v8844_v60  ;;  %v17482_v60 = vld [vmem:[#allocation38_spill] sm:$0xff] }
 0x7f6   : > { %6612 = vmatprep.mubr.bf16.mxu1 %v5999_v20  ;;  %v17478_v54 = vpack.c.bf16 %v15185_v39, %v15175_v35  ;;  %v5119_v35 = vsel %vm3335_vm15, %v8840_v1, %v8841_v59  ;;  %v17483_v20 = vunpack.i.h.bf16 %v17482_v60 }
 0x7f7   : > { %v4736_v63 = vsel %vm3487_vm10, %v8786_v12, %v8851_v32  ;;  %v4735_v41 = vsel %vm3487_vm10, %v8785_v48, %v8850_v49  ;;  %v7445_v48 = vpop.f32.mrb[44].mxu1  ;;  %v5120_v39 = vsel %vm3335_vm15, %v8845_v55, %v8846_v50 }
 0x7f8   : > { %6613 = vmatmul.mubr.bf16.gmra.mrb[96].mxu1 %v17478_v54  ;;  %v15778_v5 = vpop.permute.xlu1 %8853  ;;  %v5855_v32 = vsel %vm3335_vm15, %v4735_v41, %v8840_v1  ;;  %v5856_v49 = vsel %vm3335_vm15, %v4736_v63, %v8845_v55  ;;  %v17484_v54 = vunpack.i.l.bf16 %v17482_v60  ;;  %v7446_v38 = vpop.f32.mrb[45].mxu1 }
 0x7f9   : > { %v8859_v11 = vpop.permute.xlu0 %8858  ;;  %6838 = vmatprep.mubr.bf16.mxu1 %v17481_v23  ;;  %v16656_v12 = vunpack.i.h.bf16 %v15778_v5  ;;  %v16657_v17 = vunpack.i.l.bf16 %v15778_v5  ;;  %v15795_v16 = vadd.f32 %v7446_v38, %v7445_v48  ;;  %v7448_v10 = vpop.f32.mrb[46].mxu1  ;;  %v5986_v60 = vpack.c.bf16 %v5856_v49, %v5855_v32 }
 0x7fa   : > { %v8861_v9 = vunpack.i.h.bf16 %v8859_v11  ;;  %v8860_v40 = vunpack.i.l.bf16 %v8859_v11  ;;  %v7449_v41 = vpop.f32.mrb[47].mxu1 }
 0x7fb   : > { %v5887_v63 = vsel %vm4321_vm5, %v5119_v35, %v16657_v17  ;;  %v5888_v50 = vsel %vm4321_vm5, %v5120_v39, %v16656_v12  ;;  %v15803_v48 = vadd.f32 %v7449_v41, %v7448_v10 }
 0x7fc   : > { %v5484_v11 = vsel %vm4321_vm5, %v17483_v20, %v8861_v9  ;;  %v5483_v23 = vsel %vm4321_vm5, %v17484_v54, %v8860_v40  ;;  %v8864_v1 = vpop.permute.xlu1 %8863  ;;  %v5987_v9 = vpack.c.bf16 %v5888_v50, %v5887_v63 }
 0x7fd   : > { %v8869_v62 = vpop.permute.xlu0 %8868  ;;  %v5918_v59 = vpack.c.bf16 %v5484_v11, %v5483_v23  ;;  %v8866_v20 = vunpack.i.h.bf16 %v8864_v1  ;;  %v8865_v54 = vunpack.i.l.bf16 %v8864_v1  ;;  %v17485_v23 = vld [vmem:[#allocation78_spill] sm:$0xff] }
 0x7fe   : > { %v8871_v55 = vunpack.i.h.bf16 %v8869_v62  ;;  %v8870_v40 = vunpack.i.l.bf16 %v8869_v62  ;;  %6757 = vmatprep.mubr.bf16.mxu0 %v5987_v9  ;;  %v17487_v12 = vpack.c.bf16 %v17485_v23, %v17486_v30  ;;  %v15831_v23 = vld [vmem:[%s16409_s6] ss:$0 sm:$0xff] }
 0x7ff   : > { %6758 = vmatmul.mubr.bf16.gmra.mrb[88].mxu0 %v5986_v60  ;;  %v5121_v49 = vsel %vm3335_vm15, %v8865_v54, %v8866_v20 }
 0x800   : > { %6839 = vmatmul.mubr.bf16.vlgmr.msra.gmra.mrb[100].mxu1 %v5918_v59  ;;  %v8874_v11 = vpop.permute.xlu1 %8873  ;;  %v5122_v32 = vsel %vm3335_vm15, %v8870_v40, %v8871_v55 }
 0x801   : > { %v15805_v38 = vpop.permute.xlu0 %8878  ;;  %6846 = vmatprep.mubr.bf16.mxu1 %v17487_v12  ;;  %v8876_v10 = vunpack.i.h.bf16 %v8874_v11  ;;  %v8875_v62 = vunpack.i.l.bf16 %v8874_v11 }
 0x802   : > { %v16658_v35 = vunpack.i.h.bf16 %v15805_v38  ;;  %v16659_v39 = vunpack.i.l.bf16 %v15805_v38  ;;  %v7451_v8 = vpop.f32.mrb[48].mxu1 }
 0x803   : > { %v4737_v59 = vsel %vm3487_vm10, %v8810_v7, %v8875_v62  ;;  %v4738_v30 = vsel %vm3487_vm10, %v8811_v46, %v8876_v10  ;;  %v17488_v46 = vld [vmem:[#allocation66_spill] sm:$0xff] }
 0x804   : > { %v5889_v63 = vsel %vm4321_vm5, %v5121_v49, %v16659_v39  ;;  %v5890_v50 = vsel %vm4321_vm5, %v5122_v32, %v16658_v35  ;;  %v8884_v1 = vpop.permute.xlu1 %8883  ;;  %v5857_v41 = vsel %vm3335_vm15, %v4737_v59, %v8865_v54  ;;  %v5858_v9 = vsel %vm3335_vm15, %v4738_v30, %v8870_v40  ;;  %v17490_v54 = vld [vmem:[#allocation60_spill] sm:$0xff]  ;;  %v7452_v30 = vpop.f32.mrb[49].mxu1  ;;  %v17492_v39 = vld [vmem:[#allocation43_spill] sm:$0xff] }
 0x805   : > { %v8889_v12 = vpop.permute.xlu0 %8888  ;;  %v5994_v55 = vpack.c.bf16 %v5890_v50, %v5889_v63  ;;  %v8886_v60 = vunpack.i.h.bf16 %v8884_v1  ;;  %v8885_v20 = vunpack.i.l.bf16 %v8884_v1  ;;  %v5993_v11 = vpack.c.bf16 %v5858_v9, %v5857_v41  ;;  %v7454_v35 = vpop.f32.mrb[50].mxu1 }
 0x806   : > { %v8891_v7 = vunpack.i.h.bf16 %v8889_v12  ;;  %v17489_v49 = vunpack.i.h.bf16 %v17488_v46  ;;  %v17491_v62 = vunpack.i.l.bf16 %v17490_v54  ;;  %v8890_v63 = vunpack.i.l.bf16 %v8889_v12 }
 0x807   : > { %6765 = vmatprep.mubr.bf16.mxu0 %v5994_v55  ;;  %v15839_v41 = vadd.f32 %v7452_v30, %v7451_v8  ;;  %v5573_v46 = vrot.slane %v17492_v39, 4  ;;  %v17494_v8 = vld [vmem:[#allocation87_spill] sm:$0xff] }
 0x808   : > { %6766 = vmatmul.mubr.bf16.gmra.mrb[92].mxu0 %v5993_v11  ;;  %v5485_v10 = vsel %vm4321_vm5, %v17489_v49, %v8885_v20  ;;  %v5486_v40 = vsel %vm4321_vm5, %v17491_v62, %v8886_v60  ;;  %v7545_v11 = vpop.f32.mrb[36].mxu0  ;;  %v6495_v20 = vadd.f32 %v15731_v42, %v15831_v23  ;;  %v7455_v60 = vpop.f32.mrb[51].mxu1  ;;  %v17493_v49 = vld [vmem:[#allocation71_spill] sm:$0xff]  ;;  %v5579_v54 = vrot.slane %v17494_v8, 4 }
 0x809   : > { %v8899_v32 = vpop.permute.xlu0 %8898  ;;  %v8894_v55 = vpop.permute.xlu1 %8893  ;;  %v5925_v1 = vpack.c.bf16 %v5486_v40, %v5485_v10  ;;  %v5574_v10 = vrot.slane %v17493_v49, 4  ;;  %v6498_v62 = vadd.f32 %v15743_v0, %v15831_v23  ;;  %v15854_v40 = vadd.f32 %v7455_v60, %v7454_v35 }
 0x80a   : > { %v8901_v50 = vunpack.i.h.bf16 %v8899_v32  ;;  %v8900_v59 = vunpack.i.l.bf16 %v8899_v32  ;;  %v8896_v9 = vunpack.i.h.bf16 %v8894_v55  ;;  %v8895_v17 = vunpack.i.l.bf16 %v8894_v55  ;;  %v7546_v32 = vpop.f32.mrb[37].mxu0  ;;  %v17495_v55 = vld [vmem:[#allocation9_spill] sm:$0xff] }
 0x80b   : > { %6847 = vmatmul.mubr.bf16.gmra.mrb[104].mxu1 %v5925_v1  ;;  %v7547_v42 = vadd.f32 %v7546_v32, %v7545_v11  ;;  %v7548_v1 = vpop.f32.mrb[38].mxu0  ;;  %v5123_v49 = vsel %vm3335_vm15, %v8890_v63, %v8891_v7  ;;  %v17498_v60 = vunpack.i.l.bf16 %v15201_v47 }
 0x80c   : > { %v4739_v12 = vsel %vm3487_vm10, %v8835_v26, %v8900_v59  ;;  %v4740_v39 = vsel %vm3487_vm10, %v8836_v4, %v8901_v50  ;;  %v17496_v26 = vld [vmem:[#allocation81_spill] sm:$0xff]  ;;  %v5124_v8 = vsel %vm3335_vm15, %v8895_v17, %v8896_v9  ;;  %v7549_v57 = vpop.f32.mrb[39].mxu0  ;;  %v17499_v9 = vunpack.i.h.bf16 %v15201_v47 }
 0x80d   : > { %v8909_v30 = vpop.permute.xlu0 %8908  ;;  %v17497_v59 = vpack.c.bf16 %v17495_v55, %v17496_v26  ;;  %v15861_v0 = vpop.permute.xlu1 %8903  ;;  %v15863_v34 = vadd.f32 %v7547_v42, %v6495_v20  ;;  %v5859_v50 = vsel %vm3335_vm15, %v4739_v12, %v8890_v63  ;;  %v7550_v11 = vadd.f32 %v7549_v57, %v7548_v1 }
 0x80e   : > { %v8911_v25 = vunpack.i.h.bf16 %v8909_v30  ;;  %v8910_v2 = vunpack.i.l.bf16 %v8909_v30  ;;  %v8906_v4 = vunpack.i.h.bf16 %v15861_v0  ;;  %v16663_v35 = vunpack.i.l.bf16 %v15861_v0 }
 0x80f   : > { %6854 = vmatprep.mubr.bf16.mxu1 %v17497_v59  ;;  %v5860_v30 = vsel %vm3335_vm15, %v4740_v39, %v8895_v17  ;;  %v5580_v42 = vsel %vm17500_vm11, %v5574_v10, %v5579_v54  ;;  %v15882_v26 = vadd.f32 %v7550_v11, %v6498_v62  ;;  %v17502_v59 = vld [vmem:[#allocation53_spill] sm:$0xff]  ;;  %v17504_v54 = vld [vmem:[#allocation36_spill] sm:$0xff]  ;;  %v17505_v62 = vld [vmem:[#allocation55_spill] sm:$0xff] }
 0x810   : > { %v5487_v7 = vsel %vm4321_vm5, %v17498_v60, %v8910_v2  ;;  %v5488_v32 = vsel %vm4321_vm5, %v17499_v9, %v8911_v25  ;;  %v5891_v20 = vsel %vm4321_vm5, %v5123_v49, %v16663_v35  ;;  %v5892_v63 = vsel %vm4321_vm5, %v5124_v8, %v8906_v4  ;;  %v17503_v60 = vld [vmem:[#allocation67_spill] sm:$0xff]  ;;  %vm17509_vm15 = vmmov %vm17501_vm2 }
 0x811   : > { %v8919_v55 = vpop.permute.xlu0 %8918  ;;  %v5932_v12 = vpack.c.bf16 %v5488_v32, %v5487_v7  ;;  %v6001_v47 = vpack.c.bf16 %v5892_v63, %v5891_v20  ;;  %v5575_v25 = vsel %vm17501_vm2, %v5573_v46, %v5574_v10  ;;  %v5584_v17 = vrot.slane %v17502_v59, 4  ;;  %v17507_v32 = vld [vmem:[#allocation24_spill] sm:$0xff]  ;;  %vm17554_vm11 = vmmov %vm17523_vm0 }
 0x812   : > { %v8921_v39 = vunpack.i.h.bf16 %v8919_v55  ;;  %v8920_v1 = vunpack.i.l.bf16 %v8919_v55  ;;  %v6000_v57 = vpack.c.bf16 %v5860_v30, %v5859_v50  ;;  %v5589_v49 = vrot.slane %v17503_v60, 4  ;;  %vm17555_vm2 = vmmov %vm17523_vm0 }
 0x813   : > { %6773 = vmatprep.mubr.bf16.mxu0 %v6001_v47  ;;  %6855 = vmatmul.mubr.bf16.gmra.mrb[108].mxu1 %v5932_v12  ;;  %v5898_v8 = vpack.c.bf16 %v5580_v42, %v5575_v25  ;;  %v17506_v11 = vpack.c.bf16 %v17504_v54, %v17505_v62  ;;  %v5583_v46 = vrot.slane %v17507_v32, 4  ;;  %v17508_v30 = vunpack.i.h.bf16 %v15450_v19  ;;  %v17511_v12 = vld [vmem:[#allocation19_spill] sm:$0xff] }
 0x814   : > { %v8914_v2 = vpop.permute.xlu1 %8913  ;;  %6774 = vmatmul.mubr.bf16.gmra.mrb[96].mxu0 %v6000_v57  ;;  %v5489_v50 = vsel %vm4321_vm5, %v8680_v3, %v8920_v1  ;;  %v5590_v63 = vsel %vm17510_vm4, %v5584_v17, %v5589_v49  ;;  %v17512_v42 = vunpack.i.l.bf16 %v17511_v12  ;;  %v17513_v47 = vld [vmem:[#allocation15_spill] sm:$0xff]  ;;  %v7551_v57 = vpop.f32.mrb[40].mxu0  ;;  %v9152_v3 = vld [vmem:[#allocation3 + $0x60] sm:$0xff]  ;;  %v9153_v1 = vld [vmem:[#allocation3 + $0x68] sm:$0xff]  ;;  %v6503_v54 = vadd.f32 %v15757_v13, %v15831_v23 }
 0x815   : > { %v8916_v9 = vunpack.i.h.bf16 %v8914_v2  ;;  %v8915_v35 = vunpack.i.l.bf16 %v8914_v2  ;;  %6862 = vmatprep.mubr.bf16.mxu1 %v17506_v11  ;;  %6814 = vmatprep.mubr.bf16.mxu0 %v5898_v8  ;;  %v5490_v55 = vsel %vm4321_vm5, %v17508_v30, %v8921_v39  ;;  %v5585_v20 = vsel %vm17509_vm15, %v5583_v46, %v5584_v17  ;;  %v7552_v60 = vpop.f32.mrb[41].mxu0  ;;  %vm17558_vm15 = vmmov %vm17523_vm0 }
 0x816   : > { %v8929_v7 = vpop.permute.xlu0 %8928  ;;  %v17514_v25 = vunpack.i.h.bf16 %v17513_v47  ;;  %v5576_v19 = vrot.slane %v9152_v3, 4  ;;  %v5577_v39 = vrot.slane %v9153_v1, 4  ;;  %v7553_v17 = vadd.f32 %v7552_v60, %v7551_v57  ;;  %v7554_v49 = vpop.f32.mrb[42].mxu0  ;;  %v9155_v1 = vld [vmem:[#allocation3 + $0x88] sm:$0xf]  ;;  %vm17559_vm4 = vmmov %vm17523_vm0 }
 0x817   : > { %v5478_v2 = vsel %vm4321_vm5, %v17512_v42, %v8916_v9  ;;  %v5939_v62 = vpack.c.bf16 %v5490_v55, %v5489_v50  ;;  %v5905_v11 = vpack.c.bf16 %v5590_v63, %v5585_v20  ;;  %v6506_v9 = vadd.f32 %v15767_v21, %v15831_v23  ;;  %v7555_v12 = vpop.f32.mrb[43].mxu0  ;;  %v9046_v42 = vld [vmem:[%s16408_s5 + $0x188] sm:$0xff]   ;;  %v17515_v20 = vld [vmem:[#allocation84_spill] sm:$0xff] }
 0x818   : > { %v5477_v59 = vsel %vm4321_vm5, %v17514_v25, %v8915_v35  ;;  %v8931_v35 = vunpack.i.h.bf16 %v8929_v7  ;;  %v8930_v46 = vunpack.i.l.bf16 %v8929_v7  ;;  %v15916_v13 = vadd.f32 %v7553_v17, %v6503_v54  ;;  %v17516_v7 = vld [vmem:[#allocation12_spill] sm:$0xff] }
 0x819   : > { %v8924_v10 = vpop.permute.xlu1 %8923  ;;  %v5897_v32 = vpack.c.bf16 %v5478_v2, %v5477_v59  ;;  %v7556_v57 = vadd.f32 %v7555_v12, %v7554_v49  ;;  %v7457_v50 = vpop.f32.mrb[52].mxu1  ;;  %v17517_v63 = vpack.c.bf16 %v17515_v20, %v17516_v7  ;;  %v9154_v2 = vld [vmem:[#allocation3 + $0x70] sm:$0xf]  ;;  %v5591_v54 = vrot.slane %v9155_v1, 4 }
 0x81a   : > { %v15905_v8 = vpop.permute.xlu0 %8938  ;;  %v8926_v47 = vunpack.i.h.bf16 %v8924_v10  ;;  %v8925_v25 = vunpack.i.l.bf16 %v8924_v10  ;;  %v7458_v21 = vpop.f32.mrb[53].mxu1  ;;  %v5581_v59 = vrot.slane %v9154_v2, 4 }
 0x81b   : > { %6863 = vmatmul.mubr.bf16.gmra.mrb[112].mxu1 %v5939_v62  ;;  %v15923_v60 = vadd.f32 %v7556_v57, %v6506_v9  ;;  %v15925_v3 = vadd.f32 %v7458_v21, %v7457_v50  ;;  %v7460_v10 = vpop.f32.mrb[54].mxu1  ;;  %v5491_v62 = vsel %vm4321_vm5, %v8705_v15, %v8930_v46  ;;  %v5492_v9 = vsel %vm4321_vm5, %v8706_v43, %v8931_v35  ;;  %v17519_v57 = vld [vmem:[#allocation68_spill] sm:$0xff]  ;;  %v17522_v35 = vld [vmem:[#allocation22_spill] sm:$0xff] }
 0x81c   : > { %6815 = vmatmul.mubr.bf16.vlgmr.msra.gmra.mrb[100].mxu0 %v5897_v32  ;;  %6870 = vmatprep.mubr.bf16.mxu1 %v17517_v63  ;;  %v7461_v49 = vpop.f32.mrb[55].mxu1  ;;  %v15937_v32 = vsel %vm17518_vm14, %v5576_v19, %v5577_v39  ;;  %v17520_v50 = vunpack.i.l.bf16 %v17519_v57  ;;  %v17521_v20 = vunpack.i.h.bf16 %v17519_v57  ;;  %v9157_v46 = vld [vmem:[#allocation3 + $0x80] sm:$0xff]  ;;  %v5663_v43 = vrot.slane %v14496_v56, 4  ;;  %vm17560_vm14 = vmmov %vm17523_vm0 }
 0x81d   : > { %v15911_v30 = vpop.permute.xlu1 %8933  ;;  %7816 = vmatpush3.bf16.msra.mxu0 %v15469_v18  ;;  %6822 = vmatprep.mubr.bf16.mxu0 %v5905_v11  ;;  %v9156_v18 = vld [vmem:[#allocation3 + $0x78] sm:$0xff]  ;;  %v15939_v11 = vadd.f32 %v7461_v49, %v7460_v10  ;;  %v5587_v44 = vrot.slane %v9157_v46, 4  ;;  %v5664_v19 = vrot.slane %v14507_v61, 4  ;;  %v5669_v63 = vrot.slane %v17522_v35, 4  ;;  %v17532_v35 = vld [vmem:[#allocation61_spill] sm:$0xff] }
 0x81e   : > { %v15918_v55 = vpop.permute.xlu0 %8948  ;;  %7817 = vmatprep.subr.bf16.mxu0 %v9046_v42  ;;  %v5586_v12 = vrot.slane %v9156_v18, 4  ;;  %v5479_v21 = vsel %vm4321_vm5, %v17520_v50, %v8925_v25  ;;  %v5480_v15 = vsel %vm4321_vm5, %v17521_v20, %v8926_v47  ;;  %v15951_v2 = vsel %vm17523_vm0, %v5577_v39, %v5581_v59 }
 0x81f   : > { %v8940_v10 = vunpack.i.l.bf16 %v15905_v8  ;;  %v5946_v49 = vpack.c.bf16 %v5492_v9, %v5491_v62  ;;  %v8941_v47 = vunpack.i.h.bf16 %v15905_v8  ;;  %v8936_v18 = vunpack.i.h.bf16 %v15911_v30  ;;  %v17525_v62 = vld [vmem:[#allocation6_spill] sm:$0xff]  ;;  %v17526_v9 = vld [vmem:[#allocation80_spill] sm:$0xff] }
 0x820   : > { %v8935_v57 = vunpack.i.l.bf16 %v15911_v30  ;;  %v5904_v61 = vpack.c.bf16 %v5480_v15, %v5479_v21  ;;  %v5899_v39 = vpack.c.bf16 %v15951_v2, %v15937_v32  ;;  %v15962_v59 = vsel %vm17524_vm12, %v5586_v12, %v5587_v44  ;;  %v9158_v32 = vld [vmem:[#allocation3 + $0x90] sm:$0xff]  ;;  %vm17563_vm12 = vmmov %vm17523_vm0 }
 0x821   : > { %v15928_v17 = vpop.permute.xlu1 %8943  ;;  %7818 = vmatpush3.bf16.msra.mxu0 %v9046_v42  ;;  %v17527_v30 = vpack.c.bf16 %v17525_v62, %v17526_v9  ;;  %v5665_v50 = vsel %vm17528_vm3, %v5663_v43, %v5664_v19  ;;  %v15974_v21 = vsel %vm17529_vm6, %v5587_v44, %v5591_v54  ;;  %v5596_v20 = vrot.slane %v9158_v32, 4  ;;  %vm17564_vm3 = vmmov %vm17523_vm0 }
 0x822   : > { %v8959_v7 = vpop.permute.xlu0 %8958  ;;  %v17530_v12 = vunpack.i.h.bf16 %v15729_v36  ;;  %v5670_v54 = vsel %vm17535_vm13, %v5664_v19, %v5669_v63  ;;  %v17541_v19 = vunpack.i.l.bf16 %v15805_v38  ;;  %vm17565_vm6 = vmmov %vm17523_vm0 }
 0x823   : > { %v8961_v1 = vunpack.i.h.bf16 %v8959_v7  ;;  %v8960_v25 = vunpack.i.l.bf16 %v8959_v7  ;;  %6871 = vmatmul.mubr.bf16.gmra.mrb[116].mxu1 %v5946_v49  ;;  %v17531_v7 = vld [vmem:[#allocation57_spill] sm:$0xff]  ;;  %v17536_v49 = vunpack.i.h.bf16 %v15587_v14  ;;  %vm17566_vm13 = vmmov %vm17523_vm0 }
 0x824   : > { %6823 = vmatmul.mubr.bf16.gmra.mrb[104].mxu0 %v5904_v61  ;;  %6878 = vmatprep.mubr.bf16.mxu1 %v17527_v30  ;;  %v17533_v2 = vpack.c.bf16 %v17531_v7, %v17532_v35  ;;  %v17537_v61 = vld [vmem:[#allocation17_spill] sm:$0xff]  ;;  %v5961_v7 = vpack.c.bf16 %v5670_v54, %v5665_v50  ;;  %v9159_v35 = vld [vmem:[#allocation3 + $0x98] sm:$0xff]  ;;  %v8945_v54 = vunpack.i.l.bf16 %v15928_v17 }
 0x825   : > { %v15957_v56 = vpop.permute.xlu1 %8953  ;;  %v15967_v42 = vsel %vm4321_vm5, %v8830_v51, %v8960_v25  ;;  %v15979_v15 = vsel %vm4321_vm5, %v17530_v12, %v8961_v1  ;;  %v17534_v25 = vunpack.i.l.bf16 %v15587_v14  ;;  %v5494_v36 = vsel %vm4321_vm5, %v17536_v49, %v8941_v47 }
 0x826   : > { %v8969_v8 = vpop.permute.xlu0 %8968  ;;  %6830 = vmatprep.mubr.bf16.mxu0 %v17533_v2  ;;  %v17538_v1 = vunpack.i.h.bf16 %v17537_v61  ;;  %v5981_v32 = vpack.c.bf16 %v15979_v15, %v15967_v42  ;;  %v17542_v14 = vunpack.i.h.bf16 %v15805_v38  ;;  %v5597_v2 = vrot.slane %v9159_v35, 4  ;;  %v9183_v15 = vld [vmem:[#allocation3 + $0x160] sm:$0xf] }
 0x827   : > { %v8971_v51 = vunpack.i.h.bf16 %v8969_v8  ;;  %v8970_v46 = vunpack.i.l.bf16 %v8969_v8  ;;  %v5493_v43 = vsel %vm4321_vm5, %v17534_v25, %v8940_v10  ;;  %v17539_v8 = vld [vmem:[#allocation76_spill] sm:$0xff] }
 0x828   : > { %v5481_v62 = vsel %vm4321_vm5, %v17538_v1, %v8935_v57  ;;  %v17540_v9 = vunpack.i.l.bf16 %v17539_v8  ;;  %v7463_v57 = vpop.f32.mrb[56].mxu1  ;;  %v5953_v1 = vpack.c.bf16 %v5494_v36, %v5493_v43 }
 0x829   : > { %v8964_v44 = vpop.permute.xlu1 %8963  ;;  %v16002_v63 = vsel %vm4321_vm5, %v17541_v19, %v8970_v46  ;;  %v16007_v47 = vsel %vm4321_vm5, %v17542_v14, %v8971_v51  ;;  %v7464_v61 = vpop.f32.mrb[57].mxu1  ;;  %v17543_v46 = vunpack.i.l.bf16 %v15778_v5  ;;  %v17544_v51 = vunpack.i.h.bf16 %v15778_v5 }
 0x82a   : > { %v5482_v30 = vsel %vm4321_vm5, %v17540_v9, %v8936_v18  ;;  %v8966_v12 = vunpack.i.h.bf16 %v8964_v44  ;;  %v8965_v10 = vunpack.i.l.bf16 %v8964_v44  ;;  %v9160_v18 = vld [vmem:[#allocation3 + $0xa0] sm:$0xf]  ;;  %v8946_v44 = vunpack.i.h.bf16 %v15928_v17  ;;  %v7466_v19 = vpop.f32.mrb[58].mxu1 }
 0x82b   : > { %v5601_v25 = vrot.slane %v9160_v18, 4  ;;  %v16023_v8 = vadd.f32 %v7464_v61, %v7463_v57  ;;  %v5911_v14 = vpack.c.bf16 %v5482_v30, %v5481_v62  ;;  %v7467_v18 = vpop.f32.mrb[59].mxu1  ;;  %6879 = vmatmul.mubr.bf16.gmra.mrb[120].mxu1 %v5953_v1  ;;  %v5673_v62 = vrot.slane %v17463_v6, 4  ;;  %v9161_v57 = vld [vmem:[#allocation3 + $0xb8] sm:$0xf] }
 0x82c   : > { %v16015_v38 = vsel %vm4321_vm5, %v17543_v46, %v8965_v10  ;;  %v16020_v50 = vsel %vm4321_vm5, %v17544_v51, %v8966_v12  ;;  %v7557_v10 = vpop.f32.mrb[44].mxu0  ;;  %v17545_v46 = vld [vmem:[#allocation16_spill] sm:$0xff]  ;;  %v5906_v12 = vpack.c.bf16 %v15974_v21, %v15962_v59  ;;  %v16030_v51 = vadd.f32 %v7467_v18, %v7466_v19  ;;  %6886 = vmatprep.mubr.bf16.mxu1 %v5961_v7 }
 0x82d   : > { %v8974_v9 = vpop.permute.xlu1 %8973  ;;  %v5988_v43 = vpack.c.bf16 %v16020_v50, %v16015_v38  ;;  %v5679_v5 = vrot.slane %v17545_v46, 4  ;;  %v7558_v17 = vpop.f32.mrb[45].mxu0  ;;  %6831 = vmatmul.mubr.bf16.gmra.mrb[108].mxu0 %v5911_v14  ;;  %v5674_v30 = vrot.slane %v17464_v27, 4  ;;  %v5611_v61 = vrot.slane %v9161_v57, 4 }
 0x82e   : > { %v8976_v36 = vunpack.i.h.bf16 %v8974_v9  ;;  %v8975_v35 = vunpack.i.l.bf16 %v8974_v9  ;;  %v6511_v9 = vadd.f32 %v15795_v16, %v15831_v23  ;;  %v7559_v1 = vadd.f32 %v7558_v17, %v7557_v10  ;;  %v7560_v49 = vpop.f32.mrb[46].mxu0  ;;  %7819 = vmatprep.mubr.msk.bf16.mxu0 %vm3487_vm10, %v5899_v39 }
 0x82f   : > { %v17546_v59 = vunpack.i.l.bf16 %v15861_v0  ;;  %v7561_v27 = vpop.f32.mrb[47].mxu0  ;;  %v17547_v7 = vunpack.i.l.bf16 %v15618_v28  ;;  %v17548_v16 = vunpack.i.h.bf16 %v15618_v28  ;;  %v5598_v39 = vsel %vm17549_vm1, %v5596_v20, %v5597_v2  ;;  %v9163_v28 = vld [vmem:[#allocation3 + $0xb0] sm:$0xff]  ;;  %vm17569_vm1 = vmmov %vm17523_vm0 }
 0x830   : > { %v16045_v6 = vsel %vm4321_vm5, %v8906_v4, %v8976_v36  ;;  %v6514_v0 = vadd.f32 %v15803_v48, %v15831_v23  ;;  %v16058_v18 = vadd.f32 %v7559_v1, %v6511_v9  ;;  %v7562_v4 = vadd.f32 %v7561_v27, %v7560_v49  ;;  %v9166_v1 = vld [vmem:[#allocation3 + $0xc8] sm:$0xff] }
 0x831   : > { %v16040_v21 = vsel %vm4321_vm5, %v17546_v59, %v8975_v35  ;;  %v5495_v19 = vsel %vm4321_vm5, %v17547_v7, %v8945_v54  ;;  %v5496_v14 = vsel %vm4321_vm5, %v17548_v16, %v8946_v44  ;;  %v5680_v36 = vsel %vm17550_vm7, %v5674_v30, %v5679_v5  ;;  %v9162_v54 = vld [vmem:[#allocation3 + $0xa8] sm:$0xff]  ;;  %v9164_v44 = vld [vmem:[#allocation3 + $0xd0] sm:$0xf]  ;;  %v9165_v16 = vld [vmem:[#allocation3 + $0xc0] sm:$0xff] }
 0x832   : > { %v6002_v35 = vpack.c.bf16 %v16045_v6, %v16040_v21  ;;  %v5602_v10 = vsel %vm17551_vm8, %v5597_v2, %v5601_v25  ;;  %v5606_v46 = vrot.slane %v9162_v54, 4  ;;  %v5607_v17 = vrot.slane %v9163_v28, 4  ;;  %v17553_v54 = vld [vmem:[#allocation65_spill] sm:$0xff]  ;;  %vm17570_vm7 = vmmov %vm17523_vm0 }
 0x833   : > { %v5621_v57 = vrot.slane %v9164_v44, 4  ;;  %v16062_v20 = vadd.f32 %v7562_v4, %v6514_v0  ;;  %v5960_v59 = vpack.c.bf16 %v5496_v14, %v5495_v19  ;;  %v5675_v7 = vsel %vm17552_vm9, %v5673_v62, %v5674_v30  ;;  %v7563_v4 = vpop.f32.mrb[48].mxu0  ;;  %vm17571_vm8 = vmmov %vm17523_vm0 }
 0x834   : > { %v5616_v48 = vrot.slane %v9165_v16, 4  ;;  %v8951_v9 = vunpack.i.h.bf16 %v15918_v55  ;;  %v8950_v49 = vunpack.i.l.bf16 %v15918_v55  ;;  %v5968_v5 = vpack.c.bf16 %v5680_v36, %v5675_v7  ;;  %vm17574_vm9 = vmmov %vm17523_vm0 }
 0x835   : > { %v5617_v2 = vrot.slane %v9166_v1, 4  ;;  %6887 = vmatmul.mubr.bf16.gmra.mrb[124].mxu1 %v5960_v59  ;;  %v5913_v25 = vpack.c.bf16 %v5602_v10, %v5598_v39  ;;  %v5684_v27 = vrot.slane %v17472_v37, 4  ;;  %v5689_v28 = vrot.slane %v17553_v54, 4  ;;  %7820 = vmatmul.mubr.msk.bf16.vlgmr.msra.gmra.mrb[112].mxu0 %vm3487_vm10, %v5906_v12  ;;  %v7564_v10 = vpop.f32.mrb[49].mxu0  ;;  %v9168_v1 = vld [vmem:[#allocation3 + $0xd8] sm:$0xff] }
 0x836   : > { %6894 = vmatprep.mubr.bf16.mxu1 %v5968_v5  ;;  %v5683_v62 = vrot.slane %v17471_v45, 4  ;;  %v5608_v30 = vsel %vm17554_vm11, %v5606_v46, %v5607_v17  ;;  %v5612_v55 = vsel %vm17555_vm2, %v5607_v17, %v5611_v61  ;;  %v17556_v19 = vunpack.i.l.bf16 %v15657_v58  ;;  %v9167_v61 = vld [vmem:[#allocation3 + $0xe8] sm:$0xf]  ;;  %vm17575_vm11 = vmmov %vm17523_vm0 }
 0x837   : > { %7823 = vmatprep.mubr.msk.bf16.mxu0 %vm3487_vm10, %v5913_v25  ;;  %v17557_v39 = vunpack.i.h.bf16 %v15657_v58  ;;  %v5618_v0 = vsel %vm17558_vm15, %v5616_v48, %v5617_v2  ;;  %v5622_v12 = vsel %vm17559_vm4, %v5617_v2, %v5621_v57  ;;  %v5690_v45 = vsel %vm17523_vm0, %v5684_v27, %v5689_v28  ;;  %v7566_v58 = vpop.f32.mrb[50].mxu0  ;;  %v9169_v28 = vld [vmem:[#allocation3 + $0xe0] sm:$0xff]  ;;  %vm17576_vm2 = vmmov %vm17523_vm0 }
 0x838   : > { %v5497_v14 = vsel %vm4321_vm5, %v17556_v19, %v8950_v49  ;;  %v5685_v36 = vsel %vm17560_vm14, %v5683_v62, %v5684_v27  ;;  %v5920_v46 = vpack.c.bf16 %v5612_v55, %v5608_v30  ;;  %v5631_v17 = vrot.slane %v9167_v61, 4  ;;  %v7469_v49 = vpop.f32.mrb[60].mxu1  ;;  %v9170_v55 = vld [vmem:[#allocation3 + $0xf8] sm:$0xff]  ;;  %vm17577_vm15 = vmmov %vm17523_vm0 }
 0x839   : > { %v5498_v37 = vsel %vm4321_vm5, %v17557_v39, %v8951_v9  ;;  %v6519_v44 = vadd.f32 %v15839_v41, %v15831_v23  ;;  %v7565_v59 = vadd.f32 %v7564_v10, %v7563_v4  ;;  %v5927_v16 = vpack.c.bf16 %v5622_v12, %v5618_v0  ;;  %v7567_v9 = vpop.f32.mrb[51].mxu0  ;;  %v7470_v41 = vpop.f32.mrb[61].mxu1  ;;  %v9172_v10 = vld [vmem:[#allocation3 + $0xf0] sm:$0xff]  ;;  %vm17581_vm4 = vmmov %vm17523_vm0 }
 0x83a   : > { %v5967_v7 = vpack.c.bf16 %v5498_v37, %v5497_v14  ;;  %v8956_v48 = vunpack.i.h.bf16 %v15957_v56  ;;  %v8955_v57 = vunpack.i.l.bf16 %v15957_v56  ;;  %v5975_v5 = vpack.c.bf16 %v5690_v45, %v5685_v36  ;;  %v7472_v56 = vpop.f32.mrb[62].mxu1  ;;  %v9171_v14 = vld [vmem:[#allocation3 + $0x100] sm:$0xf]  ;;  %vm17582_vm14 = vmmov %vm17523_vm0 }
 0x83b   : > { %v5626_v2 = vrot.slane %v9168_v1, 4  ;;  %v6522_v25 = vadd.f32 %v15854_v40, %v15831_v23  ;;  %v16090_v27 = vadd.f32 %v7565_v59, %v6519_v44  ;;  %v7568_v54 = vadd.f32 %v7567_v9, %v7566_v58  ;;  %v7473_v40 = vpop.f32.mrb[63].mxu1  ;;  %v9175_v1 = vld [vmem:[#allocation3 + $0x118] sm:$0xf] }
 0x83c   : > { %v5627_v62 = vrot.slane %v9169_v28, 4  ;;  %v16092_v30 = vadd.f32 %v7470_v41, %v7469_v49  ;;  %v5637_v19 = vrot.slane %v9170_v55, 4  ;;  %v5641_v39 = vrot.slane %v9171_v14, 4  ;;  %v9173_v49 = vld [vmem:[#allocation3 + $0x108] sm:$0xff]  ;;  %v9178_v28 = vld [vmem:[#allocation3 + $0x130] sm:$0xf] }
 0x83d   : > { %6895 = vmatmul.mubr.bf16.gmra.mrb[128].mxu1 %v5967_v7  ;;  %7824 = vmatmul.mubr.msk.bf16.gmra.mrb[116].mxu0 %vm3487_vm10, %v5920_v46  ;;  %v16095_v37 = vadd.f32 %v7568_v54, %v6522_v25  ;;  %v16098_v0 = vadd.f32 %v7473_v40, %v7472_v56  ;;  %v17561_v12 = vunpack.i.l.bf16 %v15698_v31  ;;  %v17562_v36 = vunpack.i.h.bf16 %v15698_v31  ;;  %v9177_v54 = vld [vmem:[#allocation3 + $0x128] sm:$0xff] }
 0x83e   : > { %6902 = vmatprep.mubr.bf16.mxu1 %v5975_v5  ;;  %7827 = vmatprep.mubr.msk.bf16.mxu0 %vm3487_vm10, %v5927_v16  ;;  %v5636_v46 = vrot.slane %v9172_v10, 4  ;;  %v5628_v61 = vsel %vm17563_vm12, %v5626_v2, %v5627_v62  ;;  %v5632_v44 = vsel %vm17564_vm3, %v5627_v62, %v5631_v17  ;;  %v5642_v58 = vsel %vm17566_vm13, %v5637_v19, %v5641_v39  ;;  %v9174_v5 = vld [vmem:[#allocation3 + $0x110] sm:$0xff]  ;;  %v9176_v17 = vld [vmem:[#allocation3 + $0x120] sm:$0xff]  ;;  %vm17583_vm12 = vmmov %vm17523_vm0 }
 0x83f   : > { %v5499_v4 = vsel %vm4321_vm5, %v17561_v12, %v8955_v57  ;;  %v5500_v45 = vsel %vm4321_vm5, %v17562_v36, %v8956_v48  ;;  %v5934_v16 = vpack.c.bf16 %v5632_v44, %v5628_v61  ;;  %v5646_v57 = vrot.slane %v9173_v49, 4  ;;  %vm17568_vm5 = vmmov %vm17523_vm0  ;;  %v9179_v36 = vld [vmem:[#allocation3 + $0x148] sm:$0xf]  ;;  %v9180_v44 = vld [vmem:[#allocation3 + $0x138] sm:$0xff] }
 0x840   : > { %v5638_v59 = vsel %vm17565_vm6, %v5636_v46, %v5637_v19  ;;  %v5974_v7 = vpack.c.bf16 %v5500_v45, %v5499_v4  ;;  %v5647_v31 = vrot.slane %v9174_v5, 4  ;;  %v5651_v48 = vrot.slane %v9175_v1, 4  ;;  %vm17588_vm3 = vmmov %vm17523_vm0 }
 0x841   : > { %v5941_v9 = vpack.c.bf16 %v5642_v58, %v5638_v59  ;;  %v17567_v25 = vpack.c.bf16 %v15274_v33, %v15266_v22  ;;  %v5656_v2 = vrot.slane %v9176_v17, 4  ;;  %v5657_v41 = vrot.slane %v9177_v54, 4  ;;  %v9181_v58 = vld [vmem:[#allocation3 + $0x140] sm:$0xff]  ;;  %vm17589_vm6 = vmmov %vm17523_vm0 }
 0x842   : > { %v5661_v62 = vrot.slane %v9178_v28, 4  ;;  %v5648_v56 = vsel %vm17568_vm5, %v5646_v57, %v5647_v31  ;;  %v5652_v55 = vsel %vm17569_vm1, %v5647_v31, %v5651_v48  ;;  %v5671_v45 = vrot.slane %v9179_v36, 4  ;;  %v17572_v31 = vld [vmem:[#allocation35_spill] sm:$0xff]  ;;  %v9188_v36 = vld [vmem:[#allocation3 + $0x190] sm:$0xf]  ;;  %vm17590_vm13 = vmmov %vm17523_vm0 }
 0x843   : > { %v5658_v14 = vsel %vm17570_vm7, %v5656_v2, %v5657_v41  ;;  %v5948_v4 = vpack.c.bf16 %v5652_v55, %v5648_v56  ;;  %v5666_v59 = vrot.slane %v9180_v44, 4  ;;  %v6527_v49 = vadd.f32 %v15925_v3, %v15831_v23  ;;  %vm17591_vm5 = vmmov %vm17523_vm0 }
 0x844   : > { %v5662_v22 = vsel %vm17571_vm8, %v5657_v41, %v5661_v62  ;;  %v17573_v1 = vpack.c.bf16 %v15280_v53, %v17572_v31  ;;  %v6530_v3 = vadd.f32 %v15939_v11, %v15831_v23  ;;  %v9185_v62 = vld [vmem:[#allocation3 + $0x178] sm:$0xf]  ;;  %v9190_v31 = vld [vmem:[#allocation3 + $0x1a0] sm:$0xff]  ;;  %vm17592_vm1 = vmmov %vm17523_vm0 }
 0x845   : > { %6903 = vmatmul.mubr.bf16.gmra.mrb[132].mxu1 %v5974_v7  ;;  %7828 = vmatmul.mubr.msk.bf16.gmra.mrb[120].mxu0 %vm3487_vm10, %v5934_v16  ;;  %v5955_v61 = vpack.c.bf16 %v5662_v22, %v5658_v14  ;;  %v5667_v7 = vrot.slane %v9181_v58, 4  ;;  %v9182_v16 = vld [vmem:[#allocation3 + $0x158] sm:$0xff]  ;;  %v5691_v56 = vrot.slane %v9185_v62, 4  ;;  %v9186_v14 = vld [vmem:[#allocation3 + $0x168] sm:$0xff]  ;;  %v17584_v62 = vpack.c.bf16 %v16007_v47, %v16002_v63  ;;  %vm17593_vm7 = vmmov %vm17523_vm0 }
 0x846   : > { %6910 = vmatprep.mubr.bf16.mxu1 %v17567_v25  ;;  %7831 = vmatprep.mubr.msk.bf16.mxu0 %vm3487_vm10, %v5941_v9  ;;  %v5677_v9 = vrot.slane %v9182_v16, 4  ;;  %v9184_v25 = vld [vmem:[#allocation3 + $0x150] sm:$0xff]  ;;  %v5686_v22 = vrot.slane %v9186_v14, 4 }
 0x847   : > { %v7475_v19 = vpop.f32.mrb[64].mxu1  ;;  %v5676_v17 = vrot.slane %v9184_v25, 4  ;;  %v5668_v41 = vsel %vm17574_vm9, %v5666_v59, %v5667_v7  ;;  %v5672_v53 = vsel %vm17575_vm11, %v5667_v7, %v5671_v45  ;;  %v5716_v25 = vrot.slane %v15716_v52, 4  ;;  %v17586_v14 = vld [vmem:[#allocation90_spill] sm:$0xff] }
 0x848   : > { %v7476_v33 = vpop.f32.mrb[65].mxu1  ;;  %v5962_v11 = vpack.c.bf16 %v5672_v53, %v5668_v41  ;;  %v9193_v53 = vld [vmem:[#allocation3 + $0x1c0] sm:$0xf] }
 0x849   : > { %v16119_v39 = vadd.f32 %v7476_v33, %v7475_v19  ;;  %v7478_v40 = vpop.f32.mrb[66].mxu1  ;;  %v7569_v12 = vpop.f32.mrb[52].mxu0  ;;  %v5678_v28 = vsel %vm17576_vm2, %v5676_v17, %v5677_v9  ;;  %v9187_v33 = vld [vmem:[#allocation3 + $0x170] sm:$0xff]  ;;  %v9192_v17 = vld [vmem:[#allocation3 + $0x1b8] sm:$0xff] }
 0x84a   : > { %v7479_v10 = vpop.f32.mrb[67].mxu1  ;;  %v7570_v46 = vpop.f32.mrb[53].mxu0 }
 0x84b   : > { %v16126_v57 = vadd.f32 %v7479_v10, %v7478_v40  ;;  %v7571_v5 = vadd.f32 %v7570_v46, %v7569_v12  ;;  %v7572_v42 = vpop.f32.mrb[54].mxu0  ;;  %v5687_v40 = vrot.slane %v9187_v33, 4  ;;  %v5696_v12 = vrot.slane %v15642_v24, 4  ;;  %v17578_v46 = vld [vmem:[#allocation31_spill] sm:$0xff] }
 0x84c   : > { %v7573_v48 = vpop.f32.mrb[55].mxu0  ;;  %v5701_v10 = vrot.slane %v9188_v36, 4 }
 0x84d   : > { %6911 = vmatmul.mubr.bf16.gmra.mrb[136].mxu1 %v5981_v32  ;;  %7832 = vmatmul.mubr.msk.bf16.gmra.mrb[124].mxu0 %vm3487_vm10, %v5948_v4  ;;  %v5681_v32 = vrot.slane %v9183_v15, 4  ;;  %v16135_v2 = vadd.f32 %v7571_v5, %v6527_v49  ;;  %v7574_v54 = vadd.f32 %v7573_v48, %v7572_v42  ;;  %v5697_v4 = vrot.slane %v15648_v29, 4  ;;  %v9189_v49 = vld [vmem:[#allocation3 + $0x198] sm:$0xff] }
 0x84e   : > { %6918 = vmatprep.mubr.bf16.mxu1 %v17573_v1  ;;  %7835 = vmatprep.mubr.msk.bf16.mxu0 %vm3487_vm10, %v5955_v61  ;;  %v17579_v61 = vld [vmem:[#allocation64_spill] sm:$0xff]  ;;  %v5688_v59 = vsel %vm17581_vm4, %v5686_v22, %v5687_v40  ;;  %v5692_v58 = vsel %vm17582_vm14, %v5687_v40, %v5691_v56  ;;  %v5706_v5 = vrot.slane %v9189_v49, 4  ;;  %v5707_v1 = vrot.slane %v9190_v31, 4 }
 0x84f   : > { %v16140_v55 = vadd.f32 %v7574_v54, %v6530_v3  ;;  %v5682_v19 = vsel %vm17577_vm15, %v5677_v9, %v5681_v32  ;;  %v17580_v44 = vpack.c.bf16 %v17578_v46, %v17579_v61  ;;  %v5698_v29 = vsel %vm17523_vm0, %v5696_v12, %v5697_v4  ;;  %v9191_v32 = vld [vmem:[#allocation3 + $0x1a8] sm:$0xf] }
 0x850   : > { %v5969_v45 = vpack.c.bf16 %v5682_v19, %v5678_v28  ;;  %v5702_v7 = vsel %vm17583_vm12, %v5697_v4, %v5701_v10  ;;  %v5976_v50 = vpack.c.bf16 %v5692_v58, %v5688_v59  ;;  %v5711_v48 = vrot.slane %v9191_v32, 4  ;;  %v17585_v19 = vld [vmem:[#allocation52_spill] sm:$0xff]  ;;  %v9195_v4 = vld [vmem:[#allocation3 + $0x1d0] sm:$0xff]  ;;  %v9196_v10 = vld [vmem:[#allocation3 + $0x1d8] sm:$0xf] }
 0x851   : > { %v5983_v15 = vpack.c.bf16 %v5702_v7, %v5698_v29  ;;  %v5717_v3 = vrot.slane %v9192_v17, 4  ;;  %v6538_v54 = vadd.f32 %v16030_v51, %v15831_v23  ;;  %v5721_v28 = vrot.slane %v9193_v53, 4 }
 0x852   : > { %v17587_v22 = vpack.c.bf16 %v17585_v19, %v17586_v14  ;;  %v5708_v52 = vsel %vm17588_vm3, %v5706_v5, %v5707_v1  ;;  %v5712_v51 = vsel %vm17589_vm6, %v5707_v1, %v5711_v48  ;;  %v5727_v36 = vrot.slane %v9195_v4, 4 }
 0x853   : > { %v5718_v33 = vsel %vm17590_vm13, %v5716_v25, %v5717_v3  ;;  %v5722_v40 = vsel %vm17591_vm5, %v5717_v3, %v5721_v28  ;;  %v5990_v63 = vpack.c.bf16 %v5712_v51, %v5708_v52  ;;  %v6554_v28 = vadd.f32 %v16126_v57, %v15831_v23 }
 0x854   : > { %v5997_v47 = vpack.c.bf16 %v5722_v40, %v5718_v33 }
 0x855   : > { %6919 = vmatmul.mubr.bf16.gmra.mrb[140].mxu1 %v5988_v43  ;;  %7836 = vmatmul.mubr.msk.bf16.gmra.mrb[128].mxu0 %vm3487_vm10, %v5962_v11  ;;  %v6535_v43 = vadd.f32 %v16023_v8, %v15831_v23  ;;  %v9194_v11 = vld [vmem:[#allocation3 + $0x1c8] sm:$0xff] }
 0x856   : > { %6926 = vmatprep.mubr.bf16.mxu1 %v17580_v44  ;;  %7839 = vmatprep.mubr.msk.bf16.mxu0 %vm3487_vm10, %v5969_v45  ;;  %v5726_v12 = vrot.slane %v9194_v11, 4  ;;  %v5731_v45 = vrot.slane %v9196_v10, 4 }
 0x857   : > { %v7575_v24 = vpop.f32.mrb[56].mxu0 }
 0x858   : > { %v7576_v38 = vpop.f32.mrb[57].mxu0  ;;  %v5728_v46 = vsel %vm17592_vm1, %v5726_v12, %v5727_v36  ;;  %v5732_v61 = vsel %vm17593_vm7, %v5727_v36, %v5731_v45 }
 0x859   : > { %v7577_v16 = vadd.f32 %v7576_v38, %v7575_v24  ;;  %v7578_v9 = vpop.f32.mrb[58].mxu0  ;;  %v6004_v44 = vpack.c.bf16 %v5732_v61, %v5728_v46 }
 0x85a   : > { %v7579_v42 = vpop.f32.mrb[59].mxu0 }
 0x85b   : > { %v16162_v41 = vadd.f32 %v7577_v16, %v6535_v43  ;;  %v7580_v8 = vadd.f32 %v7579_v42, %v7578_v9  ;;  %v6543_v43 = vadd.f32 %v16092_v30, %v15831_v23  ;;  %v6546_v42 = vadd.f32 %v16098_v0, %v15831_v23 }
 0x85c   : > { %v6551_v30 = vadd.f32 %v16119_v39, %v15831_v23 }
 0x85d   : > { %6927 = vmatmul.mubr.bf16.gmra.mrb[144].mxu1 %v17584_v62  ;;  %v16167_v56 = vadd.f32 %v7580_v8, %v6538_v54  ;;  %7840 = vmatmul.mubr.msk.bf16.gmra.mrb[132].mxu0 %vm3487_vm10, %v5976_v50 }
 0x85e   : > { %6934 = vmatprep.mubr.bf16.mxu1 %v17587_v22  ;;  %7843 = vmatprep.mubr.msk.bf16.mxu0 %vm3487_vm10, %v5983_v15 }
 0x865   : > { %6935 = vmatmul.mubr.bf16.gmra.mrb[148].mxu1 %v6002_v35  ;;  %7844 = vmatmul.mubr.msk.bf16.gmra.mrb[136].mxu0 %vm3487_vm10, %v5990_v63 }
 0x866   : > { %7847 = vmatprep.mubr.msk.bf16.mxu0 %vm3487_vm10, %v5997_v47 }
 0x86d   : > { %7848 = vmatmul.mubr.msk.bf16.gmra.mrb[140].mxu0 %vm3487_vm10, %v6004_v44  ;;  %vm17594_vm10 = vcmask 23552  }
 0x86e   : > { %vm17595_vm8 = vmmov %vm17594_vm10 }
 0x86f   : > { %v7481_v59 = vpop.f32.mrb[68].mxu1  ;;  %vm17596_vm9 = vmmov %vm17595_vm8 }
 0x870   : > { %v7482_v58 = vpop.f32.mrb[69].mxu1  ;;  %vm17597_vm11 = vmmov %vm17595_vm8 }
 0x871   : > { %v7483_v24 = vadd.f32 %v7482_v58, %v7481_v59  ;;  %v7484_v29 = vpop.f32.mrb[70].mxu1  ;;  %vm17598_vm2 = vmmov %vm17595_vm8 }
 0x872   : > { %v7485_v7 = vpop.f32.mrb[71].mxu1  ;;  %vm17599_vm15 = vmmov %vm17598_vm2 }
 0x873   : > { %v7486_v38 = vadd.f32 %v7485_v7, %v7484_v29  ;;  %v6559_v12 = vadd.f32 %v7483_v24, %v15831_v23  ;;  %vm17600_vm4 = vmmov %vm17598_vm2 }
 0x874   : > { %vm17601_vm14 = vmmov %vm17598_vm2 }
 0x875   : > { %v6562_v61 = vadd.f32 %v7486_v38, %v15831_v23  ;;  %vm17602_vm0 = vmmov %vm17598_vm2 }
 0x876   : > { %vm17603_vm12 = vmmov %vm17602_vm0 }
 0x877   : > { %v7487_v50 = vpop.f32.mrb[72].mxu1  ;;  %vm17604_vm3 = vmmov %vm17602_vm0 }
 0x878   : > { %v7581_v21 = vpop.f32.mrb[60].mxu0  ;;  %v7488_v6 = vpop.f32.mrb[73].mxu1  ;;  %vm17605_vm6 = vmmov %vm17602_vm0 }
 0x879   : > { %v7582_v35 = vpop.f32.mrb[61].mxu0  ;;  %v7489_v16 = vadd.f32 %v7488_v6, %v7487_v50  ;;  %v7490_v49 = vpop.f32.mrb[74].mxu1  ;;  %vm17606_vm13 = vmmov %vm17602_vm0 }
 0x87a   : > { %v7583_v9 = vadd.f32 %v7582_v35, %v7581_v21  ;;  %v7584_v5 = vpop.f32.mrb[62].mxu0  ;;  %v7491_v31 = vpop.f32.mrb[75].mxu1  ;;  %vm17607_vm5 = vmmov %vm17602_vm0 }
 0x87b   : > { %v7585_v1 = vpop.f32.mrb[63].mxu0  ;;  %v7492_v32 = vadd.f32 %v7491_v31, %v7490_v49  ;;  %v6567_v21 = vadd.f32 %v7489_v16, %v15831_v23  ;;  %vm17608_vm1 = vmmov %vm17602_vm0 }
 0x87c   : > { %v16190_v15 = vadd.f32 %v7583_v9, %v6543_v43  ;;  %v7586_v48 = vadd.f32 %v7585_v1, %v7584_v5  ;;  %vm17609_vm7 = vmmov %vm17602_vm0 }
 0x87d   : > { %v6570_v43 = vadd.f32 %v7492_v32, %v15831_v23 }
 0x87e   : > { %v16192_v25 = vadd.f32 %v7586_v48, %v6546_v42 }
 0x882   : > { %v7587_v17 = vpop.f32.mrb[64].mxu0 }
 0x883   : > { %v7588_v3 = vpop.f32.mrb[65].mxu0 }
 0x884   : > { %v7589_v54 = vadd.f32 %v7588_v3, %v7587_v17  ;;  %v7590_v8 = vpop.f32.mrb[66].mxu0  ;;  %v7493_v19 = vpop.f32.mrb[76].mxu1 }
 0x885   : > { %v7591_v53 = vpop.f32.mrb[67].mxu0  ;;  %v7494_v14 = vpop.f32.mrb[77].mxu1 }
 0x886   : > { %v16198_v62 = vadd.f32 %v7589_v54, %v6551_v30  ;;  %v7592_v0 = vadd.f32 %v7591_v53, %v7590_v8  ;;  %v7495_v52 = vadd.f32 %v7494_v14, %v7493_v19  ;;  %v7496_v51 = vpop.f32.mrb[78].mxu1 }
 0x887   : > { %v7497_v33 = vpop.f32.mrb[79].mxu1 }
 0x888   : > { %v16200_v22 = vadd.f32 %v7592_v0, %v6554_v28  ;;  %v7498_v40 = vadd.f32 %v7497_v33, %v7496_v51  ;;  %v6575_v16 = vadd.f32 %v7495_v52, %v15831_v23 }
 0x88a   : > { %v6578_v32 = vadd.f32 %v7498_v40, %v15831_v23 }
 0x88c   : > { %v7593_v63 = vpop.f32.mrb[68].mxu0  ;;  %v7499_v47 = vpop.f32.mrb[80].mxu1 }
 0x88d   : > { %v7594_v39 = vpop.f32.mrb[69].mxu0  ;;  %v7500_v11 = vpop.f32.mrb[81].mxu1 }
 0x88e   : > { %v7595_v4 = vadd.f32 %v7594_v39, %v7593_v63  ;;  %v7501_v36 = vadd.f32 %v7500_v11, %v7499_v47  ;;  %v7596_v57 = vpop.f32.mrb[70].mxu0  ;;  %v7502_v10 = vpop.f32.mrb[82].mxu1 }
 0x88f   : > { %v7597_v45 = vpop.f32.mrb[71].mxu0  ;;  %v7503_v46 = vpop.f32.mrb[83].mxu1 }
 0x890   : > { %v16204_v44 = vadd.f32 %v7595_v4, %v6559_v12  ;;  %v7598_v59 = vadd.f32 %v7597_v45, %v7596_v57  ;;  %v7504_v58 = vadd.f32 %v7503_v46, %v7502_v10  ;;  %v6583_v52 = vadd.f32 %v7501_v36, %v15831_v23 }
 0x892   : > { %v16206_v29 = vadd.f32 %v7598_v59, %v6562_v61  ;;  %v6586_v40 = vadd.f32 %v7504_v58, %v15831_v23 }
 0x894   : > { %v7599_v7 = vpop.f32.mrb[72].mxu0 }
 0x895   : > { %v7600_v50 = vpop.f32.mrb[73].mxu0 }
 0x896   : > { %v7601_v6 = vadd.f32 %v7600_v50, %v7599_v7  ;;  %v7602_v24 = vpop.f32.mrb[74].mxu0 }
 0x897   : > { %v7603_v35 = vpop.f32.mrb[75].mxu0 }
 0x898   : > { %v16210_v9 = vadd.f32 %v7601_v6, %v6567_v21  ;;  %v7604_v49 = vadd.f32 %v7603_v35, %v7602_v24 }
 0x899   : > { %v7505_v38 = vpop.f32.mrb[84].mxu1 }
 0x89a   : > { %v16212_v5 = vadd.f32 %v7604_v49, %v6570_v43  ;;  %v7506_v31 = vpop.f32.mrb[85].mxu1 }
 0x89b   : > { %v7507_v1 = vadd.f32 %v7506_v31, %v7505_v38  ;;  %v7508_v42 = vpop.f32.mrb[86].mxu1 }
 0x89c   : > { %v7509_v48 = vpop.f32.mrb[87].mxu1 }
 0x89d   : > { %v7510_v17 = vadd.f32 %v7509_v48, %v7508_v42  ;;  %v6591_v36 = vadd.f32 %v7507_v1, %v15831_v23 }
 0x89f   : > { %v6594_v58 = vadd.f32 %v7510_v17, %v15831_v23 }
 0x8a1   : > { %v7605_v3 = vpop.f32.mrb[76].mxu0 }
 0x8a2   : > { %v7606_v30 = vpop.f32.mrb[77].mxu0 }
 0x8a3   : > { %v7607_v54 = vadd.f32 %v7606_v30, %v7605_v3  ;;  %v7608_v8 = vpop.f32.mrb[78].mxu0 }
 0x8a4   : > { %v7609_v53 = vpop.f32.mrb[79].mxu0 }
 0x8a5   : > { %v16216_v28 = vadd.f32 %v7607_v54, %v6575_v16  ;;  %v7610_v0 = vadd.f32 %v7609_v53, %v7608_v8 }
 0x8a6   : > { %v7511_v19 = vpop.f32.mrb[88].mxu1 }
 0x8a7   : > { %v16218_v14 = vadd.f32 %v7610_v0, %v6578_v32  ;;  %v7512_v51 = vpop.f32.mrb[89].mxu1 }
 0x8a8   : > { %v7513_v33 = vadd.f32 %v7512_v51, %v7511_v19  ;;  %v7514_v63 = vpop.f32.mrb[90].mxu1 }
 0x8a9   : > { %v7515_v47 = vpop.f32.mrb[91].mxu1 }
 0x8aa   : > { %v7516_v39 = vadd.f32 %v7515_v47, %v7514_v63  ;;  %v6599_v63 = vadd.f32 %v7513_v33, %v15831_v23 }
 0x8af   : > { %v7611_v11 = vpop.f32.mrb[80].mxu0 }
 0x8b0   : > { %v7612_v12 = vpop.f32.mrb[81].mxu0 }
 0x8b1   : > { %v7613_v4 = vadd.f32 %v7612_v12, %v7611_v11  ;;  %v7614_v57 = vpop.f32.mrb[82].mxu0 }
 0x8b2   : > { %v7615_v10 = vpop.f32.mrb[83].mxu0 }
 0x8b3   : > { %v16222_v45 = vadd.f32 %v7613_v4, %v6583_v52  ;;  %v7616_v46 = vadd.f32 %v7615_v10, %v7614_v57  ;;  %v6602_v52 = vadd.f32 %v7516_v39, %v15831_v23  ;;  %v9197_v23 = vld [vmem:[%s16409_s6] ss:$0 sm:$0xff] }
 0x8b5   : > { %v16224_v61 = vadd.f32 %v7616_v46, %v6586_v40 }
 0x8bc   : > { %v7517_v59 = vpop.f32.mrb[92].mxu1 }
 0x8bd   : > { %v7518_v7 = vpop.f32.mrb[93].mxu1 }
 0x8be   : > { %v7519_v50 = vadd.f32 %v7518_v7, %v7517_v59  ;;  %v7520_v21 = vpop.f32.mrb[94].mxu1 }
 0x8bf   : > { %v7521_v6 = vpop.f32.mrb[95].mxu1 }
 0x8c0   : > { %v7522_v24 = vadd.f32 %v7521_v6, %v7520_v21  ;;  %v6607_v39 = vadd.f32 %v9197_v23, %v7519_v50 }
 0x8c4   : > { %v7617_v35 = vpop.f32.mrb[84].mxu0 }
 0x8c5   : > { %v7618_v43 = vpop.f32.mrb[85].mxu0 }
 0x8c6   : > { %v7619_v49 = vadd.f32 %v7618_v43, %v7617_v35  ;;  %v7620_v38 = vpop.f32.mrb[86].mxu0 }
 0x8c7   : > { %v7621_v31 = vpop.f32.mrb[87].mxu0 }
 0x8c8   : > { %v16228_v42 = vadd.f32 %v7619_v49, %v6591_v36  ;;  %v7622_v48 = vadd.f32 %v7621_v31, %v7620_v38  ;;  %v6610_v38 = vadd.f32 %v9197_v23, %v7522_v24 }
 0x8ca   : > { %v16230_v30 = vadd.f32 %v7622_v48, %v6594_v58 }
 0x8cb   : > { %v7523_v3 = vpop.f32.mrb[96].mxu1 }
 0x8cc   : > { %v7524_v16 = vpop.f32.mrb[97].mxu1 }
 0x8cd   : > { %v7525_v54 = vadd.f32 %v7524_v16, %v7523_v3  ;;  %v7526_v8 = vpop.f32.mrb[98].mxu1 }
 0x8ce   : > { %v7527_v53 = vpop.f32.mrb[99].mxu1 }
 0x8cf   : > { %v7528_v32 = vadd.f32 %v7527_v53, %v7526_v8 }
 0x8d2   : > { %v7623_v0 = vpop.f32.mrb[88].mxu0 }
 0x8d3   : > { %v7675_v19 = vpop.f32.mrb[100].mxu1  ;;  %v7624_v51 = vpop.f32.mrb[89].mxu0 }
 0x8d4   : > { %v7676_v1 = vpop.f32.mrb[101].mxu1  ;;  %v7625_v47 = vadd.f32 %v7624_v51, %v7623_v0  ;;  %v7626_v17 = vpop.f32.mrb[90].mxu0 }
 0x8d5   : > { %v7677_v11 = vadd.f32 %v7676_v1, %v7675_v19  ;;  %v7678_v12 = vpop.f32.mrb[102].mxu1  ;;  %v7627_v4 = vpop.f32.mrb[91].mxu0 }
 0x8d6   : > { %v7679_v57 = vpop.f32.mrb[103].mxu1  ;;  %v16234_v10 = vadd.f32 %v7625_v47, %v6599_v63  ;;  %v7628_v40 = vadd.f32 %v7627_v4, %v7626_v17  ;;  %v6615_v47 = vadd.f32 %v9197_v23, %v7525_v54 }
 0x8d7   : > { %v7680_v46 = vadd.f32 %v7679_v57, %v7678_v12  ;;  %v16237_v59 = vadd.f32 %v7677_v11, %v16090_v27 }
 0x8d8   : > { %v16239_v7 = vadd.f32 %v7628_v40, %v6602_v52 }
 0x8d9   : > { %v16242_v21 = vadd.f32 %v7680_v46, %v16095_v37 }
 0x8db   : > { %v7629_v33 = vpop.f32.mrb[92].mxu0 }
 0x8dc   : > { %v7630_v6 = vpop.f32.mrb[93].mxu0 }
 0x8dd   : > { %v7631_v35 = vadd.f32 %v7630_v6, %v7629_v33  ;;  %v7632_v43 = vpop.f32.mrb[94].mxu0 }
 0x8de   : > { %v7633_v36 = vpop.f32.mrb[95].mxu0  ;;  %v7681_v49 = vpop.f32.mrb[104].mxu1 }
 0x8df   : > { %v16247_v31 = vadd.f32 %v7631_v35, %v6607_v39  ;;  %v7634_v27 = vadd.f32 %v7633_v36, %v7632_v43  ;;  %v7682_v58 = vpop.f32.mrb[105].mxu1 }
 0x8e0   : > { %v7683_v48 = vadd.f32 %v7682_v58, %v7681_v49  ;;  %v7684_v3 = vpop.f32.mrb[106].mxu1 }
 0x8e1   : > { %v16249_v37 = vadd.f32 %v7634_v27, %v6610_v38  ;;  %v7685_v16 = vpop.f32.mrb[107].mxu1 }
 0x8e2   : > { %v7686_v8 = vadd.f32 %v7685_v16, %v7684_v3  ;;  %v16252_v53 = vadd.f32 %v7683_v48, %v16135_v2  ;;  %v6618_v2 = vadd.f32 %v9197_v23, %v7528_v32 }
 0x8e4   : > { %v16255_v50 = vadd.f32 %v7686_v8, %v16140_v55 }
 0x8e6   : > { %v7687_v0 = vpop.f32.mrb[108].mxu1 }
 0x8e7   : > { %v7635_v19 = vpop.f32.mrb[96].mxu0  ;;  %v7688_v51 = vpop.f32.mrb[109].mxu1 }
 0x8e8   : > { %v7689_v24 = vadd.f32 %v7688_v51, %v7687_v0  ;;  %v7636_v1 = vpop.f32.mrb[97].mxu0  ;;  %v7690_v63 = vpop.f32.mrb[110].mxu1 }
 0x8e9   : > { %v7637_v11 = vadd.f32 %v7636_v1, %v7635_v19  ;;  %v7638_v17 = vpop.f32.mrb[98].mxu0  ;;  %v7691_v12 = vpop.f32.mrb[111].mxu1 }
 0x8ea   : > { %v7692_v52 = vadd.f32 %v7691_v12, %v7690_v63  ;;  %v7639_v4 = vpop.f32.mrb[99].mxu0  ;;  %v16258_v57 = vadd.f32 %v7689_v24, %v16162_v41 }
 0x8eb   : > { %v16260_v40 = vadd.f32 %v7637_v11, %v6615_v47  ;;  %v7640_v55 = vadd.f32 %v7639_v4, %v7638_v17 }
 0x8ec   : > { %v16263_v46 = vadd.f32 %v7692_v52, %v16167_v56 }
 0x8ed   : > { %v16265_v33 = vadd.f32 %v7640_v55, %v6618_v2 }
 0x8ee   : > { %v7693_v6 = vpop.f32.mrb[112].mxu1 }
 0x8ef   : > { %v7657_v39 = vpop.f32.mrb[100].mxu0  ;;  %v7694_v54 = vpop.f32.mrb[113].mxu1 }
 0x8f0   : > { %v7695_v35 = vadd.f32 %v7694_v54, %v7693_v6  ;;  %v7658_v43 = vpop.f32.mrb[101].mxu0  ;;  %v7696_v36 = vpop.f32.mrb[114].mxu1 }
 0x8f1   : > { %v7659_v49 = vadd.f32 %v7658_v43, %v7657_v39  ;;  %v7660_v38 = vpop.f32.mrb[102].mxu0  ;;  %v7697_v27 = vpop.f32.mrb[115].mxu1 }
 0x8f2   : > { %v7698_v41 = vadd.f32 %v7697_v27, %v7696_v36  ;;  %v7661_v58 = vpop.f32.mrb[103].mxu0  ;;  %v16268_v32 = vadd.f32 %v7695_v35, %v16190_v15 }
 0x8f3   : > { %v7662_v23 = vadd.f32 %v7661_v58, %v7660_v38  ;;  %v6817_v56 = vadd.f32 %v7659_v49, %v15863_v34 }
 0x8f4   : > { %v16272_v48 = vadd.f32 %v7698_v41, %v16192_v25 }
 0x8f5   : > { %v6820_v3 = vadd.f32 %v7662_v23, %v15882_v26 }
 0x8f6   : > { %v7699_v16 = vpop.f32.mrb[116].mxu1 }
 0x8f7   : > { %v7663_v8 = vpop.f32.mrb[104].mxu0  ;;  %v7700_v0 = vpop.f32.mrb[117].mxu1 }
 0x8f8   : > { %v7701_v19 = vadd.f32 %v7700_v0, %v7699_v16  ;;  %v7664_v51 = vpop.f32.mrb[105].mxu0  ;;  %v7702_v24 = vpop.f32.mrb[118].mxu1 }
 0x8f9   : > { %v7665_v1 = vadd.f32 %v7664_v51, %v7663_v8  ;;  %v7666_v63 = vpop.f32.mrb[106].mxu0  ;;  %v7703_v47 = vpop.f32.mrb[119].mxu1 }
 0x8fa   : > { %v7704_v11 = vadd.f32 %v7703_v47, %v7702_v24  ;;  %v7667_v15 = vpop.f32.mrb[107].mxu0  ;;  %v16276_v17 = vadd.f32 %v7701_v19, %v16198_v62 }
 0x8fb   : > { %v7668_v34 = vadd.f32 %v7667_v15, %v7666_v63  ;;  %v6825_v25 = vadd.f32 %v7665_v1, %v15916_v13 }
 0x8fc   : > { %v16280_v12 = vadd.f32 %v7704_v11, %v16200_v22 }
 0x8fd   : > { %v6828_v26 = vadd.f32 %v7668_v34, %v15923_v60 }
 0x8fe   : > { %v7705_v52 = vpop.f32.mrb[120].mxu1 }
 0x8ff   : > { %v7706_v2 = vpop.f32.mrb[121].mxu1 }
 0x900   : > { %v7669_v4 = vpop.f32.mrb[108].mxu0  ;;  %v7707_v55 = vadd.f32 %v7706_v2, %v7705_v52  ;;  %v7708_v39 = vpop.f32.mrb[122].mxu1 }
 0x901   : > { %v7670_v6 = vpop.f32.mrb[109].mxu0  ;;  %v7709_v43 = vpop.f32.mrb[123].mxu1 }
 0x902   : > { %v7671_v54 = vadd.f32 %v7670_v6, %v7669_v4  ;;  %v7672_v35 = vpop.f32.mrb[110].mxu0  ;;  %v7710_v62 = vadd.f32 %v7709_v43, %v7708_v39  ;;  %v16284_v49 = vadd.f32 %v7707_v55, %v16204_v44 }
 0x903   : > { %v7673_v36 = vpop.f32.mrb[111].mxu0 }
 0x904   : > { %v7674_v13 = vadd.f32 %v7673_v36, %v7672_v35  ;;  %v6833_v22 = vadd.f32 %v7671_v54, %v16058_v18  ;;  %v16288_v60 = vadd.f32 %v7710_v62, %v16206_v29 }
 0x906   : > { %v6836_v38 = vadd.f32 %v7674_v13, %v16062_v20 }
 0x908   : > { %v7711_v27 = vpop.f32.mrb[124].mxu1  ;;  %v7821_v44 = vpop.f32.mrb[112].mxu0 }
 0x909   : > { %v7712_v41 = vpop.f32.mrb[125].mxu1  ;;  %v6986_v18 = vadd.f32 %v7821_v44, %v6825_v25  ;;  %v6977_v29 = vpop.f32.mrb[113].mxu0 }
 0x90a   : > { %v7713_v58 = vadd.f32 %v7712_v41, %v7711_v27  ;;  %v7714_v23 = vpop.f32.mrb[126].mxu1  ;;  %v6978_v16 = vadd.f32 %v6977_v29, %v6817_v56  ;;  %v7822_v20 = vpop.f32.mrb[114].mxu0 }
 0x90b   : > { %v7715_v8 = vpop.f32.mrb[127].mxu1  ;;  %7106 = vst.msk [vmem:[%s16296_s26 + $0x10] sm:$0xff] %vm17594_vm10, %v6986_v18  ;;  %v6989_v19 = vadd.f32 %v7822_v20, %v6828_v26  ;;  %v6980_v51 = vpop.f32.mrb[115].mxu0  ;;  %vm17610_vm10 = vmmov %vm17602_vm0 }
 0x90c   : > { %v7716_v0 = vadd.f32 %v7715_v8, %v7714_v23  ;;  %v16301_v24 = vadd.f32 %v7713_v58, %v16210_v9  ;;  %7104 = vst.msk [vmem:[%s16296_s26] sm:$0xff] %vm17595_vm8, %v6978_v16  ;;  %v6981_v1 = vadd.f32 %v6980_v51, %v6820_v3  ;;  %vm17611_vm8 = vmmov %vm17602_vm0 }
 0x90d   : > { %7107 = vst.msk [vmem:[%s16296_s26 + $0x18] sm:$0xff] %vm17596_vm9, %v6989_v19  ;;  %vm17612_vm9 = vmmov %vm17602_vm0 }
 0x90e   : > { %v16308_v63 = vadd.f32 %v7716_v0, %v16212_v5  ;;  %7105 = vst.msk [vmem:[%s16296_s26 + $0x8] sm:$0xff] %vm17597_vm11, %v6981_v1  ;;  %vm17613_vm11 = vmmov %vm17602_vm0 }
 0x910   : > { %v7717_v56 = vpop.f32.mrb[128].mxu1  ;;  %v7825_v11 = vpop.f32.mrb[116].mxu0 }
 0x911   : > { %v7718_v47 = vpop.f32.mrb[129].mxu1  ;;  %v7002_v9 = vadd.f32 %v7825_v11, %v16237_v59  ;;  %v6993_v25 = vpop.f32.mrb[117].mxu0 }
 0x912   : > { %v7719_v15 = vadd.f32 %v7718_v47, %v7717_v56  ;;  %v7720_v34 = vpop.f32.mrb[130].mxu1  ;;  %v6994_v26 = vadd.f32 %v6993_v25, %v6833_v22  ;;  %v7826_v52 = vpop.f32.mrb[118].mxu0 }
 0x913   : > { %v7721_v3 = vpop.f32.mrb[131].mxu1  ;;  %7110 = vst.msk [vmem:[%s16296_s26 + $0x30] sm:$0xff] %vm17598_vm2, %v7002_v9  ;;  %v7005_v4 = vadd.f32 %v7826_v52, %v16242_v21  ;;  %v6996_v2 = vpop.f32.mrb[119].mxu0  ;;  %vm17614_vm2 = vmmov %vm17602_vm0 }
 0x914   : > { %v7722_v5 = vadd.f32 %v7721_v3, %v7720_v34  ;;  %v16317_v55 = vadd.f32 %v7719_v15, %v16216_v28  ;;  %7108 = vst.msk [vmem:[%s16296_s26 + $0x20] sm:$0xff] %vm17599_vm15, %v6994_v26  ;;  %v6997_v6 = vadd.f32 %v6996_v2, %v6836_v38  ;;  %vm17615_vm15 = vmmov %vm17602_vm0 }
 0x915   : > { %7111 = vst.msk [vmem:[%s16296_s26 + $0x38] sm:$0xff] %vm17600_vm4, %v7005_v4  ;;  %vm17616_vm4 = vmmov %vm17602_vm0 }
 0x916   : > { %v16324_v59 = vadd.f32 %v7722_v5, %v16218_v14  ;;  %7109 = vst.msk [vmem:[%s16296_s26 + $0x28] sm:$0xff] %vm17601_vm14, %v6997_v6  ;;  %vm17617_vm14 = vmmov %vm17602_vm0 }
 0x918   : > { %v7723_v39 = vpop.f32.mrb[132].mxu1  ;;  %v7829_v21 = vpop.f32.mrb[120].mxu0 }
 0x919   : > { %v7724_v54 = vpop.f32.mrb[133].mxu1  ;;  %v7018_v28 = vadd.f32 %v7829_v21, %v16258_v57  ;;  %v7009_v62 = vpop.f32.mrb[121].mxu0 }
 0x91a   : > { %v7725_v35 = vadd.f32 %v7724_v54, %v7723_v39  ;;  %v7726_v43 = vpop.f32.mrb[134].mxu1  ;;  %v7010_v36 = vadd.f32 %v7009_v62, %v16252_v53  ;;  %v7830_v22 = vpop.f32.mrb[122].mxu0 }
 0x91b   : > { %v7727_v13 = vpop.f32.mrb[135].mxu1  ;;  %7114 = vst.msk [vmem:[%s16296_s26 + $0x50] sm:$0xff] %vm17602_vm0, %v7018_v28  ;;  %v7021_v38 = vadd.f32 %v7830_v22, %v16263_v46  ;;  %v7012_v27 = vpop.f32.mrb[123].mxu0 }
 0x91c   : > { %v7728_v14 = vadd.f32 %v7727_v13, %v7726_v43  ;;  %v6905_v41 = vadd.f32 %v7725_v35, %v16222_v45  ;;  %7112 = vst.msk [vmem:[%s16296_s26 + $0x40] sm:$0xff] %vm17603_vm12, %v7010_v36  ;;  %v7013_v44 = vadd.f32 %v7012_v27, %v16255_v50  ;;  %vm17618_vm12 = vmmov %vm17602_vm0 }
 0x91d   : > { %7115 = vst.msk [vmem:[%s16296_s26 + $0x58] sm:$0xff] %vm17604_vm3, %v7021_v38  ;;  %vm17619_vm3 = vmmov %vm17602_vm0 }
 0x91e   : > { %v6908_v57 = vadd.f32 %v7728_v14, %v16224_v61  ;;  %7113 = vst.msk [vmem:[%s16296_s26 + $0x48] sm:$0xff] %vm17605_vm6, %v7013_v44  ;;  %vm17620_vm6 = vmmov %vm17602_vm0 }
 0x920   : > { %v7729_v53 = vpop.f32.mrb[136].mxu1  ;;  %v7833_v18 = vpop.f32.mrb[124].mxu0 }
 0x921   : > { %v7730_v58 = vpop.f32.mrb[137].mxu1  ;;  %v7034_v45 = vadd.f32 %v7833_v18, %v16276_v17  ;;  %v7025_v29 = vpop.f32.mrb[125].mxu0 }
 0x922   : > { %v7731_v46 = vadd.f32 %v7730_v58, %v7729_v53  ;;  %v7732_v23 = vpop.f32.mrb[138].mxu1  ;;  %v7026_v16 = vadd.f32 %v7025_v29, %v16268_v32  ;;  %v7834_v8 = vpop.f32.mrb[126].mxu0 }
 0x923   : > { %v7733_v50 = vpop.f32.mrb[139].mxu1  ;;  %7118 = vst.msk [vmem:[%s16296_s26 + $0x70] sm:$0xff] %vm17606_vm13, %v7034_v45  ;;  %v7037_v20 = vadd.f32 %v7834_v8, %v16280_v12  ;;  %v7028_v0 = vpop.f32.mrb[127].mxu0  ;;  %vm17621_vm13 = vmmov %vm17602_vm0 }
 0x924   : > { %v7734_v61 = vadd.f32 %v7733_v50, %v7732_v23  ;;  %v6913_v19 = vadd.f32 %v7731_v46, %v16228_v42  ;;  %7116 = vst.msk [vmem:[%s16296_s26 + $0x60] sm:$0xff] %vm17607_vm5, %v7026_v16  ;;  %v7029_v51 = vadd.f32 %v7028_v0, %v16272_v48  ;;  %vm17622_vm5 = vmmov %vm17602_vm0 }
 0x925   : > { %7119 = vst.msk [vmem:[%s16296_s26 + $0x78] sm:$0xff] %vm17608_vm1, %v7037_v20  ;;  %vm17623_vm1 = vmmov %vm17602_vm0 }
 0x926   : > { %v6916_v17 = vadd.f32 %v7734_v61, %v16230_v30  ;;  %7117 = vst.msk [vmem:[%s16296_s26 + $0x68] sm:$0xff] %vm17609_vm7, %v7029_v51  ;;  %vm17624_vm7 = vmmov %vm17602_vm0 }
 0x928   : > { %v7735_v32 = vpop.f32.mrb[140].mxu1  ;;  %v7837_v56 = vpop.f32.mrb[128].mxu0 }
 0x929   : > { %v7736_v1 = vpop.f32.mrb[141].mxu1  ;;  %v7050_v42 = vadd.f32 %v7837_v56, %v16301_v24  ;;  %v7041_v11 = vpop.f32.mrb[129].mxu0 }
 0x92a   : > { %v7737_v12 = vadd.f32 %v7736_v1, %v7735_v32  ;;  %v7738_v47 = vpop.f32.mrb[142].mxu1  ;;  %v7042_v15 = vadd.f32 %v7041_v11, %v16284_v49  ;;  %v7838_v9 = vpop.f32.mrb[130].mxu0 }
 0x92b   : > { %v7739_v48 = vpop.f32.mrb[143].mxu1  ;;  %7122 = vst.msk [vmem:[%s16296_s26 + $0x90] sm:$0xff] %vm17610_vm10, %v7050_v42  ;;  %v7053_v34 = vadd.f32 %v7838_v9, %v16308_v63  ;;  %v7044_v25 = vpop.f32.mrb[131].mxu0 }
 0x92c   : > { %v7740_v30 = vadd.f32 %v7739_v48, %v7738_v47  ;;  %v6921_v26 = vadd.f32 %v7737_v12, %v16234_v10  ;;  %7120 = vst.msk [vmem:[%s16296_s26 + $0x80] sm:$0xff] %vm17611_vm8, %v7042_v15  ;;  %v7045_v3 = vadd.f32 %v7044_v25, %v16288_v60 }
 0x92d   : > { %7123 = vst.msk [vmem:[%s16296_s26 + $0x98] sm:$0xff] %vm17612_vm9, %v7053_v34 }
 0x92e   : > { %v6924_v24 = vadd.f32 %v7740_v30, %v16239_v7  ;;  %7121 = vst.msk [vmem:[%s16296_s26 + $0x88] sm:$0xff] %vm17613_vm11, %v7045_v3 }
 0x930   : > { %v7741_v49 = vpop.f32.mrb[144].mxu1  ;;  %v7841_v5 = vpop.f32.mrb[132].mxu0 }
 0x931   : > { %v7742_v52 = vpop.f32.mrb[145].mxu1  ;;  %v7066_v4 = vadd.f32 %v7841_v5, %v6905_v41  ;;  %v7057_v2 = vpop.f32.mrb[133].mxu0 }
 0x932   : > { %v7743_v63 = vadd.f32 %v7742_v52, %v7741_v49  ;;  %v7744_v10 = vpop.f32.mrb[146].mxu1  ;;  %v7058_v6 = vadd.f32 %v7057_v2, %v16317_v55  ;;  %v7842_v60 = vpop.f32.mrb[134].mxu0 }
 0x933   : > { %v7745_v39 = vpop.f32.mrb[147].mxu1  ;;  %7126 = vst.msk [vmem:[%s16296_s26 + $0xb0] sm:$0xff] %vm17614_vm2, %v7066_v4  ;;  %v7069_v7 = vadd.f32 %v7842_v60, %v6908_v57  ;;  %v7060_v21 = vpop.f32.mrb[135].mxu0 }
 0x934   : > { %v7746_v54 = vadd.f32 %v7745_v39, %v7744_v10  ;;  %v6929_v35 = vadd.f32 %v7743_v63, %v16247_v31  ;;  %7124 = vst.msk [vmem:[%s16296_s26 + $0xa0] sm:$0xff] %vm17615_vm15, %v7058_v6  ;;  %v7061_v28 = vadd.f32 %v7060_v21, %v16324_v59 }
 0x935   : > { %7127 = vst.msk [vmem:[%s16296_s26 + $0xb8] sm:$0xff] %vm17616_vm4, %v7069_v7 }
 0x936   : > { %v6932_v43 = vadd.f32 %v7746_v54, %v16249_v37  ;;  %7125 = vst.msk [vmem:[%s16296_s26 + $0xa8] sm:$0xff] %vm17617_vm14, %v7061_v28 }
 0x938   : > { %v7747_v55 = vpop.f32.mrb[148].mxu1  ;;  %v7845_v36 = vpop.f32.mrb[136].mxu0 }
 0x939   : > { %v7748_v62 = vpop.f32.mrb[149].mxu1  ;;  %v7082_v22 = vadd.f32 %v7845_v36, %v6921_v26  ;;  %v7073_v14 = vpop.f32.mrb[137].mxu0 }
 0x93a   : > { %v7749_v13 = vadd.f32 %v7748_v62, %v7747_v55  ;;  %v7750_v31 = vpop.f32.mrb[150].mxu1  ;;  %v7074_v38 = vadd.f32 %v7073_v14, %v6913_v19  ;;  %v7846_v41 = vpop.f32.mrb[138].mxu0 }
 0x93b   : > { %v7751_v27 = vpop.f32.mrb[151].mxu1  ;;  %7130 = vst.msk [vmem:[%s16296_s26 + $0xd0] sm:$0xff] %vm17602_vm0, %v7082_v22  ;;  %v7085_v37 = vadd.f32 %v7846_v41, %v6924_v24  ;;  %v7076_v44 = vpop.f32.mrb[139].mxu0 }
 0x93c   : > { %v7752_v59 = vadd.f32 %v7751_v27, %v7750_v31  ;;  %v6937_v57 = vadd.f32 %v7749_v13, %v16260_v40  ;;  %7128 = vst.msk [vmem:[%s16296_s26 + $0xc0] sm:$0xff] %vm17618_vm12, %v7074_v38  ;;  %v7077_v53 = vadd.f32 %v7076_v44, %v6916_v17 }
 0x93d   : > { %7131 = vst.msk [vmem:[%s16296_s26 + $0xd8] sm:$0xff] %vm17619_vm3, %v7085_v37 }
 0x93e   : > { %v6940_v58 = vadd.f32 %v7752_v59, %v16265_v33  ;;  %7129 = vst.msk [vmem:[%s16296_s26 + $0xc8] sm:$0xff] %vm17620_vm6, %v7077_v53 }
 0x940   : > { %v7849_v18 = vpop.f32.mrb[140].mxu0 }
 0x941   : > { %v7098_v46 = vadd.f32 %v7849_v18, %v6937_v57  ;;  %v7089_v45 = vpop.f32.mrb[141].mxu0 }
 0x942   : > { %v7090_v23 = vadd.f32 %v7089_v45, %v6929_v35  ;;  %v7850_v29 = vpop.f32.mrb[142].mxu0 }
 0x943   : > { %7134 = vst.msk [vmem:[%s16296_s26 + $0xf0] sm:$0xff] %vm17621_vm13, %v7098_v46  ;;  %v7101_v16 = vadd.f32 %v7850_v29, %v6940_v58  ;;  %v7092_v40 = vpop.f32.mrb[143].mxu0 }
 0x944   : > { %7132 = vst.msk [vmem:[%s16296_s26 + $0xe0] sm:$0xff] %vm17622_vm5, %v7090_v23  ;;  %v7093_v50 = vadd.f32 %v7092_v40, %v6932_v43 }
 0x945   : > { %7135 = vst.msk [vmem:[%s16296_s26 + $0xf8] sm:$0xff] %vm17623_vm1, %v7101_v16 }
 0x946   : > { %7133 = vst.msk [vmem:[%s16296_s26 + $0xe8] sm:$0xff] %vm17624_vm7, %v7093_v50 }
 0x947 PF: > { %s17_s24 = sadd.s32 1, %s9204_s24  }
 0x948   : > { %p14_p4 = scmp.ge.s32.totalorder %s17_s24, 4  }
 0x94a   :  { %16 = sbr.rel (!%p14_p4) target bundleno = 1 (0x1), region = 81 }

</bundles_post_ra>
